<compile_context>
chip_gen: v7x
topology: tpu7x:2x2x1
jax: 0.10.0
libtpu: 0.0.40
codegen_flags: <defaults>
</compile_context>

<pallas_src>
import math
from functools import partial

import jax
import jax.numpy as jnp
from jax import lax
from jax.experimental import pallas as pl
from jax.experimental.pallas import tpu as pltpu


def _round_up(a, b):
    return ((a + b - 1) // b) * b


def _gelu_exact(x):
    # torch.nn.functional.gelu default = exact erf-based gelu
    return 0.5 * x * (1.0 + lax.erf(x * (1.0 / math.sqrt(2.0))))


def _vmem_capacity_bytes():
    try:
        cap = getattr(pltpu.get_tpu_info(), "vmem_capacity_bytes", None)
        if cap:
            return int(cap)
    except Exception:
        pass
    return 64 * 1024 * 1024          # conservative default (v7x per-TC VMEM)


def _tensorcores_per_chip():
    try:
        kind = str(getattr(jax.devices()[0], "device_kind", "")).lower()
        if "v7" in kind:             # v7x: 2 TensorCores share the megacore grid
            return 2
    except Exception:
        pass
    return 1                         # v5e / v6e: single TensorCore


def _fff_kernel(x_ref, w1_ref, w2_ref, o_ref, *, depth, pad_k):
    x = x_ref[...]                           # (TB, W)      f32
    tb, w = x.shape
    kpad, npad = w1_ref.shape                # (Kpad, Npad) f32, node vectors as cols

    if pad_k and w < kpad:
        # pad the contraction dim to 128 lanes in VMEM (keeps HBM reads W-wide)
        x = jnp.concatenate([x, jnp.zeros((tb, kpad - w), x.dtype)], axis=1)
        w1 = w1_ref[...]
    elif w < kpad:
        w1 = w1_ref[0:w, :]                  # fallback: use only the real rows
    else:
        w1 = w1_ref[...]

    # Logits of ALL candidate nodes in one MXU matmul, f32 accumulate with
    # pinned precision so routing signs match the f32 reference.
    logits_all = jnp.dot(x, w1, preferred_element_type=jnp.float32,
                         precision=lax.Precision.HIGHEST)   # (TB, Npad)

    w2_dtype = w2_ref.dtype
    current = jnp.zeros((tb, 1), jnp.int32)         # current node per sample
    band_hidden = {}   # static (lo, hi) -> (TB, hi-lo) partial hidden in w2 dtype

    # depth is small & static -> unrolled Python loop. At level d the live
    # nodes are [2^d - 1, 2^(d+1) - 2]; restrict one-hot gather/scatter to the
    # 128-lane-aligned band covering that range.
    for d in range(depth + 1):
        lo = ((2 ** d - 1) // 128) * 128
        hi = min(npad, _round_up(2 ** (d + 1) - 1, 128))
        width = hi - lo

        band = lax.slice_in_dim(logits_all, lo, hi, axis=1)           # (TB, width)
        band_iota = lax.broadcasted_iota(jnp.int32, (tb, width), 1) + lo
        sel = band_iota == current                                     # one-hot in band
        logit = jnp.sum(jnp.where(sel, band, 0.0),
                        axis=1, keepdims=True)                         # (TB, 1) gather
        g = _gelu_exact(logit).astype(w2_dtype)                        # (TB, 1)
        upd = jnp.where(sel, g, jnp.zeros_like(g))                     # scatter, w2 dtype

        key = (lo, hi)
        band_hidden[key] = upd if key not in band_hidden else band_hidden[key] + upd
        current = current * 2 + (logit >= 0.0).astype(jnp.int32) + 1

    # new_logits = hidden_sparse @ w2s  — one matmul per distinct band,
    # f32 accumulation; no dense (TB, Npad) hidden slab is materialized.
    acc = jnp.zeros((tb, o_ref.shape[1]), jnp.float32)
    for (lo, hi), h in band_hidden.items():
        acc = acc + jnp.dot(h, w2_ref[lo:hi, :],
                            preferred_element_type=jnp.float32)
    o_ref[...] = acc.astype(o_ref.dtype)


def fff_sparse_forward(x, w1s, w2s, depth, *, batch_tile=256,
                       w2_dtype=jnp.bfloat16, out_dtype=jnp.float32):
    """Pallas TPU implementation of FFF_Sparse.forward."""
    B, W = x.shape
    n_nodes = 2 ** (depth + 1) - 1
    O = w2s.shape[1]
    assert w1s.shape == (W * n_nodes, 1)
    assert w2s.shape == (n_nodes, O)

    # --- glue (plain JAX): reshape + zero-pad node / output / K axes to 128 --
    kpad = _round_up(W, 128)
    npad = _round_up(n_nodes, 128)
    opad = _round_up(O, 128)
    w1_mat = w1s.reshape(n_nodes, W).T.astype(jnp.float32)            # (W, N)
    w1_p = jnp.zeros((kpad, npad), jnp.float32).at[:W, :n_nodes].set(w1_mat)
    w2_p = (jnp.zeros((npad, opad), w2_dtype)
            .at[:n_nodes, :O].set(w2s.astype(w2_dtype)))
    w2_itemsize = jnp.dtype(w2_dtype).itemsize

    # --- batch tile: largest tile that fits; split across the 'parallel' grid
    # only on multi-TensorCore chips (v7x megacore). --------------------------
    ncores = _tensorcores_per_chip()
    vmem_cap = _vmem_capacity_bytes()

    tb = max(8, (min(int(batch_tile), 1024) // 8) * 8)
    b8 = _round_up(max(B, 1), 8)
    tb = min(tb, b8)
    if ncores > 1 and b8 > 8 and tb >= b8:
        tb = max(8, _round_up(pl.cdiv(b8, ncores), 8))
    bpad = _round_up(B, tb)

    x_p = x.astype(jnp.float32)
    if bpad != B:
        x_p = jnp.zeros((bpad, W), jnp.float32).at[:B].set(x_p)

    grid = (bpad // tb,)

    # --- advisory cost estimate for the XLA scheduler ------------------------
    cost = pl.CostEstimate(
        flops=int(2 * bpad * kpad * npad + 2 * bpad * npad * opad),
        transcendentals=int(bpad * (depth + 1)),
        bytes_accessed=int(bpad * W * 4 + kpad * npad * 4
                           + npad * opad * w2_itemsize
                           + bpad * opad * jnp.dtype(out_dtype).itemsize),
    )

    # --- VMEM budget: double-buffered x/out tiles, single-buffered resident
    # weights, in-kernel temporaries; clamp generation-aware with headroom. ---
    vmem_need = (2 * tb * W * 4 + 2 * tb * opad * 4        # x / out tiles
                 + kpad * npad * 4 + npad * opad * w2_itemsize
                 + tb * kpad * 4                           # padded x copy
                 + 5 * tb * npad * 4)                      # logits / masks / bands
    headroom = max(8 * 1024 * 1024, vmem_cap // 8)         # ~8 MiB v7x, ~16 MiB v5e/v6e
    vmem_limit = int(min(max(32 * 1024 * 1024, 2 * vmem_need),
                         vmem_cap - headroom))

    def build(fast):
        wkw = dict(pipeline_mode=pl.Buffered(1)) if fast else {}
        return pl.pallas_call(
            partial(_fff_kernel, depth=depth, pad_k=fast),
            out_shape=jax.ShapeDtypeStruct((bpad, opad), out_dtype),
            grid=grid,
            in_specs=[
                pl.BlockSpec((tb, W), lambda i: (i, 0)),          # x tile
                pl.BlockSpec((kpad, npad), lambda i: (0, 0), **wkw),  # full w1
                pl.BlockSpec((npad, opad), lambda i: (0, 0), **wkw),  # full w2
            ],
            out_specs=pl.BlockSpec((tb, opad), lambda i: (i, 0)),
            compiler_params=pltpu.CompilerParams(
                dimension_semantics=("parallel",),
                vmem_limit_bytes=vmem_limit),
            cost_estimate=cost,
        )

    try:
        out = build(True)(x_p, w1_p, w2_p)
    except Exception:
        # Safe fallback: default double-buffering, no in-kernel K padding.
        out = build(False)(x_p, w1_p, w2_p)
    return out[:B, :O]


def fff_sparse_ref(x, w1s, w2s, depth):
    """Pure-JAX reference of the FFF_Sparse forward semantics."""
    B, W = x.shape
    n_nodes = 2 ** (depth + 1) - 1
    w1_mat = w1s.reshape(n_nodes, W)
    current = jnp.zeros((B,), jnp.int32)
    out = jnp.zeros((B, w2s.shape[1]), jnp.float32)
    for _ in range(depth + 1):
        logit = jnp.sum(x * w1_mat[current], axis=1)               # (B,)
        g = 0.5 * logit * (1.0 + lax.erf(logit / jnp.sqrt(2.0)))
        out = out + g[:, None] * w2s[current]
        current = current * 2 + (logit >= 0.0).astype(jnp.int32) + 1
    return out


if __name__ == "__main__":
    input_width = 32
    output_width = 32
    depth = 3
    batch = 256                       # small but big enough to exercise tiling
    n_nodes = 2 ** (depth + 1) - 1

    key = jax.random.PRNGKey(0)
    kx, k1, k2 = jax.random.split(key, 3)
    l1 = 1.0 / math.sqrt(input_width)
    l2 = 1.0 / math.sqrt(n_nodes)
    # Deterministic synthetic parameters (uniform init like nn.Parameter.uniform_)
    w1s = jax.random.uniform(k1, (input_width * n_nodes, 1),
                             jnp.float32, minval=-l1, maxval=l1)
    w2s = jax.random.uniform(k2, (n_nodes, output_width),
                             jnp.float32, minval=-l2, maxval=l2)
    x = jax.random.normal(kx, (batch, input_width), jnp.float32)

    y_ref = fff_sparse_ref(x, w1s, w2s, depth)

    # Full-f32 path: matches the reference to tight tolerance.
    y32 = fff_sparse_forward(x, w1s, w2s, depth, w2_dtype=jnp.float32)
    y32 = jax.block_until_ready(y32)
    assert y32.shape == (batch, output_width)
    assert jnp.allclose(y32, y_ref, atol=1e-5, rtol=1e-5), "f32 mismatch vs reference"

    # Default fast path: bf16 hidden@w2 contraction (f32 accumulate, f32 routing).
    y = fff_sparse_forward(x, w1s, w2s, depth)
    y = jax.block_until_ready(y)
    assert y.shape == (batch, output_width)
    assert jnp.allclose(y, y_ref, atol=3e-2, rtol=3e-2), "bf16 mismatch vs reference"

    print("KERNEL_OK")
</pallas_src>

<mosaic_0001>
module attributes {stable_mosaic.version = 11 : i64} {
  func.func @_fff_kernel(%arg0: i32, %arg1: memref<256x32xf32, #tpu.memory_space<vmem>>, %arg2: memref<128x128xf32, #tpu.memory_space<vmem>>, %arg3: memref<128x128xf32, #tpu.memory_space<vmem>>, %arg4: memref<256x128xf32, #tpu.memory_space<vmem>>) attributes {dimension_semantics = [#tpu.dimension_semantics<parallel>], iteration_bounds = array<i64: 1>, scalar_prefetch = 0 : i64, scratch_operands = 0 : i64, tpu.core_type = #tpu.core_type<tc>, window_params = [{transform_indices = @transform_0, window_bounds = array<i64: 256, 32>}, {pipeline_mode = #tpu.pipeline_mode<synchronous>, transform_indices = @transform_1, window_bounds = array<i64: 128, 128>}, {pipeline_mode = #tpu.pipeline_mode<synchronous>, transform_indices = @transform_2, window_bounds = array<i64: 128, 128>}, {transform_indices = @transform_3, window_bounds = array<i64: 256, 128>}]} {
    %c0 = arith.constant 0 : index
    %c0_0 = arith.constant 0 : index
    %0 = vector.load %arg1[%c0, %c0_0] : memref<256x32xf32, #tpu.memory_space<vmem>>, vector<256x32xf32>
    %cst = arith.constant 0.000000e+00 : f32
    %1 = vector.broadcast %cst : f32 to vector<256x96xf32>
    %2 = tpu.concatenate %0, %1 in 1 : vector<256x32xf32>, vector<256x96xf32> -> vector<256x128xf32>
    %c0_1 = arith.constant 0 : index
    %c0_2 = arith.constant 0 : index
    %3 = vector.load %arg2[%c0_1, %c0_2] : memref<128x128xf32, #tpu.memory_space<vmem>>, vector<128x128xf32>
    %cst_3 = arith.constant dense<0.000000e+00> : vector<256x128xf32>
    %4 = tpu.matmul %2, %3, %cst_3 {dimension_numbers = #tpu.dot_dimension_numbers<[1], [0], [0], [1], [0, 0, 1, 1], [], []>, precision = #tpu.contract_precision<fp32>} : vector<256x128xf32>, vector<128x128xf32>, vector<256x128xf32> -> vector<256x128xf32>
    %c0_i32 = arith.constant 0 : i32
    %5 = vector.broadcast %c0_i32 : i32 to vector<256x1xi32>
    %6 = vector.extract_strided_slice %4 {offsets = [0, 0], sizes = [256, 128], strides = [1, 1]} : vector<256x128xf32> to vector<256x128xf32>
    %7 = tpu.iota {dimensions = array<i32: 1>} : vector<256x128xi32>
    %c0_i32_4 = arith.constant 0 : i32
    %8 = vector.broadcast %c0_i32_4 : i32 to vector<256x128xi32>
    %9 = arith.addi %7, %8 : vector<256x128xi32>
    %10 = vector.broadcast %5 : vector<256x1xi32> to vector<256x128xi32>
    %11 = arith.cmpi eq, %9, %10 : vector<256x128xi32>
    %cst_5 = arith.constant 0.000000e+00 : f32
    %12 = vector.broadcast %cst_5 : f32 to vector<256x128xf32>
    %13 = arith.select %11, %6, %12 : vector<256x128xi1>, vector<256x128xf32>
    %cst_6 = arith.constant dense<0.000000e+00> : vector<256xf32>
    %14 = vector.multi_reduction <add>, %13, %cst_6 [1] : vector<256x128xf32> to vector<256xf32>
    %15 = vector.shape_cast %14 : vector<256xf32> to vector<256x1xf32>
    %cst_7 = arith.constant 5.000000e-01 : f32
    %16 = vector.broadcast %cst_7 : f32 to vector<256x1xf32>
    %17 = arith.mulf %16, %15 : vector<256x1xf32>
    %cst_8 = arith.constant 0.707106769 : f32
    %18 = vector.broadcast %cst_8 : f32 to vector<256x1xf32>
    %19 = arith.mulf %15, %18 : vector<256x1xf32>
    %20 = math.erf %19 : vector<256x1xf32>
    %cst_9 = arith.constant 1.000000e+00 : f32
    %21 = vector.broadcast %cst_9 : f32 to vector<256x1xf32>
    %22 = arith.addf %21, %20 : vector<256x1xf32>
    %23 = arith.mulf %17, %22 : vector<256x1xf32>
    %cst_10 = arith.constant 0.000000e+00 : f32
    %24 = vector.broadcast %cst_10 : f32 to vector<256x1xf32>
    %25 = vector.shape_cast %23 : vector<256x1xf32> to vector<256x1xf32>
    %26 = vector.broadcast %25 : vector<256x1xf32> to vector<256x128xf32>
    %27 = vector.shape_cast %24 : vector<256x1xf32> to vector<256x1xf32>
    %28 = vector.broadcast %27 : vector<256x1xf32> to vector<256x128xf32>
    %29 = arith.select %11, %26, %28 : vector<256x128xi1>, vector<256x128xf32>
    %c2_i32 = arith.constant 2 : i32
    %30 = vector.broadcast %c2_i32 : i32 to vector<256x1xi32>
    %31 = arith.muli %5, %30 : vector<256x1xi32>
    %cst_11 = arith.constant 0.000000e+00 : f32
    %32 = vector.broadcast %cst_11 : f32 to vector<256x1xf32>
    %33 = arith.cmpf oge, %15, %32 : vector<256x1xf32>
    %34 = arith.extui %33 : vector<256x1xi1> to vector<256x1xi32>
    %35 = arith.addi %31, %34 : vector<256x1xi32>
    %c1_i32 = arith.constant 1 : i32
    %36 = vector.broadcast %c1_i32 : i32 to vector<256x1xi32>
    %37 = arith.addi %35, %36 : vector<256x1xi32>
    %38 = vector.extract_strided_slice %4 {offsets = [0, 0], sizes = [256, 128], strides = [1, 1]} : vector<256x128xf32> to vector<256x128xf32>
    %39 = tpu.iota {dimensions = array<i32: 1>} : vector<256x128xi32>
    %c0_i32_12 = arith.constant 0 : i32
    %40 = vector.broadcast %c0_i32_12 : i32 to vector<256x128xi32>
    %41 = arith.addi %39, %40 : vector<256x128xi32>
    %42 = vector.broadcast %37 : vector<256x1xi32> to vector<256x128xi32>
    %43 = arith.cmpi eq, %41, %42 : vector<256x128xi32>
    %cst_13 = arith.constant 0.000000e+00 : f32
    %44 = vector.broadcast %cst_13 : f32 to vector<256x128xf32>
    %45 = arith.select %43, %38, %44 : vector<256x128xi1>, vector<256x128xf32>
    %cst_14 = arith.constant dense<0.000000e+00> : vector<256xf32>
    %46 = vector.multi_reduction <add>, %45, %cst_14 [1] : vector<256x128xf32> to vector<256xf32>
    %47 = vector.shape_cast %46 : vector<256xf32> to vector<256x1xf32>
    %cst_15 = arith.constant 5.000000e-01 : f32
    %48 = vector.broadcast %cst_15 : f32 to vector<256x1xf32>
    %49 = arith.mulf %48, %47 : vector<256x1xf32>
    %cst_16 = arith.constant 0.707106769 : f32
    %50 = vector.broadcast %cst_16 : f32 to vector<256x1xf32>
    %51 = arith.mulf %47, %50 : vector<256x1xf32>
    %52 = math.erf %51 : vector<256x1xf32>
    %cst_17 = arith.constant 1.000000e+00 : f32
    %53 = vector.broadcast %cst_17 : f32 to vector<256x1xf32>
    %54 = arith.addf %53, %52 : vector<256x1xf32>
    %55 = arith.mulf %49, %54 : vector<256x1xf32>
    %cst_18 = arith.constant 0.000000e+00 : f32
    %56 = vector.broadcast %cst_18 : f32 to vector<256x1xf32>
    %57 = vector.shape_cast %55 : vector<256x1xf32> to vector<256x1xf32>
    %58 = vector.broadcast %57 : vector<256x1xf32> to vector<256x128xf32>
    %59 = vector.shape_cast %56 : vector<256x1xf32> to vector<256x1xf32>
    %60 = vector.broadcast %59 : vector<256x1xf32> to vector<256x128xf32>
    %61 = arith.select %43, %58, %60 : vector<256x128xi1>, vector<256x128xf32>
    %62 = arith.addf %29, %61 : vector<256x128xf32>
    %c2_i32_19 = arith.constant 2 : i32
    %63 = vector.broadcast %c2_i32_19 : i32 to vector<256x1xi32>
    %64 = arith.muli %37, %63 : vector<256x1xi32>
    %cst_20 = arith.constant 0.000000e+00 : f32
    %65 = vector.broadcast %cst_20 : f32 to vector<256x1xf32>
    %66 = arith.cmpf oge, %47, %65 : vector<256x1xf32>
    %67 = arith.extui %66 : vector<256x1xi1> to vector<256x1xi32>
    %68 = arith.addi %64, %67 : vector<256x1xi32>
    %c1_i32_21 = arith.constant 1 : i32
    %69 = vector.broadcast %c1_i32_21 : i32 to vector<256x1xi32>
    %70 = arith.addi %68, %69 : vector<256x1xi32>
    %71 = vector.extract_strided_slice %4 {offsets = [0, 0], sizes = [256, 128], strides = [1, 1]} : vector<256x128xf32> to vector<256x128xf32>
    %72 = tpu.iota {dimensions = array<i32: 1>} : vector<256x128xi32>
    %c0_i32_22 = arith.constant 0 : i32
    %73 = vector.broadcast %c0_i32_22 : i32 to vector<256x128xi32>
    %74 = arith.addi %72, %73 : vector<256x128xi32>
    %75 = vector.broadcast %70 : vector<256x1xi32> to vector<256x128xi32>
    %76 = arith.cmpi eq, %74, %75 : vector<256x128xi32>
    %cst_23 = arith.constant 0.000000e+00 : f32
    %77 = vector.broadcast %cst_23 : f32 to vector<256x128xf32>
    %78 = arith.select %76, %71, %77 : vector<256x128xi1>, vector<256x128xf32>
    %cst_24 = arith.constant dense<0.000000e+00> : vector<256xf32>
    %79 = vector.multi_reduction <add>, %78, %cst_24 [1] : vector<256x128xf32> to vector<256xf32>
    %80 = vector.shape_cast %79 : vector<256xf32> to vector<256x1xf32>
    %cst_25 = arith.constant 5.000000e-01 : f32
    %81 = vector.broadcast %cst_25 : f32 to vector<256x1xf32>
    %82 = arith.mulf %81, %80 : vector<256x1xf32>
    %cst_26 = arith.constant 0.707106769 : f32
    %83 = vector.broadcast %cst_26 : f32 to vector<256x1xf32>
    %84 = arith.mulf %80, %83 : vector<256x1xf32>
    %85 = math.erf %84 : vector<256x1xf32>
    %cst_27 = arith.constant 1.000000e+00 : f32
    %86 = vector.broadcast %cst_27 : f32 to vector<256x1xf32>
    %87 = arith.addf %86, %85 : vector<256x1xf32>
    %88 = arith.mulf %82, %87 : vector<256x1xf32>
    %cst_28 = arith.constant 0.000000e+00 : f32
    %89 = vector.broadcast %cst_28 : f32 to vector<256x1xf32>
    %90 = vector.shape_cast %88 : vector<256x1xf32> to vector<256x1xf32>
    %91 = vector.broadcast %90 : vector<256x1xf32> to vector<256x128xf32>
    %92 = vector.shape_cast %89 : vector<256x1xf32> to vector<256x1xf32>
    %93 = vector.broadcast %92 : vector<256x1xf32> to vector<256x128xf32>
    %94 = arith.select %76, %91, %93 : vector<256x128xi1>, vector<256x128xf32>
    %95 = arith.addf %62, %94 : vector<256x128xf32>
    %c2_i32_29 = arith.constant 2 : i32
    %96 = vector.broadcast %c2_i32_29 : i32 to vector<256x1xi32>
    %97 = arith.muli %70, %96 : vector<256x1xi32>
    %cst_30 = arith.constant 0.000000e+00 : f32
    %98 = vector.broadcast %cst_30 : f32 to vector<256x1xf32>
    %99 = arith.cmpf oge, %80, %98 : vector<256x1xf32>
    %100 = arith.extui %99 : vector<256x1xi1> to vector<256x1xi32>
    %101 = arith.addi %97, %100 : vector<256x1xi32>
    %c1_i32_31 = arith.constant 1 : i32
    %102 = vector.broadcast %c1_i32_31 : i32 to vector<256x1xi32>
    %103 = arith.addi %101, %102 : vector<256x1xi32>
    %104 = vector.extract_strided_slice %4 {offsets = [0, 0], sizes = [256, 128], strides = [1, 1]} : vector<256x128xf32> to vector<256x128xf32>
    %105 = tpu.iota {dimensions = array<i32: 1>} : vector<256x128xi32>
    %c0_i32_32 = arith.constant 0 : i32
    %106 = vector.broadcast %c0_i32_32 : i32 to vector<256x128xi32>
    %107 = arith.addi %105, %106 : vector<256x128xi32>
    %108 = vector.broadcast %103 : vector<256x1xi32> to vector<256x128xi32>
    %109 = arith.cmpi eq, %107, %108 : vector<256x128xi32>
    %cst_33 = arith.constant 0.000000e+00 : f32
    %110 = vector.broadcast %cst_33 : f32 to vector<256x128xf32>
    %111 = arith.select %109, %104, %110 : vector<256x128xi1>, vector<256x128xf32>
    %cst_34 = arith.constant dense<0.000000e+00> : vector<256xf32>
    %112 = vector.multi_reduction <add>, %111, %cst_34 [1] : vector<256x128xf32> to vector<256xf32>
    %113 = vector.shape_cast %112 : vector<256xf32> to vector<256x1xf32>
    %cst_35 = arith.constant 5.000000e-01 : f32
    %114 = vector.broadcast %cst_35 : f32 to vector<256x1xf32>
    %115 = arith.mulf %114, %113 : vector<256x1xf32>
    %cst_36 = arith.constant 0.707106769 : f32
    %116 = vector.broadcast %cst_36 : f32 to vector<256x1xf32>
    %117 = arith.mulf %113, %116 : vector<256x1xf32>
    %118 = math.erf %117 : vector<256x1xf32>
    %cst_37 = arith.constant 1.000000e+00 : f32
    %119 = vector.broadcast %cst_37 : f32 to vector<256x1xf32>
    %120 = arith.addf %119, %118 : vector<256x1xf32>
    %121 = arith.mulf %115, %120 : vector<256x1xf32>
    %cst_38 = arith.constant 0.000000e+00 : f32
    %122 = vector.broadcast %cst_38 : f32 to vector<256x1xf32>
    %123 = vector.shape_cast %121 : vector<256x1xf32> to vector<256x1xf32>
    %124 = vector.broadcast %123 : vector<256x1xf32> to vector<256x128xf32>
    %125 = vector.shape_cast %122 : vector<256x1xf32> to vector<256x1xf32>
    %126 = vector.broadcast %125 : vector<256x1xf32> to vector<256x128xf32>
    %127 = arith.select %109, %124, %126 : vector<256x128xi1>, vector<256x128xf32>
    %128 = arith.addf %95, %127 : vector<256x128xf32>
    %cst_39 = arith.constant 0.000000e+00 : f32
    %129 = vector.broadcast %cst_39 : f32 to vector<256x128xf32>
    %c0_40 = arith.constant 0 : index
    %c0_41 = arith.constant 0 : index
    %130 = vector.load %arg3[%c0_40, %c0_41] : memref<128x128xf32, #tpu.memory_space<vmem>>, vector<128x128xf32>
    %cst_42 = arith.constant dense<0.000000e+00> : vector<256x128xf32>
    %131 = tpu.matmul %128, %130, %cst_42 {dimension_numbers = #tpu.dot_dimension_numbers<[1], [0], [0], [1], [0, 0, 1, 1], [], []>} : vector<256x128xf32>, vector<128x128xf32>, vector<256x128xf32> -> vector<256x128xf32>
    %132 = arith.addf %129, %131 : vector<256x128xf32>
    %c0_43 = arith.constant 0 : index
    %c0_44 = arith.constant 0 : index
    %133 = vector.load %arg4[%c0_43, %c0_44] : memref<256x128xf32, #tpu.memory_space<vmem>>, vector<256x128xf32>
    tpu.vector_store %arg4[%c0_43, %c0_44], %132 {strides = array<i32>} : memref<256x128xf32, #tpu.memory_space<vmem>>, vector<256x128xf32>,
    return
  }
  func.func @transform_0(%arg0: i32) -> (i32, i32) {
    %c0_i32 = arith.constant 0 : i32
    %c0_i32_0 = arith.constant 0 : i32
    return %arg0, %c0_i32 : i32, i32
  }
  func.func @transform_1(%arg0: i32) -> (i32, i32) {
    %c0_i32 = arith.constant 0 : i32
    %c0_i32_0 = arith.constant 0 : i32
    %c0_i32_1 = arith.constant 0 : i32
    return %c0_i32, %c0_i32_0 : i32, i32
  }
  func.func @transform_2(%arg0: i32) -> (i32, i32) {
    %c0_i32 = arith.constant 0 : i32
    %c0_i32_0 = arith.constant 0 : i32
    %c0_i32_1 = arith.constant 0 : i32
    return %c0_i32, %c0_i32_0 : i32, i32
  }
  func.func @transform_3(%arg0: i32) -> (i32, i32) {
    %c0_i32 = arith.constant 0 : i32
    %c0_i32_0 = arith.constant 0 : i32
    return %arg0, %c0_i32 : i32, i32
  }
}

module attributes {stable_mosaic.version = 11 : i64} {
  func.func @_fff_kernel(%arg0: i32, %arg1: memref<256x32xf32, #tpu.memory_space<vmem>>, %arg2: memref<128x128xf32, #tpu.memory_space<vmem>>, %arg3: memref<128x128xf32, #tpu.memory_space<vmem>>, %arg4: memref<256x128xf32, #tpu.memory_space<vmem>>) attributes {dimension_semantics = [#tpu.dimension_semantics<parallel>], iteration_bounds = array<i64: 1>, scalar_prefetch = 0 : i64, scratch_operands = 0 : i64, tpu.core_type = #tpu.core_type<tc>, window_params = [{transform_indices = @transform_0, window_bounds = array<i64: 256, 32>}, {pipeline_mode = #tpu.pipeline_mode<synchronous>, transform_indices = @transform_1, window_bounds = array<i64: 128, 128>}, {pipeline_mode = #tpu.pipeline_mode<synchronous>, transform_indices = @transform_2, window_bounds = array<i64: 128, 128>}, {transform_indices = @transform_3, window_bounds = array<i64: 256, 128>}]} {
    %c0 = arith.constant 0 : index
    %c0_0 = arith.constant 0 : index
    %0 = vector.load %arg1[%c0, %c0_0] : memref<256x32xf32, #tpu.memory_space<vmem>>, vector<256x32xf32>
    %c0_1 = arith.constant 0 : index
    %c0_2 = arith.constant 0 : index
    %1 = vector.load %arg2[%c0_1, %c0_2] : memref<128x128xf32, #tpu.memory_space<vmem>>, vector<32x128xf32>
    %cst = arith.constant dense<0.000000e+00> : vector<256x128xf32>
    %2 = tpu.matmul %0, %1, %cst {dimension_numbers = #tpu.dot_dimension_numbers<[1], [0], [0], [1], [0, 0, 1, 1], [], []>, precision = #tpu.contract_precision<fp32>} : vector<256x32xf32>, vector<32x128xf32>, vector<256x128xf32> -> vector<256x128xf32>
    %c0_i32 = arith.constant 0 : i32
    %3 = vector.broadcast %c0_i32 : i32 to vector<256x1xi32>
    %4 = vector.extract_strided_slice %2 {offsets = [0, 0], sizes = [256, 128], strides = [1, 1]} : vector<256x128xf32> to vector<256x128xf32>
    %5 = tpu.iota {dimensions = array<i32: 1>} : vector<256x128xi32>
    %c0_i32_3 = arith.constant 0 : i32
    %6 = vector.broadcast %c0_i32_3 : i32 to vector<256x128xi32>
    %7 = arith.addi %5, %6 : vector<256x128xi32>
    %8 = vector.broadcast %3 : vector<256x1xi32> to vector<256x128xi32>
    %9 = arith.cmpi eq, %7, %8 : vector<256x128xi32>
    %cst_4 = arith.constant 0.000000e+00 : f32
    %10 = vector.broadcast %cst_4 : f32 to vector<256x128xf32>
    %11 = arith.select %9, %4, %10 : vector<256x128xi1>, vector<256x128xf32>
    %cst_5 = arith.constant dense<0.000000e+00> : vector<256xf32>
    %12 = vector.multi_reduction <add>, %11, %cst_5 [1] : vector<256x128xf32> to vector<256xf32>
    %13 = vector.shape_cast %12 : vector<256xf32> to vector<256x1xf32>
    %cst_6 = arith.constant 5.000000e-01 : f32
    %14 = vector.broadcast %cst_6 : f32 to vector<256x1xf32>
    %15 = arith.mulf %14, %13 : vector<256x1xf32>
    %cst_7 = arith.constant 0.707106769 : f32
    %16 = vector.broadcast %cst_7 : f32 to vector<256x1xf32>
    %17 = arith.mulf %13, %16 : vector<256x1xf32>
    %18 = math.erf %17 : vector<256x1xf32>
    %cst_8 = arith.constant 1.000000e+00 : f32
    %19 = vector.broadcast %cst_8 : f32 to vector<256x1xf32>
    %20 = arith.addf %19, %18 : vector<256x1xf32>
    %21 = arith.mulf %15, %20 : vector<256x1xf32>
    %cst_9 = arith.constant 0.000000e+00 : f32
    %22 = vector.broadcast %cst_9 : f32 to vector<256x1xf32>
    %23 = vector.shape_cast %21 : vector<256x1xf32> to vector<256x1xf32>
    %24 = vector.broadcast %23 : vector<256x1xf32> to vector<256x128xf32>
    %25 = vector.shape_cast %22 : vector<256x1xf32> to vector<256x1xf32>
    %26 = vector.broadcast %25 : vector<256x1xf32> to vector<256x128xf32>
    %27 = arith.select %9, %24, %26 : vector<256x128xi1>, vector<256x128xf32>
    %c2_i32 = arith.constant 2 : i32
    %28 = vector.broadcast %c2_i32 : i32 to vector<256x1xi32>
    %29 = arith.muli %3, %28 : vector<256x1xi32>
    %cst_10 = arith.constant 0.000000e+00 : f32
    %30 = vector.broadcast %cst_10 : f32 to vector<256x1xf32>
    %31 = arith.cmpf oge, %13, %30 : vector<256x1xf32>
    %32 = arith.extui %31 : vector<256x1xi1> to vector<256x1xi32>
    %33 = arith.addi %29, %32 : vector<256x1xi32>
    %c1_i32 = arith.constant 1 : i32
    %34 = vector.broadcast %c1_i32 : i32 to vector<256x1xi32>
    %35 = arith.addi %33, %34 : vector<256x1xi32>
    %36 = vector.extract_strided_slice %2 {offsets = [0, 0], sizes = [256, 128], strides = [1, 1]} : vector<256x128xf32> to vector<256x128xf32>
    %37 = tpu.iota {dimensions = array<i32: 1>} : vector<256x128xi32>
    %c0_i32_11 = arith.constant 0 : i32
    %38 = vector.broadcast %c0_i32_11 : i32 to vector<256x128xi32>
    %39 = arith.addi %37, %38 : vector<256x128xi32>
    %40 = vector.broadcast %35 : vector<256x1xi32> to vector<256x128xi32>
    %41 = arith.cmpi eq, %39, %40 : vector<256x128xi32>
    %cst_12 = arith.constant 0.000000e+00 : f32
    %42 = vector.broadcast %cst_12 : f32 to vector<256x128xf32>
    %43 = arith.select %41, %36, %42 : vector<256x128xi1>, vector<256x128xf32>
    %cst_13 = arith.constant dense<0.000000e+00> : vector<256xf32>
    %44 = vector.multi_reduction <add>, %43, %cst_13 [1] : vector<256x128xf32> to vector<256xf32>
    %45 = vector.shape_cast %44 : vector<256xf32> to vector<256x1xf32>
    %cst_14 = arith.constant 5.000000e-01 : f32
    %46 = vector.broadcast %cst_14 : f32 to vector<256x1xf32>
    %47 = arith.mulf %46, %45 : vector<256x1xf32>
    %cst_15 = arith.constant 0.707106769 : f32
    %48 = vector.broadcast %cst_15 : f32 to vector<256x1xf32>
    %49 = arith.mulf %45, %48 : vector<256x1xf32>
    %50 = math.erf %49 : vector<256x1xf32>
    %cst_16 = arith.constant 1.000000e+00 : f32
    %51 = vector.broadcast %cst_16 : f32 to vector<256x1xf32>
    %52 = arith.addf %51, %50 : vector<256x1xf32>
    %53 = arith.mulf %47, %52 : vector<256x1xf32>
    %cst_17 = arith.constant 0.000000e+00 : f32
    %54 = vector.broadcast %cst_17 : f32 to vector<256x1xf32>
    %55 = vector.shape_cast %53 : vector<256x1xf32> to vector<256x1xf32>
    %56 = vector.broadcast %55 : vector<256x1xf32> to vector<256x128xf32>
    %57 = vector.shape_cast %54 : vector<256x1xf32> to vector<256x1xf32>
    %58 = vector.broadcast %57 : vector<256x1xf32> to vector<256x128xf32>
    %59 = arith.select %41, %56, %58 : vector<256x128xi1>, vector<256x128xf32>
    %60 = arith.addf %27, %59 : vector<256x128xf32>
    %c2_i32_18 = arith.constant 2 : i32
    %61 = vector.broadcast %c2_i32_18 : i32 to vector<256x1xi32>
    %62 = arith.muli %35, %61 : vector<256x1xi32>
    %cst_19 = arith.constant 0.000000e+00 : f32
    %63 = vector.broadcast %cst_19 : f32 to vector<256x1xf32>
    %64 = arith.cmpf oge, %45, %63 : vector<256x1xf32>
    %65 = arith.extui %64 : vector<256x1xi1> to vector<256x1xi32>
    %66 = arith.addi %62, %65 : vector<256x1xi32>
    %c1_i32_20 = arith.constant 1 : i32
    %67 = vector.broadcast %c1_i32_20 : i32 to vector<256x1xi32>
    %68 = arith.addi %66, %67 : vector<256x1xi32>
    %69 = vector.extract_strided_slice %2 {offsets = [0, 0], sizes = [256, 128], strides = [1, 1]} : vector<256x128xf32> to vector<256x128xf32>
    %70 = tpu.iota {dimensions = array<i32: 1>} : vector<256x128xi32>
    %c0_i32_21 = arith.constant 0 : i32
    %71 = vector.broadcast %c0_i32_21 : i32 to vector<256x128xi32>
    %72 = arith.addi %70, %71 : vector<256x128xi32>
    %73 = vector.broadcast %68 : vector<256x1xi32> to vector<256x128xi32>
    %74 = arith.cmpi eq, %72, %73 : vector<256x128xi32>
    %cst_22 = arith.constant 0.000000e+00 : f32
    %75 = vector.broadcast %cst_22 : f32 to vector<256x128xf32>
    %76 = arith.select %74, %69, %75 : vector<256x128xi1>, vector<256x128xf32>
    %cst_23 = arith.constant dense<0.000000e+00> : vector<256xf32>
    %77 = vector.multi_reduction <add>, %76, %cst_23 [1] : vector<256x128xf32> to vector<256xf32>
    %78 = vector.shape_cast %77 : vector<256xf32> to vector<256x1xf32>
    %cst_24 = arith.constant 5.000000e-01 : f32
    %79 = vector.broadcast %cst_24 : f32 to vector<256x1xf32>
    %80 = arith.mulf %79, %78 : vector<256x1xf32>
    %cst_25 = arith.constant 0.707106769 : f32
    %81 = vector.broadcast %cst_25 : f32 to vector<256x1xf32>
    %82 = arith.mulf %78, %81 : vector<256x1xf32>
    %83 = math.erf %82 : vector<256x1xf32>
    %cst_26 = arith.constant 1.000000e+00 : f32
    %84 = vector.broadcast %cst_26 : f32 to vector<256x1xf32>
    %85 = arith.addf %84, %83 : vector<256x1xf32>
    %86 = arith.mulf %80, %85 : vector<256x1xf32>
    %cst_27 = arith.constant 0.000000e+00 : f32
    %87 = vector.broadcast %cst_27 : f32 to vector<256x1xf32>
    %88 = vector.shape_cast %86 : vector<256x1xf32> to vector<256x1xf32>
    %89 = vector.broadcast %88 : vector<256x1xf32> to vector<256x128xf32>
    %90 = vector.shape_cast %87 : vector<256x1xf32> to vector<256x1xf32>
    %91 = vector.broadcast %90 : vector<256x1xf32> to vector<256x128xf32>
    %92 = arith.select %74, %89, %91 : vector<256x128xi1>, vector<256x128xf32>
    %93 = arith.addf %60, %92 : vector<256x128xf32>
    %c2_i32_28 = arith.constant 2 : i32
    %94 = vector.broadcast %c2_i32_28 : i32 to vector<256x1xi32>
    %95 = arith.muli %68, %94 : vector<256x1xi32>
    %cst_29 = arith.constant 0.000000e+00 : f32
    %96 = vector.broadcast %cst_29 : f32 to vector<256x1xf32>
    %97 = arith.cmpf oge, %78, %96 : vector<256x1xf32>
    %98 = arith.extui %97 : vector<256x1xi1> to vector<256x1xi32>
    %99 = arith.addi %95, %98 : vector<256x1xi32>
    %c1_i32_30 = arith.constant 1 : i32
    %100 = vector.broadcast %c1_i32_30 : i32 to vector<256x1xi32>
    %101 = arith.addi %99, %100 : vector<256x1xi32>
    %102 = vector.extract_strided_slice %2 {offsets = [0, 0], sizes = [256, 128], strides = [1, 1]} : vector<256x128xf32> to vector<256x128xf32>
    %103 = tpu.iota {dimensions = array<i32: 1>} : vector<256x128xi32>
    %c0_i32_31 = arith.constant 0 : i32
    %104 = vector.broadcast %c0_i32_31 : i32 to vector<256x128xi32>
    %105 = arith.addi %103, %104 : vector<256x128xi32>
    %106 = vector.broadcast %101 : vector<256x1xi32> to vector<256x128xi32>
    %107 = arith.cmpi eq, %105, %106 : vector<256x128xi32>
    %cst_32 = arith.constant 0.000000e+00 : f32
    %108 = vector.broadcast %cst_32 : f32 to vector<256x128xf32>
    %109 = arith.select %107, %102, %108 : vector<256x128xi1>, vector<256x128xf32>
    %cst_33 = arith.constant dense<0.000000e+00> : vector<256xf32>
    %110 = vector.multi_reduction <add>, %109, %cst_33 [1] : vector<256x128xf32> to vector<256xf32>
    %111 = vector.shape_cast %110 : vector<256xf32> to vector<256x1xf32>
    %cst_34 = arith.constant 5.000000e-01 : f32
    %112 = vector.broadcast %cst_34 : f32 to vector<256x1xf32>
    %113 = arith.mulf %112, %111 : vector<256x1xf32>
    %cst_35 = arith.constant 0.707106769 : f32
    %114 = vector.broadcast %cst_35 : f32 to vector<256x1xf32>
    %115 = arith.mulf %111, %114 : vector<256x1xf32>
    %116 = math.erf %115 : vector<256x1xf32>
    %cst_36 = arith.constant 1.000000e+00 : f32
    %117 = vector.broadcast %cst_36 : f32 to vector<256x1xf32>
    %118 = arith.addf %117, %116 : vector<256x1xf32>
    %119 = arith.mulf %113, %118 : vector<256x1xf32>
    %cst_37 = arith.constant 0.000000e+00 : f32
    %120 = vector.broadcast %cst_37 : f32 to vector<256x1xf32>
    %121 = vector.shape_cast %119 : vector<256x1xf32> to vector<256x1xf32>
    %122 = vector.broadcast %121 : vector<256x1xf32> to vector<256x128xf32>
    %123 = vector.shape_cast %120 : vector<256x1xf32> to vector<256x1xf32>
    %124 = vector.broadcast %123 : vector<256x1xf32> to vector<256x128xf32>
    %125 = arith.select %107, %122, %124 : vector<256x128xi1>, vector<256x128xf32>
    %126 = arith.addf %93, %125 : vector<256x128xf32>
    %cst_38 = arith.constant 0.000000e+00 : f32
    %127 = vector.broadcast %cst_38 : f32 to vector<256x128xf32>
    %c0_39 = arith.constant 0 : index
    %c0_40 = arith.constant 0 : index
    %128 = vector.load %arg3[%c0_39, %c0_40] : memref<128x128xf32, #tpu.memory_space<vmem>>, vector<128x128xf32>
    %cst_41 = arith.constant dense<0.000000e+00> : vector<256x128xf32>
    %129 = tpu.matmul %126, %128, %cst_41 {dimension_numbers = #tpu.dot_dimension_numbers<[1], [0], [0], [1], [0, 0, 1, 1], [], []>} : vector<256x128xf32>, vector<128x128xf32>, vector<256x128xf32> -> vector<256x128xf32>
    %130 = arith.addf %127, %129 : vector<256x128xf32>
    %c0_42 = arith.constant 0 : index
    %c0_43 = arith.constant 0 : index
    %131 = vector.load %arg4[%c0_42, %c0_43] : memref<256x128xf32, #tpu.memory_space<vmem>>, vector<256x128xf32>
    tpu.vector_store %arg4[%c0_42, %c0_43], %130 {strides = array<i32>} : memref<256x128xf32, #tpu.memory_space<vmem>>, vector<256x128xf32>,
    return
  }
  func.func @transform_0(%arg0: i32) -> (i32, i32) {
    %c0_i32 = arith.constant 0 : i32
    %c0_i32_0 = arith.constant 0 : i32
    return %arg0, %c0_i32 : i32, i32
  }
  func.func @transform_1(%arg0: i32) -> (i32, i32) {
    %c0_i32 = arith.constant 0 : i32
    %c0_i32_0 = arith.constant 0 : i32
    %c0_i32_1 = arith.constant 0 : i32
    return %c0_i32, %c0_i32_0 : i32, i32
  }
  func.func @transform_2(%arg0: i32) -> (i32, i32) {
    %c0_i32 = arith.constant 0 : i32
    %c0_i32_0 = arith.constant 0 : i32
    %c0_i32_1 = arith.constant 0 : i32
    return %c0_i32, %c0_i32_0 : i32, i32
  }
  func.func @transform_3(%arg0: i32) -> (i32, i32) {
    %c0_i32 = arith.constant 0 : i32
    %c0_i32_0 = arith.constant 0 : i32
    return %arg0, %c0_i32 : i32, i32
  }
}

</mosaic_0001>

<bundles_post_ra>
// kernel: tpu_custom_call.1
= control target key start
LH: loop header
LB: loop body
LE: loop exit
PB: predicated region body
PF: predicated region fallthrough
CT: control target
= control target key end

     0   :  { %vm47_vm0 = vcmask 261120   ;;  %s9350_s0 = inlined_call_operand.vmem [shape: f32[256,32], index: 0, kind: input, shape index: {}]   ;;  %s9351_s1 = inlined_call_operand.vmem [shape: f32[128,128], index: 1, kind: input, shape index: {}]   ;;  %s9352_s2 = inlined_call_operand.vmem [shape: f32[128,128], index: 2, kind: input, shape index: {}]   ;;  %s9353_s3 = inlined_call_operand.hbm [shape: f32[256,128], index: 3, kind: output, shape index: {}]  }
   0x1   :  { %v80_v0 = vld [vmem:[%s9351_s1] sm:$0xff]  ;;  %v81_v1 = vld [vmem:[%s9351_s1 + $0x8] sm:$0xff]  ;;  %v82_v2 = vld [vmem:[%s9351_s1 + $0x10] sm:$0xff] }
   0x2   :  { %v97_v3 = vand.u32 4294901760, %v80_v0  ;;  %v100_v4 = vand.u32 4294901760, %v81_v1  ;;  %v83_v5 = vld [vmem:[%s9351_s1 + $0x18] sm:$0xff]  ;;  %v103_v6 = vand.u32 4294901760, %v82_v2  ;;  %v84_v7 = vld [vmem:[%s9351_s1 + $0x20] sm:$0xff]  ;;  %v85_v8 = vld [vmem:[%s9351_s1 + $0x28] sm:$0xff] }
   0x3   :  { %v106_v9 = vand.u32 4294901760, %v83_v5  ;;  %v109_v10 = vand.u32 4294901760, %v84_v7  ;;  %v112_v11 = vand.u32 4294901760, %v85_v8  ;;  %v86_v12 = vld [vmem:[%s9351_s1 + $0x30] sm:$0xff]  ;;  %v87_v13 = vld [vmem:[%s9351_s1 + $0x38] sm:$0xff]  ;;  %v88_v25 = vld [vmem:[%s9351_s1 + $0x40] sm:$0xff] }
   0x4   :  { %v5750_v14 = vpack.c.bf16 %v100_v4, %v97_v3  ;;  %v5752_v15 = vsub.f32 %v80_v0, %v97_v3  ;;  %v5754_v16 = vsub.f32 %v81_v1, %v100_v4  ;;  %v5756_v17 = vsub.f32 %v82_v2, %v103_v6  ;;  %v89_v27 = vld [vmem:[%s9351_s1 + $0x48] sm:$0xff]  ;;  %v90_v30 = vld [vmem:[%s9351_s1 + $0x50] sm:$0xff]  ;;  %v91_v31 = vld [vmem:[%s9351_s1 + $0x58] sm:$0xff] }
   0x5   :  { %v5758_v18 = vpack.c.bf16 %v106_v9, %v103_v6  ;;  %v5760_v19 = vsub.f32 %v83_v5, %v106_v9  ;;  %v5762_v20 = vsub.f32 %v84_v7, %v109_v10  ;;  %v5769_v22 = vsub.f32 %v85_v8, %v112_v11  ;;  %v15_v32 = vld [vmem:[%s9350_s0] sm:$0xff]  ;;  %v16_v37 = vld [vmem:[%s9350_s0 + $0x8] sm:$0xff]  ;;  %v17_v42 = vld [vmem:[%s9350_s0 + $0x10] sm:$0xff] }
   0x6   :  { %9764 = vst [vmem:[#allocation5_spill] sm:$0xff] %v5750_v14  ;;  %5019 = vmatprep.subr.bf16.mxu1 %v5750_v14  ;;  %v5767_v21 = vpack.c.bf16 %v5754_v16, %v5752_v15  ;;  %v115_v23 = vand.u32 4294901760, %v86_v12  ;;  %v118_v24 = vand.u32 4294901760, %v87_v13  ;;  %v5784_v28 = vpack.c.bf16 %v112_v11, %v109_v10  ;;  %v92_v47 = vld [vmem:[%s9351_s1 + $0x60] sm:$0xff]  ;;  %v18_v49 = vld [vmem:[%s9350_s0 + $0x18] sm:$0xff]  ;;  %v93_v50 = vld [vmem:[%s9351_s1 + $0x68] sm:$0xff] }
   0x7   :  { %9765 = vst [vmem:[#allocation6_spill] sm:$0xff] %v5758_v18  ;;  %5021 = vmatpush3.bf16.msra.mxu1 %v5750_v14  ;;  %v5777_v26 = vpack.c.bf16 %v5760_v19, %v5756_v17  ;;  %v121_v29 = vand.u32 4294901760, %v88_v25  ;;  %v5799_v33 = vpack.c.bf16 %v5769_v22, %v5762_v20  ;;  %v124_v36 = vand.u32 4294901760, %v89_v27  ;;  %v5842_v51 = vld [vmem:[%s9351_s1 + $0x70] sm:$0xff]  ;;  %v19_v54 = vld [vmem:[%s9350_s0 + $0x20] sm:$0xff]  ;;  %v5861_v58 = vld [vmem:[%s9351_s1 + $0x78] sm:$0xff] }
   0x8   :  { %9766 = vst [vmem:[#allocation7_spill] sm:$0xff] %v5767_v21  ;;  %5083 = vmatprep.subr.bf16.mxu0 %v5767_v21  ;;  %5023 = vmatprep.subr.bf16.mxu1 %v5758_v18  ;;  %9768 = vst [vmem:[#allocation9_spill] sm:$0xff] %v5784_v28  ;;  %v5801_v34 = vsub.f32 %v86_v12, %v115_v23  ;;  %v5803_v35 = vsub.f32 %v87_v13, %v118_v24  ;;  %v127_v39 = vand.u32 4294901760, %v90_v30  ;;  %v20_v60 = vld [vmem:[%s9350_s0 + $0x28] sm:$0xff]  ;;  %v21_v61 = vld [vmem:[%s9350_s0 + $0x30] sm:$0xff] }
   0x9   :  { %9767 = vst [vmem:[#allocation8_spill] sm:$0xff] %v5777_v26  ;;  %5085 = vmatpush3.bf16.msra.mxu0 %v5767_v21  ;;  %9769 = vst [vmem:[#allocation10_spill] sm:$0xff] %v5799_v33  ;;  %v5810_v38 = vpack.c.bf16 %v118_v24, %v115_v23  ;;  %v130_v40 = vand.u32 4294901760, %v91_v31  ;;  %v48_v41 = vsel %vm47_vm0, %v15_v32, 0.0  ;;  %v5824_v45 = vsub.f32 %v88_v25, %v121_v29  ;;  %v22_v2 = vld [vmem:[%s9350_s0 + $0x38] sm:$0xff] }
   0xa   :  { %5087 = vmatprep.subr.bf16.mxu0 %v5777_v26  ;;  %v5817_v43 = vand.u32 4294901760, %v48_v41  ;;  %v5822_v44 = vpack.c.bf16 %v5803_v35, %v5801_v34  ;;  %v5826_v46 = vsub.f32 %v89_v27, %v124_v36  ;;  %v49_v48 = vsel %vm47_vm0, %v16_v37, 0.0 }
   0xb   :  { %5025 = vmatpush3.bf16.msra.mxu1 %v5758_v18  ;;  %9770 = vst [vmem:[#allocation11_spill] sm:$0xff] %v5810_v38  ;;  %v50_v53 = vsel %vm47_vm0, %v17_v42, 0.0  ;;  %v5852_v55 = vpack.c.bf16 %v124_v36, %v121_v29  ;;  %v5854_v56 = vpack.c.bf16 %v130_v40, %v127_v39  ;;  %v5856_v57 = vsub.f32 %v90_v30, %v127_v39 }
   0xc   :  { %5027 = vmatprep.subr.bf16.mxu1 %v5784_v28  ;;  %9771 = vst [vmem:[#allocation12_spill] sm:$0xff] %v5817_v43  ;;  %9772 = vst [vmem:[#allocation13_spill] sm:$0xff] %v5822_v44  ;;  %v5845_v52 = vsub.f32 %v48_v41, %v5817_v43  ;;  %v5863_v59 = vand.u32 4294901760, %v49_v48  ;;  %v5872_v62 = vsub.f32 %v91_v31, %v130_v40  ;;  %v133_v63 = vand.u32 4294901760, %v92_v47 }
   0xd   :  { %5089 = vmatpush3.bf16.msra.mxu0 %v5777_v26  ;;  %9773 = vst [vmem:[#allocation14_spill] sm:$0xff] %v5852_v55  ;;  %9774 = vst [vmem:[#allocation15_spill] sm:$0xff] %v5854_v56  ;;  %v51_v1 = vsel %vm47_vm0, %v18_v49, 0.0 }
   0xe   :  { %5091 = vmatprep.subr.bf16.mxu0 %v5799_v33  ;;  %9775 = vst [vmem:[#allocation16_spill] sm:$0xff] %v5863_v59  ;;  %v9354_v0 = vand.u32 4294901760, %v5845_v52  ;;  %4650 = vmatprep.mubr.f32.mxu0 %v5845_v52 }
   0xf   :  { %5029 = vmatpush3.bf16.msra.mxu1 %v5784_v28 }
  0x10   :  { %5031 = vmatprep.subr.bf16.mxu1 %v5810_v38 }
  0x11   :  { %5093 = vmatpush3.bf16.msra.mxu0 %v5799_v33 }
  0x12   :  { %8 = vsyncpa [#allocation3], 0  ;;  %5095 = vmatprep.subr.bf16.mxu0 %v5822_v44  ;;  %v5883_v3 = vpack.c.bf16 %v5826_v46, %v5824_v45  ;;  %v136_v4 = vand.u32 4294901760, %v93_v50  ;;  %v5885_v5 = vand.u32 4294901760, %v50_v53  ;;  %v52_v6 = vsel %vm47_vm0, %v19_v54, 0.0  ;;  %v23_v24 = vld [vmem:[%s9350_s0 + $0x40] sm:$0xff] }
  0x13   :  { %5033 = vmatpush3.bf16.msra.mxu1 %v5810_v38  ;;  %v139_v7 = vand.u32 4294901760, %v5842_v51  ;;  %v180_v8 = vsub.f32 %v5845_v52, %v9354_v0  ;;  %v53_v9 = vsel %vm47_vm0, %v20_v60, 0.0  ;;  %v54_v10 = vsel %vm47_vm0, %v21_v61, 0.0  ;;  %v24_v39 = vld [vmem:[%s9350_s0 + $0x48] sm:$0xff]  ;;  %v25_v40 = vld [vmem:[%s9350_s0 + $0x50] sm:$0xff]  ;;  %v26_v54 = vld [vmem:[%s9350_s0 + $0x58] sm:$0xff] }
  0x14   :  { %9776 = vst [vmem:[#allocation17_spill] sm:$0xff] %v5883_v3  ;;  %9777 = vst [vmem:[#allocation18_spill] sm:$0xff] %v5885_v5  ;;  %5035 = vmatprep.subr.bf16.mxu1 %v5852_v55  ;;  %v142_v11 = vand.u32 4294901760, %v5861_v58  ;;  %v5898_v12 = vsub.f32 %v49_v48, %v5863_v59  ;;  %v5900_v13 = vand.u32 4294901760, %v51_v1  ;;  %v55_v23 = vsel %vm47_vm0, %v22_v2, 0.0 }
  0x15   :  { %5097 = vmatpush3.bf16.msra.mxu0 %v5822_v44  ;;  %v5909_v25 = vpack.c.bf16 %v5872_v62, %v5856_v57  ;;  %v5911_v27 = vsub.f32 %v92_v47, %v133_v63  ;;  %v181_v29 = vand.u32 4294901760, %v180_v8  ;;  %v5913_v30 = vand.u32 4294901760, %v52_v6 }
  0x16   :  { %9778 = vst [vmem:[#allocation19_spill] sm:$0xff] %v5900_v13  ;;  %5099 = vmatprep.subr.bf16.mxu0 %v5883_v3  ;;  %v5916_v31 = vsub.f32 %v93_v50, %v136_v4  ;;  %v5919_v32 = vsub.f32 %v50_v53, %v5885_v5  ;;  %v5921_v36 = vand.u32 4294901760, %v53_v9  ;;  %v5923_v37 = vand.u32 4294901760, %v54_v10 }
  0x17   :  { %9779 = vst [vmem:[#allocation20_spill] sm:$0xff] %v5909_v25  ;;  %9780 = vst [vmem:[#allocation21_spill] sm:$0xff] %v5913_v30  ;;  %5037 = vmatpush3.bf16.msra.mxu1 %v5852_v55  ;;  %v5932_v41 = vpack.c.bf16 %v136_v4, %v133_v63  ;;  %4490 = vmatprep.mubr.f32.mxu1 %v181_v29  ;;  %v5934_v42 = vand.u32 4294901760, %v55_v23  ;;  %v56_v47 = vsel %vm47_vm0, %v23_v24, 0.0  ;;  %v9355_v50 = vand.u32 4294901760, %v5898_v12 }
  0x18   :  { %9781 = vst [vmem:[#allocation22_spill] sm:$0xff] %v5921_v36  ;;  %9782 = vst [vmem:[#allocation23_spill] sm:$0xff] %v5923_v37  ;;  %5039 = vmatprep.subr.bf16.mxu1 %v5854_v56  ;;  %v5939_v48 = vsub.f32 %v5842_v51, %v139_v7  ;;  %v5942_v49 = vsub.f32 %v5861_v58, %v142_v11  ;;  %v5946_v53 = vsub.f32 %v51_v1, %v5900_v13 }
  0x19   :  { %9783 = vst [vmem:[#allocation24_spill] sm:$0xff] %v5932_v41  ;;  %9784 = vst [vmem:[#allocation25_spill] sm:$0xff] %v5934_v42  ;;  %5101 = vmatpush3.bf16.msra.mxu0 %v5883_v3  ;;  %v5953_v60 = vsub.f32 %v52_v6, %v5913_v30  ;;  %v5955_v61 = vand.u32 4294901760, %v56_v47  ;;  %v57_v51 = vsel %vm47_vm0, %v24_v39, 0.0  ;;  %v58_v58 = vsel %vm47_vm0, %v25_v40, 0.0  ;;  %v27_v6 = vld [vmem:[%s9350_s0 + $0x60] sm:$0xff] }
  0x1a   :  { %5103 = vmatprep.subr.bf16.mxu0 %v5909_v25  ;;  %v5962_v63 = vpack.c.bf16 %v5916_v31, %v5911_v27  ;;  %v5966_v2 = vsub.f32 %v53_v9, %v5921_v36  ;;  %v5969_v4 = vsub.f32 %v54_v10, %v5923_v37  ;;  %v5976_v8 = vsub.f32 %v55_v23, %v5934_v42 }
  0x1b   :  { %9785 = vst [vmem:[#allocation26_spill] sm:$0xff] %v5955_v61  ;;  %5041 = vmatpush3.bf16.msra.mxu1 %v5854_v56  ;;  %v5978_v24 = vand.u32 4294901760, %v57_v51  ;;  %v5980_v29 = vand.u32 4294901760, %v58_v58  ;;  %v59_v39 = vsel %vm47_vm0, %v26_v54, 0.0  ;;  %v5984_v9 = vpack.c.bf16 %v142_v11, %v139_v7 }
  0x1c   :  { %9786 = vst [vmem:[#allocation27_spill] sm:$0xff] %v5962_v63  ;;  %9787 = vst [vmem:[#allocation28_spill] sm:$0xff] %v5969_v4  ;;  %5043 = vmatprep.subr.bf16.mxu1 %v5932_v41  ;;  %v5988_v40 = vsub.f32 %v56_v47, %v5955_v61  ;;  %v190_v23 = vsub.f32 %v5898_v12, %v9355_v50  ;;  %v5995_v1 = vand.u32 4294901760, %v59_v39  ;;  %v60_v54 = vsel %vm47_vm0, %v27_v6, 0.0  ;;  %v28_v50 = vld [vmem:[%s9350_s0 + $0x68] sm:$0xff] }
  0x1d   :  { %9788 = vst [vmem:[#allocation29_spill] sm:$0xff] %v5978_v24  ;;  %9789 = vst [vmem:[#allocation30_spill] sm:$0xff] %v5980_v29  ;;  %5105 = vmatpush3.bf16.msra.mxu0 %v5909_v25  ;;  %v6001_v7 = vpack.c.bf16 %v5942_v49, %v5939_v48  ;;  %v6006_v10 = vsub.f32 %v57_v51, %v5978_v24  ;;  %v9792_v6 = vand.u32 4294901760, %v5919_v32  ;;  %v29_v51 = vld [vmem:[%s9350_s0 + $0x70] sm:$0xff]  ;;  %v9793_v47 = vand.u32 4294901760, %v5946_v53 }
  0x1e   :  { %9790 = vst [vmem:[#allocation31_spill] sm:$0xff] %v5995_v1  ;;  %5107 = vmatprep.subr.bf16.mxu0 %v5962_v63  ;;  %v6017_v3 = vsub.f32 %v58_v58, %v5980_v29  ;;  %v6027_v61 = vand.u32 4294901760, %v60_v54  ;;  %v191_v58 = vand.u32 4294901760, %v190_v23  ;;  %v9795_v25 = vand.u32 4294901760, %v5953_v60 }
  0x1f   :  { %9791 = vst [vmem:[#allocation32_spill] sm:$0xff] %v6001_v7  ;;  %5045 = vmatpush3.bf16.msra.mxu1 %v5932_v41  ;;  %v200_v0 = vsub.f32 %v5919_v32, %v9792_v6  ;;  %v210_v11 = vsub.f32 %v5946_v53, %v9793_v47  ;;  %v30_v6 = vld [vmem:[%s9350_s0 + $0x78] sm:$0xff]  ;;  %v6037_v42 = vsub.f32 %v59_v39, %v5995_v1  ;;  %v61_v47 = vsel %vm47_vm0, %v28_v50, 0.0 }
  0x20   :  { %5047 = vmatprep.subr.bf16.mxu1 %v5984_v9  ;;  %9794 = vst [vmem:[#allocation33_spill] sm:$0xff] %v6027_v61  ;;  %v220_v29 = vsub.f32 %v5953_v60, %v9795_v25  ;;  %v9796_v24 = vand.u32 4294901760, %v5966_v2  ;;  %v9797_v37 = vand.u32 4294901760, %v5969_v4  ;;  %v62_v25 = vsel %vm47_vm0, %v29_v51, 0.0 }
  0x21   :  { %5109 = vmatpush3.bf16.msra.mxu0 %v5962_v63  ;;  %v201_v39 = vand.u32 4294901760, %v200_v0  ;;  %v9798_v50 = vand.u32 4294901760, %v5976_v8  ;;  %v63_v36 = vsel %vm47_vm0, %v30_v6, 0.0  ;;  %v211_v33 = vand.u32 4294901760, %v210_v11  ;;  %v31_v11 = vld [vmem:[%s9350_s0 + $0x80] sm:$0xff] }
  0x22   :  { %5111 = vmatprep.subr.bf16.mxu0 %v6001_v7  ;;  %v6044_v44 = vsub.f32 %v5966_v2, %v9796_v24  ;;  %v6049_v23 = vsub.f32 %v5969_v4, %v9797_v37  ;;  %v9799_v37 = vand.u32 4294901760, %v5988_v40  ;;  %v6067_v51 = vsub.f32 %v60_v54, %v6027_v61 }
  0x23   :  { %5049 = vmatpush3.bf16.msra.mxu1 %v5984_v9  ;;  %v6057_v1 = vsub.f32 %v5976_v8, %v9798_v50  ;;  %v6069_v63 = vand.u32 4294901760, %v61_v47  ;;  %v221_v0 = vand.u32 4294901760, %v220_v29  ;;  %v6073_v13 = vand.u32 4294901760, %v62_v25 }
  0x24   :  { %v6064_v30 = vsub.f32 %v5988_v40, %v9799_v37  ;;  %v9392_v6 = vand.u32 4294901760, %v5752_v15  ;;  %v231_v54 = vand.u32 4294901760, %v6044_v44  ;;  %v241_v37 = vand.u32 4294901760, %v6049_v23  ;;  %v32_v44 = vld [vmem:[%s9350_s0 + $0x88] sm:$0xff] }
  0x25   :  { %9800 = vst [vmem:[#allocation34_spill] sm:$0xff] %v6069_v63  ;;  %5113 = vmatpush3.bf16.msra.mxu0 %v6001_v7  ;;  %9801 = vst [vmem:[#allocation35_spill] sm:$0xff] %v6073_v13  ;;  %v9802_v24 = vand.u32 4294901760, %v6006_v10  ;;  %v6087_v50 = vand.u32 4294901760, %v63_v36  ;;  %v9804_v61 = vand.u32 4294901760, %v6017_v3  ;;  %v6106_v26 = vsub.f32 %v61_v47, %v6069_v63 }
  0x26   :  { %4491 = vmatmul.mubr.f32.vlgmr.msra.gmra.mrb[0].mxu1 %v191_v58  ;;  %5115 = vmatprep.subr.bf16.mxu0 %v5750_v14  ;;  %v501_v23 = vsub.f32 %v5752_v15, %v9392_v6  ;;  %v9805_v5 = vand.u32 4294901760, %v6037_v42  ;;  %v9806_v7 = vand.u32 4294901760, %v5754_v16 }
  0x27   :  { %v6085_v29 = vsub.f32 %v6006_v10, %v9802_v24  ;;  %9803 = vst [vmem:[#allocation36_spill] sm:$0xff] %v6087_v50  ;;  %4493 = vmatprep.mubr.f32.mxu1 %v201_v39  ;;  %v6093_v58 = vsub.f32 %v6017_v3, %v9804_v61  ;;  %v64_v61 = vsel %vm47_vm0, %v31_v11, 0.0  ;;  %v6117_v24 = vsub.f32 %v62_v25, %v6073_v13  ;;  %v33_v11 = vld [vmem:[%s9350_s0 + $0x90] sm:$0xff] }
  0x28   :  { %4651 = vmatmul.mubr.f32.vlgmr.msra.gmra.mrb[0].mxu0 %v5898_v12  ;;  %v6114_v6 = vsub.f32 %v6037_v42, %v9805_v5  ;;  %v502_v39 = vand.u32 4294901760, %v501_v23  ;;  %v508_v47 = vsub.f32 %v5754_v16, %v9806_v7  ;;  %v6128_v5 = vsub.f32 %v63_v36, %v6087_v50  ;;  %v34_v23 = vld [vmem:[%s9350_s0 + $0x98] sm:$0xff] }
  0x29   :  { %5117 = vmatpush3.bf16.msra.mxu0 %v5750_v14  ;;  %4653 = vmatprep.mubr.f32.mxu0 %v5919_v32  ;;  %v65_v25 = vsel %vm47_vm0, %v32_v44, 0.0  ;;  %v9405_v7 = vand.u32 4294901760, %v5756_v17  ;;  %v6136_v14 = vand.u32 4294901760, %v64_v61  ;;  %v9808_v36 = vand.u32 4294901760, %v6067_v51 }
  0x2a   :  { %4494 = vmatmul.mubr.f32.gmra.mrb[2].mxu1 %v211_v33  ;;  %5119 = vmatprep.subr.bf16.mxu0 %v5758_v18  ;;  %v509_v33 = vand.u32 4294901760, %v508_v47  ;;  %v66_v50 = vsel %vm47_vm0, %v33_v11, 0.0  ;;  %v6152_v47 = vand.u32 4294901760, %v65_v25  ;;  %v67_v59 = vsel %vm47_vm0, %v34_v23, 0.0 }
  0x2b   :  { %4496 = vmatprep.mubr.f32.mxu1 %v221_v0  ;;  %9807 = vst [vmem:[#allocation37_spill] sm:$0xff] %v6136_v14  ;;  %v6143_v44 = vsub.f32 %v6067_v51, %v9808_v36  ;;  %v515_v0 = vsub.f32 %v5756_v17, %v9405_v7  ;;  %v9810_v36 = vand.u32 4294901760, %v5760_v19  ;;  %v6166_v23 = vsub.f32 %v64_v61, %v6136_v14  ;;  %v37_v7 = vld [vmem:[%s9350_s0 + $0xb0] sm:$0xff] }
  0x2c   :  { %4654 = vmatmul.mubr.f32.gmra.mrb[2].mxu0 %v5946_v53  ;;  %9809 = vst [vmem:[#allocation38_spill] sm:$0xff] %v6152_v47  ;;  %v5050_v13 = vpack.c.bf16 %v509_v33, %v502_v39  ;;  %v35_v39 = vld [vmem:[%s9350_s0 + $0xa0] sm:$0xff]  ;;  %v6168_v33 = vand.u32 4294901760, %v66_v50  ;;  %v9812_v63 = vand.u32 4294901760, %v6106_v26  ;;  %v6181_v61 = vand.u32 4294901760, %v67_v59 }
  0x2d   :  { %5121 = vmatpush3.bf16.msra.mxu0 %v5758_v18  ;;  %4656 = vmatprep.mubr.f32.mxu0 %v5953_v60  ;;  %v522_v43 = vsub.f32 %v5760_v19, %v9810_v36  ;;  %v516_v18 = vand.u32 4294901760, %v515_v0  ;;  %v36_v36 = vld [vmem:[%s9350_s0 + $0xa8] sm:$0xff]  ;;  %v6190_v0 = vsub.f32 %v65_v25, %v6152_v47  ;;  %v9816_v21 = vand.u32 4294901760, %v6117_v24 }
  0x2e   :  { %4497 = vmatmul.mubr.f32.gmra.mrb[4].mxu1 %v231_v54  ;;  %5123 = vmatprep.subr.bf16.mxu0 %v5784_v28  ;;  %9811 = vst [vmem:[#allocation39_spill] sm:$0xff] %v6168_v33  ;;  %9813 = vst [vmem:[#allocation40_spill] sm:$0xff] %v6181_v61  ;;  %v9817_v25 = vand.u32 4294901760, %v6128_v5  ;;  %v6217_v47 = vsub.f32 %v66_v50, %v6168_v33  ;;  %v9427_v33 = vand.u32 4294901760, %v5826_v46 }
  0x2f   :  { %4499 = vmatprep.mubr.f32.mxu1 %v241_v37  ;;  %5051 = vmatprep.subr.bf16.mxu1 %v5050_v13  ;;  %v523_v54 = vand.u32 4294901760, %v522_v43  ;;  %v6179_v37 = vsub.f32 %v6106_v26, %v9812_v63  ;;  %v68_v63 = vsel %vm47_vm0, %v35_v39, 0.0  ;;  %v9815_v43 = vand.u32 4294901760, %v6057_v1 }
  0x30   :  { %4657 = vmatmul.mubr.f32.gmra.mrb[4].mxu0 %v5966_v2  ;;  %5053 = vmatpush3.bf16.msra.mxu1 %v5050_v13  ;;  %v9814_v13 = vand.u32 4294901760, %v5762_v20  ;;  %v69_v39 = vsel %vm47_vm0, %v36_v36, 0.0  ;;  %v9819_v1 = vand.u32 4294901760, %v6064_v30 }
  0x31   :  { %5125 = vmatpush3.bf16.msra.mxu0 %v5784_v28  ;;  %4659 = vmatprep.mubr.f32.mxu0 %v5969_v4  ;;  %v5054_v11 = vpack.c.bf16 %v523_v54, %v516_v18  ;;  %v6202_v28 = vsub.f32 %v6117_v24, %v9816_v21  ;;  %v6207_v18 = vsub.f32 %v6128_v5, %v9817_v25  ;;  %v9818_v54 = vand.u32 4294901760, %v5769_v22 }
  0x32   :  { %v529_v14 = vsub.f32 %v5762_v20, %v9814_v13  ;;  %4500 = vmatmul.mubr.f32.gmra.mrb[6].mxu1 %v9815_v43  ;;  %5127 = vmatprep.subr.bf16.mxu0 %v5810_v38  ;;  %v70_v4 = vsel %vm47_vm0, %v37_v7, 0.0  ;;  %v311_v36 = vand.u32 4294901760, %v6179_v37  ;;  %v6223_v25 = vsub.f32 %v67_v59, %v6181_v61  ;;  %v38_v7 = vld [vmem:[%s9350_s0 + $0xb8] sm:$0xff] }
  0x33   :  { %v536_v13 = vsub.f32 %v5769_v22, %v9818_v54  ;;  %4502 = vmatprep.mubr.f32.mxu1 %v9819_v1  ;;  %5055 = vmatprep.subr.bf16.mxu1 %v5054_v11  ;;  %v6225_v54 = vand.u32 4294901760, %v68_v63  ;;  %v6242_v43 = vand.u32 4294901760, %v70_v4  ;;  %v9825_v61 = vand.u32 4294901760, %v6166_v23 }
  0x34   :  { %v530_v21 = vand.u32 4294901760, %v529_v14  ;;  %4660 = vmatmul.mubr.f32.gmra.mrb[6].mxu0 %v5976_v8  ;;  %5057 = vmatpush3.bf16.msra.mxu1 %v5054_v11  ;;  %v6230_v14 = vand.u32 4294901760, %v69_v39  ;;  %v9822_v11 = vand.u32 4294901760, %v6085_v29 }
  0x35   :  { %9820 = vst [vmem:[#allocation41_spill] sm:$0xff] %v6225_v54  ;;  %v537_v30 = vand.u32 4294901760, %v536_v13  ;;  %5129 = vmatpush3.bf16.msra.mxu0 %v5810_v38  ;;  %4662 = vmatprep.mubr.f32.mxu0 %v5988_v40  ;;  %v321_v13 = vand.u32 4294901760, %v6202_v28  ;;  %9823 = vst [vmem:[#allocation43_spill] sm:$0xff] %v6242_v43  ;;  %v9824_v38 = vand.u32 4294901760, %v6093_v58  ;;  %v6249_v37 = vsub.f32 %v6166_v23, %v9825_v61  ;;  %v39_v58 = vld [vmem:[%s9350_s0 + $0xc0] sm:$0xff] }
  0x36   :  { %9821 = vst [vmem:[#allocation42_spill] sm:$0xff] %v6230_v14  ;;  %4503 = vmatmul.mubr.f32.gmra.mrb[8].mxu1 %v9822_v11  ;;  %5131 = vmatprep.subr.bf16.mxu0 %v5852_v55  ;;  %v9826_v11 = vand.u32 4294901760, %v5801_v34  ;;  %v9827_v28 = vand.u32 4294901760, %v5803_v35  ;;  %v6264_v61 = vsub.f32 %v68_v63, %v6225_v54  ;;  %v6276_v29 = vsub.f32 %v69_v39, %v6230_v14 }
  0x37   :  { %v5058_v50 = vpack.c.bf16 %v537_v30, %v530_v21  ;;  %4505 = vmatprep.mubr.f32.mxu1 %v9824_v38  ;;  %v71_v30 = vsel %vm47_vm0, %v38_v7, 0.0  ;;  %v9829_v54 = vand.u32 4294901760, %v6114_v6  ;;  %v6282_v7 = vsub.f32 %v70_v4, %v6242_v43 }
  0x38   :  { %v543_v59 = vsub.f32 %v5801_v34, %v9826_v11  ;;  %v550_v21 = vsub.f32 %v5803_v35, %v9827_v28  ;;  %4663 = vmatmul.mubr.f32.gmra.mrb[8].mxu0 %v6006_v10  ;;  %v9828_v28 = vand.u32 4294901760, %v6190_v0  ;;  %v72_v11 = vsel %vm47_vm0, %v39_v58, 0.0 }
  0x39   :  { %5059 = vmatprep.subr.bf16.mxu1 %v5058_v50  ;;  %5133 = vmatpush3.bf16.msra.mxu0 %v5852_v55  ;;  %v9830_v55 = vand.u32 4294901760, %v5824_v45  ;;  %v9831_v39 = vand.u32 4294901760, %v6143_v44  ;;  %v9833_v6 = vand.u32 4294901760, %v5754_v16  ;;  %v9834_v4 = vand.u32 4294901760, %v6217_v47  ;;  %v40_v44 = vld [vmem:[%s9350_s0 + $0xc8] sm:$0xff] }
  0x3a   :  { %4665 = vmatprep.mubr.f32.mxu0 %v6017_v3  ;;  %v6273_v1 = vsub.f32 %v6190_v0, %v9828_v28  ;;  %v544_v38 = vand.u32 4294901760, %v543_v59  ;;  %v551_v63 = vand.u32 4294901760, %v550_v21  ;;  %4506 = vmatmul.mubr.f32.gmra.mrb[10].mxu1 %v9829_v54  ;;  %v9832_v59 = vand.u32 4294901760, %v5752_v15 }
  0x3b   :  { %5135 = vmatprep.subr.bf16.mxu0 %v5854_v56  ;;  %v557_v28 = vsub.f32 %v5824_v45, %v9830_v55  ;;  %4508 = vmatprep.mubr.f32.mxu1 %v9831_v39  ;;  %v6300_v21 = vsub.f32 %v6217_v47, %v9834_v4  ;;  %v6302_v58 = vand.u32 4294901760, %v71_v30  ;;  %v9836_v15 = vand.u32 4294901760, %v6223_v25  ;;  %v41_v4 = vld [vmem:[%s9350_s0 + $0xd0] sm:$0xff] }
  0x3c   :  { %v6295_v54 = vpack.c.bf16 %v9833_v6, %v9832_v59  ;;  %5061 = vmatpush3.bf16.msra.mxu1 %v5058_v50  ;;  %v5062_v55 = vpack.c.bf16 %v551_v63, %v544_v38  ;;  %4666 = vmatmul.mubr.f32.gmra.mrb[10].mxu0 %v6037_v42  ;;  %v564_v50 = vsub.f32 %v5826_v46, %v9427_v33  ;;  %v341_v38 = vand.u32 4294901760, %v6249_v37 }
  0x3d   :  { %9835 = vst [vmem:[#allocation44_spill] sm:$0xff] %v6302_v58  ;;  %v6311_v16 = vsub.f32 %v6223_v25, %v9836_v15  ;;  %v558_v59 = vand.u32 4294901760, %v557_v28  ;;  %5137 = vmatpush3.bf16.msra.mxu0 %v5854_v56  ;;  %4668 = vmatprep.mubr.f32.mxu0 %v6067_v51  ;;  %v351_v63 = vand.u32 4294901760, %v6273_v1  ;;  %v6321_v6 = vand.u32 4294901760, %v72_v11 }
  0x3e   :  { %v9430_v28 = vand.u32 4294901760, %v5856_v57  ;;  %4509 = vmatmul.mubr.f32.gmra.mrb[12].mxu1 %v311_v36  ;;  %5139 = vmatprep.subr.bf16.mxu0 %v5932_v41  ;;  %v73_v39 = vsel %vm47_vm0, %v40_v44, 0.0  ;;  %v565_v37 = vand.u32 4294901760, %v564_v50  ;;  %v361_v1 = vand.u32 4294901760, %v6300_v21  ;;  %v42_v36 = vld [vmem:[%s9350_s0 + $0xd8] sm:$0xff] }
  0x3f   :  { %9837 = vst [vmem:[#allocation45_spill] sm:$0xff] %v6321_v6  ;;  %4511 = vmatprep.mubr.f32.mxu1 %v321_v13  ;;  %v6333_v56 = vsub.f32 %v71_v30, %v6302_v58  ;;  %5063 = vmatprep.subr.bf16.mxu1 %v5062_v55  ;;  %v9838_v21 = vand.u32 4294901760, %v6264_v61  ;;  %v74_v50 = vsel %vm47_vm0, %v41_v4, 0.0  ;;  %v6355_v33 = vand.u32 4294901760, %v73_v39 }
  0x40   :  { %v571_v15 = vsub.f32 %v5856_v57, %v9430_v28  ;;  %4669 = vmatmul.mubr.f32.gmra.mrb[12].mxu0 %v6106_v26  ;;  %5065 = vmatpush3.bf16.msra.mxu1 %v5062_v55  ;;  %v5066_v44 = vpack.c.bf16 %v565_v37, %v558_v59  ;;  %v6353_v28 = vsub.f32 %v72_v11, %v6321_v6  ;;  %v9839_v13 = vand.u32 4294901760, %v5872_v62  ;;  %v43_v55 = vld [vmem:[%s9350_s0 + $0xe0] sm:$0xff] }
  0x41   :  { %v6347_v30 = vsub.f32 %v6264_v61, %v9838_v21  ;;  %5141 = vmatpush3.bf16.msra.mxu0 %v5932_v41  ;;  %4671 = vmatprep.mubr.f32.mxu0 %v6117_v24  ;;  %v9840_v59 = vand.u32 4294901760, %v6207_v18  ;;  %v9841_v4 = vand.u32 4294901760, %v6276_v29  ;;  %v9441_v21 = vand.u32 4294901760, %v5911_v27 }
  0x42   :  { %v572_v58 = vand.u32 4294901760, %v571_v15  ;;  %v578_v43 = vsub.f32 %v5872_v62, %v9839_v13  ;;  %5143 = vmatprep.subr.bf16.mxu0 %v5984_v9  ;;  %v9842_v15 = vand.u32 4294901760, %v6282_v7  ;;  %v75_v13 = vsel %vm47_vm0, %v42_v36, 0.0  ;;  %5067 = vmatprep.subr.bf16.mxu1 %v5066_v44 }
  0x43   :  { %4512 = vmatmul.mubr.f32.gmra.mrb[14].mxu1 %v9840_v59  ;;  %v6369_v11 = vsub.f32 %v6276_v29, %v9841_v4  ;;  %v9843_v18 = vand.u32 4294901760, %v5756_v17  ;;  %v9844_v59 = vand.u32 4294901760, %v5760_v19  ;;  %v9443_v6 = vand.u32 4294901760, %v6333_v56  ;;  %v44_v17 = vld [vmem:[%s9350_s0 + $0xe8] sm:$0xff] }
  0x44   :  { %v6374_v37 = vsub.f32 %v6282_v7, %v9842_v15  ;;  %4514 = vmatprep.mubr.f32.mxu1 %v341_v38  ;;  %v6383_v4 = vand.u32 4294901760, %v74_v50  ;;  %v579_v14 = vand.u32 4294901760, %v578_v43  ;;  %4672 = vmatmul.mubr.f32.gmra.mrb[14].mxu0 %v6128_v5  ;;  %v381_v15 = vand.u32 4294901760, %v6347_v30 }
  0x45   :  { %v5150_v41 = vpack.c.bf16 %v9844_v59, %v9843_v18  ;;  %5069 = vmatpush3.bf16.msra.mxu1 %v5066_v44  ;;  %v76_v36 = vsel %vm47_vm0, %v43_v55, 0.0  ;;  %v585_v19 = vsub.f32 %v5911_v27, %v9441_v21  ;;  %v9442_v38 = vand.u32 4294901760, %v5916_v31  ;;  %5145 = vmatpush3.bf16.msra.mxu0 %v5984_v9  ;;  %v45_v59 = vld [vmem:[%s9350_s0 + $0xf0] sm:$0xff] }
  0x46   :  { %v9845_v43 = vand.u32 4294901760, %v5845_v52  ;;  %v6400_v44 = vsub.f32 %v73_v39, %v6355_v33  ;;  %v6402_v55 = vand.u32 4294901760, %v75_v13  ;;  %v5070_v18 = vpack.c.bf16 %v579_v14, %v572_v58  ;;  %5147 = vmatprep.subr.bf16.mxu0 %v6295_v54 }
  0x47   :  { %4515 = vmatmul.mubr.f32.gmra.mrb[16].mxu1 %v351_v63  ;;  %v391_v21 = vand.u32 4294901760, %v6369_v11  ;;  %v401_v52 = vand.u32 4294901760, %v6374_v37  ;;  %v592_v39 = vsub.f32 %v5916_v31, %v9442_v38  ;;  %v410_v14 = vsub.f32 %v6333_v56, %v9443_v6 }
  0x48   :  { %4730 = vmatprep.mubr.f32.mxu0 %v9845_v43  ;;  %v586_v43 = vand.u32 4294901760, %v585_v19  ;;  %4517 = vmatprep.mubr.f32.mxu1 %v361_v1  ;;  %v6417_v58 = vsub.f32 %v74_v50, %v6383_v4  ;;  %v6419_v63 = vand.u32 4294901760, %v76_v36  ;;  %v77_v11 = vsel %vm47_vm0, %v44_v17, 0.0  ;;  %v46_v1 = vld [vmem:[%s9350_s0 + $0xf8] sm:$0xff] }
  0x49   :  { %5071 = vmatprep.subr.bf16.mxu1 %v5070_v18  ;;  %v9846_v37 = vand.u32 4294901760, %v5898_v12  ;;  %v593_v19 = vand.u32 4294901760, %v592_v39  ;;  %v78_v38 = vsel %vm47_vm0, %v45_v59, 0.0  ;;  %v9847_v30 = vand.u32 4294901760, %v5919_v32 }
  0x4a   :  { %5073 = vmatpush3.bf16.msra.mxu1 %v5070_v18  ;;  %v9848_v12 = vand.u32 4294901760, %v6353_v28  ;;  %v9849_v59 = vand.u32 4294901760, %v5762_v20  ;;  %v9850_v39 = vand.u32 4294901760, %v5769_v22  ;;  %v6442_v6 = vsub.f32 %v75_v13, %v6402_v55 }
  0x4b   :  { %4731 = vmatmul.mubr.f32.vlgmr.msra.gmra.mrb[0].mxu0 %v9846_v37  ;;  %v9851_v50 = vand.u32 4294901760, %v6311_v16  ;;  %v6446_v32 = vand.u32 4294901760, %v77_v11  ;;  %v9853_v18 = vand.u32 4294901760, %v5942_v49  ;;  %v439_v22 = vand.u32 4294901760, %v6417_v58 }
  0x4c   :  { %5149 = vmatpush3.bf16.msra.mxu0 %v6295_v54  ;;  %4733 = vmatprep.mubr.f32.mxu0 %v9847_v30  ;;  %v420_v17 = vsub.f32 %v6353_v28, %v9848_v12  ;;  %v5154_v37 = vpack.c.bf16 %v9850_v39, %v9849_v59  ;;  %v5074_v54 = vpack.c.bf16 %v593_v19, %v586_v43  ;;  %v9852_v30 = vand.u32 4294901760, %v5939_v48 }
  0x4d   :  { %4518 = vmatmul.mubr.f32.gmra.mrb[18].mxu1 %v9851_v50  ;;  %5151 = vmatprep.subr.bf16.mxu0 %v5150_v41  ;;  %v606_v20 = vsub.f32 %v5942_v49, %v9853_v18  ;;  %v6456_v13 = vsub.f32 %v76_v36, %v6419_v63  ;;  %v6458_v16 = vand.u32 4294901760, %v78_v38  ;;  %v79_v50 = vsel %vm47_vm0, %v46_v1, 0.0 }
  0x4e   :  { %v599_v12 = vsub.f32 %v5939_v48, %v9852_v30  ;;  %4520 = vmatprep.mubr.f32.mxu1 %v381_v15  ;;  %v9854_v43 = vand.u32 4294901760, %v5946_v53  ;;  %5075 = vmatprep.subr.bf16.mxu1 %v5074_v54  ;;  %v9855_v39 = vand.u32 4294901760, %v5953_v60  ;;  %v411_v15 = vand.u32 4294901760, %v410_v14 }
  0x4f   :  { %v607_v59 = vand.u32 4294901760, %v606_v20  ;;  %v9856_v18 = vand.u32 4294901760, %v6400_v44  ;;  %v449_v30 = vand.u32 4294901760, %v6442_v6  ;;  %v6470_v1 = vsub.f32 %v77_v11, %v6446_v32  ;;  %5077 = vmatpush3.bf16.msra.mxu1 %v5074_v54 }
  0x50   :  { %4734 = vmatmul.mubr.f32.gmra.mrb[2].mxu0 %v9854_v43  ;;  %v600_v19 = vand.u32 4294901760, %v599_v12  ;;  %v9857_v53 = vand.u32 4294901760, %v5801_v34  ;;  %v9858_v12 = vand.u32 4294901760, %v5803_v35  ;;  %v6476_v60 = vand.u32 4294901760, %v79_v50  ;;  %v9860_v35 = vld [vmem:[#allocation28_spill] sm:$0xff] }
  0x51   :  { %4736 = vmatprep.mubr.f32.mxu0 %v9855_v39  ;;  %5153 = vmatpush3.bf16.msra.mxu0 %v5150_v41  ;;  %v430_v36 = vsub.f32 %v6400_v44, %v9856_v18  ;;  %v421_v14 = vand.u32 4294901760, %v420_v17  ;;  %v440_v43 = vsub.f32 %v6417_v58, %v439_v22  ;;  %v6483_v11 = vsub.f32 %v78_v38, %v6458_v16 }
  0x52   :  { %4521 = vmatmul.mubr.f32.gmra.mrb[20].mxu1 %v391_v21  ;;  %5155 = vmatprep.subr.bf16.mxu0 %v5154_v37  ;;  %v5158_v20 = vpack.c.bf16 %v9858_v12, %v9857_v53  ;;  %v5078_v41 = vpack.c.bf16 %v607_v59, %v600_v19  ;;  %v459_v21 = vand.u32 4294901760, %v6456_v13  ;;  %v9859_v34 = vand.u32 4294901760, %v5966_v2  ;;  %v9865_v53 = vld [vmem:[#allocation7_spill] sm:$0xff] }
  0x53   :  { %4523 = vmatprep.mubr.f32.mxu1 %v401_v52  ;;  %v9861_v39 = vand.u32 4294901760, %v9860_v35  ;;  %v431_v19 = vand.u32 4294901760, %v430_v36  ;;  %v450_v52 = vsub.f32 %v6442_v6, %v449_v30  ;;  %v469_v17 = vand.u32 4294901760, %v6470_v1 }
  0x54   :  { %4737 = vmatmul.mubr.f32.gmra.mrb[4].mxu0 %v9859_v34  ;;  %5079 = vmatprep.subr.bf16.mxu1 %v5078_v41  ;;  %v6494_v38 = vsub.f32 %v79_v50, %v6476_v60  ;;  %v9862_v2 = vand.u32 4294901760, %v5824_v45  ;;  %v9863_v54 = vand.u32 4294901760, %v5826_v46  ;;  %v441_v18 = vand.u32 4294901760, %v440_v43 }
  0x55   :  { %4739 = vmatprep.mubr.f32.mxu0 %v9861_v39  ;;  %5157 = vmatpush3.bf16.msra.mxu0 %v5154_v37  ;;  %v460_v37 = vsub.f32 %v6456_v13, %v459_v21  ;;  %v9864_v36 = vand.u32 4294901760, %v5976_v8  ;;  %v9866_v50 = vand.u32 4294901760, %v5988_v40  ;;  %v451_v45 = vand.u32 4294901760, %v450_v52 }
  0x56   :  { %4524 = vmatmul.mubr.f32.gmra.mrb[22].mxu1 %v411_v15  ;;  %5159 = vmatprep.subr.bf16.mxu0 %v5158_v20  ;;  %v5162_v59 = vpack.c.bf16 %v9863_v54, %v9862_v2  ;;  %v479_v15 = vand.u32 4294901760, %v6483_v11  ;;  %v470_v46 = vsub.f32 %v6470_v1, %v469_v17  ;;  %v489_v12 = vand.u32 4294901760, %v6494_v38 }
  0x57   :  { %4526 = vmatprep.mubr.f32.mxu1 %v421_v14  ;;  %5081 = vmatpush3.bf16.msra.mxu1 %v5078_v41  ;;  %v9867_v41 = vand.u32 4294901760, %v5856_v57  ;;  %v9868_v8 = vand.u32 4294901760, %v5872_v62  ;;  %v461_v43 = vand.u32 4294901760, %v460_v37  ;;  %v9870_v34 = vand.u32 4294901760, %v6017_v3  ;;  %v9883_v37 = vld [vmem:[#allocation5_spill] sm:$0xff] }
  0x58   :  { %4740 = vmatmul.mubr.f32.gmra.mrb[6].mxu0 %v9864_v36  ;;  %5242 = vmatprep.subr.bf16.mxu1 %v9865_v53  ;;  %v480_v40 = vsub.f32 %v6483_v11, %v479_v15  ;;  %v471_v35 = vand.u32 4294901760, %v470_v46  ;;  %v490_v57 = vsub.f32 %v6494_v38, %v489_v12  ;;  %v9871_v62 = vand.u32 4294901760, %v5911_v27  ;;  %v9886_v36 = vld [vmem:[#allocation8_spill] sm:$0xff] }
  0x59   :  { %4742 = vmatprep.mubr.f32.mxu0 %v9866_v50  ;;  %5161 = vmatpush3.bf16.msra.mxu0 %v5158_v20  ;;  %v5166_v14 = vpack.c.bf16 %v9868_v8, %v9867_v41  ;;  %v9869_v20 = vand.u32 4294901760, %v6006_v10  ;;  %v9872_v39 = vand.u32 4294901760, %v5916_v31  ;;  %v9873_v10 = vand.u32 4294901760, %v6037_v42  ;;  %v9879_v42 = vld [vmem:[#allocation12_spill] sm:$0xff]  ;;  %v9888_v50 = vld [vmem:[#allocation19_spill] sm:$0xff]  ;;  %v9891_v41 = vld [vmem:[#allocation10_spill] sm:$0xff] }
  0x5a   :  { %4527 = vmatmul.mubr.f32.gmra.mrb[24].mxu1 %v431_v19  ;;  %5163 = vmatprep.subr.bf16.mxu0 %v5162_v59  ;;  %v481_v52 = vand.u32 4294901760, %v480_v40  ;;  %v9874_v3 = vand.u32 4294901760, %v6067_v51  ;;  %v491_v2 = vand.u32 4294901760, %v490_v57  ;;  %v9875_v54 = vand.u32 4294901760, %v5939_v48  ;;  %v9893_v8 = vld [vmem:[#allocation22_spill] sm:$0xff]  ;;  %v9896_v40 = vld [vmem:[#allocation13_spill] sm:$0xff] }
  0x5b   :  { %4529 = vmatprep.mubr.f32.mxu1 %v441_v18  ;;  %v5170_v19 = vpack.c.bf16 %v9872_v39, %v9871_v62  ;;  %v9877_v31 = vand.u32 4294901760, %v6106_v26  ;;  %v9878_v18 = vand.u32 4294901760, %v6117_v24  ;;  %v9880_v51 = vand.u32 4294901760, %v6128_v5  ;;  %v9884_v26 = vld [vmem:[#allocation18_spill] sm:$0xff]  ;;  %v9901_v62 = vld [vmem:[#allocation17_spill] sm:$0xff] }
  0x5c   :  { %4743 = vmatmul.mubr.f32.gmra.mrb[8].mxu0 %v9869_v20  ;;  %v9881_v48 = vand.u32 4294901760, %v6166_v23  ;;  %v9885_v24 = vand.u32 4294901760, %v6190_v0  ;;  %v9887_v5 = vand.u32 4294901760, %v6217_v47  ;;  %v9890_v46 = vand.u32 4294901760, %v6223_v25 }
  0x5d   :  { %4745 = vmatprep.mubr.f32.mxu0 %v9870_v34  ;;  %5165 = vmatpush3.bf16.msra.mxu0 %v5162_v59  ;;  %v9876_v59 = vand.u32 4294901760, %v5942_v49  ;;  %v9882_v49 = vld [vmem:[#allocation16_spill] sm:$0xff]  ;;  %v9897_v20 = vand.u32 4294901760, %v6282_v7  ;;  %v9898_v34 = vld [vmem:[#allocation25_spill] sm:$0xff]  ;;  %v9900_v57 = vand.u32 4294901760, %v6333_v56  ;;  %v9902_v39 = vand.u32 4294901760, %v6353_v28 }
  0x5e   :  { %4530 = vmatmul.mubr.f32.gmra.mrb[26].mxu1 %v451_v45  ;;  %5167 = vmatprep.subr.bf16.mxu0 %v5166_v14  ;;  %v9889_v45 = vld [vmem:[#allocation21_spill] sm:$0xff] }
  0x5f   :  { %4532 = vmatprep.mubr.f32.mxu1 %v461_v43  ;;  %v5174_v27 = vpack.c.bf16 %v9876_v59, %v9875_v54  ;;  %v9895_v43 = vand.u32 4294901760, %v6276_v29  ;;  %v9908_v54 = vld [vmem:[#allocation33_spill] sm:$0xff]  ;;  %v9909_v59 = vld [vmem:[#allocation27_spill] sm:$0xff] }
  0x60   :  { %4746 = vmatmul.mubr.f32.gmra.mrb[10].mxu0 %v9873_v10  ;;  %v9905_v10 = vand.u32 4294901760, %v6400_v44 }
  0x61   :  { %4748 = vmatprep.mubr.f32.mxu0 %v9874_v3  ;;  %5169 = vmatpush3.bf16.msra.mxu0 %v5166_v14  ;;  %v9894_v14 = vld [vmem:[#allocation23_spill] sm:$0xff]  ;;  %v9906_v3 = vld [vmem:[#allocation20_spill] sm:$0xff] }
  0x62   :  { %4533 = vmatmul.mubr.f32.gmra.mrb[28].mxu1 %v471_v35  ;;  %5171 = vmatprep.subr.bf16.mxu0 %v5170_v19  ;;  %v9899_v35 = vld [vmem:[#allocation26_spill] sm:$0xff] }
  0x63   :  { %4535 = vmatprep.mubr.f32.mxu1 %v481_v52  ;;  %v9904_v52 = vld [vmem:[#allocation30_spill] sm:$0xff] }
  0x64   :  { %4749 = vmatmul.mubr.f32.gmra.mrb[12].mxu0 %v9877_v31  ;;  %v9911_v31 = vld [vmem:[#allocation35_spill] sm:$0xff] }
  0x65   :  { %4751 = vmatprep.mubr.f32.mxu0 %v9878_v18  ;;  %5173 = vmatpush3.bf16.msra.mxu0 %v5170_v19  ;;  %v9903_v19 = vld [vmem:[#allocation29_spill] sm:$0xff] }
  0x66   :  { %4536 = vmatmul.mubr.f32.gmra.mrb[30].mxu1 %v491_v2  ;;  %5175 = vmatprep.subr.bf16.mxu0 %v5174_v27  ;;  %v9907_v2 = vld [vmem:[#allocation31_spill] sm:$0xff]  ;;  %v9914_v18 = vld [vmem:[#allocation37_spill] sm:$0xff] }
  0x67   :  { %4570 = vmatprep.mubr.f32.mxu1 %v9879_v42 }
  0x68   :  { %4752 = vmatmul.mubr.f32.gmra.mrb[14].mxu0 %v9880_v51  ;;  %v9916_v51 = vld [vmem:[#allocation39_spill] sm:$0xff] }
  0x69   :  { %4754 = vmatprep.mubr.f32.mxu0 %v9881_v48  ;;  %5177 = vmatpush3.bf16.msra.mxu0 %v5174_v27  ;;  %v9910_v27 = vld [vmem:[#allocation34_spill] sm:$0xff]  ;;  %v9919_v48 = vld [vmem:[#allocation41_spill] sm:$0xff] }
  0x6a   :  { %4571 = vmatmul.mubr.f32.vlgmr.msra.gmra.mrb[0].mxu1 %v9882_v49  ;;  %5179 = vmatprep.subr.bf16.mxu0 %v9883_v37 }
  0x6b   :  { %4573 = vmatprep.mubr.f32.mxu1 %v9884_v26  ;;  %5250 = vmatpush3.bf16.msra.mxu1 %v9865_v53  ;;  %v9892_v53 = vand.u32 4294901760, %v6264_v61 }
  0x6c   :  { %4755 = vmatmul.mubr.f32.gmra.mrb[16].mxu0 %v9885_v24  ;;  %5243 = vmatprep.subr.bf16.mxu1 %v9886_v36  ;;  %v9921_v24 = vld [vmem:[#allocation9_spill] sm:$0xff] }
  0x6d   :  { %4757 = vmatprep.mubr.f32.mxu0 %v9887_v5  ;;  %v9924_v5 = vld [vmem:[#allocation11_spill] sm:$0xff] }
  0x6e   :  { %4574 = vmatmul.mubr.f32.gmra.mrb[2].mxu1 %v9888_v50 }
  0x6f   :  { %4576 = vmatprep.mubr.f32.mxu1 %v9889_v45  ;;  %5251 = vmatpush3.bf16.msra.mxu1 %v9886_v36  ;;  %v9922_v36 = vld [vmem:[#allocation43_spill] sm:$0xff] }
  0x70   :  { %4758 = vmatmul.mubr.f32.gmra.mrb[18].mxu0 %v9890_v46  ;;  %5244 = vmatprep.subr.bf16.mxu1 %v9891_v41  ;;  %v9925_v46 = vld [vmem:[#allocation45_spill] sm:$0xff] }
  0x71   :  { %4760 = vmatprep.mubr.f32.mxu0 %v9892_v53  ;;  %v9927_v53 = vld [vmem:[#allocation15_spill] sm:$0xff] }
  0x72   :  { %4577 = vmatmul.mubr.f32.gmra.mrb[4].mxu1 %v9893_v8 }
  0x73   :  { %4579 = vmatprep.mubr.f32.mxu1 %v9894_v14  ;;  %5252 = vmatpush3.bf16.msra.mxu1 %v9891_v41  ;;  %v9926_v41 = vld [vmem:[#allocation14_spill] sm:$0xff] }
  0x74   :  { %4761 = vmatmul.mubr.f32.gmra.mrb[20].mxu0 %v9895_v43  ;;  %5245 = vmatprep.subr.bf16.mxu1 %v9896_v40  ;;  %v9928_v43 = vld [vmem:[#allocation24_spill] sm:$0xff] }
  0x75   :  { %4763 = vmatprep.mubr.f32.mxu0 %v9897_v20 }
  0x76   :  { %4580 = vmatmul.mubr.f32.gmra.mrb[6].mxu1 %v9898_v34 }
  0x77   :  { %4582 = vmatprep.mubr.f32.mxu1 %v9899_v35  ;;  %5253 = vmatpush3.bf16.msra.mxu1 %v9896_v40 }
  0x78   :  { %4764 = vmatmul.mubr.f32.gmra.mrb[22].mxu0 %v9900_v57  ;;  %5246 = vmatprep.subr.bf16.mxu1 %v9901_v62 }
  0x79   :  { %4766 = vmatprep.mubr.f32.mxu0 %v9902_v39 }
  0x7a   :  { %4583 = vmatmul.mubr.f32.gmra.mrb[8].mxu1 %v9903_v19 }
  0x7b   :  { %4585 = vmatprep.mubr.f32.mxu1 %v9904_v52  ;;  %5254 = vmatpush3.bf16.msra.mxu1 %v9901_v62 }
  0x7c   :  { %4767 = vmatmul.mubr.f32.gmra.mrb[24].mxu0 %v9905_v10  ;;  %5247 = vmatprep.subr.bf16.mxu1 %v9906_v3 }
  0x7d   :  { %4769 = vmatprep.mubr.f32.mxu0 %v439_v22  ;;  %v9912_v22 = vld [vmem:[#allocation32_spill] sm:$0xff] }
  0x7e   :  { %4586 = vmatmul.mubr.f32.gmra.mrb[10].mxu1 %v9907_v2 }
  0x7f   :  { %4588 = vmatprep.mubr.f32.mxu1 %v9908_v54  ;;  %5255 = vmatpush3.bf16.msra.mxu1 %v9906_v3 }
  0x80   :  { %4770 = vmatmul.mubr.f32.gmra.mrb[26].mxu0 %v449_v30  ;;  %5248 = vmatprep.subr.bf16.mxu1 %v9909_v59  ;;  %v9913_v30 = vld [vmem:[#allocation36_spill] sm:$0xff] }
  0x81   :  { %4772 = vmatprep.mubr.f32.mxu0 %v459_v21  ;;  %v9915_v21 = vld [vmem:[#allocation38_spill] sm:$0xff] }
  0x82   :  { %4589 = vmatmul.mubr.f32.gmra.mrb[12].mxu1 %v9910_v27 }
  0x83   :  { %4591 = vmatprep.mubr.f32.mxu1 %v9911_v31  ;;  %5256 = vmatpush3.bf16.msra.mxu1 %v9909_v59 }
  0x84   :  { %4773 = vmatmul.mubr.f32.gmra.mrb[28].mxu0 %v469_v17  ;;  %5249 = vmatprep.subr.bf16.mxu1 %v9912_v22  ;;  %v9917_v17 = vld [vmem:[#allocation40_spill] sm:$0xff] }
  0x85   :  { %4775 = vmatprep.mubr.f32.mxu0 %v479_v15  ;;  %v9918_v15 = vld [vmem:[#allocation6_spill] sm:$0xff] }
  0x86   :  { %4592 = vmatmul.mubr.f32.gmra.mrb[14].mxu1 %v9913_v30 }
  0x87   :  { %4594 = vmatprep.mubr.f32.mxu1 %v9914_v18  ;;  %5257 = vmatpush3.bf16.msra.mxu1 %v9912_v22 }
  0x88   :  { %4776 = vmatmul.mubr.f32.gmra.mrb[30].mxu0 %v489_v12  ;;  %v9920_v12 = vld [vmem:[#allocation42_spill] sm:$0xff] }
  0x89   :  { %4810 = vmatprep.mubr.f32.mxu0 %v9879_v42 }
  0x8a   :  { %4595 = vmatmul.mubr.f32.gmra.mrb[16].mxu1 %v9915_v21 }
  0x8b   :  { %4597 = vmatprep.mubr.f32.mxu1 %v9916_v51 }
  0x8c   :  { %4811 = vmatmul.mubr.f32.vlgmr.msra.gmra.mrb[0].mxu0 %v9882_v49 }
  0x8d   :  { %5181 = vmatpush3.bf16.msra.mxu0 %v9883_v37  ;;  %4813 = vmatprep.mubr.f32.mxu0 %v9884_v26  ;;  %v9923_v37 = vld [vmem:[#allocation44_spill] sm:$0xff] }
  0x8e   :  { %4598 = vmatmul.mubr.f32.gmra.mrb[18].mxu1 %v9917_v17  ;;  %5183 = vmatprep.subr.bf16.mxu0 %v9918_v15 }
  0x8f   :  { %4600 = vmatprep.mubr.f32.mxu1 %v9919_v48 }
  0x90   :  { %4814 = vmatmul.mubr.f32.gmra.mrb[2].mxu0 %v9888_v50 }
  0x91   :  { %4816 = vmatprep.mubr.f32.mxu0 %v9889_v45  ;;  %5185 = vmatpush3.bf16.msra.mxu0 %v9918_v15 }
  0x92   :  { %4601 = vmatmul.mubr.f32.gmra.mrb[20].mxu1 %v9920_v12  ;;  %5187 = vmatprep.subr.bf16.mxu0 %v9921_v24 }
  0x93   :  { %4603 = vmatprep.mubr.f32.mxu1 %v9922_v36 }
  0x94   :  { %4817 = vmatmul.mubr.f32.gmra.mrb[4].mxu0 %v9893_v8 }
  0x95   :  { %4819 = vmatprep.mubr.f32.mxu0 %v9894_v14  ;;  %5189 = vmatpush3.bf16.msra.mxu0 %v9921_v24 }
  0x96   :  { %4604 = vmatmul.mubr.f32.gmra.mrb[22].mxu1 %v9923_v37  ;;  %5191 = vmatprep.subr.bf16.mxu0 %v9924_v5 }
  0x97   :  { %4606 = vmatprep.mubr.f32.mxu1 %v9925_v46 }
  0x98   :  { %4820 = vmatmul.mubr.f32.gmra.mrb[6].mxu0 %v9898_v34 }
  0x99   :  { %4822 = vmatprep.mubr.f32.mxu0 %v9899_v35  ;;  %5193 = vmatpush3.bf16.msra.mxu0 %v9924_v5 }
  0x9a   :  { %4607 = vmatmul.mubr.f32.gmra.mrb[24].mxu1 %v6355_v33  ;;  %5195 = vmatprep.subr.bf16.mxu0 %v9926_v41 }
  0x9b   :  { %4609 = vmatprep.mubr.f32.mxu1 %v6383_v4 }
  0x9c   :  { %4823 = vmatmul.mubr.f32.gmra.mrb[8].mxu0 %v9903_v19 }
  0x9d   :  { %4825 = vmatprep.mubr.f32.mxu0 %v9904_v52  ;;  %5197 = vmatpush3.bf16.msra.mxu0 %v9926_v41 }
  0x9e   :  { %4610 = vmatmul.mubr.f32.gmra.mrb[26].mxu1 %v6402_v55  ;;  %5199 = vmatprep.subr.bf16.mxu0 %v9927_v53 }
  0x9f   :  { %4612 = vmatprep.mubr.f32.mxu1 %v6419_v63 }
  0xa0   :  { %4826 = vmatmul.mubr.f32.gmra.mrb[10].mxu0 %v9907_v2 }
  0xa1   :  { %4828 = vmatprep.mubr.f32.mxu0 %v9908_v54  ;;  %5201 = vmatpush3.bf16.msra.mxu0 %v9927_v53 }
  0xa2   :  { %4613 = vmatmul.mubr.f32.gmra.mrb[28].mxu1 %v6446_v32  ;;  %5203 = vmatprep.subr.bf16.mxu0 %v9928_v43 }
  0xa3   :  { %4615 = vmatprep.mubr.f32.mxu1 %v6458_v16 }
  0xa4   :  { %4829 = vmatmul.mubr.f32.gmra.mrb[12].mxu0 %v9910_v27 }
  0xa5   :  { %4831 = vmatprep.mubr.f32.mxu0 %v9911_v31  ;;  %5205 = vmatpush3.bf16.msra.mxu0 %v9928_v43 }
  0xa6   :  { %4616 = vmatmul.mubr.f32.gmra.mrb[30].mxu1 %v6476_v60  ;;  %5207 = vmatprep.subr.bf16.mxu0 %v5984_v9 }
  0xa7   :  { %4674 = vmatprep.mubr.f32.mxu1 %v6166_v23 }
  0xa8   :  { %4832 = vmatmul.mubr.f32.gmra.mrb[14].mxu0 %v9913_v30 }
  0xa9   :  { %4834 = vmatprep.mubr.f32.mxu0 %v9914_v18  ;;  %5209 = vmatpush3.bf16.msra.mxu0 %v5984_v9 }
  0xaa   :  { %4675 = vmatmul.mubr.f32.vlgmr.msra.gmra.mrb[16].mxu1 %v6190_v0 }
  0xab   :  { %4677 = vmatprep.mubr.f32.mxu1 %v6217_v47 }
  0xac   :  { %4835 = vmatmul.mubr.f32.gmra.mrb[16].mxu0 %v9915_v21 }
  0xad   :  { %4837 = vmatprep.mubr.f32.mxu0 %v9916_v51 }
  0xae   :  { %4678 = vmatmul.mubr.f32.gmra.mrb[18].mxu1 %v6223_v25 }
  0xaf   :  { %4680 = vmatprep.mubr.f32.mxu1 %v6264_v61 }
  0xb0   :  { %4838 = vmatmul.mubr.f32.gmra.mrb[18].mxu0 %v9917_v17 }
  0xb1   :  { %4840 = vmatprep.mubr.f32.mxu0 %v9919_v48 }
  0xb2   :  { %4681 = vmatmul.mubr.f32.gmra.mrb[20].mxu1 %v6276_v29 }
  0xb3   :  { %4683 = vmatprep.mubr.f32.mxu1 %v6282_v7 }
  0xb4   :  { %4841 = vmatmul.mubr.f32.gmra.mrb[20].mxu0 %v9920_v12 }
  0xb5   :  { %4843 = vmatprep.mubr.f32.mxu0 %v9922_v36 }
  0xb6   :  { %4684 = vmatmul.mubr.f32.gmra.mrb[22].mxu1 %v6333_v56 }
  0xb7   :  { %4686 = vmatprep.mubr.f32.mxu1 %v6353_v28 }
  0xb8   :  { %4844 = vmatmul.mubr.f32.gmra.mrb[22].mxu0 %v9923_v37 }
  0xb9   :  { %4846 = vmatprep.mubr.f32.mxu0 %v9925_v46 }
  0xba   :  { %4687 = vmatmul.mubr.f32.gmra.mrb[24].mxu1 %v6400_v44 }
  0xbb   :  { %4689 = vmatprep.mubr.f32.mxu1 %v6417_v58 }
  0xbc   :  { %4847 = vmatmul.mubr.f32.gmra.mrb[24].mxu0 %v6355_v33 }
  0xbd   :  { %4849 = vmatprep.mubr.f32.mxu0 %v6383_v4 }
  0xbe   :  { %4690 = vmatmul.mubr.f32.gmra.mrb[26].mxu1 %v6442_v6 }
  0xbf   :  { %4692 = vmatprep.mubr.f32.mxu1 %v6456_v13 }
  0xc0   :  { %4850 = vmatmul.mubr.f32.gmra.mrb[26].mxu0 %v6402_v55 }
  0xc1   :  { %4852 = vmatprep.mubr.f32.mxu0 %v6419_v63 }
  0xc2   :  { %4693 = vmatmul.mubr.f32.gmra.mrb[28].mxu1 %v6470_v1 }
  0xc3   :  { %4695 = vmatprep.mubr.f32.mxu1 %v6483_v11 }
  0xc4   :  { %4853 = vmatmul.mubr.f32.gmra.mrb[28].mxu0 %v6446_v32 }
  0xc5   :  { %4855 = vmatprep.mubr.f32.mxu0 %v6458_v16 }
  0xc6   :  { %4696 = vmatmul.mubr.f32.gmra.mrb[30].mxu1 %v6494_v38 }
  0xc8   :  { %4856 = vmatmul.mubr.f32.gmra.mrb[30].mxu0 %v6476_v60 }
  0xc9   :  { %4890 = vmatprep.mubr.f32.mxu0 %v9879_v42 }
  0xcc   :  { %4891 = vmatmul.mubr.f32.vlgmr.msra.gmra.mrb[0].mxu0 %v9882_v49 }
  0xcd   :  { %4893 = vmatprep.mubr.f32.mxu0 %v9884_v26 }
  0xd0   :  { %4894 = vmatmul.mubr.f32.gmra.mrb[2].mxu0 %v9888_v50 }
  0xd1   :  { %4896 = vmatprep.mubr.f32.mxu0 %v9889_v45 }
  0xd4   :  { %4897 = vmatmul.mubr.f32.gmra.mrb[4].mxu0 %v9893_v8 }
  0xd5   :  { %4899 = vmatprep.mubr.f32.mxu0 %v9894_v14  ;;  %v2070_v14 = vlaneseq }
  0xd8   :  { %4900 = vmatmul.mubr.f32.gmra.mrb[6].mxu0 %v9898_v34  ;;  %v6762_v34 = vand.u32 127, %v2070_v14 }
  0xd9   :  { %4902 = vmatprep.mubr.f32.mxu0 %v9899_v35 }
  0xda   :  { %vm2072_vm1 = vcmp.eq.s32.totalorder %v6762_v34, 0 }
  0xdc   :  { %4903 = vmatmul.mubr.f32.gmra.mrb[8].mxu0 %v9903_v19 }
  0xdd   :  { %4905 = vmatprep.mubr.f32.mxu0 %v9904_v52 }
  0xe0   :  { %4906 = vmatmul.mubr.f32.gmra.mrb[10].mxu0 %v9907_v2 }
  0xe1   :  { %4908 = vmatprep.mubr.f32.mxu0 %v9908_v54 }
  0xe4   :  { %4909 = vmatmul.mubr.f32.gmra.mrb[12].mxu0 %v9910_v27 }
  0xe5   :  { %4911 = vmatprep.mubr.f32.mxu0 %v9911_v31 }
  0xe8   :  { %4912 = vmatmul.mubr.f32.gmra.mrb[14].mxu0 %v9913_v30 }
  0xe9   :  { %4914 = vmatprep.mubr.f32.mxu0 %v9914_v18 }
  0xec   :  { %4915 = vmatmul.mubr.f32.gmra.mrb[16].mxu0 %v9915_v21 }
  0xed   :  { %4917 = vmatprep.mubr.f32.mxu0 %v9916_v51 }
  0xf0   :  { %4918 = vmatmul.mubr.f32.gmra.mrb[18].mxu0 %v9917_v17 }
  0xf1   :  { %4920 = vmatprep.mubr.f32.mxu0 %v9919_v48 }
  0xf4   :  { %4921 = vmatmul.mubr.f32.gmra.mrb[20].mxu0 %v9920_v12 }
  0xf5   :  { %4923 = vmatprep.mubr.f32.mxu0 %v9922_v36 }
  0xf8   :  { %4924 = vmatmul.mubr.f32.gmra.mrb[22].mxu0 %v9923_v37 }
  0xf9   :  { %4926 = vmatprep.mubr.f32.mxu0 %v9925_v46 }
  0xfc   :  { %4927 = vmatmul.mubr.f32.gmra.mrb[24].mxu0 %v6355_v33 }
  0xfd   :  { %4929 = vmatprep.mubr.f32.mxu0 %v6383_v4 }
 0x100   :  { %4930 = vmatmul.mubr.f32.gmra.mrb[26].mxu0 %v6402_v55 }
 0x101   :  { %4932 = vmatprep.mubr.f32.mxu0 %v6419_v63 }
 0x104   :  { %4933 = vmatmul.mubr.f32.gmra.mrb[28].mxu0 %v6446_v32 }
 0x105   :  { %4935 = vmatprep.mubr.f32.mxu0 %v6458_v16 }
 0x108   :  { %4936 = vmatmul.mubr.f32.gmra.mrb[30].mxu0 %v6476_v60 }
 0x13d   :  { %v4572_v56 = vpop.f32.mrb[0].mxu1 }
 0x13e   :  { %v644_v9 = vpop.f32.mrb[1].mxu1 }
 0x141   :  { %v4575_v47 = vpop.f32.mrb[2].mxu1 }
 0x142   :  { %v656_v23 = vpop.f32.mrb[3].mxu1 }
 0x145   :  { %v4578_v0 = vpop.f32.mrb[4].mxu1 }
 0x146   :  { %v668_v25 = vpop.f32.mrb[5].mxu1 }
 0x149   :  { %v4581_v29 = vpop.f32.mrb[6].mxu1 }
 0x14a   :  { %v680_v33 = vpop.f32.mrb[7].mxu1 }
 0x14d   :  { %v4584_v61 = vpop.f32.mrb[8].mxu1 }
 0x14e   :  { %v692_v7 = vpop.f32.mrb[9].mxu1 }
 0x151   :  { %v4587_v6 = vpop.f32.mrb[10].mxu1 }
 0x152   :  { %v6720_v28 = vpop.f32.mrb[11].mxu1 }
 0x155   :  { %v6722_v4 = vpop.f32.mrb[12].mxu1 }
 0x156   :  { %v6724_v44 = vpop.f32.mrb[13].mxu1 }
 0x159   :  { %v6726_v55 = vpop.f32.mrb[14].mxu1 }
 0x15a   :  { %v6728_v58 = vpop.f32.mrb[15].mxu1 }
 0x17d   :  { %v6730_v63 = vpop.f32.mrb[16].mxu1 }
 0x17e   :  { %v6732_v32 = vpop.f32.mrb[17].mxu1 }
 0x181   :  { %v6734_v13 = vpop.f32.mrb[18].mxu1 }
 0x182   :  { %v6736_v16 = vpop.f32.mrb[19].mxu1 }
 0x185   :  { %v6738_v1 = vpop.f32.mrb[20].mxu1 }
 0x186   :  { %v6740_v60 = vpop.f32.mrb[21].mxu1 }
 0x189   :  { %v6742_v11 = vpop.f32.mrb[22].mxu1 }
 0x18a   :  { %v6744_v38 = vpop.f32.mrb[23].mxu1 }
 0x18d   :  { %v6746_v42 = vpop.f32.mrb[24].mxu1 }
 0x18e   :  { %v6748_v49 = vpop.f32.mrb[25].mxu1 }
 0x191   :  { %v6750_v26 = vpop.f32.mrb[26].mxu1 }
 0x192   :  { %v6752_v50 = vpop.f32.mrb[27].mxu1 }
 0x195   :  { %v6754_v45 = vpop.f32.mrb[28].mxu1 }
 0x196   :  { %v6756_v8 = vpop.f32.mrb[29].mxu1 }
 0x199   :  { %v6758_v40 = vpop.f32.mrb[30].mxu1 }
 0x19a   :  { %v6760_v20 = vpop.f32.mrb[31].mxu1 }
 0x19f   :  { %v4892_v35 = vpop.f32.mrb[0].mxu0 }
 0x1a0   :  { %v6764_v57 = vadd.f32 %v4892_v35, %v4572_v56  ;;  %v1880_v62 = vpop.f32.mrb[1].mxu0 }
 0x1a1   :  { %v6767_v39 = vadd.f32 %v1880_v62, %v644_v9 }
 0x1a2   :  { %9929 = vst [vmem:[#allocation28_spill] sm:$0xff] %v6764_v57  ;;  %v2074_v59 = vsel %vm2072_vm1, %v6764_v57, 0.0 }
 0x1a3   :  { %9930 = vst [vmem:[#allocation7_spill] sm:$0xff] %v6767_v39  ;;  %v4895_v19 = vpop.f32.mrb[2].mxu0  ;;  %v2073_v52 = vsel %vm2072_vm1, %v6767_v39, 0.0 }
 0x1a4   :  { %v6772_v10 = vadd.f32 %v4895_v19, %v4575_v47  ;;  %v1892_v3 = vpop.f32.mrb[3].mxu0  ;;  %2105 = vadd.xlane.f32.xlu0 %v2073_v52 }
 0x1a5   :  { %v6774_v2 = vadd.f32 %v1892_v3, %v656_v23 }
 0x1a6   :  { %9931 = vst [vmem:[#allocation12_spill] sm:$0xff] %v6772_v10  ;;  %v2076_v21 = vsel %vm2072_vm1, %v6772_v10, 0.0 }
 0x1a7   :  { %9932 = vst [vmem:[#allocation16_spill] sm:$0xff] %v6774_v2  ;;  %v4898_v54 = vpop.f32.mrb[4].mxu0  ;;  %v2075_v27 = vsel %vm2072_vm1, %v6774_v2, 0.0 }
 0x1a8   :  { %v6782_v31 = vadd.f32 %v4898_v54, %v4578_v0  ;;  %v1904_v22 = vpop.f32.mrb[5].mxu0  ;;  %2107 = vadd.xlane.f32.xlu0 %v2074_v59  ;;  %2109 = vadd.xlane.f32.xlu1 %v2075_v27 }
 0x1a9   :  { %v6784_v30 = vadd.f32 %v1904_v22, %v668_v25 }
 0x1aa   :  { %9933 = vst [vmem:[#allocation5_spill] sm:$0xff] %v6782_v31  ;;  %v2078_v24 = vsel %vm2072_vm1, %v6782_v31, 0.0 }
 0x1ab   :  { %9934 = vst [vmem:[#allocation18_spill] sm:$0xff] %v6784_v30  ;;  %v4901_v18 = vpop.f32.mrb[6].mxu0  ;;  %v2077_v51 = vsel %vm2072_vm1, %v6784_v30, 0.0 }
 0x1ac   :  { %v6792_v17 = vadd.f32 %v4901_v18, %v4581_v29  ;;  %v1916_v15 = vpop.f32.mrb[7].mxu0  ;;  %2111 = vadd.xlane.f32.xlu1 %v2076_v21  ;;  %2113 = vadd.xlane.f32.xlu0 %v2077_v51 }
 0x1ad   :  { %v6794_v48 = vadd.f32 %v1916_v15, %v680_v33 }
 0x1ae   :  { %9935 = vst [vmem:[#allocation8_spill] sm:$0xff] %v6792_v17  ;;  %v2080_v53 = vsel %vm2072_vm1, %v6792_v17, 0.0 }
 0x1af   :  { %9936 = vst [vmem:[#allocation19_spill] sm:$0xff] %v6794_v48  ;;  %v4904_v12 = vpop.f32.mrb[8].mxu0  ;;  %v2079_v36 = vsel %vm2072_vm1, %v6794_v48, 0.0 }
 0x1b0   :  { %v6802_v37 = vadd.f32 %v4904_v12, %v4584_v61  ;;  %v1928_v5 = vpop.f32.mrb[9].mxu0  ;;  %2115 = vadd.xlane.f32.xlu1 %v2078_v24  ;;  %2117 = vadd.xlane.f32.xlu0 %v2079_v36 }
 0x1b1   :  { %v6804_v46 = vadd.f32 %v1928_v5, %v692_v7 }
 0x1b2   :  { %9937 = vst [vmem:[#allocation21_spill] sm:$0xff] %v6802_v37  ;;  %v2082_v0 = vsel %vm2072_vm1, %v6802_v37, 0.0 }
 0x1b3   :  { %9938 = vst [vmem:[#allocation10_spill] sm:$0xff] %v6804_v46  ;;  %v4907_v41 = vpop.f32.mrb[10].mxu0  ;;  %v2081_v43 = vsel %vm2072_vm1, %v6804_v46, 0.0 }
 0x1b4   :  { %v6812_v56 = vadd.f32 %v4907_v41, %v4587_v6  ;;  %v1940_v9 = vpop.f32.mrb[11].mxu0  ;;  %2119 = vadd.xlane.f32.xlu1 %v2080_v53  ;;  %2121 = vadd.xlane.f32.xlu0 %v2081_v43 }
 0x1b5   :  { %v6815_v47 = vadd.f32 %v1940_v9, %v6720_v28 }
 0x1b6   :  { %9939 = vst [vmem:[#allocation22_spill] sm:$0xff] %v6812_v56  ;;  %v2084_v6 = vsel %vm2072_vm1, %v6812_v56, 0.0 }
 0x1b7   :  { %9940 = vst [vmem:[#allocation23_spill] sm:$0xff] %v6815_v47  ;;  %v4910_v23 = vpop.f32.mrb[12].mxu0  ;;  %v2083_v25 = vsel %vm2072_vm1, %v6815_v47, 0.0 }
 0x1b8   :  { %v6824_v29 = vadd.f32 %v4910_v23, %v6722_v4  ;;  %v1952_v33 = vpop.f32.mrb[13].mxu0  ;;  %2123 = vadd.xlane.f32.xlu1 %v2082_v0  ;;  %2125 = vadd.xlane.f32.xlu0 %v2083_v25 }
 0x1b9   :  { %v6827_v61 = vadd.f32 %v1952_v33, %v6724_v44 }
 0x1ba   :  { %9941 = vst [vmem:[#allocation13_spill] sm:$0xff] %v6824_v29  ;;  %v2086_v62 = vsel %vm2072_vm1, %v6824_v29, 0.0 }
 0x1bb   :  { %9942 = vst [vmem:[#allocation25_spill] sm:$0xff] %v6827_v61  ;;  %v4913_v7 = vpop.f32.mrb[14].mxu0  ;;  %v2085_v28 = vsel %vm2072_vm1, %v6827_v61, 0.0 }
 0x1bc   :  { %v6836_v14 = vadd.f32 %v4913_v7, %v6726_v55  ;;  %v1964_v4 = vpop.f32.mrb[15].mxu0  ;;  %2127 = vadd.xlane.f32.xlu1 %v2084_v6  ;;  %2129 = vadd.xlane.f32.xlu0 %v2085_v28 }
 0x1bd   :  { %v6839_v35 = vadd.f32 %v1964_v4, %v6728_v58 }
 0x1be   :  { %9943 = vst [vmem:[#allocation26_spill] sm:$0xff] %v6836_v14  ;;  %v2088_v54 = vsel %vm2072_vm1, %v6836_v14, 0.0 }
 0x1bf   :  { %9944 = vst [vmem:[#allocation17_spill] sm:$0xff] %v6839_v35  ;;  %v4916_v44 = vpop.f32.mrb[16].mxu0  ;;  %v2087_v19 = vsel %vm2072_vm1, %v6839_v35, 0.0 }
 0x1c0   :  { %v6848_v52 = vadd.f32 %v4916_v44, %v6730_v63  ;;  %v1976_v55 = vpop.f32.mrb[17].mxu0  ;;  %2131 = vadd.xlane.f32.xlu1 %v2086_v62  ;;  %2133 = vadd.xlane.f32.xlu0 %v2087_v19 }
 0x1c1   :  { %v6851_v3 = vadd.f32 %v1976_v55, %v6732_v32 }
 0x1c2   :  { %9945 = vst [vmem:[#allocation29_spill] sm:$0xff] %v6848_v52  ;;  %v2090_v18 = vsel %vm2072_vm1, %v6848_v52, 0.0 }
 0x1c3   :  { %9946 = vst [vmem:[#allocation30_spill] sm:$0xff] %v6851_v3  ;;  %v4919_v58 = vpop.f32.mrb[18].mxu0  ;;  %v2089_v59 = vsel %vm2072_vm1, %v6851_v3, 0.0 }
 0x1c4   :  { %v6860_v27 = vadd.f32 %v4919_v58, %v6734_v13  ;;  %v1988_v63 = vpop.f32.mrb[19].mxu0  ;;  %2135 = vadd.xlane.f32.xlu1 %v2088_v54  ;;  %2137 = vadd.xlane.f32.xlu0 %v2089_v59 }
 0x1c5   :  { %v6863_v22 = vadd.f32 %v1988_v63, %v6736_v16 }
 0x1c6   :  { %9947 = vst [vmem:[#allocation20_spill] sm:$0xff] %v6860_v27  ;;  %v2092_v12 = vsel %vm2072_vm1, %v6860_v27, 0.0 }
 0x1c7   :  { %9948 = vst [vmem:[#allocation31_spill] sm:$0xff] %v6863_v22  ;;  %v4922_v32 = vpop.f32.mrb[20].mxu0  ;;  %v2091_v21 = vsel %vm2072_vm1, %v6863_v22, 0.0 }
 0x1c8   :  { %v6872_v51 = vadd.f32 %v4922_v32, %v6738_v1  ;;  %v2000_v13 = vpop.f32.mrb[21].mxu0  ;;  %2139 = vadd.xlane.f32.xlu1 %v2090_v18  ;;  %2141 = vadd.xlane.f32.xlu0 %v2091_v21 }
 0x1c9   :  { %v6875_v15 = vadd.f32 %v2000_v13, %v6740_v60 }
 0x1ca   :  { %9949 = vst [vmem:[#allocation33_spill] sm:$0xff] %v6872_v51  ;;  %v2094_v41 = vsel %vm2072_vm1, %v6872_v51, 0.0 }
 0x1cb   :  { %9950 = vst [vmem:[#allocation27_spill] sm:$0xff] %v6875_v15  ;;  %v4925_v16 = vpop.f32.mrb[22].mxu0  ;;  %v2093_v24 = vsel %vm2072_vm1, %v6875_v15, 0.0 }
 0x1cc   :  { %v6884_v36 = vadd.f32 %v4925_v16, %v6742_v11  ;;  %v2012_v1 = vpop.f32.mrb[23].mxu0  ;;  %2143 = vadd.xlane.f32.xlu1 %v2092_v12  ;;  %2145 = vadd.xlane.f32.xlu0 %v2093_v24 }
 0x1cd   :  { %v6887_v5 = vadd.f32 %v2012_v1, %v6744_v38 }
 0x1ce   :  { %9951 = vst [vmem:[#allocation34_spill] sm:$0xff] %v6884_v36  ;;  %v2096_v23 = vsel %vm2072_vm1, %v6884_v36, 0.0 }
 0x1cf   :  { %9952 = vst [vmem:[#allocation35_spill] sm:$0xff] %v6887_v5  ;;  %v4928_v60 = vpop.f32.mrb[24].mxu0  ;;  %v2095_v53 = vsel %vm2072_vm1, %v6887_v5, 0.0 }
 0x1d0   :  { %v6896_v43 = vadd.f32 %v4928_v60, %v6746_v42  ;;  %v2024_v11 = vpop.f32.mrb[25].mxu0  ;;  %2147 = vadd.xlane.f32.xlu1 %v2094_v41  ;;  %2149 = vadd.xlane.f32.xlu0 %v2095_v53 }
 0x1d1   :  { %v6899_v9 = vadd.f32 %v2024_v11, %v6748_v49 }
 0x1d2   :  { %9953 = vst [vmem:[#allocation32_spill] sm:$0xff] %v6896_v43  ;;  %v2098_v7 = vsel %vm2072_vm1, %v6896_v43, 0.0 }
 0x1d3   :  { %9954 = vst [vmem:[#allocation36_spill] sm:$0xff] %v6899_v9  ;;  %v4931_v38 = vpop.f32.mrb[26].mxu0  ;;  %v2097_v0 = vsel %vm2072_vm1, %v6899_v9, 0.0 }
 0x1d4   :  { %v6908_v25 = vadd.f32 %v4931_v38, %v6750_v26  ;;  %v2036_v42 = vpop.f32.mrb[27].mxu0  ;;  %2151 = vadd.xlane.f32.xlu1 %v2096_v23  ;;  %2153 = vadd.xlane.f32.xlu0 %v2097_v0 }
 0x1d5   :  { %v6911_v33 = vadd.f32 %v2036_v42, %v6752_v50 }
 0x1d6   :  { %9955 = vst [vmem:[#allocation37_spill] sm:$0xff] %v6908_v25  ;;  %v2100_v44 = vsel %vm2072_vm1, %v6908_v25, 0.0 }
 0x1d7   :  { %9956 = vst [vmem:[#allocation38_spill] sm:$0xff] %v6911_v33  ;;  %v4934_v49 = vpop.f32.mrb[28].mxu0  ;;  %v2099_v6 = vsel %vm2072_vm1, %v6911_v33, 0.0 }
 0x1d8   :  { %v6920_v28 = vadd.f32 %v4934_v49, %v6754_v45  ;;  %v2048_v26 = vpop.f32.mrb[29].mxu0  ;;  %2155 = vadd.xlane.f32.xlu1 %v2098_v7  ;;  %2157 = vadd.xlane.f32.xlu0 %v2099_v6 }
 0x1d9   :  { %v6923_v4 = vadd.f32 %v2048_v26, %v6756_v8 }
 0x1da   :  { %9957 = vst [vmem:[#allocation39_spill] sm:$0xff] %v6920_v28  ;;  %v2102_v8 = vsel %vm2072_vm1, %v6920_v28, 0.0 }
 0x1db   :  { %9958 = vst [vmem:[#allocation40_spill] sm:$0xff] %v6923_v4  ;;  %v4937_v50 = vpop.f32.mrb[30].mxu0  ;;  %v2101_v62 = vsel %vm2072_vm1, %v6923_v4, 0.0 }
 0x1dc   :  { %v6932_v19 = vadd.f32 %v4937_v50, %v6758_v40  ;;  %v2060_v45 = vpop.f32.mrb[31].mxu0  ;;  %2159 = vadd.xlane.f32.xlu1 %v2100_v44  ;;  %2161 = vadd.xlane.f32.xlu0 %v2101_v62 }
 0x1dd   :  { %v6935_v55 = vadd.f32 %v2060_v45, %v6760_v20  ;;  %v9499_v20 = vmov 0  }
 0x1de   :  { %9959 = vst [vmem:[#allocation6_spill] sm:$0xff] %v6932_v19  ;;  %v2104_v40 = vsel %vm2072_vm1, %v6932_v19, 0.0 }
 0x1df   :  { %9960 = vst [vmem:[#allocation41_spill] sm:$0xff] %v6935_v55  ;;  %v2103_v58 = vsel %vm2072_vm1, %v6935_v55, 0.0 }
 0x1e0   :  { %2163 = vadd.xlane.f32.xlu1 %v2102_v8  ;;  %2165 = vadd.xlane.f32.xlu0 %v2103_v58 }
 0x1e4   :  { %2167 = vadd.xlane.f32.xlu1 %v2104_v40 }
 0x231   :  { %v6946_v54 = vpop.xlane.xlu0 %2105 }
 0x232   :  { %vm2361_vm2 = vcmp.ge.f32.partialorder %v6946_v54, 0.0 }
 0x233   :  { %v2393_v59 = vsel %vm2361_vm2, 1, %v9499_v20 }
 0x234   :  { %v6950_v63 = vadd.s32 1, %v2393_v59 }
 0x235   :  { %v6952_v32 = vpop.xlane.xlu0 %2107  ;;  %v6954_v18 = vpop.xlane.xlu1 %2109 }
 0x236   :  { %9961 = vst [vmem:[#allocation42_spill] sm:$0xff] %v6950_v63  ;;  %vm2457_vm3 = vcmp.eq.s32.totalorder %v6762_v34, %v6950_v63  ;;  %vm2362_vm4 = vcmp.ge.f32.partialorder %v6952_v32, 0.0  ;;  %vm2363_vm5 = vcmp.ge.f32.partialorder %v6954_v18, 0.0 }
 0x237   :  { %v2489_v21 = vsel %vm2457_vm3, %v6767_v39, 0.0  ;;  %v2394_v13 = vsel %vm2362_vm4, 1, %v9499_v20  ;;  %v2395_v16 = vsel %vm2363_vm5, 1, %v9499_v20 }
 0x238   :  { %2521 = vadd.xlane.f32.xlu0 %v2489_v21  ;;  %v6970_v1 = vadd.s32 1, %v2394_v13  ;;  %v6972_v60 = vadd.s32 1, %v2395_v16 }
 0x239   :  { %v6966_v12 = vpop.xlane.xlu1 %2111  ;;  %v6968_v24 = vpop.xlane.xlu0 %2113 }
 0x23a   :  { %9962 = vst [vmem:[#allocation9_spill] sm:$0xff] %v6970_v1  ;;  %9963 = vst [vmem:[#allocation43_spill] sm:$0xff] %v6972_v60  ;;  %vm2458_vm6 = vcmp.eq.s32.totalorder %v6762_v34, %v6970_v1  ;;  %vm2459_vm7 = vcmp.eq.s32.totalorder %v6762_v34, %v6972_v60  ;;  %vm2364_vm8 = vcmp.ge.f32.partialorder %v6966_v12, 0.0  ;;  %vm2365_vm9 = vcmp.ge.f32.partialorder %v6968_v24, 0.0 }
 0x23b   :  { %v2490_v41 = vsel %vm2458_vm6, %v6764_v57, 0.0  ;;  %v2491_v53 = vsel %vm2459_vm7, %v6774_v2, 0.0  ;;  %v2396_v23 = vsel %vm2364_vm8, 1, %v9499_v20  ;;  %v2397_v42 = vsel %vm2365_vm9, 1, %v9499_v20 }
 0x23c   :  { %2523 = vadd.xlane.f32.xlu1 %v2490_v41  ;;  %2525 = vadd.xlane.f32.xlu0 %v2491_v53  ;;  %v6993_v0 = vadd.s32 1, %v2396_v23  ;;  %v6997_v49 = vadd.s32 1, %v2397_v42 }
 0x23d   :  { %v6987_v11 = vpop.xlane.xlu1 %2115  ;;  %v6989_v38 = vpop.xlane.xlu0 %2117 }
 0x23e   :  { %9964 = vst [vmem:[#allocation44_spill] sm:$0xff] %v6993_v0  ;;  %vm2366_vm10 = vcmp.ge.f32.partialorder %v6987_v11, 0.0  ;;  %9965 = vst [vmem:[#allocation11_spill] sm:$0xff] %v6997_v49  ;;  %vm2460_vm11 = vcmp.eq.s32.totalorder %v6762_v34, %v6993_v0  ;;  %vm2367_vm12 = vcmp.ge.f32.partialorder %v6989_v38, 0.0  ;;  %vm2461_vm13 = vcmp.eq.s32.totalorder %v6762_v34, %v6997_v49 }
 0x23f   :  { %v2398_v26 = vsel %vm2366_vm10, 1, %v9499_v20  ;;  %v2492_v50 = vsel %vm2460_vm11, %v6772_v10, 0.0  ;;  %v2493_v44 = vsel %vm2461_vm13, %v6784_v30, 0.0  ;;  %v2399_v45 = vsel %vm2367_vm12, 1, %v9499_v20 }
 0x240   :  { %2527 = vadd.xlane.f32.xlu1 %v2492_v50  ;;  %2529 = vadd.xlane.f32.xlu0 %v2493_v44  ;;  %v7017_v62 = vadd.s32 1, %v2398_v26  ;;  %v7020_v8 = vadd.s32 1, %v2399_v45 }
 0x241   :  { %v7001_v7 = vpop.xlane.xlu1 %2119  ;;  %v7003_v6 = vpop.xlane.xlu0 %2121 }
 0x242   :  { %9966 = vst [vmem:[#allocation45_spill] sm:$0xff] %v7017_v62  ;;  %9967 = vst [vmem:[#allocation14_spill] sm:$0xff] %v7020_v8  ;;  %vm2462_vm14 = vcmp.eq.s32.totalorder %v6762_v34, %v7017_v62  ;;  %vm2368_vm15 = vcmp.ge.f32.partialorder %v7001_v7, 0.0  ;;  %vm2463_vm0 = vcmp.eq.s32.totalorder %v6762_v34, %v7020_v8  ;;  %vm2369_vm2 = vcmp.ge.f32.partialorder %v7003_v6, 0.0 }
 0x243   :  { %v2494_v59 = vsel %vm2462_vm14, %v6782_v31, 0.0  ;;  %v2495_v21 = vsel %vm2463_vm0, %v6794_v48, 0.0  ;;  %v2400_v13 = vsel %vm2368_vm15, 1, %v9499_v20  ;;  %v2401_v53 = vsel %vm2369_vm2, 1, %v9499_v20 }
 0x244   :  { %2531 = vadd.xlane.f32.xlu1 %v2494_v59  ;;  %2533 = vadd.xlane.f32.xlu0 %v2495_v21  ;;  %v7042_v41 = vadd.s32 1, %v2400_v13  ;;  %v7048_v23 = vadd.s32 1, %v2401_v53 }
 0x245   :  { %v7022_v58 = vpop.xlane.xlu1 %2123  ;;  %v7026_v40 = vpop.xlane.xlu0 %2125 }
 0x246   :  { %9968 = vst [vmem:[#allocation15_spill] sm:$0xff] %v7042_v41  ;;  %vm2464_vm4 = vcmp.eq.s32.totalorder %v6762_v34, %v7042_v41  ;;  %9969 = vst [vmem:[#allocation24_spill] sm:$0xff] %v7048_v23  ;;  %vm2465_vm5 = vcmp.eq.s32.totalorder %v6762_v34, %v7048_v23  ;;  %vm2370_vm8 = vcmp.ge.f32.partialorder %v7022_v58, 0.0  ;;  %vm2371_vm9 = vcmp.ge.f32.partialorder %v7026_v40, 0.0 }
 0x247   :  { %v2496_v26 = vsel %vm2464_vm4, %v6792_v17, 0.0  ;;  %v2497_v44 = vsel %vm2465_vm5, %v6804_v46, 0.0  ;;  %v2402_v45 = vsel %vm2370_vm8, 1, %v9499_v20  ;;  %v2403_v59 = vsel %vm2371_vm9, 1, %v9499_v20 }
 0x248   :  { %2535 = vadd.xlane.f32.xlu1 %v2496_v26  ;;  %2537 = vadd.xlane.f32.xlu0 %v2497_v44  ;;  %v7068_v21 = vadd.s32 1, %v2402_v45  ;;  %v7070_v13 = vadd.s32 1, %v2403_v59 }
 0x249   :  { %v7040_v16 = vpop.xlane.xlu1 %2127  ;;  %v7050_v42 = vpop.xlane.xlu0 %2129 }
 0x24a   :  { %9970 = vst [vmem:[#allocation46_spill] sm:$0xff] %v7068_v21  ;;  %9971 = vst [vmem:[#allocation47_spill] sm:$0xff] %v7070_v13  ;;  %vm9498_vm10 = vcmp.eq.s32.totalorder %v6762_v34, %v7068_v21  ;;  %vm9454_vm12 = vcmp.eq.s32.totalorder %v6762_v34, %v7070_v13  ;;  %vm2372_vm15 = vcmp.ge.f32.partialorder %v7040_v16, 0.0  ;;  %vm2373_vm2 = vcmp.ge.f32.partialorder %v7050_v42, 0.0 }
 0x24b   :  { %v2498_v44 = vsel %vm9498_vm10, %v6802_v37, 0.0  ;;  %v2499_v45 = vsel %vm9454_vm12, %v6815_v47, 0.0  ;;  %v2404_v59 = vsel %vm2372_vm15, 1, %v9499_v20  ;;  %v2405_v46 = vsel %vm2373_vm2, 1, %v9499_v20 }
 0x24c   :  { %2539 = vadd.xlane.f32.xlu1 %v2498_v44  ;;  %2541 = vadd.xlane.f32.xlu0 %v2499_v45  ;;  %v7092_v17 = vadd.s32 1, %v2404_v59  ;;  %v7094_v48 = vadd.s32 1, %v2405_v46 }
 0x24d   :  { %v7056_v50 = vpop.xlane.xlu1 %2131  ;;  %v7072_v53 = vpop.xlane.xlu0 %2133 }
 0x24e   :  { %9972 = vst [vmem:[#allocation48_spill] sm:$0xff] %v7092_v17  ;;  %9973 = vst [vmem:[#allocation49_spill] sm:$0xff] %v7094_v48  ;;  %vm2374_vm8 = vcmp.ge.f32.partialorder %v7056_v50, 0.0  ;;  %vm9461_vm9 = vcmp.eq.s32.totalorder %v6762_v34, %v7092_v17  ;;  %vm9482_vm12 = vcmp.eq.s32.totalorder %v6762_v34, %v7094_v48  ;;  %vm2375_vm15 = vcmp.ge.f32.partialorder %v7072_v53, 0.0 }
 0x24f   :  { %v2500_v44 = vsel %vm9461_vm9, %v6812_v56, 0.0  ;;  %v2501_v46 = vsel %vm9482_vm12, %v6827_v61, 0.0  ;;  %v2406_v45 = vsel %vm2374_vm8, 1, %v9499_v20  ;;  %v2407_v47 = vsel %vm2375_vm15, 1, %v9499_v20 }
 0x250   :  { %2543 = vadd.xlane.f32.xlu1 %v2500_v44  ;;  %2545 = vadd.xlane.f32.xlu0 %v2501_v46  ;;  %v7115_v59 = vadd.s32 1, %v2406_v45  ;;  %v7118_v13 = vadd.s32 1, %v2407_v47 }
 0x251   :  { %v7074_v26 = vpop.xlane.xlu1 %2135  ;;  %v7096_v37 = vpop.xlane.xlu0 %2137 }
 0x252   :  { %9974 = vst [vmem:[#allocation50_spill] sm:$0xff] %v7115_v59  ;;  %9975 = vst [vmem:[#allocation51_spill] sm:$0xff] %v7118_v13  ;;  %vm9466_vm2 = vcmp.eq.s32.totalorder %v6762_v34, %v7115_v59  ;;  %vm2376_vm9 = vcmp.ge.f32.partialorder %v7074_v26, 0.0  ;;  %vm9474_vm8 = vcmp.eq.s32.totalorder %v6762_v34, %v7118_v13  ;;  %vm2377_vm15 = vcmp.ge.f32.partialorder %v7096_v37, 0.0 }
 0x253   :  { %v2502_v44 = vsel %vm9466_vm2, %v6824_v29, 0.0  ;;  %v2503_v47 = vsel %vm9474_vm8, %v6839_v35, 0.0  ;;  %v2408_v46 = vsel %vm2376_vm9, 1, %v9499_v20  ;;  %v2409_v48 = vsel %vm2377_vm15, 1, %v9499_v20 }
 0x254   :  { %2547 = vadd.xlane.f32.xlu1 %v2502_v44  ;;  %2549 = vadd.xlane.f32.xlu0 %v2503_v47  ;;  %v7138_v45 = vadd.s32 1, %v2408_v46  ;;  %v7144_v29 = vadd.s32 1, %v2409_v48 }
 0x255   :  { %v7099_v31 = vpop.xlane.xlu1 %2139  ;;  %v7122_v56 = vpop.xlane.xlu0 %2141 }
 0x256   :  { %9976 = vst [vmem:[#allocation52_spill] sm:$0xff] %v7138_v45  ;;  %vm9473_vm2 = vcmp.eq.s32.totalorder %v6762_v34, %v7138_v45  ;;  %9977 = vst [vmem:[#allocation53_spill] sm:$0xff] %v7144_v29  ;;  %vm2378_vm9 = vcmp.ge.f32.partialorder %v7099_v31, 0.0  ;;  %vm9481_vm15 = vcmp.eq.s32.totalorder %v6762_v34, %v7144_v29 }
 0x257   :  { %v2504_v44 = vsel %vm9473_vm2, %v6836_v14, 0.0  ;;  %v2410_v46 = vsel %vm2378_vm9, 1, %v9499_v20  ;;  %v2505_v48 = vsel %vm9481_vm15, %v6851_v3, 0.0  ;;  %vm2379_vm2 = vcmp.ge.f32.partialorder %v7122_v56, 0.0 }
 0x258   :  { %2551 = vadd.xlane.f32.xlu1 %v2504_v44  ;;  %v7162_v13 = vadd.s32 1, %v2410_v46  ;;  %2553 = vadd.xlane.f32.xlu0 %v2505_v48  ;;  %v2411_v44 = vsel %vm2379_vm2, 1, %v9499_v20 }
 0x259   :  { %v7125_v61 = vpop.xlane.xlu1 %2143  ;;  %v7150_v35 = vpop.xlane.xlu0 %2145  ;;  %v7172_v45 = vadd.s32 1, %v2411_v44 }
 0x25a   :  { %9978 = vst [vmem:[#allocation54_spill] sm:$0xff] %v7162_v13  ;;  %vm9497_vm8 = vcmp.eq.s32.totalorder %v6762_v34, %v7162_v13  ;;  %vm2380_vm9 = vcmp.ge.f32.partialorder %v7125_v61, 0.0  ;;  %vm2381_vm15 = vcmp.ge.f32.partialorder %v7150_v35, 0.0 }
 0x25b   :  { %v2506_v14 = vsel %vm9497_vm8, %v6848_v52, 0.0  ;;  %9979 = vst [vmem:[#allocation55_spill] sm:$0xff] %v7172_v45  ;;  %vm9491_vm12 = vcmp.eq.s32.totalorder %v6762_v34, %v7172_v45  ;;  %v2412_v48 = vsel %vm2380_vm9, 1, %v9499_v20 }
 0x25c   :  { %2555 = vadd.xlane.f32.xlu1 %v2506_v14  ;;  %v2507_v44 = vsel %vm9491_vm12, %v6863_v22, 0.0  ;;  %v7187_v52 = vadd.s32 1, %v2412_v48  ;;  %v2413_v14 = vsel %vm2381_vm15, 1, %v9499_v20 }
 0x25d   :  { %v7153_v47 = vpop.xlane.xlu1 %2147  ;;  %v7174_v29 = vpop.xlane.xlu0 %2149  ;;  %2557 = vadd.xlane.f32.xlu0 %v2507_v44  ;;  %v7192_v3 = vadd.s32 1, %v2413_v14 }
 0x25e   :  { %9980 = vst [vmem:[#allocation56_spill] sm:$0xff] %v7187_v52  ;;  %vm9496_vm2 = vcmp.eq.s32.totalorder %v6762_v34, %v7187_v52  ;;  %vm2382_vm12 = vcmp.ge.f32.partialorder %v7153_v47, 0.0  ;;  %vm2383_vm15 = vcmp.ge.f32.partialorder %v7174_v29, 0.0 }
 0x25f   :  { %9981 = vst [vmem:[#allocation57_spill] sm:$0xff] %v7192_v3  ;;  %v2508_v13 = vsel %vm9496_vm2, %v6860_v27, 0.0  ;;  %vm9684_vm9 = vcmp.eq.s32.totalorder %v6762_v34, %v7192_v3  ;;  %v2414_v14 = vsel %vm2382_vm12, 1, %v9499_v20 }
 0x260   :  { %2559 = vadd.xlane.f32.xlu1 %v2508_v13  ;;  %v2509_v44 = vsel %vm9684_vm9, %v6875_v15, 0.0  ;;  %v2415_v13 = vsel %vm2383_vm15, 1, %v9499_v20  ;;  %v7212_v27 = vadd.s32 1, %v2414_v14  ;;  %v9984_v15 = vmov 0  }
 0x261   :  { %v7178_v46 = vpop.xlane.xlu1 %2151  ;;  %v7200_v22 = vpop.xlane.xlu0 %2153  ;;  %2561 = vadd.xlane.f32.xlu0 %v2509_v44  ;;  %v7214_v52 = vadd.s32 1, %v2415_v13 }
 0x262   :  { %9982 = vst [vmem:[#allocation58_spill] sm:$0xff] %v7212_v27  ;;  %vm2384_vm2 = vcmp.ge.f32.partialorder %v7178_v46, 0.0  ;;  %vm9529_vm8 = vcmp.eq.s32.totalorder %v6762_v34, %v7212_v27  ;;  %vm2385_vm12 = vcmp.ge.f32.partialorder %v7200_v22, 0.0 }
 0x263   :  { %9983 = vst [vmem:[#allocation59_spill] sm:$0xff] %v7214_v52  ;;  %vm9511_vm10 = vcmp.eq.s32.totalorder %v6762_v34, %v7214_v52  ;;  %v2510_v44 = vsel %vm9529_vm8, %v6872_v51, 0.0  ;;  %v2416_v3 = vsel %vm2384_vm2, 1, %v9984_v15  ;;  %v2417_v27 = vsel %vm2385_vm12, 1, %v9984_v15 }
 0x264   :  { %v2511_v14 = vsel %vm9511_vm10, %v6887_v5, 0.0  ;;  %2563 = vadd.xlane.f32.xlu1 %v2510_v44  ;;  %v7235_v45 = vadd.s32 1, %v2416_v3  ;;  %v7238_v51 = vadd.s32 1, %v2417_v27 }
 0x265   :  { %v7204_v48 = vpop.xlane.xlu1 %2155  ;;  %v7229_v13 = vpop.xlane.xlu0 %2157  ;;  %2565 = vadd.xlane.f32.xlu0 %v2511_v14 }
 0x266   :  { %9985 = vst [vmem:[#allocation60_spill] sm:$0xff] %v7235_v45  ;;  %9986 = vst [vmem:[#allocation61_spill] sm:$0xff] %v7238_v51  ;;  %vm2386_vm15 = vcmp.ge.f32.partialorder %v7204_v48, 0.0  ;;  %vm9518_vm10 = vcmp.eq.s32.totalorder %v6762_v34, %v7235_v45  ;;  %vm9521_vm2 = vcmp.eq.s32.totalorder %v6762_v34, %v7238_v51  ;;  %vm2387_vm12 = vcmp.ge.f32.partialorder %v7229_v13, 0.0 }
 0x267   :  { %v2512_v44 = vsel %vm9518_vm10, %v6884_v36, 0.0  ;;  %v2513_v3 = vsel %vm9521_vm2, %v6899_v9, 0.0  ;;  %v2418_v14 = vsel %vm2386_vm15, 1, %v9984_v15  ;;  %v2419_v36 = vsel %vm2387_vm12, 1, %v9984_v15 }
 0x268   :  { %2567 = vadd.xlane.f32.xlu1 %v2512_v44  ;;  %v7258_v52 = vadd.s32 1, %v2418_v14  ;;  %v7264_v44 = vadd.s32 1, %v2419_v36 }
 0x269   :  { %v7231_v20 = vpop.xlane.xlu1 %2159  ;;  %v7253_v27 = vpop.xlane.xlu0 %2161  ;;  %2569 = vadd.xlane.f32.xlu0 %v2513_v3 }
 0x26a   :  { %9987 = vst [vmem:[#allocation62_spill] sm:$0xff] %v7258_v52  ;;  %vm9528_vm10 = vcmp.eq.s32.totalorder %v6762_v34, %v7258_v52  ;;  %9988 = vst [vmem:[#allocation63_spill] sm:$0xff] %v7264_v44  ;;  %vm2388_vm15 = vcmp.ge.f32.partialorder %v7231_v20, 0.0  ;;  %vm9530_vm2 = vcmp.eq.s32.totalorder %v6762_v34, %v7264_v44  ;;  %vm2389_vm12 = vcmp.ge.f32.partialorder %v7253_v27, 0.0 }
 0x26b   :  { %v2514_v9 = vsel %vm9528_vm10, %v6896_v43, 0.0  ;;  %v2515_v3 = vsel %vm9530_vm2, %v6911_v33, 0.0  ;;  %v2420_v36 = vsel %vm2388_vm15, 1, %v9984_v15 }
 0x26c   :  { %2571 = vadd.xlane.f32.xlu1 %v2514_v9  ;;  %v7283_v43 = vadd.s32 1, %v2420_v36  ;;  %v2421_v9 = vsel %vm2389_vm12, 1, %v9984_v15 }
 0x26d   :  { %v7256_v5 = vpop.xlane.xlu1 %2163  ;;  %v7277_v14 = vpop.xlane.xlu0 %2165  ;;  %2573 = vadd.xlane.f32.xlu0 %v2515_v3  ;;  %v7286_v52 = vadd.s32 1, %v2421_v9 }
 0x26e   :  { %9990 = vst [vmem:[#allocation65_spill] sm:$0xff] %v7283_v43  ;;  %vm2390_vm10 = vcmp.ge.f32.partialorder %v7256_v5, 0.0  ;;  %vm2391_vm8 = vcmp.ge.f32.partialorder %v7277_v14, 0.0  ;;  %vm9683_vm2 = vcmp.eq.s32.totalorder %v6762_v34, %v7283_v43 }
 0x26f   :  { %9991 = vst [vmem:[#allocation66_spill] sm:$0xff] %v7286_v52  ;;  %v2422_v33 = vsel %vm2390_vm10, 1, %v9984_v15  ;;  %v2516_v3 = vsel %vm9683_vm2, %v6908_v25, 0.0  ;;  %vm9541_vm12 = vcmp.eq.s32.totalorder %v6762_v34, %v7286_v52  ;;  %v2423_v44 = vsel %vm2391_vm8, 1, %v9984_v15 }
 0x270   :  { %2575 = vadd.xlane.f32.xlu1 %v2516_v3  ;;  %v2517_v36 = vsel %vm9541_vm12, %v6923_v4, 0.0  ;;  %v7304_v9 = vadd.s32 1, %v2422_v33  ;;  %v7310_v25 = vadd.s32 1, %v2423_v44  ;;  %v2201_v44 = vmul.f32 0.70710677, %v6946_v54 }
 0x271   :  { %v7281_v51 = vpop.xlane.xlu1 %2167  ;;  %2577 = vadd.xlane.f32.xlu0 %v2517_v36  ;;  %v2202_v36 = vmul.f32 0.70710677, %v6952_v32  ;;  %v2207_v52 = vmul.f32 0.70710677, %v6989_v38 }
 0x272   :  { %9989 = vst [vmem:[#allocation64_spill] sm:$0xff] %v7281_v51  ;;  %vm2392_vm15 = vcmp.ge.f32.partialorder %v7281_v51, 0.0  ;;  %9992 = vst [vmem:[#allocation67_spill] sm:$0xff] %v7304_v9  ;;  %vm9591_vm10 = vcmp.eq.s32.totalorder %v6762_v34, %v7304_v9  ;;  %vm9566_vm12 = vcmp.eq.s32.totalorder %v6762_v34, %v7310_v25  ;;  %5422 = verf.f32 %v2201_v44 }
 0x273   :  { %v2424_v51 = vsel %vm2392_vm15, 1, %v9984_v15  ;;  %9993 = vst [vmem:[#allocation68_spill] sm:$0xff] %v7310_v25  ;;  %v2518_v3 = vsel %vm9591_vm10, %v6920_v28, 0.0  ;;  %v2519_v33 = vsel %vm9566_vm12, %v6935_v55, 0.0  ;;  %5424 = verf.f32 %v2202_v36 }
 0x274   :  { %v7312_v43 = vadd.s32 1, %v2424_v51  ;;  %2579 = vadd.xlane.f32.xlu1 %v2518_v3  ;;  %v2203_v3 = vmul.f32 0.70710677, %v6954_v18  ;;  %v2204_v28 = vmul.f32 0.70710677, %v6966_v12  ;;  %v2170_v36 = vmul.f32 0.5, %v6952_v32 }
 0x275   :  { %2581 = vadd.xlane.f32.xlu0 %v2519_v33  ;;  %v2205_v55 = vmul.f32 0.70710677, %v6968_v24  ;;  %v2206_v25 = vmul.f32 0.70710677, %v6987_v11  ;;  %v2169_v33 = vmul.f32 0.5, %v6946_v54  ;;  %v7345_v9 = vmul.f32 0.5, %v6966_v12 }
 0x276   :  { %9994 = vst [vmem:[#allocation69_spill] sm:$0xff] %v7312_v43  ;;  %vm9561_vm8 = vcmp.eq.s32.totalorder %v6762_v34, %v7312_v43  ;;  %5426 = verf.f32 %v2203_v3  ;;  %v7349_v54 = vmul.f32 0.5, %v6968_v24  ;;  %v7359_v12 = vmul.f32 0.5, %v6987_v11 }
 0x277   :  { %v2520_v51 = vsel %vm9561_vm8, %v6932_v19, 0.0  ;;  %5428 = verf.f32 %v2204_v28  ;;  %v2171_v19 = vmul.f32 0.5, %v6954_v18  ;;  %v2810_v28 = vmul.u32 2, %v6970_v1 }
 0x278   :  { %2583 = vadd.xlane.f32.xlu1 %v2520_v51  ;;  %v2809_v51 = vmul.u32 2, %v6950_v63  ;;  %5430 = verf.f32 %v2205_v55  ;;  %v2811_v63 = vmul.u32 2, %v6972_v60  ;;  %v7362_v55 = vmul.f32 0.5, %v6989_v38 }
 0x279   :  { %5432 = verf.f32 %v2206_v25  ;;  %v2209_v60 = vmul.f32 0.70710677, %v7003_v6  ;;  %v2812_v38 = vmul.u32 2, %v6993_v0 }
 0x27a   :  { %5434 = verf.f32 %v2207_v52 }
 0x27c   :  { %v5423_v4 = vpop.eup %5422 }
 0x27d   :  { %v2265_v44 = vadd.f32 1.0, %v5423_v4  ;;  %v2208_v4 = vmul.f32 0.70710677, %v7001_v7  ;;  %v5425_v24 = vpop.eup %5424 }
 0x27f   :  { %5436 = verf.f32 %v2208_v4  ;;  %v2211_v4 = vmul.f32 0.70710677, %v7026_v40 }
 0x280   :  { %5438 = verf.f32 %v2209_v60 }
 0x2c5   :  { %v7336_v43 = vpop.xlane.xlu0 %2521 }
 0x2c6   :  { %9995 = vst [vmem:[#allocation70_spill] sm:$0xff] %v7336_v43  ;;  %vm2841_vm15 = vcmp.ge.f32.partialorder %v7336_v43, 0.0  ;;  %v5427_v43 = vpop.eup %5426 }
 0x2c7   :  { %v2873_v3 = vsel %vm2841_vm15, 1, %v9984_v15 }
 0x2c8   :  { %v2905_v45 = vadd.s32 %v2873_v3, %v2809_v51  ;;  %v7365_v51 = vmul.f32 %v2265_v44, %v2169_v33  ;;  %v2266_v44 = vadd.f32 1.0, %v5425_v24  ;;  %v5429_v24 = vpop.eup %5428 }
 0x2c9   :  { %v7353_v32 = vpop.xlane.xlu1 %2523  ;;  %v7355_v18 = vpop.xlane.xlu0 %2525 }
 0x2ca   :  { %9996 = vst [vmem:[#allocation71_spill] sm:$0xff] %v7353_v32  ;;  %9997 = vst [vmem:[#allocation72_spill] sm:$0xff] %v7355_v18  ;;  %vm2842_vm15 = vcmp.ge.f32.partialorder %v7353_v32, 0.0  ;;  %vm2843_vm8 = vcmp.ge.f32.partialorder %v7355_v18, 0.0  ;;  %v7369_v3 = vadd.s32 1, %v2905_v45  ;;  %v2178_v18 = vmul.f32 0.5, %v7022_v58 }
 0x2cb   :  { %v2874_v25 = vsel %vm2842_vm15, 1, %v9984_v15  ;;  %v2875_v11 = vsel %vm2843_vm8, 1, %v9984_v15  ;;  %v2210_v32 = vmul.f32 0.70710677, %v7022_v58 }
 0x2cc   :  { %9998 = vst [vmem:[#allocation73_spill] sm:$0xff] %v7369_v3  ;;  %v2906_v1 = vadd.s32 %v2874_v25, %v2810_v28  ;;  %vm9572_vm12 = vcmp.eq.s32.totalorder %v6762_v34, %v7369_v3  ;;  %v2907_v33 = vadd.s32 %v2875_v11, %v2811_v63  ;;  %v2813_v28 = vmul.u32 2, %v6997_v49 }
 0x2cd   :  { %v3001_v52 = vsel %vm9572_vm12, %v6767_v39, 0.0  ;;  %v7385_v25 = vmul.f32 0.5, %v7001_v7  ;;  %v7388_v0 = vpop.xlane.xlu1 %2527  ;;  %v2267_v11 = vadd.f32 1.0, %v5427_v43  ;;  %v7393_v39 = vpop.xlane.xlu0 %2529  ;;  %v2212_v7 = vmul.f32 0.70710677, %v7040_v16 }
 0x2ce   :  { %v7381_v45 = vadd.s32 1, %v2906_v1  ;;  %10000 = vst [vmem:[#allocation75_spill] sm:$0xff] %v7388_v0  ;;  %3033 = vadd.xlane.f32.xlu0 %v3001_v52  ;;  %v7390_v63 = vadd.s32 1, %v2907_v33  ;;  %vm2844_vm8 = vcmp.ge.f32.partialorder %v7388_v0, 0.0  ;;  %10002 = vst [vmem:[#allocation77_spill] sm:$0xff] %v7393_v39  ;;  %v7398_v1 = vmul.f32 0.5, %v7003_v6  ;;  %v5431_v33 = vpop.eup %5430 }
 0x2cf   :  { %v2876_v49 = vsel %vm2844_vm8, 1, %v9984_v15  ;;  %vm2845_vm12 = vcmp.ge.f32.partialorder %v7393_v39, 0.0  ;;  %v7403_v52 = vmul.f32 %v2266_v44, %v2170_v36  ;;  %5440 = verf.f32 %v2210_v32  ;;  %v5433_v3 = vpop.eup %5432 }
 0x2d0   :  { %9999 = vst [vmem:[#allocation74_spill] sm:$0xff] %v7381_v45  ;;  %10001 = vst [vmem:[#allocation76_spill] sm:$0xff] %v7390_v63  ;;  %vm9589_vm15 = vcmp.eq.s32.totalorder %v6762_v34, %v7381_v45  ;;  %v2877_v43 = vsel %vm2845_vm12, 1, %v9984_v15  ;;  %v2268_v6 = vadd.f32 1.0, %v5429_v24  ;;  %5442 = verf.f32 %v2211_v4 }
 0x2d1   :  { %v3002_v60 = vsel %vm9589_vm15, %v6764_v57, 0.0  ;;  %v2213_v0 = vmul.f32 0.70710677, %v7050_v42  ;;  %vm9587_vm8 = vcmp.eq.s32.totalorder %v6762_v34, %v7390_v63  ;;  %v7413_v39 = vmul.f32 %v2267_v11, %v2171_v19  ;;  %v7415_v36 = vpop.xlane.xlu1 %2531  ;;  %v7423_v24 = vpop.xlane.xlu0 %2533 }
 0x2d2   :  { %3035 = vadd.xlane.f32.xlu1 %v3002_v60  ;;  %10003 = vst [vmem:[#allocation78_spill] sm:$0xff] %v7415_v36  ;;  %v3003_v32 = vsel %vm9587_vm8, %v6774_v2, 0.0  ;;  %v2908_v44 = vadd.s32 %v2876_v49, %v2812_v38  ;;  %v2909_v57 = vadd.s32 %v2877_v43, %v2813_v28  ;;  %v2269_v45 = vadd.f32 1.0, %v5431_v33  ;;  %10004 = vst [vmem:[#allocation79_spill] sm:$0xff] %v7423_v24  ;;  %v5435_v19 = vpop.eup %5434 }
 0x2d3   :  { %v2814_v4 = vmul.u32 2, %v7017_v62  ;;  %5444 = verf.f32 %v2212_v7  ;;  %vm2846_vm12 = vcmp.ge.f32.partialorder %v7415_v36, 0.0  ;;  %3037 = vadd.xlane.f32.xlu0 %v3003_v32  ;;  %v2270_v11 = vadd.f32 1.0, %v5433_v3  ;;  %v5437_v2 = vpop.eup %5436 }
 0x2d4   :  { %v2815_v60 = vmul.u32 2, %v7020_v8  ;;  %v2214_v63 = vmul.f32 0.70710677, %v7056_v50  ;;  %v7429_v49 = vmul.f32 %v2268_v6, %v7345_v9  ;;  %v2179_v38 = vmul.f32 0.5, %v7026_v40  ;;  %v5439_v40 = vpop.eup %5438 }
 0x2d5   :  { %5446 = verf.f32 %v2213_v0  ;;  %v2215_v28 = vmul.f32 0.70710677, %v7072_v53  ;;  %v2878_v7 = vsel %vm2846_vm12, 1, %v9984_v15  ;;  %vm2847_vm8 = vcmp.ge.f32.partialorder %v7423_v24, 0.0  ;;  %v7447_v8 = vpop.xlane.xlu1 %2535 }
 0x2d6   :  { %v7435_v3 = vadd.s32 1, %v2908_v44  ;;  %v7437_v33 = vadd.s32 1, %v2909_v57  ;;  %v7440_v58 = vmul.f32 %v2269_v45, %v7349_v54  ;;  %v2271_v43 = vadd.f32 1.0, %v5435_v19  ;;  %10007 = vst [vmem:[#allocation82_spill] sm:$0xff] %v7447_v8 }
 0x2d7   :  { %v2816_v9 = vmul.u32 2, %v7042_v41  ;;  %v2180_v6 = vmul.f32 0.5, %v7040_v16  ;;  %v7445_v0 = vmul.f32 %v2270_v11, %v7359_v12  ;;  %v2272_v32 = vadd.f32 1.0, %v5437_v2  ;;  %v7457_v12 = vpop.xlane.xlu0 %2537 }
 0x2d8   :  { %10005 = vst [vmem:[#allocation80_spill] sm:$0xff] %v7435_v3  ;;  %10006 = vst [vmem:[#allocation81_spill] sm:$0xff] %v7437_v33  ;;  %5448 = verf.f32 %v2214_v63  ;;  %vm9606_vm12 = vcmp.eq.s32.totalorder %v6762_v34, %v7435_v3  ;;  %v2216_v57 = vmul.f32 0.70710677, %v7074_v26  ;;  %v2879_v54 = vsel %vm2847_vm8, 1, %v9984_v15 }
 0x2d9   :  { %vm9603_vm15 = vcmp.eq.s32.totalorder %v6762_v34, %v7437_v33  ;;  %v2910_v45 = vadd.s32 %v2878_v7, %v2814_v4  ;;  %v5441_v16 = vpop.eup %5440  ;;  %v2181_v44 = vmul.f32 0.5, %v7050_v42  ;;  %5450 = verf.f32 %v2215_v28  ;;  %10008 = vst [vmem:[#allocation83_spill] sm:$0xff] %v7457_v12 }
 0x2da   :  { %v2217_v2 = vmul.f32 0.70710677, %v7096_v37  ;;  %v3004_v63 = vsel %vm9606_vm12, %v6772_v10, 0.0  ;;  %v5443_v19 = vpop.eup %5442  ;;  %v7464_v11 = vmul.f32 %v2271_v43, %v7362_v55  ;;  %v2273_v41 = vadd.f32 1.0, %v5439_v40 }
 0x2db   :  { %v2817_v4 = vmul.u32 2, %v7048_v23  ;;  %vm2848_vm8 = vcmp.ge.f32.partialorder %v7447_v8, 0.0  ;;  %3039 = vadd.xlane.f32.xlu1 %v3004_v63  ;;  %v7469_v42 = vmul.f32 0.5, %v7056_v50  ;;  %vm2849_vm10 = vcmp.ge.f32.partialorder %v7457_v12, 0.0 }
 0x2dc   :  { %v3005_v28 = vsel %vm9603_vm15, %v6784_v30, 0.0  ;;  %v2911_v7 = vadd.s32 %v2879_v54, %v2815_v60  ;;  %v7477_v55 = vmul.f32 %v2272_v32, %v7385_v25  ;;  %v2274_v43 = vadd.f32 1.0, %v5441_v16  ;;  %v10010_v54 = vld [vmem:[#allocation47_spill] sm:$0xff] }
 0x2dd   :  { %v5445_v10 = vpop.eup %5444  ;;  %5452 = verf.f32 %v2216_v57  ;;  %3041 = vadd.xlane.f32.xlu0 %v3005_v28  ;;  %v7479_v40 = vadd.s32 1, %v2910_v45  ;;  %v2275_v63 = vadd.f32 1.0, %v5443_v19  ;;  %v2880_v50 = vsel %vm2848_vm8, 1, %v9984_v15  ;;  %v7489_v57 = vpop.xlane.xlu1 %2539 }
 0x2de   :  { %5454 = verf.f32 %v2217_v2  ;;  %v2881_v23 = vsel %vm2849_vm10, 1, %v9984_v15  ;;  %v7484_v33 = vmul.f32 %v2273_v41, %v7398_v1  ;;  %v2818_v60 = vmul.u32 2, %v7068_v21  ;;  %10011 = vst [vmem:[#allocation85_spill] sm:$0xff] %v7489_v57  ;;  %v10013_v21 = vld [vmem:[#allocation49_spill] sm:$0xff] }
 0x2df   :  { %10009 = vst [vmem:[#allocation84_spill] sm:$0xff] %v7479_v40  ;;  %v5447_v62 = vpop.eup %5446  ;;  %v2183_v32 = vmul.f32 0.5, %v7072_v53  ;;  %v2276_v45 = vadd.f32 1.0, %v5445_v10  ;;  %v7492_v16 = vmul.f32 0.5, %v7074_v26  ;;  %vm9605_vm8 = vcmp.eq.s32.totalorder %v6762_v34, %v7479_v40 }
 0x2e0   :  { %v7496_v2 = vadd.s32 1, %v2911_v7  ;;  %v7498_v19 = vmul.f32 %v2274_v43, %v2178_v18  ;;  %v2218_v41 = vmul.f32 0.70710677, %v7099_v31  ;;  %v2912_v1 = vadd.s32 %v2880_v50, %v2816_v9  ;;  %v10014_v18 = vld [vmem:[#allocation5_spill] sm:$0xff]  ;;  %v10016_v7 = vld [vmem:[#allocation19_spill] sm:$0xff] }
 0x2e1   :  { %v2913_v28 = vadd.s32 %v2881_v23, %v2817_v4  ;;  %v7501_v30 = vmul.f32 %v2275_v63, %v2179_v38  ;;  %v2277_v53 = vadd.f32 1.0, %v5447_v62  ;;  %v2185_v26 = vmul.f32 0.5, %v7096_v37  ;;  %v7518_v37 = vpop.xlane.xlu0 %2541  ;;  %v7526_v63 = vpop.xlane.xlu1 %2543 }
 0x2e2   :  { %10012 = vst [vmem:[#allocation86_spill] sm:$0xff] %v7496_v2  ;;  %v5449_v25 = vpop.eup %5448  ;;  %v2219_v12 = vmul.f32 0.70710677, %v7122_v56  ;;  %vm2850_vm10 = vcmp.ge.f32.partialorder %v7489_v57, 0.0  ;;  %v3006_v9 = vsel %vm9605_vm8, %v10014_v18, 0.0  ;;  %v7512_v4 = vmul.f32 %v2276_v45, %v2180_v6  ;;  %10015 = vst [vmem:[#allocation87_spill] sm:$0xff] %v7518_v37 }
 0x2e3   :  { %v5451_v23 = vpop.eup %5450  ;;  %v7515_v62 = vmul.f32 0.5, %v7099_v31  ;;  %v2220_v38 = vmul.f32 0.70710677, %v7125_v61  ;;  %3043 = vadd.xlane.f32.xlu1 %v3006_v9  ;;  %vm9604_vm15 = vcmp.eq.s32.totalorder %v6762_v34, %v7496_v2  ;;  %5456 = verf.f32 %v2218_v41  ;;  %10017 = vst [vmem:[#allocation88_spill] sm:$0xff] %v7526_v63  ;;  %v10020_v18 = vld [vmem:[#allocation51_spill] sm:$0xff] }
 0x2e4   :  { %v3007_v43 = vsel %vm9604_vm15, %v10016_v7, 0.0  ;;  %v7528_v6 = vadd.s32 1, %v2912_v1  ;;  %v7530_v31 = vadd.s32 1, %v2913_v28  ;;  %v7532_v50 = vmul.f32 %v2277_v53, %v2181_v44 }
 0x2e5   :  { %v7535_v45 = vmul.f32 0.5, %v7122_v56  ;;  %v2221_v9 = vmul.f32 0.70710677, %v7150_v35  ;;  %v2882_v41 = vsel %vm2850_vm10, 1, %v9984_v15  ;;  %3045 = vadd.xlane.f32.xlu0 %v3007_v43  ;;  %v2278_v10 = vadd.f32 1.0, %v5449_v25  ;;  %v10023_v43 = vld [vmem:[#allocation10_spill] sm:$0xff]  ;;  %v7560_v1 = vpop.xlane.xlu1 %2547 }
 0x2e6   :  { %10018 = vst [vmem:[#allocation89_spill] sm:$0xff] %v7528_v6  ;;  %10019 = vst [vmem:[#allocation90_spill] sm:$0xff] %v7530_v31  ;;  %v2279_v7 = vadd.f32 1.0, %v5451_v23  ;;  %5458 = verf.f32 %v2219_v12  ;;  %v2222_v56 = vmul.f32 0.70710677, %v7153_v47  ;;  %vm2851_vm15 = vcmp.ge.f32.partialorder %v7518_v37, 0.0  ;;  %v7550_v12 = vpop.xlane.xlu0 %2545 }
 0x2e7   :  { %v5453_v3 = vpop.eup %5452  ;;  %5460 = verf.f32 %v2220_v38  ;;  %vm2852_vm8 = vcmp.ge.f32.partialorder %v7526_v63, 0.0  ;;  %vm9621_vm10 = vcmp.eq.s32.totalorder %v6762_v34, %v7528_v6  ;;  %vm9620_vm12 = vcmp.eq.s32.totalorder %v6762_v34, %v7530_v31  ;;  %10021 = vst [vmem:[#allocation91_spill] sm:$0xff] %v7550_v12  ;;  %v10022_v23 = vld [vmem:[#allocation8_spill] sm:$0xff]  ;;  %10024 = vst [vmem:[#allocation92_spill] sm:$0xff] %v7560_v1  ;;  %v10038_v37 = vld [vmem:[#allocation22_spill] sm:$0xff] }
 0x2e8   :  { %v5455_v28 = vpop.eup %5454  ;;  %v2914_v25 = vadd.s32 %v2882_v41, %v2818_v60  ;;  %v2280_v53 = vadd.f32 1.0, %v5453_v3  ;;  %5462 = verf.f32 %v2221_v9  ;;  %v3008_v38 = vsel %vm9621_vm10, %v10022_v23, 0.0  ;;  %v10025_v41 = vld [vmem:[#allocation52_spill] sm:$0xff] }
 0x2e9   :  { %v3009_v44 = vsel %vm9620_vm12, %v10023_v43, 0.0  ;;  %v7563_v2 = vmul.f32 %v2278_v10, %v7469_v42  ;;  %v7565_v60 = vmul.f32 %v2279_v7, %v2183_v32  ;;  %v2281_v3 = vadd.f32 1.0, %v5455_v28  ;;  %3047 = vadd.xlane.f32.xlu1 %v3008_v38  ;;  %v10027_v28 = vld [vmem:[#allocation53_spill] sm:$0xff] }
 0x2ea   :  { %v2883_v9 = vsel %vm2851_vm15, 1, %v9984_v15  ;;  %3049 = vadd.xlane.f32.xlu0 %v3009_v44  ;;  %v7570_v23 = vmul.f32 0.5, %v7125_v61  ;;  %v2223_v31 = vmul.f32 0.70710677, %v7174_v29  ;;  %v2884_v43 = vsel %vm2852_vm8, 1, %v9984_v15 }
 0x2eb   :  { %v7577_v42 = vmul.f32 0.5, %v7150_v35  ;;  %5464 = verf.f32 %v2222_v56  ;;  %v2224_v32 = vmul.f32 0.70710677, %v7178_v46  ;;  %v7580_v10 = vadd.s32 1, %v2914_v25  ;;  %v7599_v25 = vpop.xlane.xlu0 %2549 }
 0x2ec   :  { %v7583_v7 = vmul.f32 %v2280_v53, %v7492_v16  ;;  %v7587_v44 = vmul.f32 0.5, %v7153_v47  ;;  %v10028_v38 = vmul.u32 2, %v10010_v54  ;;  %v7591_v63 = vmul.f32 %v2281_v3, %v2185_v26  ;;  %10030 = vst [vmem:[#allocation94_spill] sm:$0xff] %v7599_v25  ;;  %v10031_v47 = vld [vmem:[#allocation21_spill] sm:$0xff]  ;;  %v7607_v3 = vpop.xlane.xlu1 %2551 }
 0x2ed   :  { %10026 = vst [vmem:[#allocation93_spill] sm:$0xff] %v7580_v10  ;;  %v5457_v40 = vpop.eup %5456  ;;  %v2225_v35 = vmul.f32 0.70710677, %v7200_v22  ;;  %vm9619_vm15 = vcmp.eq.s32.totalorder %v6762_v34, %v7580_v10  ;;  %v10029_v56 = vmul.u32 2, %v7092_v17  ;;  %5466 = verf.f32 %v2223_v31  ;;  %10033 = vst [vmem:[#allocation96_spill] sm:$0xff] %v7607_v3 }
 0x2ee   :  { %v2915_v6 = vadd.s32 %v2883_v9, %v10028_v38  ;;  %vm2853_vm8 = vcmp.ge.f32.partialorder %v7550_v12, 0.0  ;;  %v3010_v53 = vsel %vm9619_vm15, %v10031_v47, 0.0  ;;  %v10034_v38 = vld [vmem:[#allocation54_spill] sm:$0xff]  ;;  %v7611_v17 = vmul.f32 0.5, %v7174_v29 }
 0x2ef   :  { %v2916_v16 = vadd.s32 %v2884_v43, %v10029_v56  ;;  %5468 = verf.f32 %v2224_v32  ;;  %3051 = vadd.xlane.f32.xlu1 %v3010_v53  ;;  %v2282_v56 = vadd.f32 1.0, %v5457_v40  ;;  %v2226_v54 = vmul.f32 0.70710677, %v7204_v48  ;;  %v10036_v32 = vld [vmem:[#allocation23_spill] sm:$0xff] }
 0x2f0   :  { %v7605_v26 = vadd.s32 1, %v2915_v6  ;;  %v5459_v9 = vpop.eup %5458  ;;  %vm2854_vm15 = vcmp.ge.f32.partialorder %v7560_v1, 0.0  ;;  %5470 = verf.f32 %v2225_v35  ;;  %v2227_v6 = vmul.f32 0.70710677, %v7229_v13  ;;  %v10037_v35 = vld [vmem:[#allocation55_spill] sm:$0xff]  ;;  %v7645_v10 = vpop.xlane.xlu1 %2555 }
 0x2f1   :  { %v7613_v31 = vadd.s32 1, %v2916_v16  ;;  %v5461_v43 = vpop.eup %5460  ;;  %v2885_v29 = vsel %vm2853_vm8, 1, %v9984_v15  ;;  %v2283_v53 = vadd.f32 1.0, %v5459_v9  ;;  %v7628_v61 = vmul.f32 0.5, %v7178_v46  ;;  %v7641_v46 = vpop.xlane.xlu0 %2553  ;;  %10041 = vst [vmem:[#allocation98_spill] sm:$0xff] %v7645_v10 }
 0x2f2   :  { %10032 = vst [vmem:[#allocation95_spill] sm:$0xff] %v7605_v26  ;;  %vm9648_vm12 = vcmp.eq.s32.totalorder %v6762_v34, %v7605_v26  ;;  %v5463_v40 = vpop.eup %5462  ;;  %v2228_v47 = vmul.f32 0.70710677, %v7231_v20  ;;  %v2229_v1 = vmul.f32 0.70710677, %v7253_v27  ;;  %v2886_v12 = vsel %vm2854_vm15, 1, %v9984_v15 }
 0x2f3   :  { %10035 = vst [vmem:[#allocation97_spill] sm:$0xff] %v7613_v31  ;;  %v3011_v16 = vsel %vm9648_vm12, %v10036_v32, 0.0  ;;  %vm9643_vm10 = vcmp.eq.s32.totalorder %v6762_v34, %v7613_v31  ;;  %v2284_v32 = vadd.f32 1.0, %v5461_v43  ;;  %5472 = verf.f32 %v2226_v54  ;;  %10039 = vst [vmem:[#allocation55_spill] sm:$0xff] %v7641_v46 }
 0x2f4   :  { %3053 = vadd.xlane.f32.xlu0 %v3011_v16  ;;  %v3012_v9 = vsel %vm9643_vm10, %v10038_v37, 0.0  ;;  %vm2855_vm8 = vcmp.ge.f32.partialorder %v7599_v25, 0.0  ;;  %v10040_v16 = vmul.u32 2, %v10013_v21  ;;  %v7648_v8 = vmul.f32 %v2282_v56, %v7515_v62  ;;  %v10045_v21 = vld [vmem:[#allocation57_spill] sm:$0xff]  ;;  %v10051_v37 = vld [vmem:[#allocation59_spill] sm:$0xff] }
 0x2f5   :  { %3055 = vadd.xlane.f32.xlu1 %v3012_v9  ;;  %v5465_v57 = vpop.eup %5464  ;;  %v2285_v24 = vadd.f32 1.0, %v5463_v40  ;;  %v7651_v31 = vmul.f32 0.5, %v7200_v22  ;;  %5474 = verf.f32 %v2227_v6  ;;  %v7654_v54 = vmul.f32 %v2283_v53, %v7535_v45  ;;  %v10046_v40 = vld [vmem:[#allocation25_spill] sm:$0xff] }
 0x2f6   :  { %v2917_v26 = vadd.s32 %v2885_v29, %v10040_v16  ;;  %5476 = verf.f32 %v2228_v47  ;;  %v10043_v9 = vmul.u32 2, %v7115_v59  ;;  %v10044_v16 = vld [vmem:[#allocation56_spill] sm:$0xff]  ;;  %v2887_v22 = vsel %vm2855_vm8, 1, %v9984_v15 }
 0x2f7   :  { %5478 = verf.f32 %v2229_v1  ;;  %v5467_v62 = vpop.eup %5466  ;;  %v7666_v56 = vmul.f32 %v2284_v32, %v7570_v23  ;;  %v2286_v45 = vadd.f32 1.0, %v5465_v57  ;;  %v7669_v47 = vmul.f32 0.5, %v7204_v48  ;;  %v7686_v48 = vpop.xlane.xlu0 %2557 }
 0x2f8   :  { %v7656_v43 = vadd.s32 1, %v2917_v26  ;;  %v2918_v29 = vadd.s32 %v2886_v12, %v10043_v9  ;;  %v7674_v26 = vmul.f32 %v2285_v24, %v7577_v42  ;;  %v7677_v1 = vmul.f32 0.5, %v7229_v13  ;;  %10047 = vst [vmem:[#allocation56_spill] sm:$0xff] %v7686_v48  ;;  %v7692_v42 = vpop.xlane.xlu1 %2559  ;;  %v10050_v9 = vld [vmem:[#allocation58_spill] sm:$0xff] }
 0x2f9   :  { %v5469_v12 = vpop.eup %5468  ;;  %v2230_v6 = vmul.f32 0.70710677, %v7256_v5  ;;  %vm2856_vm8 = vcmp.ge.f32.partialorder %v7607_v3, 0.0  ;;  %vm2857_vm10 = vcmp.ge.f32.partialorder %v7641_v46, 0.0  ;;  %v10049_v24 = vmul.u32 2, %v10020_v18  ;;  %v10055_v18 = vld [vmem:[#allocation60_spill] sm:$0xff] }
 0x2fa   :  { %10042 = vst [vmem:[#allocation99_spill] sm:$0xff] %v7656_v43  ;;  %vm9647_vm15 = vcmp.eq.s32.totalorder %v6762_v34, %v7656_v43  ;;  %v7688_v23 = vadd.s32 1, %v2918_v29  ;;  %v5471_v32 = vpop.eup %5470  ;;  %v2287_v53 = vadd.f32 1.0, %v5467_v62  ;;  %v2231_v43 = vmul.f32 0.70710677, %v7277_v14  ;;  %v10056_v3 = vld [vmem:[#allocation17_spill] sm:$0xff] }
 0x2fb   :  { %v3013_v57 = vsel %vm9647_vm15, %v10046_v40, 0.0  ;;  %v2919_v13 = vadd.s32 %v2887_v22, %v10049_v24  ;;  %v7698_v59 = vmul.f32 %v2286_v45, %v7587_v44  ;;  %5480 = verf.f32 %v2230_v6  ;;  %v10053_v24 = vld [vmem:[#allocation13_spill] sm:$0xff] }
 0x2fc   :  { %3057 = vadd.xlane.f32.xlu0 %v3013_v57  ;;  %10048 = vst [vmem:[#allocation57_spill] sm:$0xff] %v7688_v23  ;;  %v2288_v57 = vadd.f32 1.0, %v5469_v12  ;;  %vm9665_vm15 = vcmp.eq.s32.totalorder %v6762_v34, %v7688_v23  ;;  %v2888_v22 = vsel %vm2856_vm8, 1, %v9984_v15  ;;  %v2889_v62 = vsel %vm2857_vm10, 1, %v9984_v15  ;;  %v7730_v23 = vpop.xlane.xlu0 %2561  ;;  %v7736_v25 = vpop.xlane.xlu1 %2563 }
 0x2fd   :  { %v7702_v29 = vadd.s32 1, %v2919_v13  ;;  %v3014_v44 = vsel %vm9665_vm15, %v10053_v24, 0.0  ;;  %v5473_v45 = vpop.eup %5472  ;;  %v2289_v12 = vadd.f32 1.0, %v5471_v32  ;;  %v2196_v40 = vmul.f32 0.5, %v7231_v20 }
 0x2fe   :  { %v2197_v13 = vmul.f32 0.5, %v7253_v27  ;;  %3059 = vadd.xlane.f32.xlu1 %v3014_v44  ;;  %v7719_v36 = vmul.f32 %v2287_v53, %v7611_v17  ;;  %5482 = verf.f32 %v2231_v43  ;;  %v7727_v20 = vmul.f32 %v2288_v57, %v7628_v61  ;;  %v10057_v27 = vld [vmem:[#allocation61_spill] sm:$0xff] }
 0x2ff   :  { %10052 = vst [vmem:[#allocation58_spill] sm:$0xff] %v7702_v29  ;;  %vm9664_vm12 = vcmp.eq.s32.totalorder %v6762_v34, %v7702_v29  ;;  %v5475_v6 = vpop.eup %5474  ;;  %v10058_v17 = vmul.u32 2, %v10025_v41  ;;  %v10059_v46 = vmul.u32 2, %v10027_v28  ;;  %v2290_v29 = vadd.f32 1.0, %v5473_v45  ;;  %v10063_v45 = vld [vmem:[#allocation64_spill] sm:$0xff] }
 0x300   :  { %10054 = vst [vmem:[#allocation59_spill] sm:$0xff] %v7719_v36  ;;  %v3015_v32 = vsel %vm9664_vm12, %v10056_v3, 0.0  ;;  %v5477_v24 = vpop.eup %5476  ;;  %v2198_v3 = vmul.f32 0.5, %v7256_v5  ;;  %vm2858_vm10 = vcmp.ge.f32.partialorder %v7645_v10, 0.0  ;;  %vm2859_vm8 = vcmp.ge.f32.partialorder %v7686_v48, 0.0 }
 0x301   :  { %3061 = vadd.xlane.f32.xlu0 %v3015_v32  ;;  %v2920_v53 = vadd.s32 %v2888_v22, %v10058_v17  ;;  %v2921_v43 = vadd.s32 %v2889_v62, %v10059_v46  ;;  %v5479_v36 = vpop.eup %5478  ;;  %v7742_v61 = vmul.f32 %v2289_v12, %v7651_v31  ;;  %v2291_v57 = vadd.f32 1.0, %v5475_v6  ;;  %v10062_v46 = vld [vmem:[#allocation62_spill] sm:$0xff] }
 0x302   :  { %v2292_v17 = vadd.f32 1.0, %v5477_v24  ;;  %v7750_v44 = vmul.f32 0.5, %v7277_v14  ;;  %v2232_v5 = vmul.f32 0.70710677, %v10063_v45  ;;  %v2293_v28 = vadd.f32 1.0, %v5479_v36  ;;  %v10065_v6 = vld [vmem:[#allocation26_spill] sm:$0xff]  ;;  %v7778_v24 = vpop.xlane.xlu0 %2565 }
 0x303   :  { %v7744_v32 = vadd.s32 1, %v2920_v53  ;;  %v7746_v22 = vadd.s32 1, %v2921_v43  ;;  %v2890_v41 = vsel %vm2858_vm10, 1, %v9984_v15  ;;  %v2891_v48 = vsel %vm2859_vm8, 1, %v9984_v15 }
 0x304   :  { %v7758_v31 = vmul.f32 %v2290_v29, %v7669_v47  ;;  %v7768_v36 = vmul.f32 %v2291_v57, %v7677_v1  ;;  %v7772_v62 = vmul.f32 0.5, %v10063_v45  ;;  %v10068_v47 = vld [vmem:[#allocation30_spill] sm:$0xff]  ;;  %vm2860_vm10 = vcmp.ge.f32.partialorder %v7692_v42, 0.0 }
 0x305   :  { %10060 = vst [vmem:[#allocation60_spill] sm:$0xff] %v7744_v32  ;;  %10061 = vst [vmem:[#allocation100_spill] sm:$0xff] %v7746_v22  ;;  %vm9674_vm12 = vcmp.eq.s32.totalorder %v6762_v34, %v7744_v32  ;;  %vm9673_vm15 = vcmp.eq.s32.totalorder %v6762_v34, %v7746_v22  ;;  %v5481_v32 = vpop.eup %5480  ;;  %vm2861_vm8 = vcmp.ge.f32.partialorder %v7730_v23, 0.0  ;;  %v10069_v1 = vmul.u32 2, %v10034_v38 }
 0x306   :  { %v3016_v14 = vsel %vm9674_vm12, %v10065_v6, 0.0  ;;  %10067 = vst [vmem:[#allocation64_spill] sm:$0xff] %v7772_v62  ;;  %v3017_v29 = vsel %vm9673_vm15, %v10068_v47, 0.0  ;;  %v7780_v6 = vpop.xlane.xlu1 %2567  ;;  %v10070_v45 = vmul.u32 2, %v10037_v35  ;;  %v7788_v43 = vmul.f32 %v2292_v17, %v2196_v40  ;;  %v10071_v47 = vld [vmem:[#allocation66_spill] sm:$0xff]  ;;  %v10072_v62 = vld [vmem:[#allocation67_spill] sm:$0xff] }
 0x307   :  { %3063 = vadd.xlane.f32.xlu1 %v3016_v14  ;;  %3065 = vadd.xlane.f32.xlu0 %v3017_v29  ;;  %v2922_v57 = vadd.s32 %v2890_v41, %v10069_v1  ;;  %v7790_v22 = vmul.f32 %v2293_v28, %v2197_v13  ;;  %5484 = verf.f32 %v2232_v5  ;;  %v7797_v29 = vsel %vm2072_vm1, %v7403_v52, 0.0  ;;  %v10075_v5 = vld [vmem:[#allocation68_spill] sm:$0xff]  ;;  %v10076_v1 = vld [vmem:[#allocation29_spill] sm:$0xff] }
 0x308   :  { %v2923_v14 = vadd.s32 %v2891_v48, %v10070_v45  ;;  %v5483_v53 = vpop.eup %5482  ;;  %v2294_v48 = vadd.f32 1.0, %v5481_v32  ;;  %v2892_v40 = vsel %vm2860_vm10, 1, %v9984_v15  ;;  %v2893_v28 = vsel %vm2861_vm8, 1, %v9984_v15  ;;  %v10077_v45 = vld [vmem:[#allocation31_spill] sm:$0xff] }
 0x309   :  { %v7799_v38 = vadd.s32 1, %v2922_v57  ;;  %v7808_v13 = vsel %vm2072_vm1, %v7365_v51, 0.0  ;;  %v7817_v52 = vsel %vm2072_vm1, %v7413_v39, 0.0  ;;  %v7822_v32 = vsel %vm2072_vm1, %v7429_v49, 0.0  ;;  %v7833_v39 = vpop.xlane.xlu0 %2569 }
 0x30a   :  { %v7801_v41 = vadd.s32 1, %v2923_v14  ;;  %10074 = vst [vmem:[#allocation102_spill] sm:$0xff] %v7822_v32  ;;  %v2295_v17 = vadd.f32 1.0, %v5483_v53  ;;  %v7835_v12 = vpop.xlane.xlu1 %2571  ;;  %vm2862_vm10 = vcmp.ge.f32.partialorder %v7736_v25, 0.0  ;;  %vm2863_vm8 = vcmp.ge.f32.partialorder %v7778_v24, 0.0  ;;  %v10080_v32 = vld [vmem:[#allocation69_spill] sm:$0xff] }
 0x30b   :  { %vm9682_vm15 = vcmp.eq.s32.totalorder %v6762_v34, %v7799_v38  ;;  %v10078_v49 = vmul.u32 2, %v10044_v16  ;;  %v10079_v51 = vmul.u32 2, %v10045_v21 }
 0x30c   :  { %10073 = vst [vmem:[#allocation101_spill] sm:$0xff] %v7801_v41  ;;  %vm9677_vm12 = vcmp.eq.s32.totalorder %v6762_v34, %v7801_v41  ;;  %v3018_v57 = vsel %vm9682_vm15, %v10076_v1, 0.0  ;;  %v7843_v1 = vmul.f32 %v2294_v48, %v2198_v3  ;;  %v7849_v41 = vsel %vm2072_vm1, %v7440_v58, 0.0 }
 0x30d   :  { %v3019_v14 = vsel %vm9677_vm12, %v10077_v45, 0.0  ;;  %3067 = vadd.xlane.f32.xlu1 %v3018_v57  ;;  %v2924_v53 = vadd.s32 %v2892_v40, %v10078_v49  ;;  %v2925_v10 = vadd.s32 %v2893_v28, %v10079_v51  ;;  %10081 = vst [vmem:[#allocation103_spill] sm:$0xff] %v7849_v41  ;;  %v7854_v57 = vsel %vm2072_vm1, %v7445_v0, 0.0  ;;  %v10088_v51 = vld [vmem:[#allocation20_spill] sm:$0xff]  ;;  %v10089_v49 = vld [vmem:[#allocation27_spill] sm:$0xff] }
 0x30e   :  { %3069 = vadd.xlane.f32.xlu0 %v3019_v14  ;;  %10082 = vst [vmem:[#allocation104_spill] sm:$0xff] %v7854_v57  ;;  %v7863_v3 = vsel %vm2072_vm1, %v7464_v11, 0.0  ;;  %v7868_v48 = vsel %vm2072_vm1, %v7477_v55, 0.0  ;;  %v2894_v58 = vsel %vm2862_vm10, 1, %v9984_v15  ;;  %v2895_v28 = vsel %vm2863_vm8, 1, %v9984_v15 }
 0x30f   :  { %v7856_v14 = vadd.s32 1, %v2924_v53  ;;  %v7858_v40 = vadd.s32 1, %v2925_v10  ;;  %10083 = vst [vmem:[#allocation105_spill] sm:$0xff] %v7863_v3  ;;  %10084 = vst [vmem:[#allocation106_spill] sm:$0xff] %v7868_v48  ;;  %v7875_v0 = vsel %vm2072_vm1, %v7484_v33, 0.0  ;;  %v7880_v10 = vsel %vm2072_vm1, %v7498_v19, 0.0  ;;  %v7902_v53 = vpop.xlane.xlu1 %2575 }
 0x310   :  { %10085 = vst [vmem:[#allocation107_spill] sm:$0xff] %v7875_v0  ;;  %10086 = vst [vmem:[#allocation108_spill] sm:$0xff] %v7880_v10  ;;  %v2327_v11 = vmul.f32 %v2295_v17, %v7750_v44  ;;  %v7890_v55 = vsel %vm2072_vm1, %v7501_v30, 0.0  ;;  %v7900_v17 = vpop.xlane.xlu0 %2573  ;;  %v7907_v30 = vsel %vm2072_vm1, %v7512_v4, 0.0  ;;  %v7912_v45 = vsel %vm2072_vm1, %v7532_v50, 0.0  ;;  %v10127_v3 = vld [vmem:[#allocation78_spill] sm:$0xff] }
 0x311   :  { %vm9679_vm12 = vcmp.eq.s32.totalorder %v6762_v34, %v7856_v14  ;;  %vm9678_vm10 = vcmp.eq.s32.totalorder %v6762_v34, %v7858_v40  ;;  %10087 = vst [vmem:[#allocation109_spill] sm:$0xff] %v7890_v55  ;;  %v5485_v33 = vpop.eup %5484  ;;  %10090 = vst [vmem:[#allocation110_spill] sm:$0xff] %v7907_v30  ;;  %vm2864_vm8 = vcmp.ge.f32.partialorder %v7780_v6, 0.0  ;;  %v10093_v55 = vmul.u32 2, %v10051_v37 }
 0x312   :  { %v3020_v19 = vsel %vm9679_vm12, %v10088_v51, 0.0  ;;  %v3021_v44 = vsel %vm9678_vm10, %v10089_v49, 0.0  ;;  %10091 = vst [vmem:[#allocation111_spill] sm:$0xff] %v7912_v45  ;;  %v10092_v49 = vmul.u32 2, %v10050_v9  ;;  %v7922_v4 = vsel %vm2072_vm1, %v7563_v2, 0.0 }
 0x313   :  { %3071 = vadd.xlane.f32.xlu1 %v3020_v19  ;;  %3073 = vadd.xlane.f32.xlu0 %v3021_v44  ;;  %v2927_v10 = vadd.s32 %v2895_v28, %v10093_v55  ;;  %10094 = vst [vmem:[#allocation112_spill] sm:$0xff] %v7922_v4  ;;  %vm2865_vm10 = vcmp.ge.f32.partialorder %v7833_v39, 0.0  ;;  %v7928_v50 = vsel %vm2072_vm1, %v7565_v60, 0.0  ;;  %v7933_v19 = vsel %vm2072_vm1, %v7583_v7, 0.0  ;;  %v10105_v44 = vld [vmem:[#allocation71_spill] sm:$0xff] }
 0x314   :  { %v2926_v51 = vadd.s32 %v2894_v58, %v10092_v49  ;;  %10095 = vst [vmem:[#allocation113_spill] sm:$0xff] %v7928_v50  ;;  %10096 = vst [vmem:[#allocation114_spill] sm:$0xff] %v7933_v19  ;;  %v7938_v58 = vsel %vm2072_vm1, %v7591_v63, 0.0  ;;  %v7942_v2 = vsel %vm2072_vm1, %v2327_v11, 0.0  ;;  %v7951_v60 = vsel %vm2072_vm1, %v7648_v8, 0.0  ;;  %v10110_v19 = vld [vmem:[#allocation59_spill] sm:$0xff] }
 0x315   :  { %10097 = vst [vmem:[#allocation115_spill] sm:$0xff] %v7938_v58  ;;  %10098 = vst [vmem:[#allocation116_spill] sm:$0xff] %v7942_v2  ;;  %v7946_v55 = vadd.s32 1, %v2927_v10  ;;  %v2896_v7 = vsel %vm2864_vm8, 1, %v9984_v15  ;;  %v7957_v63 = vsel %vm2072_vm1, %v7654_v54, 0.0  ;;  %v7962_v11 = vsel %vm2072_vm1, %v7666_v56, 0.0 }
 0x316   :  { %v7944_v28 = vadd.s32 1, %v2926_v51  ;;  %10100 = vst [vmem:[#allocation118_spill] sm:$0xff] %v7951_v60  ;;  %10101 = vst [vmem:[#allocation119_spill] sm:$0xff] %v7957_v63  ;;  %v7967_v10 = vsel %vm2072_vm1, %v7674_v26, 0.0  ;;  %v10104_v51 = vld [vmem:[#allocation70_spill] sm:$0xff]  ;;  %v2897_v49 = vsel %vm2865_vm10, 1, %v9984_v15  ;;  %v7984_v63 = vpop.xlane.xlu0 %2577  ;;  %v7986_v60 = vpop.xlane.xlu1 %2579 }
 0x317   :  { %10099 = vst [vmem:[#allocation117_spill] sm:$0xff] %v7946_v55  ;;  %10102 = vst [vmem:[#allocation120_spill] sm:$0xff] %v7962_v11  ;;  %v2617_v8 = vmul.f32 0.70710677, %v10104_v51  ;;  %vm9680_vm12 = vcmp.eq.s32.totalorder %v6762_v34, %v7946_v55  ;;  %v2296_v54 = vadd.f32 1.0, %v5485_v33  ;;  %v10106_v56 = vld [vmem:[#allocation33_spill] sm:$0xff] }
 0x318   :  { %10103 = vst [vmem:[#allocation121_spill] sm:$0xff] %v7967_v10  ;;  %vm9681_vm8 = vcmp.eq.s32.totalorder %v6762_v34, %v7944_v28  ;;  %v2618_v2 = vmul.f32 0.70710677, %v10105_v44  ;;  %v10107_v26 = vld [vmem:[#allocation35_spill] sm:$0xff]  ;;  %vm2866_vm10 = vcmp.ge.f32.partialorder %v7835_v12, 0.0  ;;  %v10108_v33 = vmul.u32 2, %v10055_v18 }
 0x319   :  { %v3022_v11 = vsel %vm9681_vm8, %v10106_v56, 0.0  ;;  %v3023_v10 = vsel %vm9680_vm12, %v10107_v26, 0.0  ;;  %v7994_v56 = vsel %vm2072_vm1, %v7698_v59, 0.0  ;;  %v7999_v26 = vsel %vm2072_vm1, %v10110_v19, 0.0 }
 0x31a   :  { %3075 = vadd.xlane.f32.xlu1 %v3022_v11  ;;  %3077 = vadd.xlane.f32.xlu0 %v3023_v10  ;;  %v2928_v58 = vadd.s32 %v2896_v7, %v10108_v33  ;;  %10109 = vst [vmem:[#allocation70_spill] sm:$0xff] %v7994_v56  ;;  %10111 = vst [vmem:[#allocation71_spill] sm:$0xff] %v7999_v26  ;;  %vm2867_vm12 = vcmp.ge.f32.partialorder %v7900_v17, 0.0  ;;  %v10112_v50 = vmul.u32 2, %v10057_v27  ;;  %v8007_v11 = vsel %vm2072_vm1, %v7727_v20, 0.0  ;;  %v10115_v7 = vld [vmem:[#allocation72_spill] sm:$0xff] }
 0x31b   :  { %10113 = vst [vmem:[#allocation59_spill] sm:$0xff] %v8007_v11  ;;  %v8012_v59 = vsel %vm2072_vm1, %v7742_v61, 0.0  ;;  %5486 = verf.f32 %v2617_v8  ;;  %v2619_v10 = vmul.f32 0.70710677, %v10115_v7  ;;  %v8020_v33 = vsel %vm2072_vm1, %v7758_v31, 0.0  ;;  %v10120_v31 = vld [vmem:[#allocation34_spill] sm:$0xff] }
 0x31c   :  { %v2929_v4 = vadd.s32 %v2897_v49, %v10112_v50  ;;  %10114 = vst [vmem:[#allocation122_spill] sm:$0xff] %v8012_v59  ;;  %v8015_v19 = vadd.s32 1, %v2928_v58  ;;  %10117 = vst [vmem:[#allocation123_spill] sm:$0xff] %v8020_v33  ;;  %5488 = verf.f32 %v2618_v2  ;;  %v2898_v50 = vsel %vm2866_vm10, 1, %v9984_v15  ;;  %v10119_v58 = vld [vmem:[#allocation75_spill] sm:$0xff]  ;;  %v8040_v49 = vpop.xlane.xlu1 %2583  ;;  %v10122_v59 = vld [vmem:[#allocation77_spill] sm:$0xff] }
 0x31d   :  { %vm2868_vm8 = vcmp.ge.f32.partialorder %v7902_v53, 0.0  ;;  %v2899_v61 = vsel %vm2867_vm12, 1, %v9984_v15  ;;  %vm2869_vm15 = vcmp.ge.f32.partialorder %v7984_v63, 0.0  ;;  %vm2870_vm9 = vcmp.ge.f32.partialorder %v7986_v60, 0.0  ;;  %v10123_v56 = vld [vmem:[#allocation36_spill] sm:$0xff] }
 0x31e   :  { %10116 = vst [vmem:[#allocation72_spill] sm:$0xff] %v8015_v19  ;;  %v8024_v20 = vadd.s32 1, %v2929_v4  ;;  %vm2992_vm2 = vcmp.eq.s32.totalorder %v6762_v34, %v8015_v19  ;;  %v2620_v8 = vmul.f32 0.70710677, %v10119_v58  ;;  %v8038_v4 = vpop.xlane.xlu0 %2581  ;;  %v8045_v33 = vsel %vm2072_vm1, %v7768_v36, 0.0 }
 0x31f   :  { %v3024_v2 = vsel %vm2992_vm2, %v10120_v31, 0.0  ;;  %10121 = vst [vmem:[#allocation75_spill] sm:$0xff] %v8045_v33  ;;  %5490 = verf.f32 %v2619_v10  ;;  %v2621_v11 = vmul.f32 0.70710677, %v10122_v59  ;;  %v2900_v26 = vsel %vm2868_vm8, 1, %v9984_v15  ;;  %v10125_v33 = vld [vmem:[#allocation63_spill] sm:$0xff] }
 0x320   :  { %10118 = vst [vmem:[#allocation124_spill] sm:$0xff] %v8024_v20  ;;  %vm2993_vm10 = vcmp.eq.s32.totalorder %v6762_v34, %v8024_v20  ;;  %3079 = vadd.xlane.f32.xlu1 %v3024_v2  ;;  %v2901_v45 = vsel %vm2869_vm15, 1, %v9984_v15  ;;  %v2902_v30 = vsel %vm2870_vm9, 1, %v9984_v15  ;;  %v10124_v0 = vmul.u32 2, %v10062_v46 }
 0x321   :  { %v3025_v31 = vsel %vm2993_vm10, %v10123_v56, 0.0  ;;  %v10126_v10 = vmul.u32 2, %v10125_v33  ;;  %v2622_v57 = vmul.f32 0.70710677, %v10127_v3  ;;  %vm2871_vm12 = vcmp.ge.f32.partialorder %v8038_v4, 0.0 }
 0x322   :  { %3081 = vadd.xlane.f32.xlu0 %v3025_v31  ;;  %v2930_v36 = vadd.s32 %v2898_v50, %v10124_v0  ;;  %vm2872_vm8 = vcmp.ge.f32.partialorder %v8040_v49, 0.0  ;;  %v8065_v2 = vsel %vm2072_vm1, %v7788_v43, 0.0  ;;  %v10129_v31 = vld [vmem:[#allocation64_spill] sm:$0xff]  ;;  %5492 = verf.f32 %v2620_v8  ;;  %v10132_v50 = vld [vmem:[#allocation79_spill] sm:$0xff]  ;;  %v10137_v8 = vld [vmem:[#allocation82_spill] sm:$0xff] }
 0x323   :  { %v2931_v48 = vadd.s32 %v2899_v61, %v10126_v10  ;;  %10128 = vst [vmem:[#allocation77_spill] sm:$0xff] %v8065_v2  ;;  %v2328_v56 = vmul.f32 %v2296_v54, %v10129_v31  ;;  %v2623_v61 = vmul.f32 0.70710677, %v10132_v50  ;;  %v10133_v10 = vld [vmem:[#allocation65_spill] sm:$0xff]  ;;  %v10135_v19 = vmul.u32 2, %v10071_v47  ;;  %v10138_v31 = vld [vmem:[#allocation32_spill] sm:$0xff] }
 0x324   :  { %v8068_v41 = vadd.s32 1, %v2930_v36  ;;  %v10134_v33 = vmul.u32 2, %v10133_v10  ;;  %v10136_v27 = vmul.u32 2, %v10072_v62  ;;  %5494 = verf.f32 %v2621_v11  ;;  %v10140_v11 = vld [vmem:[#allocation38_spill] sm:$0xff] }
 0x325   :  { %v8070_v0 = vadd.s32 1, %v2931_v48  ;;  %v2933_v46 = vadd.s32 %v2901_v45, %v10135_v19  ;;  %v2903_v43 = vsel %vm2871_vm12, 1, %v9984_v15  ;;  %v2904_v48 = vsel %vm2872_vm8, 1, %v9984_v15  ;;  %v5487_v54 = vpop.eup %5486 }
 0x326   :  { %10130 = vst [vmem:[#allocation78_spill] sm:$0xff] %v8068_v41  ;;  %v2932_v20 = vadd.s32 %v2900_v26, %v10134_v33  ;;  %v2934_v55 = vadd.s32 %v2902_v30, %v10136_v27  ;;  %vm2994_vm9 = vcmp.eq.s32.totalorder %v6762_v34, %v8068_v41  ;;  %5496 = verf.f32 %v2622_v57  ;;  %v5489_v27 = vpop.eup %5488  ;;  %v10139_v30 = vld [vmem:[#allocation83_spill] sm:$0xff] }
 0x327   :  { %10131 = vst [vmem:[#allocation64_spill] sm:$0xff] %v8070_v0  ;;  %v2624_v36 = vmul.f32 0.70710677, %v10137_v8  ;;  %v3026_v45 = vsel %vm2994_vm9, %v10138_v31, 0.0  ;;  %vm9695_vm15 = vcmp.eq.s32.totalorder %v6762_v34, %v8070_v0  ;;  %v2625_v26 = vmul.f32 0.70710677, %v10139_v30 }
 0x328   :  { %3083 = vadd.xlane.f32.xlu1 %v3026_v45  ;;  %v3027_v19 = vsel %vm9695_vm15, %v10140_v11, 0.0  ;;  %v8095_v57 = vadd.s32 1, %v2932_v20  ;;  %v8097_v33 = vadd.s32 1, %v2933_v46  ;;  %5498 = verf.f32 %v2623_v61  ;;  %v10155_v11 = vld [vmem:[#allocation87_spill] sm:$0xff] }
 0x329   :  { %3085 = vadd.xlane.f32.xlu0 %v3027_v19  ;;  %v8099_v2 = vadd.s32 1, %v2934_v55  ;;  %v10144_v31 = vmul.u32 2, %v10075_v5  ;;  %v10145_v47 = vmul.u32 2, %v10080_v32  ;;  %v2585_v45 = vmul.f32 0.5, %v10104_v51  ;;  %v5491_v20 = vpop.eup %5490 }
 0x32a   :  { %10141 = vst [vmem:[#allocation79_spill] sm:$0xff] %v8095_v57  ;;  %10142 = vst [vmem:[#allocation82_spill] sm:$0xff] %v8097_v33  ;;  %vm2996_vm12 = vcmp.eq.s32.totalorder %v6762_v34, %v8095_v57  ;;  %v8111_v46 = vsel %vm2072_vm1, %v7790_v22, 0.0  ;;  %v8116_v55 = vsel %vm2072_vm1, %v7843_v1, 0.0  ;;  %v2681_v61 = vadd.f32 1.0, %v5487_v54  ;;  %v10149_v22 = vld [vmem:[#allocation40_spill] sm:$0xff] }
 0x32b   :  { %10143 = vst [vmem:[#allocation83_spill] sm:$0xff] %v8099_v2  ;;  %v2935_v62 = vadd.s32 %v2903_v43, %v10144_v31  ;;  %v2936_v10 = vadd.s32 %v2904_v48, %v10145_v47  ;;  %10146 = vst [vmem:[#allocation125_spill] sm:$0xff] %v8111_v46  ;;  %5500 = verf.f32 %v2624_v36  ;;  %v10148_v43 = vld [vmem:[#allocation37_spill] sm:$0xff]  ;;  %vm9697_vm8 = vcmp.eq.s32.totalorder %v6762_v34, %v8097_v33  ;;  %v10151_v36 = vld [vmem:[#allocation39_spill] sm:$0xff] }
 0x32c   :  { %10147 = vst [vmem:[#allocation126_spill] sm:$0xff] %v8116_v55  ;;  %v3028_v47 = vsel %vm2996_vm12, %v10148_v43, 0.0  ;;  %v2682_v51 = vadd.f32 1.0, %v5489_v27  ;;  %5502 = verf.f32 %v2625_v26  ;;  %v3029_v1 = vsel %vm9697_vm8, %v10149_v22, 0.0  ;;  %v10150_v48 = vld [vmem:[#allocation85_spill] sm:$0xff]  ;;  %v5493_v26 = vpop.eup %5492 }
 0x32d   :  { %3087 = vadd.xlane.f32.xlu1 %v3028_v47  ;;  %vm9696_vm15 = vcmp.eq.s32.totalorder %v6762_v34, %v8099_v2  ;;  %v2626_v54 = vmul.f32 0.70710677, %v10150_v48  ;;  %3089 = vadd.xlane.f32.xlu0 %v3029_v1  ;;  %v8135_v19 = vadd.s32 1, %v2935_v62  ;;  %v8137_v27 = vadd.s32 1, %v2936_v10  ;;  %v10160_v2 = vld [vmem:[#allocation6_spill] sm:$0xff] }
 0x32e   :  { %v3030_v31 = vsel %vm9696_vm15, %v10151_v36, 0.0  ;;  %v8141_v47 = vsel %vm2072_vm1, %v2328_v56, 0.0  ;;  %v2586_v22 = vmul.f32 0.5, %v10105_v44  ;;  %v2587_v43 = vmul.f32 0.5, %v10115_v7  ;;  %v5495_v62 = vpop.eup %5494  ;;  %v10157_v56 = vld [vmem:[#allocation88_spill] sm:$0xff]  ;;  %v10158_v44 = vld [vmem:[#allocation41_spill] sm:$0xff] }
 0x32f   :  { %10152 = vst [vmem:[#allocation85_spill] sm:$0xff] %v8135_v19  ;;  %10153 = vst [vmem:[#allocation127_spill] sm:$0xff] %v8137_v27  ;;  %v2627_v1 = vmul.f32 0.70710677, %v10155_v11  ;;  %v2713_v55 = vmul.f32 %v2681_v61, %v2585_v45  ;;  %v2683_v46 = vadd.f32 1.0, %v5491_v20  ;;  %vm2999_vm15 = vcmp.eq.s32.totalorder %v6762_v34, %v8135_v19  ;;  %v10159_v61 = vld [vmem:[#allocation91_spill] sm:$0xff] }
 0x330   :  { %10154 = vst [vmem:[#allocation128_spill] sm:$0xff] %v8141_v47  ;;  %vm3000_vm8 = vcmp.eq.s32.totalorder %v6762_v34, %v8137_v27  ;;  %v2714_v10 = vmul.f32 %v2682_v51, %v2586_v22  ;;  %v2628_v47 = vmul.f32 0.70710677, %v10157_v56  ;;  %v3031_v7 = vsel %vm2999_vm15, %v10158_v44, 0.0  ;;  %v5497_v45 = vpop.eup %5496 }
 0x331   :  { %3091 = vadd.xlane.f32.xlu1 %v3030_v31  ;;  %v2588_v20 = vmul.f32 0.5, %v10119_v58  ;;  %5504 = verf.f32 %v2626_v54  ;;  %v2629_v5 = vmul.f32 0.70710677, %v10159_v61  ;;  %3093 = vadd.xlane.f32.xlu0 %v3031_v7  ;;  %v3032_v51 = vsel %vm3000_vm8, %v10160_v2, 0.0  ;;  %v10164_v7 = vld [vmem:[#allocation92_spill] sm:$0xff] }
 0x332   :  { %v2589_v22 = vmul.f32 0.5, %v10122_v59  ;;  %5506 = verf.f32 %v2627_v1  ;;  %v5499_v44 = vpop.eup %5498  ;;  %v2745_v58 = vsel %vm2457_vm3, %v2713_v55, 0.0  ;;  %v2715_v54 = vmul.f32 %v2683_v46, %v2587_v43  ;;  %v10166_v59 = vld [vmem:[#allocation94_spill] sm:$0xff]  ;;  %v10167_v43 = vld [vmem:[#allocation80_spill] sm:$0xff] }
 0x333   :  { %v2684_v0 = vadd.f32 1.0, %v5493_v26  ;;  %v2630_v41 = vmul.f32 0.70710677, %v10164_v7  ;;  %v2746_v2 = vsel %vm2458_vm6, %v2714_v10, 0.0  ;;  %v2685_v27 = vadd.f32 1.0, %v5495_v62  ;;  %v10168_v31 = vld [vmem:[#allocation96_spill] sm:$0xff] }
 0x334   :  { %5508 = verf.f32 %v2628_v47  ;;  %v2631_v32 = vmul.f32 0.70710677, %v10166_v59  ;;  %v2590_v1 = vmul.f32 0.5, %v10127_v3  ;;  %v2686_v33 = vadd.f32 1.0, %v5497_v45 }
 0x335   :  { %3095 = vadd.xlane.f32.xlu1 %v3032_v51  ;;  %v5501_v57 = vpop.eup %5500  ;;  %v2591_v19 = vmul.f32 0.5, %v10132_v50  ;;  %5510 = verf.f32 %v2629_v5  ;;  %v2687_v55 = vadd.f32 1.0, %v5499_v44  ;;  %v2632_v15 = vmul.f32 0.70710677, %v10168_v31  ;;  %v10172_v44 = vld [vmem:[#allocation55_spill] sm:$0xff] }
 0x336   :  { %v5503_v46 = vpop.eup %5502  ;;  %v8178_v36 = vadd.f32 %v2745_v58, %v7808_v13  ;;  %v8181_v47 = vadd.f32 %v2746_v2, %v7797_v29  ;;  %v2716_v62 = vmul.f32 %v2684_v0, %v2588_v20  ;;  %v2592_v10 = vmul.f32 0.5, %v10137_v8  ;;  %v10173_v58 = vld [vmem:[#allocation81_spill] sm:$0xff]  ;;  %v10174_v0 = vld [vmem:[#allocation98_spill] sm:$0xff] }
 0x337   :  { %5512 = verf.f32 %v2630_v41  ;;  %v2747_v5 = vsel %vm2459_vm7, %v2715_v54, 0.0  ;;  %v2717_v50 = vmul.f32 %v2685_v27, %v2589_v22  ;;  %v2633_v45 = vmul.f32 0.70710677, %v10172_v44  ;;  %v10177_v22 = vld [vmem:[#allocation56_spill] sm:$0xff] }
 0x338   :  { %10169 = vst [vmem:[#allocation87_spill] sm:$0xff] %v8178_v36  ;;  %10170 = vst [vmem:[#allocation88_spill] sm:$0xff] %v8181_v47  ;;  %5514 = verf.f32 %v2631_v32  ;;  %v2718_v51 = vmul.f32 %v2686_v33, %v2590_v1  ;;  %v2688_v26 = vadd.f32 1.0, %v5501_v57  ;;  %v2593_v13 = vmul.f32 0.5, %v10139_v30 }
 0x339   :  { %v2719_v29 = vmul.f32 %v2687_v55, %v2591_v19  ;;  %v2689_v2 = vadd.f32 1.0, %v5503_v46  ;;  %5516 = verf.f32 %v2632_v15  ;;  %v2634_v8 = vmul.f32 0.70710677, %v10174_v0 }
 0x33a   :  { %v8194_v54 = vsel %vm2460_vm11, %v2716_v62, 0.0  ;;  %v2635_v33 = vmul.f32 0.70710677, %v10177_v22  ;;  %v8199_v57 = vadd.f32 %v2747_v5, %v7817_v52  ;;  %v8204_v15 = vsel %vm2461_vm13, %v2717_v50, 0.0 }
 0x33b   :  { %v5505_v41 = vpop.eup %5504  ;;  %v2594_v19 = vmul.f32 0.5, %v10150_v48  ;;  %5518 = verf.f32 %v2633_v45  ;;  %v2636_v46 = vmul.f32 0.70710677, %v7692_v42  ;;  %v8211_v62 = vsel %vm2462_vm14, %v2718_v51, 0.0 }
 0x33c   :  { %10178 = vst [vmem:[#allocation91_spill] sm:$0xff] %v8199_v57  ;;  %v5507_v30 = vpop.eup %5506  ;;  %v2720_v3 = vmul.f32 %v2688_v26, %v2592_v10  ;;  %v2595_v52 = vmul.f32 0.5, %v10155_v11  ;;  %v2637_v5 = vmul.f32 0.70710677, %v7730_v23  ;;  %v8218_v50 = vsel %vm2463_vm0, %v2719_v29, 0.0 }
 0x33d   :  { %v2721_v48 = vmul.f32 %v2689_v2, %v2593_v13  ;;  %5520 = verf.f32 %v2634_v8  ;;  %v2690_v57 = vadd.f32 1.0, %v5505_v41  ;;  %v2691_v55 = vadd.f32 1.0, %v5507_v30 }
 0x33e   :  { %v5509_v20 = vpop.eup %5508  ;;  %5522 = verf.f32 %v2635_v33  ;;  %v2638_v26 = vmul.f32 0.70710677, %v7736_v25  ;;  %v2596_v11 = vmul.f32 0.5, %v10157_v56  ;;  %v2597_v10 = vmul.f32 0.5, %v10159_v61 }
 0x33f   :  { %v5511_v36 = vpop.eup %5510  ;;  %5524 = verf.f32 %v2636_v46  ;;  %v2639_v51 = vmul.f32 0.70710677, %v7778_v24  ;;  %v8228_v13 = vsel %vm2464_vm4, %v2720_v3, 0.0  ;;  %v2640_v41 = vmul.f32 0.70710677, %v7780_v6 }
 0x340   :  { %5526 = verf.f32 %v2637_v5  ;;  %v2692_v30 = vadd.f32 1.0, %v5509_v20  ;;  %v2693_v27 = vadd.f32 1.0, %v5511_v36  ;;  %v2598_v61 = vmul.f32 0.5, %v10164_v7 }
 0x341   :  { %v5513_v1 = vpop.eup %5512  ;;  %v8237_v32 = vsel %vm2465_vm5, %v2721_v48, 0.0  ;;  %v2722_v29 = vmul.f32 %v2690_v57, %v2594_v19  ;;  %v2723_v3 = vmul.f32 %v2691_v55, %v2595_v52  ;;  %5528 = verf.f32 %v2638_v26  ;;  %v10188_v52 = vld [vmem:[#allocation46_spill] sm:$0xff]  ;;  %v10190_v55 = vld [vmem:[#allocation47_spill] sm:$0xff] }
 0x342   :  { %v5515_v33 = vpop.eup %5514  ;;  %v2694_v8 = vadd.f32 1.0, %v5513_v1  ;;  %v2599_v5 = vmul.f32 0.5, %v10166_v59  ;;  %5530 = verf.f32 %v2639_v51  ;;  %v2641_v20 = vmul.f32 0.70710677, %v7833_v39 }
 0x343   :  { %v5517_v47 = vpop.eup %5516  ;;  %v2695_v36 = vadd.f32 1.0, %v5515_v33  ;;  %5532 = verf.f32 %v2640_v41  ;;  %v2642_v7 = vmul.f32 0.70710677, %v7835_v12  ;;  %v2724_v46 = vmul.f32 %v2692_v30, %v2596_v11 }
 0x344   :  { %v2725_v48 = vmul.f32 %v2693_v27, %v2597_v10  ;;  %v2600_v57 = vmul.f32 0.5, %v10168_v31  ;;  %v2643_v19 = vmul.f32 0.70710677, %v7900_v17  ;;  %vm10189_vm1 = vcmp.eq.s32.totalorder %v6762_v34, %v10188_v52  ;;  %v10201_v10 = vld [vmem:[#allocation51_spill] sm:$0xff] }
 0x345   :  { %v5519_v56 = vpop.eup %5518  ;;  %v8248_v59 = vsel %vm10189_vm1, %v2722_v29, 0.0  ;;  %vm10191_vm3 = vcmp.eq.s32.totalorder %v6762_v34, %v10190_v55  ;;  %v2696_v41 = vadd.f32 1.0, %v5517_v47  ;;  %v2726_v11 = vmul.f32 %v2694_v8, %v2598_v61  ;;  %v10196_v47 = vld [vmem:[#allocation49_spill] sm:$0xff] }
 0x346   :  { %v8253_v26 = vsel %vm10191_vm3, %v2723_v3, 0.0  ;;  %v2601_v27 = vmul.f32 0.5, %v10172_v44  ;;  %5534 = verf.f32 %v2641_v20  ;;  %v2727_v45 = vmul.f32 %v2695_v36, %v2599_v5  ;;  %v10194_v3 = vld [vmem:[#allocation48_spill] sm:$0xff]  ;;  %v10198_v36 = vld [vmem:[#allocation50_spill] sm:$0xff] }
 0x347   :  { %v5521_v33 = vpop.eup %5520  ;;  %v2697_v52 = vadd.f32 1.0, %v5519_v56  ;;  %v2602_v29 = vmul.f32 0.5, %v10174_v0  ;;  %5536 = verf.f32 %v2642_v7  ;;  %vm10195_vm6 = vcmp.eq.s32.totalorder %v6762_v34, %v10194_v3 }
 0x348   :  { %v5523_v30 = vpop.eup %5522  ;;  %v8262_v55 = vsel %vm10195_vm6, %v2724_v46, 0.0  ;;  %vm10197_vm7 = vcmp.eq.s32.totalorder %v6762_v34, %v10196_v47  ;;  %5538 = verf.f32 %v2643_v19  ;;  %v2644_v44 = vmul.f32 0.70710677, %v7902_v53 }
 0x349   :  { %v5525_v2 = vpop.eup %5524  ;;  %v8267_v8 = vsel %vm10197_vm7, %v2725_v48, 0.0  ;;  %v2728_v5 = vmul.f32 %v2696_v41, %v2600_v57  ;;  %v2698_v56 = vadd.f32 1.0, %v5521_v33  ;;  %v2603_v0 = vmul.f32 0.5, %v10177_v22 }
 0x34a   :  { %v5527_v61 = vpop.eup %5526  ;;  %v2645_v20 = vmul.f32 0.70710677, %v7984_v63  ;;  %vm10199_vm11 = vcmp.eq.s32.totalorder %v6762_v34, %v10198_v36  ;;  %v2699_v47 = vadd.f32 1.0, %v5523_v30  ;;  %v2604_v48 = vmul.f32 0.5, %v7692_v42  ;;  %v10204_v36 = vld [vmem:[#allocation57_spill] sm:$0xff]  ;;  %v10205_v42 = vld [vmem:[#allocation52_spill] sm:$0xff] }
 0x34b   :  { %v8275_v7 = vsel %vm10199_vm11, %v2726_v11, 0.0  ;;  %v5529_v19 = vpop.eup %5528  ;;  %vm10202_vm13 = vcmp.eq.s32.totalorder %v6762_v34, %v10201_v10  ;;  %v2729_v41 = vmul.f32 %v2697_v52, %v2601_v27  ;;  %v2605_v22 = vmul.f32 0.5, %v7730_v23 }
 0x34c   :  { %v8282_v57 = vsel %vm10202_vm13, %v2727_v45, 0.0  ;;  %v2646_v33 = vmul.f32 0.70710677, %v7986_v60  ;;  %v5531_v1 = vpop.eup %5530  ;;  %v2700_v31 = vadd.f32 1.0, %v5525_v2  ;;  %v2701_v51 = vadd.f32 1.0, %v5527_v61  ;;  %v10208_v2 = vld [vmem:[#allocation53_spill] sm:$0xff] }
 0x34d   :  { %10203 = vst [vmem:[#allocation42_spill] sm:$0xff] %v8282_v57  ;;  %5540 = verf.f32 %v2644_v44  ;;  %v5533_v30 = vpop.eup %5532  ;;  %vm10206_vm14 = vcmp.eq.s32.totalorder %v6762_v34, %v10205_v42  ;;  %v2730_v10 = vmul.f32 %v2698_v56, %v2602_v29  ;;  %v2731_v27 = vmul.f32 %v2699_v47, %v2603_v0  ;;  %v3833_v29 = vld [vmem:[%s9352_s2] sm:$0xff] }
 0x34e   :  { %v8290_v3 = vsel %vm10206_vm14, %v2728_v5, 0.0  ;;  %5542 = verf.f32 %v2645_v20  ;;  %v2606_v23 = vmul.f32 0.5, %v7736_v25  ;;  %v2702_v52 = vadd.f32 1.0, %v5529_v19  ;;  %v3834_v25 = vld [vmem:[%s9352_s2 + $0x8] sm:$0xff] }
 0x34f   :  { %v2607_v57 = vmul.f32 0.5, %v7778_v24  ;;  %vm10209_vm0 = vcmp.eq.s32.totalorder %v6762_v34, %v10208_v2  ;;  %v2703_v42 = vadd.f32 1.0, %v5531_v1  ;;  %5544 = verf.f32 %v2646_v33  ;;  %v3835_v24 = vld [vmem:[%s9352_s2 + $0x10] sm:$0xff]  ;;  %v3836_v1 = vld [vmem:[%s9352_s2 + $0x18] sm:$0xff] }
 0x350   :  { %v8298_v44 = vsel %vm10209_vm0, %v2729_v41, 0.0  ;;  %v5535_v5 = vpop.eup %5534  ;;  %v2732_v56 = vmul.f32 %v2700_v31, %v2604_v48  ;;  %v2733_v0 = vmul.f32 %v2701_v51, %v2605_v22  ;;  %v2704_v20 = vadd.f32 1.0, %v5533_v30  ;;  %v10211_v41 = vld [vmem:[#allocation54_spill] sm:$0xff]  ;;  %v10213_v2 = vld [vmem:[#allocation100_spill] sm:$0xff] }
 0x351   :  { %v5210_v47 = vpack.c.bf16 %v3834_v25, %v3833_v29  ;;  %v5537_v19 = vpop.eup %5536  ;;  %vm10212_vm4 = vcmp.eq.s32.totalorder %v6762_v34, %v10211_v41  ;;  %v2608_v46 = vmul.f32 0.5, %v7780_v6  ;;  %v5214_v61 = vpack.c.bf16 %v3836_v1, %v3835_v24  ;;  %v10215_v29 = vld [vmem:[#allocation101_spill] sm:$0xff]  ;;  %v10239_v1 = vld [vmem:[#allocation76_spill] sm:$0xff] }
 0x352   :  { %v8316_v33 = vsel %vm10212_vm4, %v2730_v10, 0.0  ;;  %v5539_v45 = vpop.eup %5538  ;;  %vm10214_vm5 = vcmp.eq.s32.totalorder %v6762_v34, %v10037_v35  ;;  %v2734_v31 = vmul.f32 %v2702_v52, %v2606_v23  ;;  %v2609_v48 = vmul.f32 0.5, %v7833_v39 }
 0x353   :  { %v8323_v51 = vsel %vm10214_vm5, %v2731_v27, 0.0  ;;  %v2647_v22 = vmul.f32 0.70710677, %v8038_v4  ;;  %5211 = vmatprep.subr.bf16.mxu1 %v5210_v47  ;;  %v2735_v30 = vmul.f32 %v2703_v42, %v2607_v57  ;;  %v2705_v41 = vadd.f32 1.0, %v5535_v5 }
 0x354   :  { %5213 = vmatpush3.bf16.msra.mxu1 %v5210_v47  ;;  %vm10216_vm1 = vcmp.eq.s32.totalorder %v6762_v34, %v10044_v16  ;;  %vm10217_vm3 = vcmp.eq.s32.totalorder %v6762_v34, %v10045_v21  ;;  %v2736_v39 = vmul.f32 %v2704_v20, %v2608_v46  ;;  %v2706_v27 = vadd.f32 1.0, %v5537_v19 }
 0x355   :  { %v8332_v6 = vsel %vm10216_vm1, %v2732_v56, 0.0  ;;  %v8337_v35 = vsel %vm10217_vm3, %v2733_v0, 0.0  ;;  %5215 = vmatprep.subr.bf16.mxu1 %v5214_v61  ;;  %v2610_v23 = vmul.f32 0.5, %v7835_v12  ;;  %v2611_v52 = vmul.f32 0.5, %v7900_v17 }
 0x356   :  { %v2707_v42 = vadd.f32 1.0, %v5539_v45  ;;  %vm10218_vm6 = vcmp.eq.s32.totalorder %v6762_v34, %v10050_v9  ;;  %5546 = verf.f32 %v2647_v22  ;;  %v2648_v46 = vmul.f32 0.70710677, %v8040_v49 }
 0x357   :  { %v5541_v24 = vpop.eup %5540  ;;  %v8345_v16 = vsel %vm10218_vm6, %v2734_v31, 0.0  ;;  %vm10219_vm7 = vcmp.eq.s32.totalorder %v6762_v34, %v10051_v37  ;;  %v2737_v12 = vmul.f32 %v2705_v41, %v2609_v48  ;;  %v2612_v17 = vmul.f32 0.5, %v7902_v53 }
 0x358   :  { %v5543_v5 = vpop.eup %5542  ;;  %v8352_v56 = vsel %vm10219_vm7, %v2735_v30, 0.0  ;;  %v2613_v45 = vmul.f32 0.5, %v7984_v63  ;;  %5217 = vmatpush3.bf16.msra.mxu1 %v5214_v61  ;;  %vm10220_vm11 = vcmp.eq.s32.totalorder %v6762_v34, %v10055_v18  ;;  %v2738_v0 = vmul.f32 %v2706_v27, %v2610_v23  ;;  %v10223_v18 = vld [vmem:[#allocation61_spill] sm:$0xff] }
 0x359   :  { %v8359_v9 = vsel %vm10220_vm11, %v2736_v39, 0.0  ;;  %v5545_v37 = vpop.eup %5544  ;;  %v2739_v31 = vmul.f32 %v2707_v42, %v2611_v52  ;;  %v2614_v48 = vmul.f32 0.5, %v7986_v60  ;;  %v2708_v53 = vadd.f32 1.0, %v5541_v24  ;;  %v10225_v27 = vld [vmem:[#allocation73_spill] sm:$0xff]  ;;  %v10227_v60 = vld [vmem:[#allocation62_spill] sm:$0xff] }
 0x35a   :  { %v2709_v63 = vadd.f32 1.0, %v5543_v5  ;;  %5548 = verf.f32 %v2648_v46  ;;  %v10222_v61 = vmov 0   ;;  %vm10224_vm14 = vcmp.eq.s32.totalorder %v6762_v34, %v10223_v18 }
 0x35b   :  { %v3034_v19 = vpop.xlane.xlu0 %3033  ;;  %v8368_v41 = vsel %vm10224_vm14, %v2737_v12, 0.0  ;;  %v2615_v39 = vmul.f32 0.5, %v8038_v4  ;;  %v10226_v23 = vmul.u32 2, %v10225_v27  ;;  %vm10228_vm0 = vcmp.eq.s32.totalorder %v6762_v34, %v10227_v60 }
 0x35c   :  { %v3129_v22 = vmul.f32 0.70710677, %v3034_v19  ;;  %vm3353_vm13 = vcmp.ge.f32.partialorder %v3034_v19, 0.0  ;;  %v8376_v42 = vsel %vm10228_vm0, %v2738_v0, 0.0  ;;  %v2710_v20 = vadd.f32 1.0, %v5545_v37  ;;  %v10243_v37 = vld [vmem:[#allocation66_spill] sm:$0xff] }
 0x35d   :  { %v3385_v30 = vsel %vm3353_vm13, 1, %v10222_v61  ;;  %v8381_v12 = vmul.f32 0.5, %v8040_v49  ;;  %v2740_v0 = vmul.f32 %v2708_v53, %v2612_v17  ;;  %v10235_v17 = vld [vmem:[#allocation74_spill] sm:$0xff]  ;;  %v10240_v10 = vmul.u32 2, %v10239_v1  ;;  %v10255_v53 = vld [vmem:[#allocation28_spill] sm:$0xff] }
 0x35e   :  { %5550 = verf.f32 %v3129_v22  ;;  %v3417_v52 = vadd.s32 %v3385_v30, %v10226_v23  ;;  %v10232_v22 = vld [vmem:[#allocation63_spill] sm:$0xff]  ;;  %v2741_v23 = vmul.f32 %v2709_v63, %v2613_v45  ;;  %v2742_v57 = vmul.f32 %v2710_v20, %v2614_v48  ;;  %v10241_v20 = vld [vmem:[#allocation65_spill] sm:$0xff] }
 0x35f   :  { %v3036_v21 = vpop.xlane.xlu1 %3035  ;;  %vm10233_vm5 = vcmp.eq.s32.totalorder %v6762_v34, %v10232_v22  ;;  %v10236_v45 = vmul.u32 2, %v10235_v17  ;;  %v10238_v22 = vld [vmem:[#allocation7_spill] sm:$0xff]  ;;  %vm10242_vm6 = vcmp.eq.s32.totalorder %v6762_v34, %v10241_v20  ;;  %vm10244_vm7 = vcmp.eq.s32.totalorder %v6762_v34, %v10243_v37 }
 0x360   :  { %v3130_v18 = vmul.f32 0.70710677, %v3036_v21  ;;  %vm3354_vm4 = vcmp.ge.f32.partialorder %v3036_v21, 0.0  ;;  %v8383_v4 = vadd.s32 1, %v3417_v52  ;;  %v8388_v30 = vsel %vm10233_vm5, %v2739_v31, 0.0  ;;  %v8391_v46 = vpop.xlane.xlu0 %3037  ;;  %v5547_v52 = vpop.eup %5546 }
 0x361   :  { %v3386_v60 = vsel %vm3354_vm4, 1, %v10222_v61  ;;  %v3131_v49 = vmul.f32 0.70710677, %v8391_v46  ;;  %vm3355_vm1 = vcmp.ge.f32.partialorder %v8391_v46, 0.0  ;;  %v8411_v48 = vsel %vm10242_vm6, %v2740_v0, 0.0  ;;  %v10250_v0 = vld [vmem:[#allocation67_spill] sm:$0xff] }
 0x362   :  { %10231 = vst [vmem:[#allocation92_spill] sm:$0xff] %v8383_v4  ;;  %5552 = verf.f32 %v3130_v18  ;;  %v3387_v25 = vsel %vm3355_vm1, 1, %v10222_v61  ;;  %vm3481_vm3 = vcmp.eq.s32.totalorder %v6762_v34, %v8383_v4  ;;  %v3418_v31 = vadd.s32 %v3386_v60, %v10236_v45 }
 0x363   :  { %5554 = verf.f32 %v3131_v49  ;;  %v3513_v18 = vsel %vm3481_vm3, %v10238_v22, 0.0  ;;  %v3419_v11 = vadd.s32 %v3387_v25, %v10240_v10  ;;  %v8416_v60 = vsel %vm10244_vm7, %v2741_v23, 0.0  ;;  %v10252_v23 = vld [vmem:[#allocation102_spill] sm:$0xff]  ;;  %v10258_v10 = vld [vmem:[#allocation16_spill] sm:$0xff] }
 0x364   :  { %3545 = vadd.xlane.f32.xlu0 %v3513_v18  ;;  %v8419_v63 = vadd.s32 1, %v3418_v31  ;;  %v2711_v4 = vadd.f32 1.0, %v5547_v52  ;;  %v5549_v20 = vpop.eup %5548  ;;  %vm10251_vm11 = vcmp.eq.s32.totalorder %v6762_v34, %v10250_v0  ;;  %v8434_v37 = vadd.f32 %v8194_v54, %v10252_v23  ;;  %v10253_v52 = vld [vmem:[#allocation103_spill] sm:$0xff]  ;;  %v10256_v0 = vld [vmem:[#allocation104_spill] sm:$0xff]  ;;  %v10260_v23 = vld [vmem:[#allocation106_spill] sm:$0xff] }
 0x365   :  { %v8423_v25 = vadd.s32 1, %v3419_v11  ;;  %v8428_v24 = vsel %vm10251_vm11, %v2742_v57, 0.0  ;;  %v8438_v31 = vadd.f32 %v8204_v15, %v10253_v52  ;;  %v8449_v49 = vadd.f32 %v8211_v62, %v10256_v0  ;;  %v10266_v54 = vld [vmem:[#allocation107_spill] sm:$0xff] }
 0x366   :  { %10246 = vst [vmem:[#allocation9_spill] sm:$0xff] %v8419_v63  ;;  %vm3482_vm13 = vcmp.eq.s32.totalorder %v6762_v34, %v8419_v63  ;;  %v3097_v5 = vmul.f32 0.5, %v3034_v19  ;;  %v2712_v11 = vadd.f32 1.0, %v5549_v20  ;;  %v10261_v20 = vmul.u32 2, %v10167_v43 }
 0x367   :  { %10249 = vst [vmem:[#allocation94_spill] sm:$0xff] %v8423_v25  ;;  %v3514_v57 = vsel %vm3482_vm13, %v10255_v53, 0.0  ;;  %vm3483_vm14 = vcmp.eq.s32.totalorder %v6762_v34, %v8423_v25  ;;  %v2743_v53 = vmul.f32 %v2711_v4, %v2615_v39  ;;  %v8469_v25 = vadd.f32 %v8228_v13, %v10260_v23 }
 0x368   :  { %v5551_v18 = vpop.eup %5550  ;;  %v8452_v52 = vpop.xlane.xlu1 %3039  ;;  %3547 = vadd.xlane.f32.xlu1 %v3514_v57  ;;  %v3515_v63 = vsel %vm3483_vm14, %v10258_v10, 0.0  ;;  %v3098_v4 = vmul.f32 0.5, %v3036_v21  ;;  %vm10262_vm5 = vcmp.eq.s32.totalorder %v6762_v34, %v10225_v27  ;;  %v10263_v13 = vmul.u32 2, %v10173_v58  ;;  %v10268_v27 = vld [vmem:[#allocation68_spill] sm:$0xff] }
 0x369   :  { %v3193_v15 = vadd.f32 1.0, %v5551_v18  ;;  %v3132_v22 = vmul.f32 0.70710677, %v8452_v52  ;;  %vm3356_vm0 = vcmp.ge.f32.partialorder %v8452_v52, 0.0  ;;  %3549 = vadd.xlane.f32.xlu0 %v3515_v63  ;;  %v10259_v18 = vld [vmem:[#allocation105_spill] sm:$0xff]  ;;  %v3099_v47 = vmul.f32 0.5, %v8391_v46 }
 0x36a   :  { %v3388_v0 = vsel %vm3356_vm0, 1, %v10222_v61  ;;  %v8461_v19 = vpop.xlane.xlu0 %3041  ;;  %v8465_v57 = vadd.f32 %v8218_v50, %v10259_v18  ;;  %vm10269_vm1 = vcmp.eq.s32.totalorder %v6762_v34, %v10268_v27  ;;  %vm10272_vm6 = vcmp.eq.s32.totalorder %v6762_v34, %v10235_v17  ;;  %v10281_v27 = vld [vmem:[#allocation112_spill] sm:$0xff] }
 0x36b   :  { %v3225_v62 = vmul.f32 %v3193_v15, %v3097_v5  ;;  %5556 = verf.f32 %v3132_v22  ;;  %v3133_v10 = vmul.f32 0.70710677, %v8461_v19  ;;  %vm3357_vm4 = vcmp.ge.f32.partialorder %v8461_v19, 0.0  ;;  %v10264_v22 = vld [vmem:[#allocation87_spill] sm:$0xff] }
 0x36c   :  { %v5553_v39 = vpop.eup %5552  ;;  %v3389_v63 = vsel %vm3357_vm4, 1, %v10222_v61  ;;  %v3420_v15 = vadd.s32 %v3388_v0, %v10261_v20  ;;  %vm10280_vm4 = vcmp.eq.s32.totalorder %v6762_v34, %v10239_v1 }
 0x36d   :  { %v3194_v5 = vadd.f32 1.0, %v5553_v39  ;;  %v3257_v50 = vsel %vm10262_vm5, %v3225_v62, 0.0  ;;  %v5555_v18 = vpop.eup %5554  ;;  %5558 = verf.f32 %v3133_v10  ;;  %v3421_v21 = vadd.s32 %v3389_v63, %v10263_v13 }
 0x36e   :  { %v8482_v23 = vadd.f32 %v3257_v50, %v10264_v22  ;;  %v8486_v39 = vadd.f32 %v8237_v32, %v10266_v54  ;;  %v3195_v0 = vadd.f32 1.0, %v5555_v18  ;;  %v8489_v20 = vadd.s32 1, %v3420_v15  ;;  %v10271_v50 = vld [vmem:[#allocation108_spill] sm:$0xff]  ;;  %v10273_v54 = vld [vmem:[#allocation109_spill] sm:$0xff]  ;;  %v10279_v18 = vld [vmem:[#allocation111_spill] sm:$0xff] }
 0x36f   :  { %v3226_v45 = vmul.f32 %v3194_v5, %v3098_v4  ;;  %v8494_v62 = vsel %vm10269_vm1, %v2743_v53, 0.0  ;;  %v2744_v10 = vmul.f32 %v2712_v11, %v8381_v12  ;;  %v8497_v63 = vadd.s32 1, %v3421_v21  ;;  %v10274_v4 = vld [vmem:[#allocation88_spill] sm:$0xff] }
 0x370   :  { %10265 = vst [vmem:[#allocation80_spill] sm:$0xff] %v8482_v23  ;;  %10267 = vst [vmem:[#allocation96_spill] sm:$0xff] %v8489_v20  ;;  %v8501_v13 = vadd.f32 %v8248_v59, %v10271_v50  ;;  %v3227_v46 = vmul.f32 %v3195_v0, %v3099_v47  ;;  %vm3484_vm7 = vcmp.eq.s32.totalorder %v6762_v34, %v8489_v20  ;;  %v8515_v11 = vpop.xlane.xlu1 %3043  ;;  %v10276_v5 = vld [vmem:[#allocation12_spill] sm:$0xff]  ;;  %v10277_v47 = vld [vmem:[#allocation110_spill] sm:$0xff] }
 0x371   :  { %10270 = vst [vmem:[#allocation43_spill] sm:$0xff] %v8497_v63  ;;  %v3258_v32 = vsel %vm10272_vm6, %v3226_v45, 0.0  ;;  %v8510_v53 = vadd.f32 %v8253_v26, %v10273_v54  ;;  %v3516_v59 = vsel %vm3484_vm7, %v10276_v5, 0.0  ;;  %vm3485_vm11 = vcmp.eq.s32.totalorder %v6762_v34, %v8497_v63  ;;  %v10278_v45 = vld [vmem:[#allocation18_spill] sm:$0xff] }
 0x372   :  { %v8513_v12 = vadd.f32 %v3258_v32, %v10274_v4  ;;  %v8525_v17 = vadd.f32 %v8262_v55, %v10277_v47  ;;  %v3134_v26 = vmul.f32 0.70710677, %v8515_v11  ;;  %vm3358_vm0 = vcmp.ge.f32.partialorder %v8515_v11, 0.0  ;;  %3551 = vadd.xlane.f32.xlu1 %v3516_v59  ;;  %v3046_v0 = vpop.xlane.xlu0 %3045  ;;  %v10282_v32 = vld [vmem:[#allocation113_spill] sm:$0xff]  ;;  %v10283_v54 = vld [vmem:[#allocation42_spill] sm:$0xff] }
 0x373   :  { %v3517_v15 = vsel %vm3485_vm11, %v10278_v45, 0.0  ;;  %v8535_v21 = vadd.f32 %v8267_v8, %v10279_v18  ;;  %v3390_v22 = vsel %vm3358_vm0, 1, %v10222_v61  ;;  %v3259_v55 = vsel %vm10280_vm4, %v3227_v46, 0.0  ;;  %v10284_v8 = vld [vmem:[#allocation114_spill] sm:$0xff]  ;;  %v10285_v45 = vld [vmem:[#allocation69_spill] sm:$0xff]  ;;  %v10288_v46 = vld [vmem:[#allocation84_spill] sm:$0xff] }
 0x374   :  { %10275 = vst [vmem:[#allocation55_spill] sm:$0xff] %v8513_v12  ;;  %3553 = vadd.xlane.f32.xlu0 %v3517_v15  ;;  %v8543_v50 = vadd.f32 %v8275_v7, %v10281_v27  ;;  %v8547_v4 = vadd.f32 %v10283_v54, %v10282_v32  ;;  %5560 = verf.f32 %v3134_v26  ;;  %v3135_v5 = vmul.f32 0.70710677, %v3046_v0  ;;  %v10290_v27 = vld [vmem:[#allocation91_spill] sm:$0xff]  ;;  %v10292_v54 = vld [vmem:[#allocation86_spill] sm:$0xff] }
 0x375   :  { %vm3359_vm5 = vcmp.ge.f32.partialorder %v3046_v0, 0.0  ;;  %v8551_v59 = vadd.f32 %v8290_v3, %v10284_v8  ;;  %v5557_v47 = vpop.eup %5556  ;;  %vm10286_vm1 = vcmp.eq.s32.totalorder %v6762_v34, %v10285_v45  ;;  %v10289_v15 = vmul.u32 2, %v10288_v46  ;;  %v10294_v8 = vld [vmem:[#allocation115_spill] sm:$0xff]  ;;  %v10296_v23 = vld [vmem:[#allocation118_spill] sm:$0xff] }
 0x376   :  { %v8556_v1 = vsel %vm10286_vm1, %v2744_v10, 0.0  ;;  %v3391_v7 = vsel %vm3359_vm5, 1, %v10222_v61  ;;  %v8562_v32 = vadd.f32 %v3259_v55, %v10290_v27  ;;  %v3196_v26 = vadd.f32 1.0, %v5557_v47  ;;  %v10297_v55 = vld [vmem:[#allocation119_spill] sm:$0xff]  ;;  %v10299_v27 = vld [vmem:[#allocation120_spill] sm:$0xff] }
 0x377   :  { %10287 = vst [vmem:[#allocation81_spill] sm:$0xff] %v8556_v1  ;;  %v3422_v18 = vadd.s32 %v3390_v22, %v10289_v15  ;;  %5562 = verf.f32 %v3135_v5  ;;  %v10293_v63 = vmul.u32 2, %v10292_v54  ;;  %v8568_v20 = vadd.f32 %v8298_v44, %v10294_v8  ;;  %v5559_v45 = vpop.eup %5558  ;;  %v3050_v15 = vpop.xlane.xlu0 %3049  ;;  %v10322_v1 = vld [vmem:[#allocation95_spill] sm:$0xff] }
 0x378   :  { %10291 = vst [vmem:[#allocation98_spill] sm:$0xff] %v8562_v32  ;;  %v3100_v10 = vmul.f32 0.5, %v8452_v52  ;;  %v8575_v22 = vadd.f32 %v8316_v33, %v10296_v23  ;;  %v8579_v47 = vadd.f32 %v8323_v51, %v10297_v55  ;;  %v3101_v5 = vmul.f32 0.5, %v8461_v19  ;;  %v10300_v33 = vld [vmem:[#allocation121_spill] sm:$0xff] }
 0x379   :  { %v3423_v3 = vadd.s32 %v3391_v7, %v10293_v63  ;;  %v8571_v12 = vadd.s32 1, %v3422_v18  ;;  %v3197_v63 = vadd.f32 1.0, %v5559_v45  ;;  %v3048_v7 = vpop.xlane.xlu1 %3047  ;;  %v8586_v52 = vadd.f32 %v8332_v6, %v10299_v27  ;;  %v10302_v6 = vld [vmem:[#allocation5_spill] sm:$0xff]  ;;  %v10306_v27 = vld [vmem:[#allocation90_spill] sm:$0xff] }
 0x37a   :  { %v3228_v18 = vmul.f32 %v3196_v26, %v3100_v10  ;;  %v3136_v8 = vmul.f32 0.70710677, %v3048_v7  ;;  %vm3360_vm6 = vcmp.ge.f32.partialorder %v3048_v7, 0.0  ;;  %v8590_v23 = vadd.f32 %v8337_v35, %v10300_v33  ;;  %v10303_v26 = vld [vmem:[#allocation19_spill] sm:$0xff]  ;;  %v10304_v10 = vld [vmem:[#allocation89_spill] sm:$0xff] }
 0x37b   :  { %10295 = vst [vmem:[#allocation44_spill] sm:$0xff] %v8571_v12  ;;  %v8582_v44 = vadd.s32 1, %v3423_v3  ;;  %v3229_v51 = vmul.f32 %v3197_v63, %v3101_v5  ;;  %v3392_v55 = vsel %vm3360_vm6, 1, %v10222_v61  ;;  %v3137_v19 = vmul.f32 0.70710677, %v3050_v15 }
 0x37c   :  { %10301 = vst [vmem:[#allocation11_spill] sm:$0xff] %v8590_v23  ;;  %vm3361_vm0 = vcmp.ge.f32.partialorder %v3050_v15, 0.0  ;;  %5564 = verf.f32 %v3136_v8  ;;  %vm9728_vm4 = vcmp.eq.s32.totalorder %v6762_v34, %v8571_v12  ;;  %v10305_v5 = vmul.u32 2, %v10304_v10  ;;  %v10310_v12 = vld [vmem:[#allocation70_spill] sm:$0xff] }
 0x37d   :  { %10298 = vst [vmem:[#allocation56_spill] sm:$0xff] %v8582_v44  ;;  %v3393_v3 = vsel %vm3361_vm0, 1, %v10222_v61  ;;  %vm9727_vm5 = vcmp.eq.s32.totalorder %v6762_v34, %v8582_v44  ;;  %5566 = verf.f32 %v3137_v19  ;;  %v3518_v35 = vsel %vm9728_vm4, %v10302_v6, 0.0  ;;  %v8620_v32 = vpop.xlane.xlu1 %3051 }
 0x37e   :  { %v3519_v45 = vsel %vm9727_vm5, %v10303_v26, 0.0  ;;  %v3424_v63 = vadd.s32 %v3392_v55, %v10305_v5  ;;  %3555 = vadd.xlane.f32.xlu1 %v3518_v35  ;;  %v10307_v8 = vmul.u32 2, %v10306_v27  ;;  %vm10308_vm1 = vcmp.eq.s32.totalorder %v6762_v34, %v10167_v43  ;;  %v5561_v26 = vpop.eup %5560  ;;  %v10315_v43 = vld [vmem:[#allocation71_spill] sm:$0xff] }
 0x37f   :  { %3557 = vadd.xlane.f32.xlu0 %v3519_v45  ;;  %v3260_v19 = vsel %vm10308_vm1, %v3228_v18, 0.0  ;;  %vm10309_vm6 = vcmp.eq.s32.totalorder %v6762_v34, %v10173_v58  ;;  %v8618_v44 = vadd.f32 %v8345_v16, %v10310_v12  ;;  %v8632_v18 = vadd.f32 %v8352_v56, %v10315_v43 }
 0x380   :  { %v3425_v33 = vadd.s32 %v3393_v3, %v10307_v8  ;;  %v3261_v6 = vsel %vm10309_vm6, %v3229_v51, 0.0  ;;  %v8622_v55 = vadd.s32 1, %v3424_v63  ;;  %v8625_v35 = vadd.f32 %v3260_v19, %v8434_v37 }
 0x381   :  { %10311 = vst [vmem:[#allocation45_spill] sm:$0xff] %v8618_v44  ;;  %v8628_v3 = vadd.f32 %v3261_v6, %v8438_v31  ;;  %10316 = vst [vmem:[#allocation46_spill] sm:$0xff] %v8632_v18  ;;  %v3102_v58 = vmul.f32 0.5, %v8515_v11  ;;  %v3198_v51 = vadd.f32 1.0, %v5561_v26  ;;  %v3138_v16 = vmul.f32 0.70710677, %v8620_v32  ;;  %v5563_v12 = vpop.eup %5562  ;;  %v8642_v56 = vpop.xlane.xlu0 %3053 }
 0x382   :  { %10312 = vst [vmem:[#allocation14_spill] sm:$0xff] %v8622_v55  ;;  %10313 = vst [vmem:[#allocation15_spill] sm:$0xff] %v8625_v35  ;;  %vm3362_vm0 = vcmp.ge.f32.partialorder %v8620_v32, 0.0  ;;  %v3103_v45 = vmul.f32 0.5, %v3046_v0  ;;  %vm9723_vm1 = vcmp.eq.s32.totalorder %v6762_v34, %v8622_v55  ;;  %v8640_v37 = vadd.s32 1, %v3425_v33  ;;  %v10318_v11 = vld [vmem:[#allocation8_spill] sm:$0xff]  ;;  %v8659_v43 = vpop.xlane.xlu1 %3055 }
 0x383   :  { %10314 = vst [vmem:[#allocation24_spill] sm:$0xff] %v8628_v3  ;;  %v3394_v5 = vsel %vm3362_vm0, 1, %v10222_v61  ;;  %v3199_v31 = vadd.f32 1.0, %v5563_v12  ;;  %v3104_v63 = vmul.f32 0.5, %v3048_v7  ;;  %5568 = verf.f32 %v3138_v16  ;;  %v3837_v7 = vld [vmem:[%s9352_s2 + $0x20] sm:$0xff]  ;;  %v3838_v33 = vld [vmem:[%s9352_s2 + $0x28] sm:$0xff] }
 0x384   :  { %10317 = vst [vmem:[#allocation47_spill] sm:$0xff] %v8640_v37  ;;  %v3520_v8 = vsel %vm9723_vm1, %v10318_v11, 0.0  ;;  %v3230_v19 = vmul.f32 %v3198_v51, %v3102_v58  ;;  %v3139_v0 = vmul.f32 0.70710677, %v8642_v56  ;;  %vm3363_vm6 = vcmp.ge.f32.partialorder %v8642_v56, 0.0  ;;  %v10319_v58 = vld [vmem:[#allocation10_spill] sm:$0xff] }
 0x385   :  { %3559 = vadd.xlane.f32.xlu1 %v3520_v8  ;;  %vm9726_vm0 = vcmp.eq.s32.totalorder %v6762_v34, %v8640_v37  ;;  %v3105_v6 = vmul.f32 0.5, %v3050_v15  ;;  %v3395_v26 = vsel %vm3363_vm6, 1, %v10222_v61  ;;  %v10320_v16 = vld [vmem:[#allocation93_spill] sm:$0xff]  ;;  %v3231_v8 = vmul.f32 %v3199_v31, %v3103_v45 }
 0x386   :  { %v3521_v51 = vsel %vm9726_vm0, %v10319_v58, 0.0  ;;  %v10321_v12 = vmul.u32 2, %v10320_v16  ;;  %5570 = verf.f32 %v3139_v0  ;;  %v3140_v55 = vmul.f32 0.70710677, %v8659_v43  ;;  %v5565_v15 = vpop.eup %5564 }
 0x387   :  { %vm3364_vm1 = vcmp.ge.f32.partialorder %v8659_v43, 0.0  ;;  %3561 = vadd.xlane.f32.xlu0 %v3521_v51  ;;  %v10323_v18 = vmul.u32 2, %v10322_v1  ;;  %v5218_v37 = vpack.c.bf16 %v3838_v33, %v3837_v7  ;;  %v5567_v58 = vpop.eup %5566  ;;  %v3200_v23 = vadd.f32 1.0, %v5565_v15  ;;  %v10327_v33 = vld [vmem:[#allocation21_spill] sm:$0xff] }
 0x388   :  { %v3426_v11 = vadd.s32 %v3394_v5, %v10321_v12  ;;  %v3396_v3 = vsel %vm3364_vm1, 1, %v10222_v61  ;;  %5572 = verf.f32 %v3140_v55  ;;  %v10324_v5 = vld [vmem:[#allocation97_spill] sm:$0xff]  ;;  %vm10326_vm6 = vcmp.eq.s32.totalorder %v6762_v34, %v10288_v46  ;;  %v3839_v46 = vld [vmem:[%s9352_s2 + $0x30] sm:$0xff] }
 0x389   :  { %v3427_v44 = vadd.s32 %v3395_v26, %v10323_v18  ;;  %v10325_v45 = vmul.u32 2, %v10324_v5  ;;  %v3262_v0 = vsel %vm10326_vm6, %v3230_v19, 0.0  ;;  %v3201_v51 = vadd.f32 1.0, %v5567_v58  ;;  %5219 = vmatprep.subr.bf16.mxu1 %v5218_v37 }
 0x38a   :  { %v8670_v35 = vadd.s32 1, %v3426_v11  ;;  %v8684_v18 = vadd.f32 %v3262_v0, %v8449_v49  ;;  %v3232_v7 = vmul.f32 %v3200_v23, %v3104_v63  ;;  %5221 = vmatpush3.bf16.msra.mxu1 %v5218_v37  ;;  %vm10329_vm6 = vcmp.eq.s32.totalorder %v6762_v34, %v10292_v54  ;;  %v8701_v63 = vpop.xlane.xlu0 %3057  ;;  %v10330_v11 = vld [vmem:[#allocation23_spill] sm:$0xff] }
 0x38b   :  { %v3428_v31 = vadd.s32 %v3396_v3, %v10325_v45  ;;  %v8681_v12 = vadd.s32 1, %v3427_v44  ;;  %v3840_v44 = vld [vmem:[%s9352_s2 + $0x38] sm:$0xff]  ;;  %v3263_v49 = vsel %vm10329_vm6, %v3231_v8, 0.0  ;;  %v3233_v23 = vmul.f32 %v3201_v51, %v3105_v6  ;;  %v10331_v6 = vld [vmem:[#allocation59_spill] sm:$0xff] }
 0x38c   :  { %vm9725_vm1 = vcmp.eq.s32.totalorder %v6762_v34, %v8670_v35  ;;  %v5222_v37 = vpack.c.bf16 %v3840_v44, %v3839_v46  ;;  %v8706_v19 = vadd.f32 %v3263_v49, %v8465_v57  ;;  %v3141_v26 = vmul.f32 0.70710677, %v8701_v63  ;;  %v10335_v51 = vld [vmem:[#allocation99_spill] sm:$0xff]  ;;  %v8734_v44 = vpop.xlane.xlu1 %3059 }
 0x38d   :  { %v3522_v55 = vsel %vm9725_vm1, %v10327_v33, 0.0  ;;  %v8690_v3 = vadd.s32 1, %v3428_v31  ;;  %vm9731_vm1 = vcmp.eq.s32.totalorder %v6762_v34, %v8681_v12  ;;  %vm3365_vm0 = vcmp.ge.f32.partialorder %v8701_v63, 0.0  ;;  %v5569_v15 = vpop.eup %5568 }
 0x38e   :  { %3563 = vadd.xlane.f32.xlu1 %v3522_v55  ;;  %v3523_v54 = vsel %vm9731_vm1, %v10330_v11, 0.0  ;;  %v8716_v8 = vadd.f32 %v8359_v9, %v10331_v6  ;;  %v3397_v58 = vsel %vm3365_vm0, 1, %v10222_v61  ;;  %5223 = vmatprep.subr.bf16.mxu1 %v5222_v37  ;;  %vm10332_vm5 = vcmp.eq.s32.totalorder %v6762_v34, %v10304_v10  ;;  %v10334_v9 = vld [vmem:[#allocation22_spill] sm:$0xff]  ;;  %v3062_v6 = vpop.xlane.xlu0 %3061 }
 0x38f   :  { %10328 = vst [vmem:[#allocation48_spill] sm:$0xff] %v8690_v3  ;;  %3565 = vadd.xlane.f32.xlu0 %v3523_v54  ;;  %vm9730_vm6 = vcmp.eq.s32.totalorder %v6762_v34, %v8690_v3  ;;  %v3264_v57 = vsel %vm10332_vm5, %v3232_v7, 0.0  ;;  %vm10333_vm4 = vcmp.eq.s32.totalorder %v6762_v34, %v10306_v27  ;;  %v3202_v31 = vadd.f32 1.0, %v5569_v15  ;;  %5225 = vmatpush3.bf16.msra.mxu1 %v5222_v37  ;;  %v10337_v7 = vld [vmem:[#allocation122_spill] sm:$0xff] }
 0x390   :  { %v3265_v45 = vsel %vm10333_vm4, %v3233_v23, 0.0  ;;  %5574 = verf.f32 %v3141_v26  ;;  %v3524_v0 = vsel %vm9730_vm6, %v10334_v9, 0.0  ;;  %v10336_v33 = vmul.u32 2, %v10335_v51  ;;  %v5571_v23 = vpop.eup %5570 }
 0x391   :  { %v3106_v46 = vmul.f32 0.5, %v8620_v32  ;;  %v8737_v10 = vadd.f32 %v3264_v57, %v8469_v25  ;;  %v8740_v27 = vadd.f32 %v3265_v45, %v8486_v39  ;;  %v8744_v49 = vadd.f32 %v8368_v41, %v10337_v7  ;;  %v10338_v32 = vld [vmem:[#allocation123_spill] sm:$0xff]  ;;  %v3841_v57 = vld [vmem:[%s9352_s2 + $0x40] sm:$0xff] }
 0x392   :  { %v3429_v55 = vadd.s32 %v3397_v58, %v10336_v33  ;;  %3567 = vadd.xlane.f32.xlu1 %v3524_v0  ;;  %v3107_v26 = vmul.f32 0.5, %v8642_v56  ;;  %v3142_v37 = vmul.f32 0.70710677, %v8734_v44  ;;  %vm3366_vm4 = vcmp.ge.f32.partialorder %v8734_v44, 0.0  ;;  %v5573_v41 = vpop.eup %5572 }
 0x393   :  { %v8751_v11 = vadd.f32 %v8376_v42, %v10338_v32  ;;  %v3234_v25 = vmul.f32 %v3202_v31, %v3106_v46  ;;  %v3203_v54 = vadd.f32 1.0, %v5571_v23  ;;  %v3398_v39 = vsel %vm3366_vm4, 1, %v10222_v61  ;;  %v3842_v42 = vld [vmem:[%s9352_s2 + $0x48] sm:$0xff] }
 0x394   :  { %v8754_v15 = vadd.s32 1, %v3429_v55  ;;  %v3108_v58 = vmul.f32 0.5, %v8659_v43  ;;  %5576 = verf.f32 %v3142_v37  ;;  %v3143_v56 = vmul.f32 0.70710677, %v3062_v6  ;;  %v10340_v43 = vld [vmem:[#allocation25_spill] sm:$0xff]  ;;  %v10342_v46 = vld [vmem:[#allocation58_spill] sm:$0xff] }
 0x395   :  { %vm3367_vm5 = vcmp.ge.f32.partialorder %v3062_v6, 0.0  ;;  %v3235_v45 = vmul.f32 %v3203_v54, %v3107_v26  ;;  %v3204_v31 = vadd.f32 1.0, %v5573_v41  ;;  %v10341_v33 = vmul.u32 2, %v10204_v36 }
 0x396   :  { %10339 = vst [vmem:[#allocation49_spill] sm:$0xff] %v8754_v15  ;;  %v3399_v9 = vsel %vm3367_vm5, 1, %v10222_v61  ;;  %vm9729_vm0 = vcmp.eq.s32.totalorder %v6762_v34, %v8754_v15  ;;  %5578 = verf.f32 %v3143_v56  ;;  %v10343_v7 = vmul.u32 2, %v10342_v46 }
 0x397   :  { %v3525_v0 = vsel %vm9729_vm0, %v10340_v43, 0.0  ;;  %v3430_v55 = vadd.s32 %v3398_v39, %v10341_v33  ;;  %v3236_v37 = vmul.f32 %v3204_v31, %v3108_v58  ;;  %v5226_v26 = vpack.c.bf16 %v3842_v42, %v3841_v57  ;;  %v3064_v58 = vpop.xlane.xlu1 %3063  ;;  %v10348_v57 = vld [vmem:[#allocation75_spill] sm:$0xff]  ;;  %v10350_v42 = vld [vmem:[#allocation125_spill] sm:$0xff]  ;;  %v10351_v31 = vld [vmem:[#allocation126_spill] sm:$0xff]  ;;  %v3066_v33 = vpop.xlane.xlu0 %3065 }
 0x398   :  { %v3431_v23 = vadd.s32 %v3399_v9, %v10343_v7  ;;  %3569 = vadd.xlane.f32.xlu0 %v3525_v0  ;;  %vm10344_vm4 = vcmp.eq.s32.totalorder %v6762_v34, %v10320_v16  ;;  %vm10345_vm5 = vcmp.eq.s32.totalorder %v6762_v34, %v10322_v1  ;;  %v8792_v16 = vadd.f32 %v8388_v30, %v10348_v57 }
 0x399   :  { %v3266_v32 = vsel %vm10344_vm4, %v3234_v25, 0.0  ;;  %v3267_v54 = vsel %vm10345_vm5, %v3235_v45, 0.0  ;;  %v8780_v41 = vadd.s32 1, %v3430_v55  ;;  %5227 = vmatprep.subr.bf16.mxu1 %v5226_v26  ;;  %v10349_v25 = vld [vmem:[#allocation77_spill] sm:$0xff]  ;;  %v8800_v45 = vadd.f32 %v8416_v60, %v10350_v42 }
 0x39a   :  { %v8782_v56 = vadd.s32 1, %v3431_v23  ;;  %v8785_v39 = vadd.f32 %v3266_v32, %v8501_v13  ;;  %v8788_v9 = vadd.f32 %v3267_v54, %v8510_v53  ;;  %v8796_v1 = vadd.f32 %v8411_v48, %v10349_v25  ;;  %v5575_v53 = vpop.eup %5574  ;;  %5229 = vmatpush3.bf16.msra.mxu1 %v5226_v26  ;;  %v10354_v26 = vld [vmem:[#allocation17_spill] sm:$0xff]  ;;  %v10355_v32 = vld [vmem:[#allocation60_spill] sm:$0xff] }
 0x39b   :  { %10346 = vst [vmem:[#allocation50_spill] sm:$0xff] %v8780_v41  ;;  %v8804_v13 = vadd.f32 %v8428_v24, %v10351_v31  ;;  %v3109_v43 = vmul.f32 0.5, %v8701_v63  ;;  %v3144_v0 = vmul.f32 0.70710677, %v3064_v58  ;;  %vm3368_vm4 = vcmp.ge.f32.partialorder %v3064_v58, 0.0  ;;  %v10353_v24 = vld [vmem:[#allocation13_spill] sm:$0xff] }
 0x39c   :  { %10347 = vst [vmem:[#allocation51_spill] sm:$0xff] %v8782_v56  ;;  %vm9743_vm5 = vcmp.eq.s32.totalorder %v6762_v34, %v8780_v41  ;;  %v3205_v30 = vadd.f32 1.0, %v5575_v53  ;;  %v3400_v48 = vsel %vm3368_vm4, 1, %v10222_v61  ;;  %v3145_v55 = vmul.f32 0.70710677, %v3066_v33  ;;  %v10359_v53 = vld [vmem:[#allocation116_spill] sm:$0xff] }
 0x39d   :  { %vm10352_vm0 = vcmp.eq.s32.totalorder %v6762_v34, %v10324_v5  ;;  %5580 = verf.f32 %v3144_v0  ;;  %vm3369_vm6 = vcmp.ge.f32.partialorder %v3066_v33, 0.0  ;;  %v3526_v63 = vsel %vm9743_vm5, %v10353_v24, 0.0  ;;  %v3843_v24 = vld [vmem:[%s9352_s2 + $0x50] sm:$0xff] }
 0x39e   :  { %v3268_v60 = vsel %vm10352_vm0, %v3236_v37, 0.0  ;;  %vm9733_vm1 = vcmp.eq.s32.totalorder %v6762_v34, %v8782_v56  ;;  %v3237_v7 = vmul.f32 %v3205_v30, %v3109_v43  ;;  %5582 = verf.f32 %v3145_v55  ;;  %3571 = vadd.xlane.f32.xlu1 %v3526_v63  ;;  %v5577_v37 = vpop.eup %5576  ;;  %v3068_v63 = vpop.xlane.xlu1 %3067 }
 0x39f   :  { %v3401_v23 = vsel %vm3369_vm6, 1, %v10222_v61  ;;  %v3527_v5 = vsel %vm9733_vm1, %v10354_v26, 0.0  ;;  %v10356_v54 = vmul.u32 2, %v10355_v32  ;;  %v10357_v25 = vmul.u32 2, %v10213_v2 }
 0x3a0   :  { %3573 = vadd.xlane.f32.xlu0 %v3527_v5  ;;  %v8829_v31 = vadd.f32 %v3268_v60, %v8525_v17  ;;  %v8833_v43 = vadd.f32 %v8494_v62, %v10359_v53  ;;  %v3110_v0 = vmul.f32 0.5, %v8734_v44  ;;  %v3206_v30 = vadd.f32 1.0, %v5577_v37  ;;  %v5579_v60 = vpop.eup %5578  ;;  %v3070_v62 = vpop.xlane.xlu0 %3069 }
 0x3a1   :  { %v3432_v57 = vadd.s32 %v3400_v48, %v10356_v54  ;;  %v3433_v42 = vadd.s32 %v3401_v23, %v10357_v25  ;;  %v3111_v55 = vmul.f32 0.5, %v3062_v6  ;;  %v3844_v48 = vld [vmem:[%s9352_s2 + $0x58] sm:$0xff]  ;;  %vm10360_vm6 = vcmp.eq.s32.totalorder %v6762_v34, %v10335_v51 }
 0x3a2   :  { %10358 = vst [vmem:[#allocation57_spill] sm:$0xff] %v8829_v31  ;;  %v3269_v17 = vsel %vm10360_vm6, %v3237_v7, 0.0  ;;  %v5230_v6 = vpack.c.bf16 %v3844_v48, %v3843_v24  ;;  %v3238_v5 = vmul.f32 %v3206_v30, %v3110_v0  ;;  %v3207_v37 = vadd.f32 1.0, %v5579_v60  ;;  %v10366_v30 = vld [vmem:[#allocation30_spill] sm:$0xff] }
 0x3a3   :  { %v8845_v23 = vadd.s32 1, %v3432_v57  ;;  %v8847_v44 = vadd.s32 1, %v3433_v42  ;;  %v8850_v26 = vadd.f32 %v3269_v17, %v8535_v21  ;;  %v3112_v54 = vmul.f32 0.5, %v3064_v58  ;;  %v10365_v42 = vld [vmem:[#allocation26_spill] sm:$0xff] }
 0x3a4   :  { %v3146_v25 = vmul.f32 0.70710677, %v3068_v63  ;;  %v3113_v53 = vmul.f32 0.5, %v3066_v33  ;;  %vm3370_vm0 = vcmp.ge.f32.partialorder %v3068_v63, 0.0  ;;  %v3147_v56 = vmul.f32 0.70710677, %v3070_v62  ;;  %5231 = vmatprep.subr.bf16.mxu1 %v5230_v6 }
 0x3a5   :  { %10361 = vst [vmem:[#allocation52_spill] sm:$0xff] %v8845_v23  ;;  %10362 = vst [vmem:[#allocation53_spill] sm:$0xff] %v8847_v44  ;;  %vm3371_vm4 = vcmp.ge.f32.partialorder %v3070_v62, 0.0  ;;  %v3239_v51 = vmul.f32 %v3207_v37, %v3111_v55  ;;  %v3402_v7 = vsel %vm3370_vm0, 1, %v10222_v61  ;;  %5233 = vmatpush3.bf16.msra.mxu1 %v5230_v6  ;;  %vm9737_vm6 = vcmp.eq.s32.totalorder %v6762_v34, %v8845_v23  ;;  %v3845_v55 = vld [vmem:[%s9352_s2 + $0x60] sm:$0xff]  ;;  %v3846_v24 = vld [vmem:[%s9352_s2 + $0x68] sm:$0xff]  ;;  %v3074_v6 = vpop.xlane.xlu0 %3073 }
 0x3a6   :  { %10363 = vst [vmem:[#allocation54_spill] sm:$0xff] %v8850_v26  ;;  %5584 = verf.f32 %v3146_v25  ;;  %v3403_v57 = vsel %vm3371_vm4, 1, %v10222_v61  ;;  %vm9736_vm1 = vcmp.eq.s32.totalorder %v6762_v34, %v8847_v44  ;;  %v10364_v21 = vmul.u32 2, %v7799_v38 }
 0x3a7   :  { %5586 = verf.f32 %v3147_v56  ;;  %v3114_v33 = vmul.f32 0.5, %v3068_v63  ;;  %v3528_v0 = vsel %vm9737_vm6, %v10365_v42, 0.0  ;;  %v3529_v56 = vsel %vm9736_vm1, %v10366_v30, 0.0  ;;  %v5581_v17 = vpop.eup %5580  ;;  %v3072_v63 = vpop.xlane.xlu1 %3071 }
 0x3a8   :  { %v3434_v58 = vadd.s32 %v3402_v7, %v10364_v21  ;;  %vm10367_vm0 = vcmp.eq.s32.totalorder %v6762_v34, %v10204_v36  ;;  %v3115_v60 = vmul.f32 0.5, %v3070_v62  ;;  %3575 = vadd.xlane.f32.xlu1 %v3528_v0  ;;  %3577 = vadd.xlane.f32.xlu0 %v3529_v56  ;;  %v5234_v25 = vpack.c.bf16 %v3846_v24, %v3845_v55  ;;  %v5583_v21 = vpop.eup %5582 }
 0x3a9   :  { %v3270_v48 = vsel %vm10367_vm0, %v3238_v5, 0.0  ;;  %v3208_v42 = vadd.f32 1.0, %v5581_v17  ;;  %v3148_v30 = vmul.f32 0.70710677, %v3072_v63  ;;  %vm3372_vm4 = vcmp.ge.f32.partialorder %v3072_v63, 0.0 }
 0x3aa   :  { %v8877_v37 = vadd.s32 1, %v3434_v58  ;;  %v8880_v7 = vadd.f32 %v3270_v48, %v8543_v50  ;;  %v10370_v44 = vmul.u32 2, %v10215_v29  ;;  %v3209_v5 = vadd.f32 1.0, %v5583_v21  ;;  %5235 = vmatprep.subr.bf16.mxu1 %v5234_v25  ;;  %v3078_v48 = vpop.xlane.xlu0 %3077 }
 0x3ab   :  { %v3404_v62 = vsel %vm3372_vm4, 1, %v10222_v61  ;;  %v3149_v23 = vmul.f32 0.70710677, %v3074_v6  ;;  %vm10371_vm0 = vcmp.eq.s32.totalorder %v6762_v34, %v10342_v46  ;;  %v3240_v0 = vmul.f32 %v3208_v42, %v3112_v54  ;;  %5237 = vmatpush3.bf16.msra.mxu1 %v5234_v25 }
 0x3ac   :  { %10368 = vst [vmem:[#allocation100_spill] sm:$0xff] %v8877_v37  ;;  %10369 = vst [vmem:[#allocation101_spill] sm:$0xff] %v8880_v7  ;;  %v3435_v36 = vadd.s32 %v3403_v57, %v10370_v44  ;;  %v3271_v58 = vsel %vm10371_vm0, %v3239_v51, 0.0  ;;  %5588 = verf.f32 %v3148_v30  ;;  %vm3373_vm1 = vcmp.ge.f32.partialorder %v3074_v6, 0.0  ;;  %v10372_v57 = vld [vmem:[#allocation29_spill] sm:$0xff]  ;;  %v3076_v51 = vpop.xlane.xlu1 %3075 }
 0x3ad   :  { %vm9738_vm6 = vcmp.eq.s32.totalorder %v6762_v34, %v8877_v37  ;;  %v3241_v50 = vmul.f32 %v3209_v5, %v3113_v53  ;;  %5590 = verf.f32 %v3149_v23  ;;  %v3405_v44 = vsel %vm3373_vm1, 1, %v10222_v61 }
 0x3ae   :  { %v3530_v56 = vsel %vm9738_vm6, %v10372_v57, 0.0  ;;  %v3116_v55 = vmul.f32 0.5, %v3072_v63  ;;  %v3117_v24 = vmul.f32 0.5, %v3074_v6  ;;  %v8895_v46 = vadd.s32 1, %v3435_v36  ;;  %v10379_v57 = vld [vmem:[#allocation31_spill] sm:$0xff] }
 0x3af   :  { %3579 = vadd.xlane.f32.xlu1 %v3530_v56  ;;  %v8898_v54 = vadd.f32 %v3271_v58, %v8547_v4  ;;  %v10375_v53 = vmul.u32 2, %v7856_v14  ;;  %v10376_v17 = vmul.u32 2, %v7858_v40  ;;  %vm10377_vm1 = vcmp.eq.s32.totalorder %v6762_v34, %v10355_v32 }
 0x3b0   :  { %10373 = vst [vmem:[#allocation61_spill] sm:$0xff] %v8895_v46  ;;  %v3272_v21 = vsel %vm10377_vm1, %v3240_v0, 0.0  ;;  %vm10378_vm4 = vcmp.eq.s32.totalorder %v6762_v34, %v10213_v2  ;;  %v5585_v6 = vpop.eup %5584  ;;  %v8910_v42 = vmul.f32 0.5, %v3076_v51  ;;  %v3150_v4 = vmul.f32 0.70710677, %v3076_v51  ;;  %v3847_v2 = vld [vmem:[%s9352_s2 + $0x70] sm:$0xff] }
 0x3b1   :  { %10374 = vst [vmem:[#allocation73_spill] sm:$0xff] %v8898_v54  ;;  %v3436_v23 = vadd.s32 %v3404_v62, %v10375_v53  ;;  %v3437_v25 = vadd.s32 %v3405_v44, %v10376_v17  ;;  %v3273_v63 = vsel %vm10378_vm4, %v3241_v50, 0.0  ;;  %vm3374_vm0 = vcmp.ge.f32.partialorder %v3076_v51, 0.0  ;;  %v5587_v36 = vpop.eup %5586  ;;  %v3848_v0 = vld [vmem:[%s9352_s2 + $0x78] sm:$0xff]  ;;  %v3080_v54 = vpop.xlane.xlu1 %3079  ;;  %s5703_s2 = smov [#allocation2]  }
 0x3b2   :  { %v8912_v30 = vmul.f32 0.5, %v3078_v48  ;;  %v3210_v5 = vadd.f32 1.0, %v5585_v6  ;;  %v3406_v62 = vsel %vm3374_vm0, 1, %v10222_v61  ;;  %v3151_v58 = vmul.f32 0.70710677, %v3078_v48  ;;  %s4111_s27 = sshll.u32 %s5703_s2, 4  ;;  %s4112_s27 = int_to_ptr.vmem [resolvable:$true] %s4111_s27 }
 0x3b3   :  { %vm3375_vm6 = vcmp.ge.f32.partialorder %v3078_v48, 0.0  ;;  %v3211_v44 = vadd.f32 1.0, %v5587_v36  ;;  %5592 = verf.f32 %v3150_v4  ;;  %vm9740_vm1 = vcmp.eq.s32.totalorder %v6762_v34, %v8895_v46  ;;  %v10383_v4 = vld [vmem:[#allocation117_spill] sm:$0xff]  ;;  %s5678_s28 = scalar_lea.vmem %s4112_s27, 4096  ;;  %p5683_p1 = scmp.lt.s32.totalorder %s4112_s27, %s4112_s27 }
 0x3b4   :  { %v3407_v32 = vsel %vm3375_vm6, 1, %v10222_v61  ;;  %v3242_v50 = vmul.f32 %v3210_v5, %v3114_v33  ;;  %5594 = verf.f32 %v3151_v58  ;;  %v3531_v56 = vsel %vm9740_vm1, %v10379_v57, 0.0  ;;  %p5679_p0 = scmp.ne.s32.totalorder %s4112_s27, %s5678_s28  ;;  %p5684_p2 = scmp.lt.s32.totalorder %s5678_s28, %s5678_s28 }
 0x3b5   :  { %v8928_v51 = vadd.s32 1, %v3436_v23  ;;  %v3243_v48 = vmul.f32 %v3211_v44, %v3115_v60  ;;  %3581 = vadd.xlane.f32.xlu0 %v3531_v56  ;;  %v8930_v53 = vadd.s32 1, %v3437_v25  ;;  %v10382_v17 = vmul.u32 2, %v7944_v28  ;;  %v10387_v44 = vld [vmem:[#allocation20_spill] sm:$0xff] }
 0x3b6   :  { %v10384_v36 = vmul.u32 2, %v10383_v4  ;;  %v5238_v33 = vpack.c.bf16 %v3848_v0, %v3847_v2  ;;  %v8939_v5 = vadd.f32 %v3272_v21, %v8551_v59  ;;  %v8942_v23 = vadd.f32 %v3273_v63, %v8568_v20  ;;  %v5589_v60 = vpop.eup %5588  ;;  %v10388_v0 = vld [vmem:[#allocation27_spill] sm:$0xff]  ;;  %p5685_p3 = por %p5684_p2, %p5683_p1 }
 0x3b7   :  { %10380 = vst [vmem:[#allocation62_spill] sm:$0xff] %v8928_v51  ;;  %10381 = vst [vmem:[#allocation63_spill] sm:$0xff] %v8930_v53  ;;  %v3438_v6 = vadd.s32 %v3406_v62, %v10382_v17  ;;  %vm9742_vm6 = vcmp.eq.s32.totalorder %v6762_v34, %v8928_v51  ;;  %v8944_v25 = vmul.f32 0.5, %v3080_v54  ;;  %v3152_v58 = vmul.f32 0.70710677, %v3080_v54  ;;  %v3082_v62 = vpop.xlane.xlu0 %3081  ;;  %v5591_v57 = vpop.eup %5590  ;;  %v10404_v51 = vld [vmem:[#allocation78_spill] sm:$0xff] }
 0x3b8   :  { %v3439_v37 = vadd.s32 %v3407_v32, %v10384_v36  ;;  %10385 = vst [vmem:[#allocation74_spill] sm:$0xff] %v8939_v5  ;;  %10386 = vst [vmem:[#allocation7_spill] sm:$0xff] %v8942_v23  ;;  %vm3376_vm4 = vcmp.ge.f32.partialorder %v3080_v54, 0.0  ;;  %v3532_v32 = vsel %vm9742_vm6, %v10387_v44, 0.0  ;;  %v3212_v56 = vadd.f32 1.0, %v5589_v60  ;;  %5239 = vmatprep.subr.bf16.mxu1 %v5238_v33  ;;  %p5686_p4 = pnand %p5685_p3, %p5679_p0 }
 0x3b9   :  { %v3408_v2 = vsel %vm3376_vm4, 1, %v10222_v61  ;;  %v8951_v59 = vmul.f32 0.5, %v3082_v62  ;;  %v3153_v21 = vmul.f32 0.70710677, %v3082_v62  ;;  %3583 = vadd.xlane.f32.xlu1 %v3532_v32  ;;  %v3213_v20 = vadd.f32 1.0, %v5591_v57  ;;  %5241 = vmatpush3.bf16.msra.mxu1 %v5238_v33  ;;  %v10393_v33 = vld [vmem:[#allocation124_spill] sm:$0xff] }
 0x3ba   :  { %5596 = verf.f32 %v3152_v58  ;;  %vm3377_vm0 = vcmp.ge.f32.partialorder %v3082_v62, 0.0  ;;  %vm9741_vm1 = vcmp.eq.s32.totalorder %v6762_v34, %v8930_v53  ;;  %v3244_v54 = vmul.f32 %v3212_v56, %v3116_v55  ;;  %v10391_v62 = vld [vmem:[#allocation72_spill] sm:$0xff] }
 0x3bb   :  { %5598 = verf.f32 %v3153_v21  ;;  %v3409_v63 = vsel %vm3377_vm0, 1, %v10222_v61  ;;  %v3533_v17 = vsel %vm9741_vm1, %v10388_v0, 0.0  ;;  %v8960_v36 = vmul.f32 %v3213_v20, %v3117_v24  ;;  %v3084_v21 = vpop.xlane.xlu1 %3083  ;;  %v3086_v20 = vpop.xlane.xlu0 %3085 }
 0x3bc   :  { %3585 = vadd.xlane.f32.xlu0 %v3533_v17  ;;  %v8962_v60 = vadd.s32 1, %v3438_v6  ;;  %v8964_v58 = vadd.s32 1, %v3439_v37  ;;  %v10392_v44 = vmul.u32 2, %v10391_v62  ;;  %v10394_v55 = vmul.u32 2, %v10393_v33 }
 0x3bd   :  { %vm10395_vm4 = vcmp.eq.s32.totalorder %v6762_v34, %v7799_v38  ;;  %vm10396_vm0 = vcmp.eq.s32.totalorder %v6762_v34, %v10215_v29  ;;  %vm10397_vm1 = vcmp.eq.s32.totalorder %v6762_v34, %v7856_v14  ;;  %v5593_v6 = vpop.eup %5592  ;;  %v3154_v14 = vmul.f32 0.70710677, %v3084_v21 }
 0x3be   :  { %10389 = vst [vmem:[#allocation76_spill] sm:$0xff] %v8962_v60  ;;  %10390 = vst [vmem:[#allocation65_spill] sm:$0xff] %v8964_v58  ;;  %v3440_v32 = vadd.s32 %v3408_v2, %v10392_v44  ;;  %v3441_v57 = vadd.s32 %v3409_v63, %v10394_v55  ;;  %v3274_v56 = vsel %vm10395_vm4, %v3242_v50, 0.0  ;;  %v8976_v24 = vsel %vm10396_vm0, %v3243_v48, 0.0  ;;  %v5595_v29 = vpop.eup %5594 }
 0x3bf   :  { %v8981_v37 = vsel %vm10397_vm1, %v3244_v54, 0.0  ;;  %vm3502_vm6 = vcmp.eq.s32.totalorder %v6762_v34, %v8962_v60  ;;  %vm3503_vm5 = vcmp.eq.s32.totalorder %v6762_v34, %v8964_v58  ;;  %v8990_v50 = vadd.f32 %v3274_v56, %v8575_v22  ;;  %v10400_v22 = vld [vmem:[#allocation33_spill] sm:$0xff] }
 0x3c0   :  { %v8987_v38 = vadd.s32 1, %v3440_v32  ;;  %v3214_v48 = vadd.f32 1.0, %v5593_v6  ;;  %v8992_v2 = vmul.f32 0.5, %v3084_v21  ;;  %vm3378_vm1 = vcmp.ge.f32.partialorder %v3084_v21, 0.0  ;;  %v10401_v6 = vld [vmem:[#allocation35_spill] sm:$0xff]  ;;  %v3088_v21 = vpop.xlane.xlu1 %3087 }
 0x3c1   :  { %10399 = vst [vmem:[#allocation67_spill] sm:$0xff] %v8990_v50  ;;  %v3215_v54 = vadd.f32 1.0, %v5595_v29  ;;  %v3410_v63 = vsel %vm3378_vm1, 1, %v10222_v61  ;;  %v8995_v0 = vmul.f32 0.5, %v3086_v20  ;;  %v3155_v17 = vmul.f32 0.70710677, %v3086_v20 }
 0x3c2   :  { %10398 = vst [vmem:[#allocation66_spill] sm:$0xff] %v8987_v38  ;;  %v8998_v44 = vmul.f32 %v3214_v48, %v8910_v42  ;;  %5600 = verf.f32 %v3154_v14  ;;  %vm3379_vm4 = vcmp.ge.f32.partialorder %v3086_v20, 0.0  ;;  %v3534_v32 = vsel %vm3502_vm6, %v10400_v22, 0.0  ;;  %v3090_v14 = vpop.xlane.xlu0 %3089 }
 0x3c3   :  { %v9005_v55 = vmul.f32 %v3215_v54, %v8912_v30  ;;  %5602 = verf.f32 %v3155_v17  ;;  %v3411_v56 = vsel %vm3379_vm4, 1, %v10222_v61  ;;  %3587 = vadd.xlane.f32.xlu1 %v3534_v32  ;;  %v3535_v42 = vsel %vm3503_vm5, %v10401_v6, 0.0 }
 0x3c4   :  { %3589 = vadd.xlane.f32.xlu0 %v3535_v42  ;;  %v9012_v29 = vmul.f32 0.5, %v3088_v21  ;;  %v3156_v48 = vmul.f32 0.70710677, %v3088_v21  ;;  %vm3380_vm0 = vcmp.ge.f32.partialorder %v3088_v21, 0.0  ;;  %vm9750_vm1 = vcmp.eq.s32.totalorder %v6762_v34, %v8987_v38  ;;  %v5597_v30 = vpop.eup %5596  ;;  %v10402_v42 = vld [vmem:[#allocation34_spill] sm:$0xff]  ;;  %v3092_v53 = vpop.xlane.xlu1 %3091 }
 0x3c5   :  { %v3412_v20 = vsel %vm3380_vm0, 1, %v10222_v61  ;;  %v9017_v54 = vmul.f32 0.5, %v3090_v14  ;;  %v3157_v17 = vmul.f32 0.70710677, %v3090_v14  ;;  %vm3381_vm4 = vcmp.ge.f32.partialorder %v3090_v14, 0.0  ;;  %v5599_v22 = vpop.eup %5598 }
 0x3c6   :  { %v3216_v32 = vadd.f32 1.0, %v5597_v30  ;;  %5604 = verf.f32 %v3156_v48  ;;  %v3413_v6 = vsel %vm3381_vm4, 1, %v10222_v61  ;;  %v3536_v21 = vsel %vm9750_vm1, %v10402_v42, 0.0  ;;  %v3094_v23 = vpop.xlane.xlu0 %3093 }
 0x3c7   :  { %v3217_v58 = vadd.f32 1.0, %v5599_v22  ;;  %5606 = verf.f32 %v3157_v17  ;;  %3591 = vadd.xlane.f32.xlu1 %v3536_v21  ;;  %v9024_v60 = vadd.s32 1, %v3441_v57  ;;  %v10405_v46 = vmul.u32 2, %v10404_v51  ;;  %v10406_v22 = vld [vmem:[#allocation36_spill] sm:$0xff]  ;;  %v10410_v21 = vld [vmem:[#allocation79_spill] sm:$0xff] }
 0x3c8   :  { %v9029_v14 = vmul.f32 %v3216_v32, %v8944_v25  ;;  %v9031_v48 = vmul.f32 0.5, %v3092_v53  ;;  %v3158_v30 = vmul.f32 0.70710677, %v3092_v53  ;;  %vm3382_vm0 = vcmp.ge.f32.partialorder %v3092_v53, 0.0  ;;  %v3096_v42 = vpop.xlane.xlu1 %3095 }
 0x3c9   :  { %10403 = vst [vmem:[#allocation102_spill] sm:$0xff] %v9024_v60  ;;  %v3442_v50 = vadd.s32 %v3410_v63, %v10405_v46  ;;  %v9034_v38 = vmul.f32 %v3217_v58, %v8951_v59  ;;  %vm9752_vm4 = vcmp.eq.s32.totalorder %v6762_v34, %v9024_v60  ;;  %v3414_v57 = vsel %vm3382_vm0, 1, %v10222_v61  ;;  %v10408_v58 = vld [vmem:[#allocation64_spill] sm:$0xff]  ;;  %v10416_v60 = vld [vmem:[#allocation83_spill] sm:$0xff] }
 0x3ca   :  { %v9039_v17 = vmul.f32 0.5, %v3094_v23  ;;  %v3537_v46 = vsel %vm9752_vm4, %v10406_v22, 0.0  ;;  %5608 = verf.f32 %v3158_v30  ;;  %v3159_v25 = vmul.f32 0.70710677, %v3094_v23 }
 0x3cb   :  { %vm3383_vm1 = vcmp.ge.f32.partialorder %v3094_v23, 0.0  ;;  %3593 = vadd.xlane.f32.xlu0 %v3537_v46  ;;  %v9046_v59 = vadd.s32 1, %v3442_v50  ;;  %v10409_v63 = vmul.u32 2, %v10408_v58  ;;  %v10411_v5 = vmul.u32 2, %v10410_v21  ;;  %v10437_v21 = vld [vmem:[#allocation128_spill] sm:$0xff] }
 0x3cc   :  { %v3415_v53 = vsel %vm3383_vm1, 1, %v10222_v61  ;;  %v5601_v41 = vpop.eup %5600  ;;  %5610 = verf.f32 %v3159_v25  ;;  %v9052_v26 = vmul.f32 0.5, %v3096_v42  ;;  %v3160_v22 = vmul.f32 0.70710677, %v3096_v42 }
 0x3cd   :  { %10407 = vst [vmem:[#allocation103_spill] sm:$0xff] %v9046_v59  ;;  %v3443_v32 = vadd.s32 %v3411_v56, %v10409_v63  ;;  %v3444_v7 = vadd.s32 %v3412_v20, %v10411_v5  ;;  %vm3384_vm0 = vcmp.ge.f32.partialorder %v3096_v42, 0.0  ;;  %v5603_v30 = vpop.eup %5602  ;;  %v3218_v23 = vadd.f32 1.0, %v5601_v41  ;;  %v10413_v63 = vld [vmem:[#allocation32_spill] sm:$0xff]  ;;  %v10414_v41 = vld [vmem:[#allocation82_spill] sm:$0xff] }
 0x3ce   :  { %vm9760_vm1 = vcmp.eq.s32.totalorder %v6762_v34, %v9046_v59  ;;  %v3416_v46 = vsel %vm3384_vm0, 1, %v10222_v61  ;;  %v3219_v56 = vadd.f32 1.0, %v5603_v30  ;;  %5612 = verf.f32 %v3160_v22  ;;  %v10418_v59 = vld [vmem:[#allocation38_spill] sm:$0xff] }
 0x3cf   :  { %v9056_v50 = vadd.s32 1, %v3443_v32  ;;  %v3538_v5 = vsel %vm9760_vm1, %v10413_v63, 0.0  ;;  %v9063_v20 = vadd.s32 1, %v3444_v7  ;;  %v3250_v25 = vmul.f32 %v3218_v23, %v8992_v2  ;;  %v10419_v2 = vld [vmem:[#allocation85_spill] sm:$0xff] }
 0x3d0   :  { %3595 = vadd.xlane.f32.xlu1 %v3538_v5  ;;  %v10415_v32 = vmul.u32 2, %v10414_v41  ;;  %v10417_v61 = vmul.u32 2, %v10416_v60  ;;  %v5605_v15 = vpop.eup %5604  ;;  %v3251_v31 = vmul.f32 %v3219_v56, %v8995_v0 }
 0x3d1   :  { %10412 = vst [vmem:[#allocation28_spill] sm:$0xff] %v9056_v50  ;;  %vm9759_vm4 = vcmp.eq.s32.totalorder %v6762_v34, %v9056_v50  ;;  %vm9758_vm0 = vcmp.eq.s32.totalorder %v6762_v34, %v9063_v20  ;;  %v10420_v22 = vmul.u32 2, %v10419_v2  ;;  %v5607_v63 = vpop.eup %5606  ;;  %v3220_v5 = vadd.f32 1.0, %v5605_v15 }
 0x3d2   :  { %v3445_v42 = vadd.s32 %v3413_v6, %v10415_v32  ;;  %v3446_v30 = vadd.s32 %v3414_v57, %v10417_v61  ;;  %v3539_v7 = vsel %vm9759_vm4, %v10418_v59, 0.0  ;;  %v10421_v6 = vld [vmem:[#allocation37_spill] sm:$0xff]  ;;  %v3221_v32 = vadd.f32 1.0, %v5607_v63  ;;  %v10422_v61 = vld [vmem:[#allocation127_spill] sm:$0xff] }
 0x3d3   :  { %v3447_v23 = vadd.s32 %v3415_v53, %v10420_v22  ;;  %3597 = vadd.xlane.f32.xlu0 %v3539_v7  ;;  %v3540_v57 = vsel %vm9758_vm0, %v10421_v6, 0.0  ;;  %v10423_v50 = vmul.u32 2, %v10422_v61  ;;  %v9095_v53 = vadd.f32 %v8976_v24, %v8579_v47  ;;  %v10425_v24 = vld [vmem:[#allocation39_spill] sm:$0xff] }
 0x3d4   :  { %v9085_v0 = vadd.s32 1, %v3445_v42  ;;  %v9087_v56 = vadd.s32 1, %v3446_v30  ;;  %v3252_v15 = vmul.f32 %v3220_v5, %v9012_v29  ;;  %3599 = vadd.xlane.f32.xlu1 %v3540_v57  ;;  %v9104_v42 = vadd.f32 %v8981_v37, %v8586_v52  ;;  %v5609_v30 = vpop.eup %5608  ;;  %v10426_v52 = vld [vmem:[#allocation41_spill] sm:$0xff]  ;;  %v10428_v63 = vld [vmem:[#allocation11_spill] sm:$0xff] }
 0x3d5   :  { %v9089_v59 = vadd.s32 1, %v3447_v23  ;;  %v3448_v3 = vadd.s32 %v3416_v46, %v10423_v50  ;;  %v3253_v50 = vmul.f32 %v3221_v32, %v9017_v54  ;;  %v10424_v46 = vld [vmem:[#allocation40_spill] sm:$0xff]  ;;  %v3222_v7 = vadd.f32 1.0, %v5609_v30  ;;  %v10431_v32 = vld [vmem:[#allocation45_spill] sm:$0xff]  ;;  %v10432_v30 = vld [vmem:[#allocation6_spill] sm:$0xff] }
 0x3d6   :  { %vm9761_vm0 = vcmp.eq.s32.totalorder %v6762_v34, %v9085_v0  ;;  %vm9762_vm4 = vcmp.eq.s32.totalorder %v6762_v34, %v9087_v56  ;;  %v5611_v23 = vpop.eup %5610  ;;  %v3284_v33 = vsel %vm2996_vm12, %v3252_v15, 0.0 }
 0x3d7   :  { %v3541_v47 = vsel %vm9761_vm0, %v10424_v46, 0.0  ;;  %v3542_v29 = vsel %vm9762_vm4, %v10425_v24, 0.0  ;;  %vm9763_vm1 = vcmp.eq.s32.totalorder %v6762_v34, %v9089_v59  ;;  %v9121_v54 = vadd.s32 1, %v3448_v3 }
 0x3d8   :  { %3601 = vadd.xlane.f32.xlu0 %v3541_v47  ;;  %v3543_v37 = vsel %vm9763_vm1, %v10426_v52, 0.0  ;;  %vm10427_vm0 = vcmp.eq.s32.totalorder %v6762_v34, %v7858_v40  ;;  %vm10429_vm4 = vcmp.eq.s32.totalorder %v6762_v34, %v7944_v28  ;;  %vm10430_vm1 = vcmp.eq.s32.totalorder %v6762_v34, %v10383_v4  ;;  %3603 = vadd.xlane.f32.xlu1 %v3542_v29 }
 0x3d9   :  { %v3277_v22 = vsel %vm10427_vm0, %v8960_v36, 0.0  ;;  %v3278_v6 = vsel %vm10429_vm4, %v8998_v44, 0.0  ;;  %v3279_v3 = vsel %vm10430_vm1, %v9005_v55, 0.0  ;;  %v3280_v40 = vsel %vm2992_vm2, %v9029_v14, 0.0  ;;  %v5613_v44 = vpop.eup %5612  ;;  %v10433_v55 = vld [vmem:[#allocation46_spill] sm:$0xff] }
 0x3da   :  { %v9128_v5 = vadd.f32 %v3277_v22, %v10428_v63  ;;  %v3254_v36 = vmul.f32 %v3222_v7, %v9031_v48  ;;  %v3223_v57 = vadd.f32 1.0, %v5611_v23  ;;  %vm3512_vm0 = vcmp.eq.s32.totalorder %v6762_v34, %v9121_v54 }
 0x3db   :  { %v9146_v28 = vadd.f32 %v3278_v6, %v10431_v32  ;;  %v3544_v4 = vsel %vm3512_vm0, %v10432_v30, 0.0  ;;  %v9153_v46 = vadd.f32 %v3279_v3, %v10433_v55  ;;  %v9156_v62 = vadd.f32 %v3280_v40, %v8716_v8 }
 0x3dc   :  { %v3281_v14 = vsel %vm2993_vm10, %v9034_v38, 0.0  ;;  %v3255_v48 = vmul.f32 %v3223_v57, %v9039_v17  ;;  %v3224_v47 = vadd.f32 1.0, %v5613_v44  ;;  %3605 = vadd.xlane.f32.xlu0 %v3543_v37  ;;  %v3282_v29 = vsel %vm2994_vm9, %v3250_v25, 0.0  ;;  %3607 = vadd.xlane.f32.xlu1 %v3544_v4  ;;  %v10446_v44 = vld [vmem:[#allocation15_spill] sm:$0xff] }
 0x3dd   :  { %v9164_v24 = vadd.f32 %v3281_v14, %v8744_v49  ;;  %v9170_v7 = vadd.f32 %v3282_v29, %v8751_v11  ;;  %vm10434_vm2 = vcmp.eq.s32.totalorder %v6762_v34, %v10408_v58  ;;  %vm10435_vm10 = vcmp.eq.s32.totalorder %v6762_v34, %v10414_v41  ;;  %v10440_v14 = vld [vmem:[#allocation80_spill] sm:$0xff] }
 0x3de   :  { %v3283_v8 = vsel %vm10434_vm2, %v3251_v31, 0.0  ;;  %v3285_v49 = vsel %vm10435_vm10, %v3253_v50, 0.0  ;;  %v3256_v38 = vmul.f32 %v3224_v47, %v9052_v26  ;;  %v9186_v11 = vadd.f32 %v3284_v33, %v8796_v1  ;;  %v10438_v26 = vld [vmem:[#allocation81_spill] sm:$0xff] }
 0x3df   :  { %v9183_v51 = vadd.f32 %v3283_v8, %v8792_v16  ;;  %v9189_v17 = vadd.f32 %v3285_v49, %v8800_v45  ;;  %vm10436_vm9 = vcmp.eq.s32.totalorder %v6762_v34, %v10416_v60  ;;  %v3287_v58 = vsel %vm2999_vm15, %v3255_v48, 0.0  ;;  %v10442_v49 = vld [vmem:[#allocation55_spill] sm:$0xff] }
 0x3e0   :  { %v3286_v31 = vsel %vm10436_vm9, %v3254_v36, 0.0  ;;  %v2808_v25 = vadd.f32 %v10438_v26, %v10437_v21  ;;  %v9203_v1 = vadd.f32 %v3287_v58, %v8833_v43  ;;  %v3288_v45 = vsel %vm3000_vm8, %v3256_v38, 0.0  ;;  %v10444_v21 = vld [vmem:[#allocation98_spill] sm:$0xff] }
 0x3e1   :  { %v9200_v16 = vadd.f32 %v3286_v31, %v8804_v13 }
 0x3e2   :  { %v9208_v41 = vadd.f32 %v3288_v45, %v2808_v25 }
 0x3f1   :  { %v3546_v60 = vpop.xlane.xlu0 %3545 }
 0x3f2   :  { %v3641_v15 = vmul.f32 0.70710677, %v3546_v60  ;;  %v3609_v22 = vmul.f32 0.5, %v3546_v60 }
 0x3f4   :  { %5614 = verf.f32 %v3641_v15 }
 0x3f5   :  { %v3548_v2 = vpop.xlane.xlu1 %3547 }
 0x3f6   :  { %v3642_v50 = vmul.f32 0.70710677, %v3548_v2  ;;  %v3550_v52 = vpop.xlane.xlu0 %3549  ;;  %v3610_v57 = vmul.f32 0.5, %v3548_v2 }
 0x3f7   :  { %v3643_v37 = vmul.f32 0.70710677, %v3550_v52  ;;  %v3611_v4 = vmul.f32 0.5, %v3550_v52 }
 0x3f8   :  { %5616 = verf.f32 %v3642_v50 }
 0x3f9   :  { %5618 = verf.f32 %v3643_v37 }
 0x3fe   :  { %v5615_v13 = vpop.eup %5614 }
 0x3ff   :  { %v3705_v23 = vadd.f32 1.0, %v5615_v13  ;;  %v3552_v43 = vpop.xlane.xlu1 %3551 }
 0x400   :  { %v3644_v63 = vmul.f32 0.70710677, %v3552_v43  ;;  %v3612_v52 = vmul.f32 0.5, %v3552_v43 }
 0x401   :  { %v3554_v6 = vpop.xlane.xlu0 %3553  ;;  %v3737_v3 = vmul.f32 %v3705_v23, %v3609_v22 }
 0x402   :  { %v3645_v61 = vmul.f32 0.70710677, %v3554_v6  ;;  %v5617_v40 = vpop.eup %5616  ;;  %5620 = verf.f32 %v3644_v63  ;;  %v3613_v13 = vmul.f32 0.5, %v3554_v6  ;;  %v10448_v6 = vld [vmem:[#allocation24_spill] sm:$0xff] }
 0x403   :  { %v5619_v36 = vpop.eup %5618  ;;  %v3706_v32 = vadd.f32 1.0, %v5617_v40  ;;  %v3769_v30 = vsel %vm3481_vm3, %v3737_v3, 0.0 }
 0x404   :  { %5622 = verf.f32 %v3645_v61  ;;  %v3707_v55 = vadd.f32 1.0, %v5619_v36  ;;  %v3801_v48 = vadd.f32 %v3769_v30, %v10440_v14 }
 0x405   :  { %v3738_v47 = vmul.f32 %v3706_v32, %v3610_v57 }
 0x406   :  { %v3739_v29 = vmul.f32 %v3707_v55, %v3611_v4  ;;  %4970 = vmatprep.mubr.f32.mxu1 %v3801_v48 }
 0x407   :  { %v3770_v33 = vsel %vm3482_vm13, %v3738_v47, 0.0  ;;  %vm10457_vm13 = vcmp.eq.s32.totalorder %v6762_v34, %v8670_v35 }
 0x408   :  { %v3802_v38 = vadd.f32 %v3770_v33, %v10442_v49  ;;  %v3771_v58 = vsel %vm3483_vm14, %v3739_v29, 0.0  ;;  %vm10458_vm14 = vcmp.eq.s32.totalorder %v6762_v34, %v8681_v12 }
 0x409   :  { %v3803_v26 = vadd.f32 %v3771_v58, %v10444_v21 }
 0x40a   :  { %4971 = vmatmul.mubr.f32.vlgmr.msra.gmra.mrb[32].mxu1 %v3802_v38 }
 0x40b   :  { %v3556_v25 = vpop.xlane.xlu1 %3555  ;;  %4973 = vmatprep.mubr.f32.mxu1 %v3803_v26 }
 0x40c   :  { %v3558_v45 = vpop.xlane.xlu0 %3557  ;;  %v3646_v60 = vmul.f32 0.70710677, %v3556_v25  ;;  %v5621_v2 = vpop.eup %5620  ;;  %v3614_v8 = vmul.f32 0.5, %v3556_v25 }
 0x40d   :  { %v3647_v15 = vmul.f32 0.70710677, %v3558_v45  ;;  %v3708_v37 = vadd.f32 1.0, %v5621_v2  ;;  %v3615_v38 = vmul.f32 0.5, %v3558_v45  ;;  %v10451_v45 = vld [vmem:[#allocation56_spill] sm:$0xff] }
 0x40e   :  { %v5623_v50 = vpop.eup %5622  ;;  %5624 = verf.f32 %v3646_v60  ;;  %vm10452_vm12 = vcmp.eq.s32.totalorder %v6762_v34, %v10451_v45 }
 0x40f   :  { %v3709_v22 = vadd.f32 1.0, %v5623_v50  ;;  %5626 = verf.f32 %v3647_v15  ;;  %v3740_v23 = vmul.f32 %v3708_v37, %v3612_v52  ;;  %v10449_v52 = vld [vmem:[#allocation44_spill] sm:$0xff] }
 0x410   :  { %vm10450_vm15 = vcmp.eq.s32.totalorder %v6762_v34, %v10449_v52 }
 0x411   :  { %v3741_v3 = vmul.f32 %v3709_v22, %v3613_v13  ;;  %v3772_v57 = vsel %vm3484_vm7, %v3740_v23, 0.0 }
 0x412   :  { %v3560_v63 = vpop.xlane.xlu1 %3559  ;;  %v3804_v30 = vadd.f32 %v3772_v57, %v10446_v44 }
 0x413   :  { %v3648_v61 = vmul.f32 0.70710677, %v3560_v63  ;;  %v3773_v4 = vsel %vm3485_vm11, %v3741_v3, 0.0  ;;  %v3616_v50 = vmul.f32 0.5, %v3560_v63 }
 0x414   :  { %v3562_v40 = vpop.xlane.xlu0 %3561  ;;  %4974 = vmatmul.mubr.f32.gmra.mrb[34].mxu1 %v3804_v30  ;;  %v3805_v55 = vadd.f32 %v3773_v4, %v10448_v6  ;;  %v10453_v30 = vld [vmem:[#allocation14_spill] sm:$0xff]  ;;  %v10455_v6 = vld [vmem:[#allocation47_spill] sm:$0xff] }
 0x415   :  { %5628 = verf.f32 %v3648_v61  ;;  %v3649_v32 = vmul.f32 0.70710677, %v3562_v40  ;;  %v3617_v36 = vmul.f32 0.5, %v3562_v40  ;;  %vm10454_vm8 = vcmp.eq.s32.totalorder %v6762_v34, %v10453_v30 }
 0x416   :  { %4976 = vmatprep.mubr.f32.mxu1 %v3805_v55  ;;  %vm10456_vm3 = vcmp.eq.s32.totalorder %v6762_v34, %v10455_v6 }
 0x417   :  { %5630 = verf.f32 %v3649_v32 }
 0x418   :  { %v5625_v48 = vpop.eup %5624 }
 0x419   :  { %v5627_v29 = vpop.eup %5626  ;;  %v3710_v33 = vadd.f32 1.0, %v5625_v48 }
 0x41a   :  { %v3711_v31 = vadd.f32 1.0, %v5627_v29 }
 0x41b   :  { %v3564_v14 = vpop.xlane.xlu1 %3563  ;;  %v3742_v21 = vmul.f32 %v3710_v33, %v3614_v8 }
 0x41c   :  { %v3650_v47 = vmul.f32 0.70710677, %v3564_v14  ;;  %v3566_v49 = vpop.xlane.xlu0 %3565  ;;  %v3743_v60 = vmul.f32 %v3711_v31, %v3615_v38  ;;  %v3618_v55 = vmul.f32 0.5, %v3564_v14 }
 0x41d   :  { %v3651_v58 = vmul.f32 0.70710677, %v3566_v49  ;;  %v3774_v37 = vsel %vm10450_vm15, %v3742_v21, 0.0  ;;  %v3619_v8 = vmul.f32 0.5, %v3566_v49 }
 0x41e   :  { %5632 = verf.f32 %v3650_v47  ;;  %v3806_v25 = vadd.f32 %v3774_v37, %v8684_v18  ;;  %v3775_v22 = vsel %vm10452_vm12, %v3743_v60, 0.0 }
 0x41f   :  { %v3568_v26 = vpop.xlane.xlu1 %3567  ;;  %5634 = verf.f32 %v3651_v58  ;;  %v5629_v2 = vpop.eup %5628  ;;  %v3807_v3 = vadd.f32 %v3775_v22, %v8706_v19 }
 0x420   :  { %v3652_v15 = vmul.f32 0.70710677, %v3568_v26  ;;  %v3712_v13 = vadd.f32 1.0, %v5629_v2  ;;  %4977 = vmatmul.mubr.f32.gmra.mrb[36].mxu1 %v3806_v25  ;;  %v3620_v60 = vmul.f32 0.5, %v3568_v26  ;;  %v10459_v26 = vld [vmem:[#allocation48_spill] sm:$0xff]  ;;  %v10461_v25 = vld [vmem:[#allocation57_spill] sm:$0xff] }
 0x421   :  { %v5631_v23 = vpop.eup %5630  ;;  %4979 = vmatprep.mubr.f32.mxu1 %v3807_v3  ;;  %vm10460_vm7 = vcmp.eq.s32.totalorder %v6762_v34, %v10459_v26 }
 0x422   :  { %5636 = verf.f32 %v3652_v15  ;;  %v3744_v61 = vmul.f32 %v3712_v13, %v3616_v50  ;;  %v3713_v57 = vadd.f32 1.0, %v5631_v23 }
 0x424   :  { %v3745_v32 = vmul.f32 %v3713_v57, %v3617_v36  ;;  %v3776_v43 = vsel %vm10454_vm8, %v3744_v61, 0.0 }
 0x425   :  { %v3570_v63 = vpop.xlane.xlu0 %3569  ;;  %v3808_v18 = vadd.f32 %v3776_v43, %v8737_v10 }
 0x426   :  { %v3653_v44 = vmul.f32 0.70710677, %v3570_v63  ;;  %v3777_v19 = vsel %vm10456_vm3, %v3745_v32, 0.0  ;;  %v3621_v45 = vmul.f32 0.5, %v3570_v63  ;;  %v10464_v32 = vld [vmem:[#allocation54_spill] sm:$0xff] }
 0x427   :  { %4980 = vmatmul.mubr.f32.gmra.mrb[38].mxu1 %v3808_v18  ;;  %v3809_v48 = vadd.f32 %v3777_v19, %v8740_v27 }
 0x428   :  { %v5633_v4 = vpop.eup %5632  ;;  %5638 = verf.f32 %v3653_v44 }
 0x429   :  { %v3714_v40 = vadd.f32 1.0, %v5633_v4  ;;  %v5635_v47 = vpop.eup %5634  ;;  %4982 = vmatprep.mubr.f32.mxu1 %v3809_v48  ;;  %v10465_v48 = vld [vmem:[#allocation50_spill] sm:$0xff] }
 0x42a   :  { %v3715_v33 = vadd.f32 1.0, %v5635_v47  ;;  %vm10466_vm4 = vcmp.eq.s32.totalorder %v6762_v34, %v10465_v48 }
 0x42b   :  { %v3746_v29 = vmul.f32 %v3714_v40, %v3618_v55  ;;  %v3572_v38 = vpop.xlane.xlu1 %3571 }
 0x42c   :  { %v5637_v31 = vpop.eup %5636  ;;  %v3654_v58 = vmul.f32 0.70710677, %v3572_v38  ;;  %v3747_v21 = vmul.f32 %v3715_v33, %v3619_v8  ;;  %v3622_v43 = vmul.f32 0.5, %v3572_v38  ;;  %v10468_v33 = vld [vmem:[#allocation51_spill] sm:$0xff] }
 0x42d   :  { %v3574_v10 = vpop.xlane.xlu0 %3573  ;;  %v3716_v15 = vadd.f32 1.0, %v5637_v31  ;;  %v3778_v14 = vsel %vm10457_vm13, %v3746_v29, 0.0  ;;  %v10467_v29 = vld [vmem:[#allocation101_spill] sm:$0xff]  ;;  %vm10469_vm1 = vcmp.eq.s32.totalorder %v6762_v34, %v10468_v33 }
 0x42e   :  { %v3655_v2 = vmul.f32 0.70710677, %v3574_v10  ;;  %5640 = verf.f32 %v3654_v58  ;;  %v3810_v27 = vadd.f32 %v3778_v14, %v8785_v39  ;;  %v3779_v49 = vsel %vm10458_vm14, %v3747_v21, 0.0  ;;  %v10470_v58 = vld [vmem:[#allocation73_spill] sm:$0xff] }
 0x42f   :  { %v3748_v50 = vmul.f32 %v3716_v15, %v3620_v60  ;;  %v3811_v52 = vadd.f32 %v3779_v49, %v8788_v9  ;;  %v10462_v9 = vld [vmem:[#allocation49_spill] sm:$0xff]  ;;  %v3623_v4 = vmul.f32 0.5, %v3574_v10  ;;  %vm10496_vm14 = vcmp.eq.s32.totalorder %v6762_v34, %v9063_v20 }
 0x430   :  { %5642 = verf.f32 %v3655_v2  ;;  %4983 = vmatmul.mubr.f32.gmra.mrb[40].mxu1 %v3810_v27  ;;  %vm10463_vm11 = vcmp.eq.s32.totalorder %v6762_v34, %v10462_v9  ;;  %v10474_v9 = vld [vmem:[#allocation53_spill] sm:$0xff] }
 0x431   :  { %v3780_v37 = vsel %vm10460_vm7, %v3748_v50, 0.0  ;;  %4985 = vmatprep.mubr.f32.mxu1 %v3811_v52  ;;  %vm10475_vm10 = vcmp.eq.s32.totalorder %v6762_v34, %v10474_v9  ;;  %vm10497_vm7 = vcmp.eq.s32.totalorder %v6762_v34, %v9085_v0 }
 0x432   :  { %v5639_v13 = vpop.eup %5638  ;;  %v3812_v35 = vadd.f32 %v3780_v37, %v10461_v25 }
 0x433   :  { %v3717_v22 = vadd.f32 1.0, %v5639_v13 }
 0x434   :  { %4986 = vmatmul.mubr.f32.gmra.mrb[42].mxu1 %v3812_v35 }
 0x435   :  { %v3576_v23 = vpop.xlane.xlu1 %3575  ;;  %v3578_v3 = vpop.xlane.xlu0 %3577  ;;  %v3749_v39 = vmul.f32 %v3717_v22, %v3621_v45  ;;  %v10471_v45 = vld [vmem:[#allocation52_spill] sm:$0xff] }
 0x436   :  { %v3656_v61 = vmul.f32 0.70710677, %v3576_v23  ;;  %v3657_v12 = vmul.f32 0.70710677, %v3578_v3  ;;  %v3624_v2 = vmul.f32 0.5, %v3576_v23  ;;  %v3625_v27 = vmul.f32 0.5, %v3578_v3 }
 0x437   :  { %v3781_v36 = vsel %vm10463_vm11, %v3749_v39, 0.0  ;;  %vm10472_vm2 = vcmp.eq.s32.totalorder %v6762_v34, %v10471_v45  ;;  %vm10498_vm11 = vcmp.eq.s32.totalorder %v6762_v34, %v9087_v56 }
 0x438   :  { %5644 = verf.f32 %v3656_v61  ;;  %v5641_v57 = vpop.eup %5640  ;;  %v3813_v44 = vadd.f32 %v3781_v36, %v10464_v32  ;;  %v10476_v36 = vld [vmem:[#allocation7_spill] sm:$0xff] }
 0x439   :  { %5646 = verf.f32 %v3657_v12  ;;  %v3718_v18 = vadd.f32 1.0, %v5641_v57  ;;  %v10473_v12 = vld [vmem:[#allocation74_spill] sm:$0xff] }
 0x43a   :  { %v5643_v30 = vpop.eup %5642  ;;  %4988 = vmatprep.mubr.f32.mxu1 %v3813_v44 }
 0x43b   :  { %v3719_v6 = vadd.f32 1.0, %v5643_v30  ;;  %v3750_v55 = vmul.f32 %v3718_v18, %v3622_v43  ;;  %v10477_v30 = vld [vmem:[#allocation100_spill] sm:$0xff] }
 0x43c   :  { %v3580_v63 = vpop.xlane.xlu1 %3579  ;;  %vm10478_vm9 = vcmp.eq.s32.totalorder %v6762_v34, %v10477_v30 }
 0x43d   :  { %v3658_v19 = vmul.f32 0.70710677, %v3580_v63  ;;  %v3751_v40 = vmul.f32 %v3719_v6, %v3623_v4  ;;  %v3782_v47 = vsel %vm10466_vm4, %v3750_v55, 0.0  ;;  %v3626_v39 = vmul.f32 0.5, %v3580_v63  ;;  %v10479_v6 = vld [vmem:[#allocation67_spill] sm:$0xff] }
 0x43e   :  { %v3814_v8 = vadd.f32 %v3782_v47, %v10467_v29  ;;  %vm10499_vm4 = vcmp.eq.s32.totalorder %v6762_v34, %v9089_v59 }
 0x43f   :  { %5648 = verf.f32 %v3658_v19  ;;  %v3783_v31 = vsel %vm10469_vm1, %v3751_v40, 0.0 }
 0x440   :  { %v3815_v21 = vadd.f32 %v3783_v31, %v10470_v58  ;;  %4989 = vmatmul.mubr.f32.gmra.mrb[44].mxu1 %v3814_v8 }
 0x442   :  { %v3582_v38 = vpop.xlane.xlu0 %3581  ;;  %v5645_v60 = vpop.eup %5644  ;;  %4991 = vmatprep.mubr.f32.mxu1 %v3815_v21  ;;  %v10480_v21 = vld [vmem:[#allocation61_spill] sm:$0xff] }
 0x443   :  { %v3659_v10 = vmul.f32 0.70710677, %v3582_v38  ;;  %v5647_v15 = vpop.eup %5646  ;;  %v3720_v14 = vadd.f32 1.0, %v5645_v60  ;;  %v3627_v55 = vmul.f32 0.5, %v3582_v38  ;;  %vm10481_vm15 = vcmp.eq.s32.totalorder %v6762_v34, %v10480_v21 }
 0x444   :  { %v3721_v49 = vadd.f32 1.0, %v5647_v15 }
 0x445   :  { %5650 = verf.f32 %v3659_v10  ;;  %v3752_v26 = vmul.f32 %v3720_v14, %v3624_v2 }
 0x446   :  { %v3584_v50 = vpop.xlane.xlu1 %3583  ;;  %v3753_v37 = vmul.f32 %v3721_v49, %v3625_v27 }
 0x447   :  { %v3660_v52 = vmul.f32 0.70710677, %v3584_v50  ;;  %v3784_v22 = vsel %vm10472_vm2, %v3752_v26, 0.0  ;;  %v3628_v33 = vmul.f32 0.5, %v3584_v50 }
 0x448   :  { %v3816_v23 = vadd.f32 %v3784_v22, %v10473_v12  ;;  %v3785_v3 = vsel %vm10475_vm10, %v3753_v37, 0.0 }
 0x449   :  { %5652 = verf.f32 %v3660_v52  ;;  %v3586_v13 = vpop.xlane.xlu0 %3585  ;;  %v5649_v25 = vpop.eup %5648  ;;  %v3817_v57 = vadd.f32 %v3785_v3, %v10476_v36  ;;  %v10482_v52 = vld [vmem:[#allocation62_spill] sm:$0xff] }
 0x44a   :  { %v3661_v35 = vmul.f32 0.70710677, %v3586_v13  ;;  %v3722_v61 = vadd.f32 1.0, %v5649_v25  ;;  %4992 = vmatmul.mubr.f32.gmra.mrb[46].mxu1 %v3816_v23  ;;  %v3629_v2 = vmul.f32 0.5, %v3586_v13  ;;  %vm10483_vm12 = vcmp.eq.s32.totalorder %v6762_v34, %v10482_v52 }
 0x44b   :  { %4994 = vmatprep.mubr.f32.mxu1 %v3817_v57 }
 0x44c   :  { %5654 = verf.f32 %v3661_v35  ;;  %v3754_v32 = vmul.f32 %v3722_v61, %v3626_v39  ;;  %v10484_v35 = vld [vmem:[#allocation63_spill] sm:$0xff] }
 0x44d   :  { %vm10485_vm8 = vcmp.eq.s32.totalorder %v6762_v34, %v10484_v35 }
 0x44e   :  { %v3786_v43 = vsel %vm10478_vm9, %v3754_v32, 0.0 }
 0x44f   :  { %v5651_v18 = vpop.eup %5650  ;;  %v3818_v19 = vadd.f32 %v3786_v43, %v10479_v6 }
 0x450   :  { %v3588_v44 = vpop.xlane.xlu1 %3587  ;;  %v3723_v40 = vadd.f32 1.0, %v5651_v18 }
 0x451   :  { %v3662_v63 = vmul.f32 0.70710677, %v3588_v44  ;;  %v3590_v4 = vpop.xlane.xlu0 %3589  ;;  %4995 = vmatmul.mubr.f32.gmra.mrb[48].mxu1 %v3818_v19  ;;  %v3630_v61 = vmul.f32 0.5, %v3588_v44 }
 0x452   :  { %v3663_v48 = vmul.f32 0.70710677, %v3590_v4  ;;  %v3755_v29 = vmul.f32 %v3723_v40, %v3627_v55  ;;  %v3631_v9 = vmul.f32 0.5, %v3590_v4 }
 0x453   :  { %5656 = verf.f32 %v3662_v63  ;;  %v5653_v47 = vpop.eup %5652 }
 0x454   :  { %5658 = verf.f32 %v3663_v48  ;;  %v3592_v8 = vpop.xlane.xlu1 %3591  ;;  %v3724_v31 = vadd.f32 1.0, %v5653_v47  ;;  %v3787_v10 = vsel %vm10481_vm15, %v3755_v29, 0.0 }
 0x455   :  { %v3664_v58 = vmul.f32 0.70710677, %v3592_v8  ;;  %v3819_v38 = vadd.f32 %v3787_v10, %v9095_v53  ;;  %v3632_v18 = vmul.f32 0.5, %v3592_v8  ;;  %v10488_v10 = vld [vmem:[#allocation66_spill] sm:$0xff] }
 0x456   :  { %v5655_v60 = vpop.eup %5654  ;;  %v3756_v15 = vmul.f32 %v3724_v31, %v3628_v33 }
 0x457   :  { %5660 = verf.f32 %v3664_v58  ;;  %v3725_v14 = vadd.f32 1.0, %v5655_v60  ;;  %4997 = vmatprep.mubr.f32.mxu1 %v3819_v38 }
 0x458   :  { %v3594_v27 = vpop.xlane.xlu0 %3593  ;;  %v3788_v50 = vsel %vm10483_vm12, %v3756_v15, 0.0 }
 0x459   :  { %v3665_v49 = vmul.f32 0.70710677, %v3594_v27  ;;  %v3757_v26 = vmul.f32 %v3725_v14, %v3629_v2  ;;  %v3820_v37 = vadd.f32 %v3788_v50, %v9104_v42  ;;  %v3633_v31 = vmul.f32 0.5, %v3594_v27  ;;  %v10490_v27 = vld [vmem:[#allocation102_spill] sm:$0xff] }
 0x45b   :  { %5662 = verf.f32 %v3665_v49  ;;  %4998 = vmatmul.mubr.f32.gmra.mrb[50].mxu1 %v3820_v37  ;;  %v3789_v45 = vsel %vm10485_vm8, %v3757_v26, 0.0 }
 0x45c   :  { %v3821_v22 = vadd.f32 %v3789_v45, %v9128_v5 }
 0x45d   :  { %v3596_v25 = vpop.xlane.xlu1 %3595  ;;  %v5657_v53 = vpop.eup %5656 }
 0x45e   :  { %v3666_v13 = vmul.f32 0.70710677, %v3596_v25  ;;  %v5659_v39 = vpop.eup %5658  ;;  %v3726_v12 = vadd.f32 1.0, %v5657_v53  ;;  %5000 = vmatprep.mubr.f32.mxu1 %v3821_v22  ;;  %v3634_v52 = vmul.f32 0.5, %v3596_v25 }
 0x45f   :  { %v3727_v3 = vadd.f32 1.0, %v5659_v39 }
 0x460   :  { %v3598_v23 = vpop.xlane.xlu0 %3597  ;;  %5664 = verf.f32 %v3666_v13  ;;  %v3758_v42 = vmul.f32 %v3726_v12, %v3630_v61  ;;  %v10492_v61 = vld [vmem:[#allocation103_spill] sm:$0xff] }
 0x461   :  { %v3667_v36 = vmul.f32 0.70710677, %v3598_v23  ;;  %v3600_v57 = vpop.xlane.xlu1 %3599  ;;  %v5661_v32 = vpop.eup %5660  ;;  %v3759_v30 = vmul.f32 %v3727_v3, %v3631_v9  ;;  %v3635_v45 = vmul.f32 0.5, %v3598_v23  ;;  %vm10493_vm3 = vcmp.eq.s32.totalorder %v6762_v34, %v10492_v61 }
 0x462   :  { %v3668_v43 = vmul.f32 0.70710677, %v3600_v57  ;;  %v3728_v63 = vadd.f32 1.0, %v5661_v32  ;;  %v3790_v44 = vsel %vm3502_vm6, %v3758_v42, 0.0  ;;  %vm10489_vm6 = vcmp.eq.s32.totalorder %v6762_v34, %v10488_v10 }
 0x463   :  { %5666 = verf.f32 %v3667_v36  ;;  %v3822_v4 = vadd.f32 %v3790_v44, %v9146_v28  ;;  %v3791_v47 = vsel %vm3503_vm5, %v3759_v30, 0.0  ;;  %vm10491_vm5 = vcmp.eq.s32.totalorder %v6762_v34, %v10490_v27 }
 0x464   :  { %5668 = verf.f32 %v3668_v43  ;;  %v3760_v55 = vmul.f32 %v3728_v63, %v3632_v18  ;;  %v3823_v8 = vadd.f32 %v3791_v47, %v9153_v46  ;;  %v3636_v22 = vmul.f32 0.5, %v3600_v57 }
 0x465   :  { %v3602_v6 = vpop.xlane.xlu0 %3601  ;;  %v3604_v40 = vpop.xlane.xlu1 %3603  ;;  %5001 = vmatmul.mubr.f32.gmra.mrb[52].mxu1 %v3822_v4 }
 0x466   :  { %v3669_v19 = vmul.f32 0.70710677, %v3602_v6  ;;  %v5663_v29 = vpop.eup %5662  ;;  %v3670_v33 = vmul.f32 0.70710677, %v3604_v40  ;;  %v3792_v60 = vsel %vm10489_vm6, %v3760_v55, 0.0  ;;  %5003 = vmatprep.mubr.f32.mxu1 %v3823_v8  ;;  %v3637_v36 = vmul.f32 0.5, %v3602_v6 }
 0x467   :  { %v3729_v58 = vadd.f32 1.0, %v5663_v29  ;;  %v3824_v15 = vadd.f32 %v3792_v60, %v9156_v62  ;;  %v3638_v43 = vmul.f32 0.5, %v3604_v40 }
 0x468   :  { %5670 = verf.f32 %v3669_v19 }
 0x469   :  { %v3606_v21 = vpop.xlane.xlu0 %3605  ;;  %5672 = verf.f32 %v3670_v33  ;;  %v3761_v38 = vmul.f32 %v3729_v58, %v3633_v31  ;;  %v3608_v2 = vpop.xlane.xlu1 %3607  ;;  %5004 = vmatmul.mubr.f32.gmra.mrb[54].mxu1 %v3824_v15 }
 0x46a   :  { %v3671_v28 = vmul.f32 0.70710677, %v3606_v21  ;;  %v5665_v14 = vpop.eup %5664  ;;  %v3672_v49 = vmul.f32 0.70710677, %v3608_v2  ;;  %v3639_v44 = vmul.f32 0.5, %v3606_v21  ;;  %v3640_v48 = vmul.f32 0.5, %v3608_v2 }
 0x46b   :  { %v3730_v46 = vadd.f32 1.0, %v5665_v14  ;;  %v3793_v50 = vsel %vm10491_vm5, %v3761_v38, 0.0 }
 0x46c   :  { %5674 = verf.f32 %v3671_v28  ;;  %v3825_v37 = vadd.f32 %v3793_v50, %v9164_v24  ;;  %v10494_v24 = vld [vmem:[#allocation28_spill] sm:$0xff] }
 0x46d   :  { %v5667_v26 = vpop.eup %5666  ;;  %5676 = verf.f32 %v3672_v49  ;;  %v3762_v35 = vmul.f32 %v3730_v46, %v3634_v52  ;;  %vm10495_vm13 = vcmp.eq.s32.totalorder %v6762_v34, %v10494_v24 }
 0x46e   :  { %v3731_v53 = vadd.f32 1.0, %v5667_v26  ;;  %v5669_v62 = vpop.eup %5668  ;;  %5006 = vmatprep.mubr.f32.mxu1 %v3825_v37 }
 0x46f   :  { %v3732_v39 = vadd.f32 1.0, %v5669_v62  ;;  %v3794_v25 = vsel %vm10493_vm3, %v3762_v35, 0.0 }
 0x470   :  { %v3763_v13 = vmul.f32 %v3731_v53, %v3635_v45  ;;  %v3826_v9 = vadd.f32 %v3794_v25, %v9170_v7 }
 0x471   :  { %v3764_v3 = vmul.f32 %v3732_v39, %v3636_v22 }
 0x472   :  { %v5671_v12 = vpop.eup %5670  ;;  %v3795_v23 = vsel %vm10495_vm13, %v3763_v13, 0.0  ;;  %5007 = vmatmul.mubr.f32.gmra.mrb[56].mxu1 %v3826_v9 }
 0x473   :  { %v3733_v42 = vadd.f32 1.0, %v5671_v12  ;;  %v5673_v32 = vpop.eup %5672  ;;  %v3827_v30 = vadd.f32 %v3795_v23, %v9183_v51  ;;  %v3796_v63 = vsel %vm10496_vm14, %v3764_v3, 0.0 }
 0x474   :  { %v3734_v18 = vadd.f32 1.0, %v5673_v32  ;;  %v3828_v7 = vadd.f32 %v3796_v63, %v9186_v11 }
 0x475   :  { %v3765_v57 = vmul.f32 %v3733_v42, %v3637_v36  ;;  %5009 = vmatprep.mubr.f32.mxu1 %v3827_v30 }
 0x476   :  { %v5675_v5 = vpop.eup %5674  ;;  %v3766_v6 = vmul.f32 %v3734_v18, %v3638_v43  ;;  %5010 = vmatmul.mubr.f32.gmra.mrb[58].mxu1 %v3828_v7 }
 0x477   :  { %v3735_v19 = vadd.f32 1.0, %v5675_v5  ;;  %v3797_v4 = vsel %vm10497_vm7, %v3765_v57, 0.0  ;;  %v5677_v55 = vpop.eup %5676 }
 0x478   :  { %v3829_v51 = vadd.f32 %v3797_v4, %v9189_v17  ;;  %v3736_v47 = vadd.f32 1.0, %v5677_v55  ;;  %v3798_v20 = vsel %vm10498_vm11, %v3766_v6, 0.0 }
 0x479   :  { %v3767_v40 = vmul.f32 %v3735_v19, %v3639_v44  ;;  %v3830_v11 = vadd.f32 %v3798_v20, %v9200_v16 }
 0x47a   :  { %5012 = vmatprep.mubr.f32.mxu1 %v3829_v51  ;;  %v3768_v0 = vmul.f32 %v3736_v47, %v3640_v48 }
 0x47b   :  { %v3799_v29 = vsel %vm10499_vm4, %v3767_v40, 0.0  ;;  %5013 = vmatmul.mubr.f32.gmra.mrb[60].mxu1 %v3830_v11 }
 0x47c   :  { %v3831_v33 = vadd.f32 %v3799_v29, %v9203_v1  ;;  %v3800_v17 = vsel %vm3512_vm0, %v3768_v0, 0.0 }
 0x47d   :  { %v3832_v8 = vadd.f32 %v3800_v17, %v9208_v41 }
 0x47e   :  { %5015 = vmatprep.mubr.f32.mxu1 %v3831_v33 }
 0x47f   :  { %5016 = vmatmul.mubr.f32.gmra.mrb[62].mxu1 %v3832_v8 }
 0x4dd   :  { %v4972_v56 = vpop.f32.mrb[32].mxu1 }
 0x4de   :  { %4075 = vst [vmem:[#allocation2 + $0x8] sm:$0xff] %v4972_v56  ;;  %v3915_v31 = vpop.f32.mrb[33].mxu1 }
 0x4df   :  { %4074 = vst [vmem:[#allocation2] sm:$0xff] %v3915_v31 }
 0x4e7   :  { %v4975_v16 = vpop.f32.mrb[34].mxu1 }
 0x4e8   :  { %4077 = vst [vmem:[#allocation2 + $0x18] sm:$0xff] %v4975_v16  ;;  %v3925_v59 = vpop.f32.mrb[35].mxu1 }
 0x4e9   :  { %4076 = vst [vmem:[#allocation2 + $0x10] sm:$0xff] %v3925_v59 }
 0x4f3   :  { %v4978_v58 = vpop.f32.mrb[36].mxu1 }
 0x4f4   :  { %4079 = vst [vmem:[#allocation2 + $0x28] sm:$0xff] %v4978_v58  ;;  %v3935_v21 = vpop.f32.mrb[37].mxu1 }
 0x4f5   :  { %4078 = vst [vmem:[#allocation2 + $0x20] sm:$0xff] %v3935_v21 }
 0x4fa   :  { %v4981_v1 = vpop.f32.mrb[38].mxu1 }
 0x4fb   :  { %4081 = vst [vmem:[#allocation2 + $0x38] sm:$0xff] %v4981_v1  ;;  %v3945_v34 = vpop.f32.mrb[39].mxu1 }
 0x4fc   :  { %4080 = vst [vmem:[#allocation2 + $0x30] sm:$0xff] %v3945_v34 }
 0x503   :  { %v4984_v54 = vpop.f32.mrb[40].mxu1 }
 0x504   :  { %4083 = vst [vmem:[#allocation2 + $0x48] sm:$0xff] %v4984_v54  ;;  %v3955_v41 = vpop.f32.mrb[41].mxu1 }
 0x505   :  { %4082 = vst [vmem:[#allocation2 + $0x40] sm:$0xff] %v3955_v41 }
 0x507   :  { %v4987_v10 = vpop.f32.mrb[42].mxu1 }
 0x508   :  { %4085 = vst [vmem:[#allocation2 + $0x58] sm:$0xff] %v4987_v10  ;;  %v3965_v60 = vpop.f32.mrb[43].mxu1 }
 0x509   :  { %4084 = vst [vmem:[#allocation2 + $0x50] sm:$0xff] %v3965_v60 }
 0x513   :  { %v4990_v28 = vpop.f32.mrb[44].mxu1 }
 0x514   :  { %4087 = vst [vmem:[#allocation2 + $0x68] sm:$0xff] %v4990_v28  ;;  %v3975_v15 = vpop.f32.mrb[45].mxu1 }
 0x515   :  { %4086 = vst [vmem:[#allocation2 + $0x60] sm:$0xff] %v3975_v15 }
 0x51d   :  { %v4993_v38 = vpop.f32.mrb[46].mxu1 }
 0x51e   :  { %4089 = vst [vmem:[#allocation2 + $0x78] sm:$0xff] %v4993_v38  ;;  %v3985_v2 = vpop.f32.mrb[47].mxu1 }
 0x51f   :  { %4088 = vst [vmem:[#allocation2 + $0x70] sm:$0xff] %v3985_v2 }
 0x524   :  { %v4996_v14 = vpop.f32.mrb[48].mxu1 }
 0x525   :  { %4091 = vst [vmem:[#allocation2 + $0x88] sm:$0xff] %v4996_v14  ;;  %v3995_v49 = vpop.f32.mrb[49].mxu1 }
 0x526   :  { %4090 = vst [vmem:[#allocation2 + $0x80] sm:$0xff] %v3995_v49 }
 0x52e   :  { %v4999_v52 = vpop.f32.mrb[50].mxu1 }
 0x52f   :  { %4093 = vst [vmem:[#allocation2 + $0x98] sm:$0xff] %v4999_v52  ;;  %v4005_v46 = vpop.f32.mrb[51].mxu1 }
 0x530   :  { %4092 = vst [vmem:[#allocation2 + $0x90] sm:$0xff] %v4005_v46 }
 0x538   :  { %v5002_v27 = vpop.f32.mrb[52].mxu1 }
 0x539   :  { %4095 = vst [vmem:[#allocation2 + $0xa8] sm:$0xff] %v5002_v27  ;;  %v4015_v50 = vpop.f32.mrb[53].mxu1 }
 0x53a   :  { %4094 = vst [vmem:[#allocation2 + $0xa0] sm:$0xff] %v4015_v50 }
 0x53c   :  { %v5005_v26 = vpop.f32.mrb[54].mxu1 }
 0x53d   :  { %4097 = vst [vmem:[#allocation2 + $0xb8] sm:$0xff] %v5005_v26  ;;  %v4025_v37 = vpop.f32.mrb[55].mxu1 }
 0x53e   :  { %4096 = vst [vmem:[#allocation2 + $0xb0] sm:$0xff] %v4025_v37 }
 0x545   :  { %v5008_v35 = vpop.f32.mrb[56].mxu1 }
 0x546   :  { %4099 = vst [vmem:[#allocation2 + $0xc8] sm:$0xff] %v5008_v35  ;;  %v4035_v45 = vpop.f32.mrb[57].mxu1 }
 0x547   :  { %4098 = vst [vmem:[#allocation2 + $0xc0] sm:$0xff] %v4035_v45 }
 0x549   :  { %v5011_v53 = vpop.f32.mrb[58].mxu1 }
 0x54a   :  { %4101 = vst [vmem:[#allocation2 + $0xd8] sm:$0xff] %v5011_v53  ;;  %v4045_v62 = vpop.f32.mrb[59].mxu1 }
 0x54b   :  { %4100 = vst [vmem:[#allocation2 + $0xd0] sm:$0xff] %v4045_v62 }
 0x54e   :  { %v5014_v13 = vpop.f32.mrb[60].mxu1 }
 0x54f   :  { %4103 = vst [vmem:[#allocation2 + $0xe8] sm:$0xff] %v5014_v13  ;;  %v4055_v22 = vpop.f32.mrb[61].mxu1 }
 0x550   :  { %4102 = vst [vmem:[#allocation2 + $0xe0] sm:$0xff] %v4055_v22 }
 0x552   :  { %v5017_v39 = vpop.f32.mrb[62].mxu1 }
 0x553   :  { %4105 = vst [vmem:[#allocation2 + $0xf8] sm:$0xff] %v5017_v39  ;;  %v4065_v61 = vpop.f32.mrb[63].mxu1 }
 0x554   :  { %4104 = vst [vmem:[#allocation2 + $0xf0] sm:$0xff] %v4065_v61 }
 0x555   :  { %5689 = shalt.err (!%p5686_p4)
}
 0x556   :  { %s5690_s1 = scalar_lea.hbm %s9353_s3, 4096 }
 0x557   :  { %p5691_p5 = scmp.ne.s32.totalorder %s9353_s3, %s5690_s1  ;;  %p5694_p6 = scmp.lt.u32.totalorder %s5690_s1, %s9353_s3 }
 0x559   :  { %p5696_p7 = pnand %p5694_p6, %p5691_p5 }
 0x55b   :  { %5699 = shalt.err (!%p5696_p7)
}
 0x55c   :  { %s5704_s8 = smov 128   ;;  %s5705_s9 = smov 8  }
 0x55d   :  { %4117 = dma.vmem_to_hbm [thread:$0]  %s4112_s27, 4096, %s9353_s3, [#allocation3], %s5704_s8, %s5704_s8, %s5705_s9  }
 0x55e   :  { %5700 = dma.done.wait [#allocation3], 4096  }
 0x55f   :  { %5701 = vsyncadd [#allocation3], 4294963200 }
 0x560   :  { %4121 = vsyncpa [#allocation3], 1 }

// kernel: tpu_custom_call.1
= control target key start
LH: loop header
LB: loop body
LE: loop exit
PB: predicated region body
PF: predicated region fallthrough
CT: control target
= control target key end

     0   :  { %vm51_vm0 = vcmask 261120   ;;  %s8552_s0 = inlined_call_operand.vmem [shape: f32[256,32], index: 0, kind: input, shape index: {}]   ;;  %s8553_s1 = inlined_call_operand.vmem [shape: f32[128,128], index: 1, kind: input, shape index: {}]   ;;  %s8554_s2 = inlined_call_operand.vmem [shape: f32[128,128], index: 2, kind: input, shape index: {}]   ;;  %s8555_s3 = inlined_call_operand.hbm [shape: f32[256,128], index: 3, kind: output, shape index: {}]  }
   0x1   :  { %v47_v0 = vld [vmem:[%s8553_s1] sm:$0xff]  ;;  %v48_v1 = vld [vmem:[%s8553_s1 + $0x8] sm:$0xff]  ;;  %v49_v2 = vld [vmem:[%s8553_s1 + $0x10] sm:$0xff] }
   0x2   :  { %v149_v3 = vand.u32 4294901760, %v47_v0  ;;  %v152_v4 = vand.u32 4294901760, %v48_v1  ;;  %v50_v5 = vld [vmem:[%s8553_s1 + $0x18] sm:$0xff]  ;;  %v155_v6 = vand.u32 4294901760, %v49_v2  ;;  %v15_v7 = vld [vmem:[%s8552_s0] sm:$0xff]  ;;  %v16_v8 = vld [vmem:[%s8552_s0 + $0x8] sm:$0xff] }
   0x3   :  { %v158_v9 = vand.u32 4294901760, %v50_v5  ;;  %v53_v10 = vsel %vm51_vm0, %v15_v7, 0  ;;  %v56_v11 = vsel %vm51_vm0, %v16_v8, 0  ;;  %v17_v12 = vld [vmem:[%s8552_s0 + $0x10] sm:$0xff]  ;;  %v18_v13 = vld [vmem:[%s8552_s0 + $0x18] sm:$0xff]  ;;  %v19_v14 = vld [vmem:[%s8552_s0 + $0x20] sm:$0xff] }
   0x4   :  { %v5279_v15 = vpack.c.bf16 %v152_v4, %v149_v3  ;;  %v5281_v16 = vsub.f32 %v47_v0, %v149_v3  ;;  %v5283_v17 = vsub.f32 %v48_v1, %v152_v4  ;;  %v5285_v18 = vsub.f32 %v49_v2, %v155_v6  ;;  %v20_v23 = vld [vmem:[%s8552_s0 + $0x28] sm:$0xff]  ;;  %v21_v24 = vld [vmem:[%s8552_s0 + $0x30] sm:$0xff]  ;;  %v22_v33 = vld [vmem:[%s8552_s0 + $0x38] sm:$0xff] }
   0x5   :  { %v5287_v19 = vpack.c.bf16 %v158_v9, %v155_v6  ;;  %v5289_v20 = vsub.f32 %v50_v5, %v158_v9  ;;  %v5291_v21 = vand.u32 4294901760, %v53_v10  ;;  %v5293_v22 = vand.u32 4294901760, %v56_v11  ;;  %v23_v54 = vld [vmem:[%s8552_s0 + $0x40] sm:$0xff]  ;;  %v24_v55 = vld [vmem:[%s8552_s0 + $0x48] sm:$0xff] }
   0x6   :  { %4699 = vmatprep.subr.bf16.mxu1 %v5279_v15  ;;  %v5304_v25 = vpack.c.bf16 %v5283_v17, %v5281_v16  ;;  %v59_v26 = vsel %vm51_vm0, %v17_v12, 0  ;;  %v62_v27 = vsel %vm51_vm0, %v18_v13, 0  ;;  %v65_v28 = vsel %vm51_vm0, %v19_v14, 0 }
   0x7   :  { %8929 = vst [vmem:[#allocation5_spill] sm:$0xff] %v5287_v19  ;;  %4701 = vmatpush3.bf16.msra.mxu1 %v5279_v15  ;;  %v5312_v29 = vpack.c.bf16 %v5289_v20, %v5285_v18  ;;  %v5315_v30 = vsub.f32 %v53_v10, %v5291_v21  ;;  %v5318_v31 = vsub.f32 %v56_v11, %v5293_v22  ;;  %v5320_v32 = vand.u32 4294901760, %v59_v26 }
   0x8   :  { %4715 = vmatprep.subr.bf16.mxu0 %v5304_v25  ;;  %4703 = vmatprep.subr.bf16.mxu1 %v5287_v19  ;;  %v5327_v34 = vand.u32 4294901760, %v62_v27  ;;  %v5329_v35 = vand.u32 4294901760, %v65_v28  ;;  %v68_v36 = vsel %vm51_vm0, %v20_v23, 0  ;;  %v71_v37 = vsel %vm51_vm0, %v21_v24, 0 }
   0x9   :  { %4717 = vmatpush3.bf16.msra.mxu0 %v5304_v25  ;;  %v8572_v38 = vand.u32 4294901760, %v5315_v30  ;;  %v8568_v39 = vand.u32 4294901760, %v5318_v31  ;;  %4402 = vmatprep.mubr.f32.mxu0 %v5315_v30  ;;  %v5338_v40 = vsub.f32 %v59_v26, %v5320_v32  ;;  %v5340_v41 = vand.u32 4294901760, %v68_v36 }
   0xa   :  { %4719 = vmatprep.subr.bf16.mxu0 %v5312_v29  ;;  %v5344_v42 = vsub.f32 %v62_v27, %v5327_v34  ;;  %v5347_v43 = vsub.f32 %v65_v28, %v5329_v35  ;;  %v5349_v44 = vand.u32 4294901760, %v71_v37  ;;  %v74_v45 = vsel %vm51_vm0, %v22_v33, 0 }
   0xb   :  { %4705 = vmatpush3.bf16.msra.mxu1 %v5287_v19  ;;  %v220_v46 = vsub.f32 %v5315_v30, %v8572_v38  ;;  %v230_v47 = vsub.f32 %v5318_v31, %v8568_v39  ;;  %v8567_v48 = vand.u32 4294901760, %v5338_v40  ;;  %v5361_v49 = vsub.f32 %v68_v36, %v5340_v41 }
   0xc   :  { %v8565_v50 = vand.u32 4294901760, %v5344_v42  ;;  %v8564_v51 = vand.u32 4294901760, %v5347_v43  ;;  %v5366_v52 = vsub.f32 %v71_v37, %v5349_v44  ;;  %v5368_v53 = vand.u32 4294901760, %v74_v45 }
   0xd   :  { %v221_v56 = vand.u32 4294901760, %v220_v46  ;;  %4721 = vmatpush3.bf16.msra.mxu0 %v5312_v29  ;;  %v231_v57 = vand.u32 4294901760, %v230_v47  ;;  %v240_v58 = vsub.f32 %v5338_v40, %v8567_v48  ;;  %v8563_v59 = vand.u32 4294901760, %v5361_v49 }
   0xe   :  { %8 = vsyncpa [#allocation3], 0  ;;  %4723 = vmatprep.subr.bf16.mxu0 %v5279_v15  ;;  %v250_v60 = vsub.f32 %v5344_v42, %v8565_v50  ;;  %v260_v61 = vsub.f32 %v5347_v43, %v8564_v51  ;;  %v8562_v62 = vand.u32 4294901760, %v5366_v52  ;;  %v5390_v63 = vsub.f32 %v74_v45, %v5368_v53  ;;  %v25_v0 = vld [vmem:[%s8552_s0 + $0x50] sm:$0xff]  ;;  %v26_v5 = vld [vmem:[%s8552_s0 + $0x58] sm:$0xff] }
   0xf   :  { %4290 = vmatprep.mubr.f32.mxu1 %v221_v56  ;;  %v241_v1 = vand.u32 4294901760, %v240_v58  ;;  %v270_v2 = vsub.f32 %v5361_v49, %v8563_v59  ;;  %v77_v3 = vsel %vm51_vm0, %v23_v54, 0  ;;  %v80_v4 = vsel %vm51_vm0, %v24_v55, 0  ;;  %v27_v9 = vld [vmem:[%s8552_s0 + $0x60] sm:$0xff]  ;;  %v28_v14 = vld [vmem:[%s8552_s0 + $0x68] sm:$0xff]  ;;  %v29_v45 = vld [vmem:[%s8552_s0 + $0x70] sm:$0xff] }
  0x10   :  { %4291 = vmatmul.mubr.f32.vlgmr.msra.gmra.mrb[0].mxu1 %v231_v57  ;;  %4403 = vmatmul.mubr.f32.vlgmr.msra.gmra.mrb[0].mxu0 %v5318_v31  ;;  %v251_v6 = vand.u32 4294901760, %v250_v60  ;;  %v280_v7 = vsub.f32 %v5366_v52, %v8562_v62  ;;  %v8560_v8 = vand.u32 4294901760, %v5390_v63  ;;  %v261_v10 = vand.u32 4294901760, %v260_v61  ;;  %v30_v46 = vld [vmem:[%s8552_s0 + $0x78] sm:$0xff] }
  0x11   :  { %4293 = vmatprep.mubr.f32.mxu1 %v241_v1  ;;  %4725 = vmatpush3.bf16.msra.mxu0 %v5279_v15  ;;  %v5412_v11 = vand.u32 4294901760, %v77_v3  ;;  %v5414_v12 = vand.u32 4294901760, %v80_v4  ;;  %v83_v13 = vsel %vm51_vm0, %v25_v0, 0  ;;  %v271_v23 = vand.u32 4294901760, %v270_v2 }
  0x12   :  { %4405 = vmatprep.mubr.f32.mxu0 %v5338_v40  ;;  %v290_v24 = vsub.f32 %v5390_v63, %v8560_v8  ;;  %4727 = vmatprep.subr.bf16.mxu0 %v5287_v19  ;;  %v5425_v26 = vand.u32 4294901760, %v83_v13  ;;  %v86_v27 = vsel %vm51_vm0, %v26_v5, 0  ;;  %v89_v37 = vsel %vm51_vm0, %v27_v9, 0 }
  0x13   :  { %v5429_v28 = vsub.f32 %v77_v3, %v5412_v11  ;;  %v5432_v33 = vsub.f32 %v80_v4, %v5414_v12  ;;  %v5434_v36 = vand.u32 4294901760, %v86_v27  ;;  %v281_v47 = vand.u32 4294901760, %v280_v7 }
  0x14   :  { %8930 = vst [vmem:[#allocation6_spill] sm:$0xff] %v5425_v26  ;;  %4294 = vmatmul.mubr.f32.gmra.mrb[2].mxu1 %v251_v6  ;;  %4406 = vmatmul.mubr.f32.gmra.mrb[2].mxu0 %v5344_v42  ;;  %v5445_v54 = vsub.f32 %v83_v13, %v5425_v26  ;;  %v5447_v55 = vand.u32 4294901760, %v89_v37  ;;  %v92_v56 = vsel %vm51_vm0, %v28_v14, 0  ;;  %v95_v2 = vsel %vm51_vm0, %v29_v45, 0 }
  0x15   :  { %8931 = vst [vmem:[#allocation7_spill] sm:$0xff] %v5434_v36  ;;  %4296 = vmatprep.mubr.f32.mxu1 %v261_v10  ;;  %4408 = vmatprep.mubr.f32.mxu0 %v5347_v43  ;;  %v8559_v57 = vand.u32 4294901760, %v5429_v28  ;;  %v8556_v58 = vand.u32 4294901760, %v5432_v33  ;;  %v5454_v60 = vsub.f32 %v86_v27, %v5434_v36  ;;  %v5456_v61 = vand.u32 4294901760, %v92_v56 }
  0x16   :  { %8932 = vst [vmem:[#allocation8_spill] sm:$0xff] %v5447_v55  ;;  %v8557_v0 = vand.u32 4294901760, %v5445_v54  ;;  %4729 = vmatpush3.bf16.msra.mxu0 %v5287_v19  ;;  %v5461_v1 = vsub.f32 %v89_v37, %v5447_v55  ;;  %v98_v3 = vsel %vm51_vm0, %v30_v46, 0  ;;  %v291_v4 = vand.u32 4294901760, %v290_v24  ;;  %v31_v24 = vld [vmem:[%s8552_s0 + $0x80] sm:$0xff] }
  0x17   :  { %8933 = vst [vmem:[#allocation9_spill] sm:$0xff] %v5456_v61  ;;  %v300_v5 = vsub.f32 %v5429_v28, %v8559_v57  ;;  %v8558_v6 = vand.u32 4294901760, %v5454_v60  ;;  %v5470_v7 = vsub.f32 %v92_v56, %v5456_v61  ;;  %v310_v9 = vsub.f32 %v5432_v33, %v8556_v58 }
  0x18   :  { %4297 = vmatmul.mubr.f32.gmra.mrb[4].mxu1 %v271_v23  ;;  %4409 = vmatmul.mubr.f32.gmra.mrb[4].mxu0 %v5361_v49  ;;  %v8561_v10 = vand.u32 4294901760, %v5461_v1  ;;  %v5477_v13 = vand.u32 4294901760, %v95_v2  ;;  %v5479_v14 = vand.u32 4294901760, %v98_v3  ;;  %v32_v23 = vld [vmem:[%s8552_s0 + $0x88] sm:$0xff]  ;;  %v320_v37 = vsub.f32 %v5445_v54, %v8557_v0  ;;  %v33_v0 = vld [vmem:[%s8552_s0 + $0x90] sm:$0xff] }
  0x19   :  { %4299 = vmatprep.mubr.f32.mxu1 %v281_v47  ;;  %4411 = vmatprep.mubr.f32.mxu0 %v5366_v52  ;;  %v301_v27 = vand.u32 4294901760, %v300_v5  ;;  %v330_v45 = vsub.f32 %v5454_v60, %v8558_v6  ;;  %v8566_v46 = vand.u32 4294901760, %v5470_v7  ;;  %v101_v58 = vsel %vm51_vm0, %v31_v24, 0  ;;  %v34_v24 = vld [vmem:[%s8552_s0 + $0x98] sm:$0xff] }
  0x1a   :  { %8934 = vst [vmem:[#allocation10_spill] sm:$0xff] %v5477_v13  ;;  %8935 = vst [vmem:[#allocation11_spill] sm:$0xff] %v5479_v14  ;;  %v5496_v56 = vsub.f32 %v95_v2, %v5477_v13  ;;  %v340_v47 = vsub.f32 %v5461_v1, %v8561_v10  ;;  %v104_v5 = vsel %vm51_vm0, %v32_v23, 0  ;;  %v311_v6 = vand.u32 4294901760, %v310_v9 }
  0x1b   :  { %v5509_v2 = vsub.f32 %v98_v3, %v5479_v14  ;;  %v5511_v8 = vand.u32 4294901760, %v101_v58  ;;  %v321_v23 = vand.u32 4294901760, %v320_v37  ;;  %v5517_v10 = vand.u32 4294901760, %v104_v5  ;;  %v36_v37 = vld [vmem:[%s8552_s0 + $0xa8] sm:$0xff] }
  0x1c   :  { %4300 = vmatmul.mubr.f32.gmra.mrb[6].mxu1 %v291_v4  ;;  %4412 = vmatmul.mubr.f32.gmra.mrb[6].mxu0 %v5390_v63  ;;  %v8570_v57 = vand.u32 4294901760, %v5496_v56  ;;  %v8571_v4 = vand.u32 4294901760, %v5281_v16  ;;  %v8569_v9 = vand.u32 4294901760, %v5283_v17  ;;  %v331_v62 = vand.u32 4294901760, %v330_v45 }
  0x1d   :  { %8936 = vst [vmem:[#allocation12_spill] sm:$0xff] %v5511_v8  ;;  %4302 = vmatprep.mubr.f32.mxu1 %v301_v27  ;;  %4414 = vmatprep.mubr.f32.mxu0 %v5429_v28  ;;  %8937 = vst [vmem:[#allocation13_spill] sm:$0xff] %v5517_v10  ;;  %v350_v3 = vsub.f32 %v5470_v7, %v8566_v46  ;;  %v5525_v59 = vsub.f32 %v101_v58, %v5511_v8  ;;  %v107_v51 = vsel %vm51_vm0, %v33_v0, 0  ;;  %v35_v27 = vld [vmem:[%s8552_s0 + $0xa0] sm:$0xff] }
  0x1e   :  { %v341_v50 = vand.u32 4294901760, %v340_v47  ;;  %v5538_v45 = vpack.c.bf16 %v8569_v9, %v8571_v4  ;;  %v5540_v46 = vand.u32 4294901760, %v107_v51  ;;  %v110_v58 = vsel %vm51_vm0, %v34_v24, 0  ;;  %v37_v9 = vld [vmem:[%s8552_s0 + $0xb0] sm:$0xff] }
  0x1f   :  { %v360_v0 = vsub.f32 %v5496_v56, %v8570_v57  ;;  %v5549_v47 = vsub.f32 %v104_v5, %v5517_v10  ;;  %v5551_v39 = vand.u32 4294901760, %v110_v58  ;;  %v113_v5 = vsel %vm51_vm0, %v35_v27, 0 }
  0x20   :  { %8938 = vst [vmem:[#allocation14_spill] sm:$0xff] %v5540_v46  ;;  %4303 = vmatmul.mubr.f32.gmra.mrb[8].mxu1 %v311_v6  ;;  %4415 = vmatmul.mubr.f32.gmra.mrb[8].mxu0 %v5432_v33  ;;  %v38_v6 = vld [vmem:[%s8552_s0 + $0xb8] sm:$0xff]  ;;  %v5562_v57 = vsub.f32 %v107_v51, %v5540_v46  ;;  %v116_v4 = vsel %vm51_vm0, %v36_v37, 0  ;;  %v5567_v38 = vand.u32 4294901760, %v113_v5  ;;  %v351_v19 = vand.u32 4294901760, %v350_v3  ;;  %v39_v51 = vld [vmem:[%s8552_s0 + $0xc0] sm:$0xff] }
  0x21   :  { %8939 = vst [vmem:[#allocation15_spill] sm:$0xff] %v5551_v39  ;;  %4305 = vmatprep.mubr.f32.mxu1 %v321_v23  ;;  %4417 = vmatprep.mubr.f32.mxu0 %v5445_v54  ;;  %v5569_v48 = vand.u32 4294901760, %v116_v4  ;;  %v119_v23 = vsel %vm51_vm0, %v37_v9, 0  ;;  %v122_v10 = vsel %vm51_vm0, %v38_v6, 0  ;;  %v361_v27 = vand.u32 4294901760, %v360_v0 }
  0x22   :  { %4731 = vmatprep.subr.bf16.mxu0 %v5538_v45  ;;  %8940 = vst [vmem:[#allocation16_spill] sm:$0xff] %v5567_v38  ;;  %v8942_v37 = vand.u32 4294901760, %v5509_v2  ;;  %v5582_v3 = vsub.f32 %v110_v58, %v5551_v39  ;;  %v8943_v9 = vand.u32 4294901760, %v5525_v59  ;;  %v5590_v0 = vsub.f32 %v113_v5, %v5567_v38  ;;  %v41_v5 = vld [vmem:[%s8552_s0 + $0xd0] sm:$0xff] }
  0x23   :  { %8941 = vst [vmem:[#allocation17_spill] sm:$0xff] %v5569_v48  ;;  %v5592_v8 = vand.u32 4294901760, %v119_v23  ;;  %v5598_v58 = vsub.f32 %v116_v4, %v5569_v48  ;;  %v125_v46 = vsel %vm51_vm0, %v39_v51, 0  ;;  %v8947_v4 = vand.u32 4294901760, %v5549_v47 }
  0x24   :  { %4306 = vmatmul.mubr.f32.gmra.mrb[10].mxu1 %v331_v62  ;;  %4418 = vmatmul.mubr.f32.gmra.mrb[10].mxu0 %v5454_v60  ;;  %v370_v24 = vsub.f32 %v5509_v2, %v8942_v37  ;;  %v380_v6 = vsub.f32 %v5525_v59, %v8943_v9  ;;  %v40_v37 = vld [vmem:[%s8552_s0 + $0xc8] sm:$0xff]  ;;  %v5606_v62 = vand.u32 4294901760, %v125_v46  ;;  %v131_v39 = vsel %vm51_vm0, %v41_v5, 0 }
  0x25   :  { %4308 = vmatprep.mubr.f32.mxu1 %v341_v50  ;;  %4420 = vmatprep.mubr.f32.mxu0 %v5461_v1  ;;  %8944 = vst [vmem:[#allocation18_spill] sm:$0xff] %v5592_v8  ;;  %v5600_v50 = vand.u32 4294901760, %v122_v10  ;;  %v5604_v9 = vsub.f32 %v119_v23, %v5592_v8  ;;  %v390_v48 = vsub.f32 %v5549_v47, %v8947_v4  ;;  %v128_v51 = vsel %vm51_vm0, %v40_v37, 0 }
  0x26   :  { %8946 = vst [vmem:[#allocation20_spill] sm:$0xff] %v5606_v62  ;;  %v371_v38 = vand.u32 4294901760, %v370_v24  ;;  %v381_v23 = vand.u32 4294901760, %v380_v6  ;;  %v8948_v8 = vand.u32 4294901760, %v5562_v57  ;;  %v43_v6 = vld [vmem:[%s8552_s0 + $0xe0] sm:$0xff]  ;;  %v5637_v37 = vand.u32 4294901760, %v128_v51 }
  0x27   :  { %8945 = vst [vmem:[#allocation19_spill] sm:$0xff] %v5600_v50  ;;  %v5625_v4 = vsub.f32 %v122_v10, %v5600_v50  ;;  %v391_v10 = vand.u32 4294901760, %v390_v48  ;;  %v8950_v13 = vand.u32 4294901760, %v5582_v3  ;;  %v5643_v24 = vand.u32 4294901760, %v131_v39 }
  0x28   :  { %4309 = vmatmul.mubr.f32.gmra.mrb[12].mxu1 %v351_v19  ;;  %4421 = vmatmul.mubr.f32.gmra.mrb[12].mxu0 %v5470_v7  ;;  %v400_v14 = vsub.f32 %v5562_v57, %v8948_v8  ;;  %v5635_v8 = vsub.f32 %v125_v46, %v5606_v62  ;;  %8949 = vst [vmem:[#allocation21_spill] sm:$0xff] %v5637_v37  ;;  %v8952_v19 = vand.u32 4294901760, %v5315_v30  ;;  %v8953_v46 = vand.u32 4294901760, %v5590_v0 }
  0x29   :  { %4311 = vmatprep.mubr.f32.mxu1 %v361_v27  ;;  %4423 = vmatprep.mubr.f32.mxu0 %v5496_v56  ;;  %v42_v27 = vld [vmem:[%s8552_s0 + $0xd8] sm:$0xff]  ;;  %v410_v5 = vsub.f32 %v5582_v3, %v8950_v13  ;;  %8951 = vst [vmem:[#allocation22_spill] sm:$0xff] %v5643_v24  ;;  %v137_v61 = vsel %vm51_vm0, %v43_v6, 0  ;;  %v8954_v48 = vand.u32 4294901760, %v5598_v58  ;;  %v8955_v13 = vand.u32 4294901760, %v5604_v9 }
  0x2a   :  { %v401_v50 = vand.u32 4294901760, %v400_v14  ;;  %v420_v62 = vsub.f32 %v5590_v0, %v8953_v46  ;;  %v44_v14 = vld [vmem:[%s8552_s0 + $0xe8] sm:$0xff]  ;;  %v8956_v6 = vand.u32 4294901760, %v5281_v16  ;;  %v8958_v30 = vand.u32 4294901760, %v5318_v31 }
  0x2b   :  { %v430_v55 = vsub.f32 %v5598_v58, %v8954_v48  ;;  %v8957_v48 = vand.u32 4294901760, %v5283_v17  ;;  %v5682_v26 = vand.u32 4294901760, %v137_v61 }
  0x2c   :  { %4312 = vmatmul.mubr.f32.gmra.mrb[14].mxu1 %v371_v38  ;;  %4424 = vmatmul.mubr.f32.gmra.mrb[14].mxu0 %v5509_v2  ;;  %v134_v38 = vsel %vm51_vm0, %v42_v27, 0  ;;  %v5664_v27 = vsub.f32 %v128_v51, %v5637_v37  ;;  %v541_v46 = vsub.f32 %v5281_v16, %v8956_v6  ;;  %v5678_v51 = vsub.f32 %v131_v39, %v5643_v24 }
  0x2d   :  { %4314 = vmatprep.mubr.f32.mxu1 %v381_v23  ;;  %4458 = vmatprep.mubr.f32.mxu0 %v8952_v19  ;;  %v440_v23 = vsub.f32 %v5604_v9, %v8955_v13  ;;  %v548_v36 = vsub.f32 %v5283_v17, %v8957_v48  ;;  %v45_v13 = vld [vmem:[%s8552_s0 + $0xf0] sm:$0xff]  ;;  %v411_v19 = vand.u32 4294901760, %v410_v5  ;;  %v5680_v37 = vand.u32 4294901760, %v134_v38 }
  0x2e   :  { %v421_v16 = vand.u32 4294901760, %v420_v62  ;;  %v140_v17 = vsel %vm51_vm0, %v44_v14, 0  ;;  %v542_v6 = vand.u32 4294901760, %v541_v46  ;;  %v431_v31 = vand.u32 4294901760, %v430_v55 }
  0x2f   :  { %v549_v48 = vand.u32 4294901760, %v548_v36  ;;  %v441_v5 = vand.u32 4294901760, %v440_v23  ;;  %v8960_v39 = vand.u32 4294901760, %v5625_v4  ;;  %v143_v24 = vsel %vm51_vm0, %v45_v13, 0 }
  0x30   :  { %4315 = vmatmul.mubr.f32.gmra.mrb[16].mxu1 %v391_v10  ;;  %4459 = vmatmul.mubr.f32.vlgmr.msra.gmra.mrb[0].mxu0 %v8958_v30  ;;  %v8959_v10 = vand.u32 4294901760, %v5338_v40  ;;  %v8961_v62 = vand.u32 4294901760, %v5635_v8  ;;  %v469_v36 = vand.u32 4294901760, %v5664_v27  ;;  %v554_v55 = vand.u32 4294901760, %v5285_v18 }
  0x31   :  { %4317 = vmatprep.mubr.f32.mxu1 %v401_v50  ;;  %4733 = vmatpush3.bf16.msra.mxu0 %v5538_v45  ;;  %v450_v30 = vsub.f32 %v5625_v4, %v8960_v39  ;;  %v46_v45 = vld [vmem:[%s8552_s0 + $0xf8] sm:$0xff]  ;;  %v4706_v40 = vpack.c.bf16 %v549_v48, %v542_v6  ;;  %v8962_v23 = vand.u32 4294901760, %v5344_v42  ;;  %v479_v14 = vand.u32 4294901760, %v5678_v51 }
  0x32   :  { %4461 = vmatprep.mubr.f32.mxu0 %v8959_v10  ;;  %v460_v50 = vsub.f32 %v5635_v8, %v8961_v62  ;;  %v5704_v46 = vsub.f32 %v134_v38, %v5680_v37  ;;  %v5707_v13 = vsub.f32 %v137_v61, %v5682_v26  ;;  %v5709_v10 = vand.u32 4294901760, %v140_v17 }
  0x33   :  { %v8963_v39 = vand.u32 4294901760, %v5347_v43  ;;  %v5713_v6 = vand.u32 4294901760, %v143_v24  ;;  %v555_v42 = vsub.f32 %v5285_v18, %v554_v55  ;;  %v561_v48 = vand.u32 4294901760, %v5289_v20  ;;  %4707 = vmatprep.subr.bf16.mxu1 %v4706_v40 }
  0x34   :  { %4318 = vmatmul.mubr.f32.gmra.mrb[18].mxu1 %v411_v19  ;;  %4462 = vmatmul.mubr.f32.gmra.mrb[2].mxu0 %v8962_v23  ;;  %v146_v19 = vsel %vm51_vm0, %v46_v45, 0  ;;  %v451_v62 = vand.u32 4294901760, %v450_v30  ;;  %v461_v38 = vand.u32 4294901760, %v460_v50  ;;  %v470_v61 = vsub.f32 %v5664_v27, %v469_v36 }
  0x35   :  { %4320 = vmatprep.mubr.f32.mxu1 %v421_v16  ;;  %4464 = vmatprep.mubr.f32.mxu0 %v8963_v39  ;;  %v556_v16 = vand.u32 4294901760, %v555_v42  ;;  %v562_v43 = vsub.f32 %v5289_v20, %v561_v48  ;;  %v8964_v23 = vand.u32 4294901760, %v5361_v49  ;;  %v489_v45 = vand.u32 4294901760, %v5704_v46 }
  0x36   :  { %4709 = vmatpush3.bf16.msra.mxu1 %v4706_v40  ;;  %v5726_v18 = vsub.f32 %v140_v17, %v5709_v10  ;;  %v5728_v30 = vand.u32 4294901760, %v146_v19  ;;  %v4734_v50 = vpack.c.bf16 %v561_v48, %v554_v55  ;;  %v8965_v39 = vand.u32 4294901760, %v5366_v52 }
  0x37   :  { %v480_v20 = vsub.f32 %v5678_v51, %v479_v14  ;;  %v5737_v49 = vsub.f32 %v143_v24, %v5713_v6  ;;  %v563_v40 = vand.u32 4294901760, %v562_v43  ;;  %v8966_v55 = vand.u32 4294901760, %v5390_v63 }
  0x38   :  { %4321 = vmatmul.mubr.f32.gmra.mrb[20].mxu1 %v431_v31  ;;  %4465 = vmatmul.mubr.f32.gmra.mrb[4].mxu0 %v8964_v23  ;;  %v499_v31 = vand.u32 4294901760, %v5707_v13  ;;  %v490_v52 = vsub.f32 %v5704_v46, %v489_v45  ;;  %v509_v42 = vand.u32 4294901760, %v5726_v18  ;;  %v5746_v48 = vsub.f32 %v146_v19, %v5728_v30 }
  0x39   :  { %4323 = vmatprep.mubr.f32.mxu1 %v441_v5  ;;  %4467 = vmatprep.mubr.f32.mxu0 %v8965_v39  ;;  %v4710_v17 = vpack.c.bf16 %v563_v40, %v556_v16  ;;  %v471_v5 = vand.u32 4294901760, %v470_v61  ;;  %v8967_v24 = vand.u32 4294901760, %v5429_v28  ;;  %v481_v16 = vand.u32 4294901760, %v480_v20 }
  0x3a   :  { %4735 = vmatprep.subr.bf16.mxu0 %v4734_v50  ;;  %v500_v63 = vsub.f32 %v5707_v13, %v499_v31  ;;  %v8968_v61 = vand.u32 4294901760, %v5432_v33  ;;  %v491_v19 = vand.u32 4294901760, %v490_v52  ;;  %v510_v28 = vsub.f32 %v5726_v18, %v509_v42 }
  0x3b   :  { %4737 = vmatpush3.bf16.msra.mxu0 %v4734_v50  ;;  %4711 = vmatprep.subr.bf16.mxu1 %v4710_v17  ;;  %v8969_v43 = vand.u32 4294901760, %v5445_v54  ;;  %v8970_v33 = vand.u32 4294901760, %v5454_v60  ;;  %v8971_v40 = vand.u32 4294901760, %v5461_v1  ;;  %v8972_v54 = vand.u32 4294901760, %v5470_v7 }
  0x3c   :  { %4324 = vmatmul.mubr.f32.gmra.mrb[22].mxu1 %v451_v62  ;;  %4468 = vmatmul.mubr.f32.gmra.mrb[6].mxu0 %v8966_v55  ;;  %v519_v62 = vand.u32 4294901760, %v5737_v49  ;;  %v501_v23 = vand.u32 4294901760, %v500_v63  ;;  %v511_v39 = vand.u32 4294901760, %v510_v28  ;;  %v8974_v60 = vand.u32 4294901760, %v5509_v2  ;;  %v8987_v28 = vld [vmem:[#allocation9_spill] sm:$0xff] }
  0x3d   :  { %4326 = vmatprep.mubr.f32.mxu1 %v461_v38  ;;  %4470 = vmatprep.mubr.f32.mxu0 %v8967_v24  ;;  %v529_v38 = vand.u32 4294901760, %v5746_v48  ;;  %v8975_v52 = vand.u32 4294901760, %v5525_v59  ;;  %v8976_v1 = vand.u32 4294901760, %v5549_v47  ;;  %v8977_v7 = vand.u32 4294901760, %v5562_v57 }
  0x3e   :  { %4739 = vmatprep.subr.bf16.mxu0 %v5279_v15  ;;  %4713 = vmatpush3.bf16.msra.mxu1 %v4710_v17  ;;  %v520_v50 = vsub.f32 %v5737_v49, %v519_v62  ;;  %v8979_v2 = vand.u32 4294901760, %v5590_v0  ;;  %v8980_v24 = vand.u32 4294901760, %v5598_v58  ;;  %v8983_v63 = vand.u32 4294901760, %v5635_v8 }
  0x3f   :  { %4778 = vmatprep.subr.bf16.mxu1 %v5304_v25  ;;  %v530_v20 = vsub.f32 %v5746_v48, %v529_v38 }
  0x40   :  { %4327 = vmatmul.mubr.f32.gmra.mrb[24].mxu1 %v471_v5  ;;  %4471 = vmatmul.mubr.f32.gmra.mrb[8].mxu0 %v8968_v61  ;;  %v521_v17 = vand.u32 4294901760, %v520_v50  ;;  %v8973_v5 = vand.u32 4294901760, %v5496_v56  ;;  %v8978_v56 = vand.u32 4294901760, %v5582_v3  ;;  %v8985_v61 = vld [vmem:[#allocation7_spill] sm:$0xff]  ;;  %v8997_v50 = vld [vmem:[#allocation18_spill] sm:$0xff] }
  0x41   :  { %4329 = vmatprep.mubr.f32.mxu1 %v481_v16  ;;  %4473 = vmatprep.mubr.f32.mxu0 %v8969_v43  ;;  %v531_v55 = vand.u32 4294901760, %v530_v20  ;;  %v8982_v16 = vand.u32 4294901760, %v5625_v4  ;;  %v8989_v43 = vld [vmem:[#allocation11_spill] sm:$0xff]  ;;  %v9001_v20 = vld [vmem:[#allocation22_spill] sm:$0xff] }
  0x44   :  { %4330 = vmatmul.mubr.f32.gmra.mrb[26].mxu1 %v491_v19  ;;  %4474 = vmatmul.mubr.f32.gmra.mrb[10].mxu0 %v8970_v33  ;;  %v8986_v19 = vld [vmem:[#allocation8_spill] sm:$0xff] }
  0x45   :  { %4332 = vmatprep.mubr.f32.mxu1 %v501_v23  ;;  %4476 = vmatprep.mubr.f32.mxu0 %v8971_v40  ;;  %v8996_v23 = vld [vmem:[#allocation17_spill] sm:$0xff]  ;;  %v8999_v33 = vld [vmem:[#allocation20_spill] sm:$0xff] }
  0x48   :  { %4333 = vmatmul.mubr.f32.gmra.mrb[28].mxu1 %v511_v39  ;;  %4477 = vmatmul.mubr.f32.gmra.mrb[12].mxu0 %v8972_v54  ;;  %v9000_v39 = vld [vmem:[#allocation21_spill] sm:$0xff] }
  0x49   :  { %4335 = vmatprep.mubr.f32.mxu1 %v521_v17  ;;  %4479 = vmatprep.mubr.f32.mxu0 %v8973_v5 }
  0x4c   :  { %4336 = vmatmul.mubr.f32.gmra.mrb[30].mxu1 %v531_v55  ;;  %4480 = vmatmul.mubr.f32.gmra.mrb[14].mxu0 %v8974_v60 }
  0x4d   :  { %4346 = vmatprep.mubr.f32.mxu1 %v5291_v21  ;;  %4482 = vmatprep.mubr.f32.mxu0 %v8975_v52 }
  0x50   :  { %4347 = vmatmul.mubr.f32.vlgmr.msra.gmra.mrb[0].mxu1 %v5293_v22  ;;  %4483 = vmatmul.mubr.f32.gmra.mrb[16].mxu0 %v8976_v1 }
  0x51   :  { %4349 = vmatprep.mubr.f32.mxu1 %v5320_v32  ;;  %4485 = vmatprep.mubr.f32.mxu0 %v8977_v7 }
  0x52   :  { %4780 = vmatpush3.bf16.msra.mxu1 %v5304_v25  ;;  %v8981_v25 = vand.u32 4294901760, %v5604_v9 }
  0x53   :  { %4779 = vmatprep.subr.bf16.mxu1 %v5312_v29 }
  0x54   :  { %4350 = vmatmul.mubr.f32.gmra.mrb[2].mxu1 %v5327_v34  ;;  %4486 = vmatmul.mubr.f32.gmra.mrb[18].mxu0 %v8978_v56 }
  0x55   :  { %4352 = vmatprep.mubr.f32.mxu1 %v5329_v35  ;;  %4488 = vmatprep.mubr.f32.mxu0 %v8979_v2 }
  0x56   :  { %4781 = vmatpush3.bf16.msra.mxu1 %v5312_v29  ;;  %v8984_v29 = vld [vmem:[#allocation6_spill] sm:$0xff] }
  0x58   :  { %4353 = vmatmul.mubr.f32.gmra.mrb[4].mxu1 %v5340_v41  ;;  %4489 = vmatmul.mubr.f32.gmra.mrb[20].mxu0 %v8980_v24 }
  0x59   :  { %4355 = vmatprep.mubr.f32.mxu1 %v5349_v44  ;;  %4491 = vmatprep.mubr.f32.mxu0 %v8981_v25 }
  0x5c   :  { %4356 = vmatmul.mubr.f32.gmra.mrb[6].mxu1 %v5368_v53  ;;  %4492 = vmatmul.mubr.f32.gmra.mrb[22].mxu0 %v8982_v16 }
  0x5d   :  { %4358 = vmatprep.mubr.f32.mxu1 %v5412_v11  ;;  %4494 = vmatprep.mubr.f32.mxu0 %v8983_v63 }
  0x60   :  { %4359 = vmatmul.mubr.f32.gmra.mrb[8].mxu1 %v5414_v12  ;;  %4495 = vmatmul.mubr.f32.gmra.mrb[24].mxu0 %v469_v36  ;;  %v8988_v36 = vld [vmem:[#allocation10_spill] sm:$0xff] }
  0x61   :  { %4361 = vmatprep.mubr.f32.mxu1 %v8984_v29  ;;  %4497 = vmatprep.mubr.f32.mxu0 %v479_v14  ;;  %v8990_v14 = vld [vmem:[#allocation12_spill] sm:$0xff] }
  0x64   :  { %4362 = vmatmul.mubr.f32.gmra.mrb[10].mxu1 %v8985_v61  ;;  %4498 = vmatmul.mubr.f32.gmra.mrb[26].mxu0 %v489_v45  ;;  %v8991_v45 = vld [vmem:[#allocation13_spill] sm:$0xff] }
  0x65   :  { %4364 = vmatprep.mubr.f32.mxu1 %v8986_v19  ;;  %4500 = vmatprep.mubr.f32.mxu0 %v499_v31  ;;  %v8992_v31 = vld [vmem:[#allocation14_spill] sm:$0xff] }
  0x68   :  { %4365 = vmatmul.mubr.f32.gmra.mrb[12].mxu1 %v8987_v28  ;;  %4501 = vmatmul.mubr.f32.gmra.mrb[28].mxu0 %v509_v42  ;;  %v8993_v42 = vld [vmem:[#allocation5_spill] sm:$0xff] }
  0x69   :  { %4367 = vmatprep.mubr.f32.mxu1 %v8988_v36  ;;  %4503 = vmatprep.mubr.f32.mxu0 %v519_v62  ;;  %v8994_v62 = vld [vmem:[#allocation15_spill] sm:$0xff] }
  0x6c   :  { %4368 = vmatmul.mubr.f32.gmra.mrb[14].mxu1 %v8989_v43  ;;  %4504 = vmatmul.mubr.f32.gmra.mrb[30].mxu0 %v529_v38  ;;  %v8995_v38 = vld [vmem:[#allocation16_spill] sm:$0xff] }
  0x6d   :  { %4370 = vmatprep.mubr.f32.mxu1 %v8990_v14  ;;  %4514 = vmatprep.mubr.f32.mxu0 %v5291_v21 }
  0x70   :  { %4371 = vmatmul.mubr.f32.gmra.mrb[16].mxu1 %v8991_v45  ;;  %4515 = vmatmul.mubr.f32.vlgmr.msra.gmra.mrb[0].mxu0 %v5293_v22 }
  0x71   :  { %4373 = vmatprep.mubr.f32.mxu1 %v8992_v31  ;;  %4741 = vmatpush3.bf16.msra.mxu0 %v5279_v15  ;;  %v8998_v15 = vld [vmem:[#allocation19_spill] sm:$0xff] }
  0x72   :  { %4517 = vmatprep.mubr.f32.mxu0 %v5320_v32  ;;  %4743 = vmatprep.subr.bf16.mxu0 %v8993_v42 }
  0x74   :  { %4374 = vmatmul.mubr.f32.gmra.mrb[18].mxu1 %v8994_v62  ;;  %4518 = vmatmul.mubr.f32.gmra.mrb[2].mxu0 %v5327_v34 }
  0x75   :  { %4376 = vmatprep.mubr.f32.mxu1 %v8995_v38  ;;  %4520 = vmatprep.mubr.f32.mxu0 %v5329_v35 }
  0x76   :  { %4745 = vmatpush3.bf16.msra.mxu0 %v8993_v42 }
  0x78   :  { %4377 = vmatmul.mubr.f32.gmra.mrb[20].mxu1 %v8996_v23  ;;  %4521 = vmatmul.mubr.f32.gmra.mrb[4].mxu0 %v5340_v41 }
  0x79   :  { %4379 = vmatprep.mubr.f32.mxu1 %v8997_v50  ;;  %4523 = vmatprep.mubr.f32.mxu0 %v5349_v44 }
  0x7c   :  { %4380 = vmatmul.mubr.f32.gmra.mrb[22].mxu1 %v8998_v15  ;;  %4524 = vmatmul.mubr.f32.gmra.mrb[6].mxu0 %v5368_v53 }
  0x7d   :  { %4382 = vmatprep.mubr.f32.mxu1 %v8999_v33  ;;  %4526 = vmatprep.mubr.f32.mxu0 %v5412_v11 }
  0x80   :  { %4383 = vmatmul.mubr.f32.gmra.mrb[24].mxu1 %v9000_v39  ;;  %4527 = vmatmul.mubr.f32.gmra.mrb[8].mxu0 %v5414_v12 }
  0x81   :  { %4385 = vmatprep.mubr.f32.mxu1 %v9001_v20  ;;  %4529 = vmatprep.mubr.f32.mxu0 %v8984_v29 }
  0x84   :  { %4386 = vmatmul.mubr.f32.gmra.mrb[26].mxu1 %v5680_v37  ;;  %4530 = vmatmul.mubr.f32.gmra.mrb[10].mxu0 %v8985_v61 }
  0x85   :  { %4388 = vmatprep.mubr.f32.mxu1 %v5682_v26  ;;  %4532 = vmatprep.mubr.f32.mxu0 %v8986_v19 }
  0x88   :  { %4389 = vmatmul.mubr.f32.gmra.mrb[28].mxu1 %v5709_v10  ;;  %4533 = vmatmul.mubr.f32.gmra.mrb[12].mxu0 %v8987_v28 }
  0x89   :  { %4391 = vmatprep.mubr.f32.mxu1 %v5713_v6  ;;  %4535 = vmatprep.mubr.f32.mxu0 %v8988_v36 }
  0x8c   :  { %4392 = vmatmul.mubr.f32.gmra.mrb[30].mxu1 %v5728_v30  ;;  %4536 = vmatmul.mubr.f32.gmra.mrb[14].mxu0 %v8989_v43 }
  0x8d   :  { %4426 = vmatprep.mubr.f32.mxu1 %v5525_v59  ;;  %4538 = vmatprep.mubr.f32.mxu0 %v8990_v14 }
  0x90   :  { %4427 = vmatmul.mubr.f32.vlgmr.msra.gmra.mrb[16].mxu1 %v5549_v47  ;;  %4539 = vmatmul.mubr.f32.gmra.mrb[16].mxu0 %v8991_v45 }
  0x91   :  { %4429 = vmatprep.mubr.f32.mxu1 %v5562_v57  ;;  %4541 = vmatprep.mubr.f32.mxu0 %v8992_v31 }
  0x94   :  { %4430 = vmatmul.mubr.f32.gmra.mrb[18].mxu1 %v5582_v3  ;;  %4542 = vmatmul.mubr.f32.gmra.mrb[18].mxu0 %v8994_v62 }
  0x95   :  { %4432 = vmatprep.mubr.f32.mxu1 %v5590_v0  ;;  %4544 = vmatprep.mubr.f32.mxu0 %v8995_v38 }
  0x98   :  { %4433 = vmatmul.mubr.f32.gmra.mrb[20].mxu1 %v5598_v58  ;;  %4545 = vmatmul.mubr.f32.gmra.mrb[20].mxu0 %v8996_v23 }
  0x99   :  { %4435 = vmatprep.mubr.f32.mxu1 %v5604_v9  ;;  %4547 = vmatprep.mubr.f32.mxu0 %v8997_v50 }
  0x9c   :  { %4436 = vmatmul.mubr.f32.gmra.mrb[22].mxu1 %v5625_v4  ;;  %4548 = vmatmul.mubr.f32.gmra.mrb[22].mxu0 %v8998_v15 }
  0x9d   :  { %4438 = vmatprep.mubr.f32.mxu1 %v5635_v8  ;;  %4550 = vmatprep.mubr.f32.mxu0 %v8999_v33 }
  0xa0   :  { %4439 = vmatmul.mubr.f32.gmra.mrb[24].mxu1 %v5664_v27  ;;  %4551 = vmatmul.mubr.f32.gmra.mrb[24].mxu0 %v9000_v39 }
  0xa1   :  { %4441 = vmatprep.mubr.f32.mxu1 %v5678_v51  ;;  %4553 = vmatprep.mubr.f32.mxu0 %v9001_v20 }
  0xa4   :  { %4442 = vmatmul.mubr.f32.gmra.mrb[26].mxu1 %v5704_v46  ;;  %4554 = vmatmul.mubr.f32.gmra.mrb[26].mxu0 %v5680_v37 }
  0xa5   :  { %4444 = vmatprep.mubr.f32.mxu1 %v5707_v13  ;;  %4556 = vmatprep.mubr.f32.mxu0 %v5682_v26 }
  0xa8   :  { %4445 = vmatmul.mubr.f32.gmra.mrb[28].mxu1 %v5726_v18  ;;  %4557 = vmatmul.mubr.f32.gmra.mrb[28].mxu0 %v5709_v10 }
  0xa9   :  { %4447 = vmatprep.mubr.f32.mxu1 %v5737_v49  ;;  %4559 = vmatprep.mubr.f32.mxu0 %v5713_v6 }
  0xac   :  { %4448 = vmatmul.mubr.f32.gmra.mrb[30].mxu1 %v5746_v48  ;;  %4560 = vmatmul.mubr.f32.gmra.mrb[30].mxu0 %v5728_v30  ;;  %v1966_v48 = vlaneseq }
  0xad   :  { %4570 = vmatprep.mubr.f32.mxu0 %v5291_v21 }
  0xae   :  { %v5964_v54 = vand.u32 127, %v1966_v48 }
  0xb0   :  { %4571 = vmatmul.mubr.f32.vlgmr.msra.gmra.mrb[0].mxu0 %v5293_v22  ;;  %vm1968_vm1 = vcmp.eq.s32.totalorder %v5964_v54, 0 }
  0xb1   :  { %4573 = vmatprep.mubr.f32.mxu0 %v5320_v32 }
  0xb4   :  { %4574 = vmatmul.mubr.f32.gmra.mrb[2].mxu0 %v5327_v34 }
  0xb5   :  { %4576 = vmatprep.mubr.f32.mxu0 %v5329_v35 }
  0xb8   :  { %4577 = vmatmul.mubr.f32.gmra.mrb[4].mxu0 %v5340_v41 }
  0xb9   :  { %4579 = vmatprep.mubr.f32.mxu0 %v5349_v44 }
  0xbc   :  { %4580 = vmatmul.mubr.f32.gmra.mrb[6].mxu0 %v5368_v53 }
  0xbd   :  { %4582 = vmatprep.mubr.f32.mxu0 %v5412_v11 }
  0xc0   :  { %4583 = vmatmul.mubr.f32.gmra.mrb[8].mxu0 %v5414_v12 }
  0xc1   :  { %4585 = vmatprep.mubr.f32.mxu0 %v8984_v29 }
  0xc4   :  { %4586 = vmatmul.mubr.f32.gmra.mrb[10].mxu0 %v8985_v61 }
  0xc5   :  { %4588 = vmatprep.mubr.f32.mxu0 %v8986_v19 }
  0xc8   :  { %4589 = vmatmul.mubr.f32.gmra.mrb[12].mxu0 %v8987_v28 }
  0xc9   :  { %4591 = vmatprep.mubr.f32.mxu0 %v8988_v36 }
  0xcc   :  { %4592 = vmatmul.mubr.f32.gmra.mrb[14].mxu0 %v8989_v43 }
  0xcd   :  { %4594 = vmatprep.mubr.f32.mxu0 %v8990_v14 }
  0xd0   :  { %4595 = vmatmul.mubr.f32.gmra.mrb[16].mxu0 %v8991_v45 }
  0xd1   :  { %4597 = vmatprep.mubr.f32.mxu0 %v8992_v31 }
  0xd4   :  { %4598 = vmatmul.mubr.f32.gmra.mrb[18].mxu0 %v8994_v62 }
  0xd5   :  { %4600 = vmatprep.mubr.f32.mxu0 %v8995_v38 }
  0xd8   :  { %4601 = vmatmul.mubr.f32.gmra.mrb[20].mxu0 %v8996_v23 }
  0xd9   :  { %4603 = vmatprep.mubr.f32.mxu0 %v8997_v50 }
  0xdc   :  { %4604 = vmatmul.mubr.f32.gmra.mrb[22].mxu0 %v8998_v15 }
  0xdd   :  { %4606 = vmatprep.mubr.f32.mxu0 %v8999_v33 }
  0xe0   :  { %4607 = vmatmul.mubr.f32.gmra.mrb[24].mxu0 %v9000_v39 }
  0xe1   :  { %4609 = vmatprep.mubr.f32.mxu0 %v9001_v20 }
  0xe4   :  { %4610 = vmatmul.mubr.f32.gmra.mrb[26].mxu0 %v5680_v37 }
  0xe5   :  { %4612 = vmatprep.mubr.f32.mxu0 %v5682_v26 }
  0xe8   :  { %4613 = vmatmul.mubr.f32.gmra.mrb[28].mxu0 %v5709_v10 }
  0xe9   :  { %4615 = vmatprep.mubr.f32.mxu0 %v5713_v6 }
  0xec   :  { %4616 = vmatmul.mubr.f32.gmra.mrb[30].mxu0 %v5728_v30 }
 0x123   :  { %v4348_v21 = vpop.f32.mrb[0].mxu1 }
 0x124   :  { %v624_v22 = vpop.f32.mrb[1].mxu1 }
 0x127   :  { %v4351_v32 = vpop.f32.mrb[2].mxu1 }
 0x128   :  { %v636_v34 = vpop.f32.mrb[3].mxu1 }
 0x12b   :  { %v4354_v35 = vpop.f32.mrb[4].mxu1 }
 0x12c   :  { %v648_v41 = vpop.f32.mrb[5].mxu1 }
 0x12f   :  { %v4357_v44 = vpop.f32.mrb[6].mxu1 }
 0x130   :  { %v660_v53 = vpop.f32.mrb[7].mxu1 }
 0x133   :  { %v4360_v59 = vpop.f32.mrb[8].mxu1 }
 0x134   :  { %v672_v11 = vpop.f32.mrb[9].mxu1 }
 0x137   :  { %v4363_v12 = vpop.f32.mrb[10].mxu1 }
 0x138   :  { %v5922_v57 = vpop.f32.mrb[11].mxu1 }
 0x13b   :  { %v5924_v26 = vpop.f32.mrb[12].mxu1 }
 0x13c   :  { %v5926_v47 = vpop.f32.mrb[13].mxu1 }
 0x13f   :  { %v5928_v3 = vpop.f32.mrb[14].mxu1 }
 0x140   :  { %v5930_v0 = vpop.f32.mrb[15].mxu1 }
 0x163   :  { %v5932_v58 = vpop.f32.mrb[16].mxu1 }
 0x164   :  { %v5934_v9 = vpop.f32.mrb[17].mxu1 }
 0x167   :  { %v5936_v4 = vpop.f32.mrb[18].mxu1 }
 0x168   :  { %v5938_v8 = vpop.f32.mrb[19].mxu1 }
 0x16b   :  { %v5940_v37 = vpop.f32.mrb[20].mxu1 }
 0x16c   :  { %v5942_v27 = vpop.f32.mrb[21].mxu1 }
 0x16f   :  { %v5944_v51 = vpop.f32.mrb[22].mxu1 }
 0x170   :  { %v5946_v46 = vpop.f32.mrb[23].mxu1 }
 0x173   :  { %v5948_v13 = vpop.f32.mrb[24].mxu1 }
 0x174   :  { %v5950_v10 = vpop.f32.mrb[25].mxu1 }
 0x177   :  { %v5952_v6 = vpop.f32.mrb[26].mxu1 }
 0x178   :  { %v5954_v18 = vpop.f32.mrb[27].mxu1 }
 0x17b   :  { %v5956_v30 = vpop.f32.mrb[28].mxu1 }
 0x17c   :  { %v5958_v49 = vpop.f32.mrb[29].mxu1 }
 0x17f   :  { %v5960_v40 = vpop.f32.mrb[30].mxu1 }
 0x180   :  { %v5962_v17 = vpop.f32.mrb[31].mxu1 }
 0x183   :  { %v4572_v55 = vpop.f32.mrb[0].mxu0 }
 0x184   :  { %v5966_v5 = vadd.f32 %v4572_v55, %v4348_v21  ;;  %v1776_v60 = vpop.f32.mrb[1].mxu0 }
 0x185   :  { %v5969_v52 = vadd.f32 %v1776_v60, %v624_v22 }
 0x186   :  { %9002 = vst [vmem:[#allocation6_spill] sm:$0xff] %v5966_v5  ;;  %v1970_v16 = vsel %vm1968_vm1, %v5966_v5, 0.0 }
 0x187   :  { %9003 = vst [vmem:[#allocation7_spill] sm:$0xff] %v5969_v52  ;;  %v4575_v1 = vpop.f32.mrb[2].mxu0  ;;  %v1969_v7 = vsel %vm1968_vm1, %v5969_v52, 0.0 }
 0x188   :  { %v5974_v56 = vadd.f32 %v4575_v1, %v4351_v32  ;;  %v1788_v2 = vpop.f32.mrb[3].mxu0  ;;  %2001 = vadd.xlane.f32.xlu0 %v1969_v7 }
 0x189   :  { %v5976_v24 = vadd.f32 %v1788_v2, %v636_v34 }
 0x18a   :  { %9004 = vst [vmem:[#allocation8_spill] sm:$0xff] %v5974_v56  ;;  %v1972_v36 = vsel %vm1968_vm1, %v5974_v56, 0.0 }
 0x18b   :  { %9005 = vst [vmem:[#allocation9_spill] sm:$0xff] %v5976_v24  ;;  %v4578_v25 = vpop.f32.mrb[4].mxu0  ;;  %v1971_v63 = vsel %vm1968_vm1, %v5976_v24, 0.0 }
 0x18c   :  { %v5984_v29 = vadd.f32 %v4578_v25, %v4354_v35  ;;  %v1800_v61 = vpop.f32.mrb[5].mxu0  ;;  %2003 = vadd.xlane.f32.xlu0 %v1970_v16  ;;  %2005 = vadd.xlane.f32.xlu1 %v1971_v63 }
 0x18d   :  { %v5986_v19 = vadd.f32 %v1800_v61, %v648_v41 }
 0x18e   :  { %9006 = vst [vmem:[#allocation10_spill] sm:$0xff] %v5984_v29  ;;  %v1974_v62 = vsel %vm1968_vm1, %v5984_v29, 0.0 }
 0x18f   :  { %9007 = vst [vmem:[#allocation11_spill] sm:$0xff] %v5986_v19  ;;  %v4581_v28 = vpop.f32.mrb[6].mxu0  ;;  %v1973_v43 = vsel %vm1968_vm1, %v5986_v19, 0.0 }
 0x190   :  { %v5994_v14 = vadd.f32 %v4581_v28, %v4357_v44  ;;  %v1812_v45 = vpop.f32.mrb[7].mxu0  ;;  %2007 = vadd.xlane.f32.xlu1 %v1972_v36  ;;  %2009 = vadd.xlane.f32.xlu0 %v1973_v43 }
 0x191   :  { %v5996_v31 = vadd.f32 %v1812_v45, %v660_v53 }
 0x192   :  { %9008 = vst [vmem:[#allocation12_spill] sm:$0xff] %v5994_v14  ;;  %v1976_v39 = vsel %vm1968_vm1, %v5994_v14, 0.0 }
 0x193   :  { %9009 = vst [vmem:[#allocation13_spill] sm:$0xff] %v5996_v31  ;;  %v4584_v42 = vpop.f32.mrb[8].mxu0  ;;  %v1975_v38 = vsel %vm1968_vm1, %v5996_v31, 0.0 }
 0x194   :  { %v6004_v23 = vadd.f32 %v4584_v42, %v4360_v59  ;;  %v1824_v50 = vpop.f32.mrb[9].mxu0  ;;  %2011 = vadd.xlane.f32.xlu1 %v1974_v62  ;;  %2013 = vadd.xlane.f32.xlu0 %v1975_v38 }
 0x195   :  { %v6006_v15 = vadd.f32 %v1824_v50, %v672_v11 }
 0x196   :  { %9010 = vst [vmem:[#allocation14_spill] sm:$0xff] %v6004_v23  ;;  %v1978_v35 = vsel %vm1968_vm1, %v6004_v23, 0.0 }
 0x197   :  { %9011 = vst [vmem:[#allocation5_spill] sm:$0xff] %v6006_v15  ;;  %v4587_v33 = vpop.f32.mrb[10].mxu0  ;;  %v1977_v20 = vsel %vm1968_vm1, %v6006_v15, 0.0 }
 0x198   :  { %v6014_v21 = vadd.f32 %v4587_v33, %v4363_v12  ;;  %v1836_v22 = vpop.f32.mrb[11].mxu0  ;;  %2015 = vadd.xlane.f32.xlu1 %v1976_v39  ;;  %2017 = vadd.xlane.f32.xlu0 %v1977_v20 }
 0x199   :  { %v6017_v32 = vadd.f32 %v1836_v22, %v5922_v57 }
 0x19a   :  { %9012 = vst [vmem:[#allocation15_spill] sm:$0xff] %v6014_v21  ;;  %v1980_v12 = vsel %vm1968_vm1, %v6014_v21, 0.0 }
 0x19b   :  { %9013 = vst [vmem:[#allocation16_spill] sm:$0xff] %v6017_v32  ;;  %v4590_v34 = vpop.f32.mrb[12].mxu0  ;;  %v1979_v41 = vsel %vm1968_vm1, %v6017_v32, 0.0 }
 0x19c   :  { %v6026_v44 = vadd.f32 %v4590_v34, %v5924_v26  ;;  %v1848_v53 = vpop.f32.mrb[13].mxu0  ;;  %2019 = vadd.xlane.f32.xlu1 %v1978_v35  ;;  %2021 = vadd.xlane.f32.xlu0 %v1979_v41 }
 0x19d   :  { %v6029_v59 = vadd.f32 %v1848_v53, %v5926_v47 }
 0x19e   :  { %9014 = vst [vmem:[#allocation17_spill] sm:$0xff] %v6026_v44  ;;  %v1982_v60 = vsel %vm1968_vm1, %v6026_v44, 0.0 }
 0x19f   :  { %9015 = vst [vmem:[#allocation18_spill] sm:$0xff] %v6029_v59  ;;  %v4593_v11 = vpop.f32.mrb[14].mxu0  ;;  %v1981_v57 = vsel %vm1968_vm1, %v6029_v59, 0.0 }
 0x1a0   :  { %v6038_v48 = vadd.f32 %v4593_v11, %v5928_v3  ;;  %v1860_v26 = vpop.f32.mrb[15].mxu0  ;;  %2023 = vadd.xlane.f32.xlu1 %v1980_v12  ;;  %2025 = vadd.xlane.f32.xlu0 %v1981_v57 }
 0x1a1   :  { %v6041_v55 = vadd.f32 %v1860_v26, %v5930_v0 }
 0x1a2   :  { %9016 = vst [vmem:[#allocation19_spill] sm:$0xff] %v6038_v48  ;;  %v1984_v25 = vsel %vm1968_vm1, %v6038_v48, 0.0 }
 0x1a3   :  { %9017 = vst [vmem:[#allocation20_spill] sm:$0xff] %v6041_v55  ;;  %v4596_v47 = vpop.f32.mrb[16].mxu0  ;;  %v1983_v1 = vsel %vm1968_vm1, %v6041_v55, 0.0 }
 0x1a4   :  { %v6050_v7 = vadd.f32 %v4596_v47, %v5932_v58  ;;  %v1872_v3 = vpop.f32.mrb[17].mxu0  ;;  %2027 = vadd.xlane.f32.xlu1 %v1982_v60  ;;  %2029 = vadd.xlane.f32.xlu0 %v1983_v1 }
 0x1a5   :  { %v6053_v2 = vadd.f32 %v1872_v3, %v5934_v9 }
 0x1a6   :  { %9018 = vst [vmem:[#allocation21_spill] sm:$0xff] %v6050_v7  ;;  %v1986_v28 = vsel %vm1968_vm1, %v6050_v7, 0.0 }
 0x1a7   :  { %9019 = vst [vmem:[#allocation22_spill] sm:$0xff] %v6053_v2  ;;  %v4599_v0 = vpop.f32.mrb[18].mxu0  ;;  %v1985_v16 = vsel %vm1968_vm1, %v6053_v2, 0.0 }
 0x1a8   :  { %v6062_v63 = vadd.f32 %v4599_v0, %v5936_v4  ;;  %v1884_v58 = vpop.f32.mrb[19].mxu0  ;;  %2031 = vadd.xlane.f32.xlu1 %v1984_v25  ;;  %2033 = vadd.xlane.f32.xlu0 %v1985_v16 }
 0x1a9   :  { %v6065_v61 = vadd.f32 %v1884_v58, %v5938_v8 }
 0x1aa   :  { %9020 = vst [vmem:[#allocation23_spill] sm:$0xff] %v6062_v63  ;;  %v1988_v42 = vsel %vm1968_vm1, %v6062_v63, 0.0 }
 0x1ab   :  { %9021 = vst [vmem:[#allocation24_spill] sm:$0xff] %v6065_v61  ;;  %v4602_v9 = vpop.f32.mrb[20].mxu0  ;;  %v1987_v36 = vsel %vm1968_vm1, %v6065_v61, 0.0 }
 0x1ac   :  { %v6074_v43 = vadd.f32 %v4602_v9, %v5940_v37  ;;  %v1896_v4 = vpop.f32.mrb[21].mxu0  ;;  %2035 = vadd.xlane.f32.xlu1 %v1986_v28  ;;  %2037 = vadd.xlane.f32.xlu0 %v1987_v36 }
 0x1ad   :  { %v6077_v45 = vadd.f32 %v1896_v4, %v5942_v27 }
 0x1ae   :  { %9022 = vst [vmem:[#allocation25_spill] sm:$0xff] %v6074_v43  ;;  %v1990_v33 = vsel %vm1968_vm1, %v6074_v43, 0.0 }
 0x1af   :  { %9023 = vst [vmem:[#allocation26_spill] sm:$0xff] %v6077_v45  ;;  %v4605_v8 = vpop.f32.mrb[22].mxu0  ;;  %v1989_v62 = vsel %vm1968_vm1, %v6077_v45, 0.0 }
 0x1b0   :  { %v6086_v38 = vadd.f32 %v4605_v8, %v5944_v51  ;;  %v1908_v37 = vpop.f32.mrb[23].mxu0  ;;  %2039 = vadd.xlane.f32.xlu1 %v1988_v42  ;;  %2041 = vadd.xlane.f32.xlu0 %v1989_v62 }
 0x1b1   :  { %v6089_v50 = vadd.f32 %v1908_v37, %v5946_v46 }
 0x1b2   :  { %9024 = vst [vmem:[#allocation27_spill] sm:$0xff] %v6086_v38  ;;  %v1992_v34 = vsel %vm1968_vm1, %v6086_v38, 0.0 }
 0x1b3   :  { %9025 = vst [vmem:[#allocation28_spill] sm:$0xff] %v6089_v50  ;;  %v4608_v27 = vpop.f32.mrb[24].mxu0  ;;  %v1991_v39 = vsel %vm1968_vm1, %v6089_v50, 0.0 }
 0x1b4   :  { %v6098_v20 = vadd.f32 %v4608_v27, %v5948_v13  ;;  %v1920_v51 = vpop.f32.mrb[25].mxu0  ;;  %2043 = vadd.xlane.f32.xlu1 %v1990_v33  ;;  %2045 = vadd.xlane.f32.xlu0 %v1991_v39 }
 0x1b5   :  { %v6101_v22 = vadd.f32 %v1920_v51, %v5950_v10 }
 0x1b6   :  { %9026 = vst [vmem:[#allocation29_spill] sm:$0xff] %v6098_v20  ;;  %v1994_v11 = vsel %vm1968_vm1, %v6098_v20, 0.0 }
 0x1b7   :  { %9027 = vst [vmem:[#allocation30_spill] sm:$0xff] %v6101_v22  ;;  %v4611_v46 = vpop.f32.mrb[26].mxu0  ;;  %v1993_v35 = vsel %vm1968_vm1, %v6101_v22, 0.0 }
 0x1b8   :  { %v6110_v41 = vadd.f32 %v4611_v46, %v5952_v6  ;;  %v1932_v13 = vpop.f32.mrb[27].mxu0  ;;  %2047 = vadd.xlane.f32.xlu1 %v1992_v34  ;;  %2049 = vadd.xlane.f32.xlu0 %v1993_v35 }
 0x1b9   :  { %v6113_v53 = vadd.f32 %v1932_v13, %v5954_v18 }
 0x1ba   :  { %9028 = vst [vmem:[#allocation31_spill] sm:$0xff] %v6110_v41  ;;  %v1996_v47 = vsel %vm1968_vm1, %v6110_v41, 0.0 }
 0x1bb   :  { %9029 = vst [vmem:[#allocation32_spill] sm:$0xff] %v6113_v53  ;;  %v4614_v10 = vpop.f32.mrb[28].mxu0  ;;  %v1995_v12 = vsel %vm1968_vm1, %v6113_v53, 0.0 }
 0x1bc   :  { %v6122_v57 = vadd.f32 %v4614_v10, %v5956_v30  ;;  %v1944_v6 = vpop.f32.mrb[29].mxu0  ;;  %2051 = vadd.xlane.f32.xlu1 %v1994_v11  ;;  %2053 = vadd.xlane.f32.xlu0 %v1995_v12 }
 0x1bd   :  { %v6125_v26 = vadd.f32 %v1944_v6, %v5958_v49 }
 0x1be   :  { %9030 = vst [vmem:[#allocation33_spill] sm:$0xff] %v6122_v57  ;;  %v1998_v49 = vsel %vm1968_vm1, %v6122_v57, 0.0 }
 0x1bf   :  { %9031 = vst [vmem:[#allocation34_spill] sm:$0xff] %v6125_v26  ;;  %v4617_v18 = vpop.f32.mrb[30].mxu0  ;;  %v1997_v60 = vsel %vm1968_vm1, %v6125_v26, 0.0 }
 0x1c0   :  { %v6134_v1 = vadd.f32 %v4617_v18, %v5960_v40  ;;  %v1956_v30 = vpop.f32.mrb[31].mxu0  ;;  %2055 = vadd.xlane.f32.xlu1 %v1996_v47  ;;  %2057 = vadd.xlane.f32.xlu0 %v1997_v60 }
 0x1c1   :  { %v6137_v3 = vadd.f32 %v1956_v30, %v5962_v17  ;;  %v8664_v17 = vmov 0  }
 0x1c2   :  { %9032 = vst [vmem:[#allocation35_spill] sm:$0xff] %v6134_v1  ;;  %v2000_v40 = vsel %vm1968_vm1, %v6134_v1, 0.0 }
 0x1c3   :  { %9033 = vst [vmem:[#allocation36_spill] sm:$0xff] %v6137_v3  ;;  %v1999_v0 = vsel %vm1968_vm1, %v6137_v3, 0.0 }
 0x1c4   :  { %2059 = vadd.xlane.f32.xlu1 %v1998_v49  ;;  %2061 = vadd.xlane.f32.xlu0 %v1999_v0 }
 0x1c8   :  { %2063 = vadd.xlane.f32.xlu1 %v2000_v40 }
 0x215   :  { %v6148_v25 = vpop.xlane.xlu0 %2001 }
 0x216   :  { %vm2257_vm2 = vcmp.ge.f32.partialorder %v6148_v25, 0.0 }
 0x217   :  { %v2289_v16 = vsel %vm2257_vm2, 1, %v8664_v17 }
 0x218   :  { %v6152_v58 = vadd.s32 1, %v2289_v16 }
 0x219   :  { %v6154_v9 = vpop.xlane.xlu0 %2003  ;;  %v6156_v28 = vpop.xlane.xlu1 %2005 }
 0x21a   :  { %9034 = vst [vmem:[#allocation37_spill] sm:$0xff] %v6152_v58  ;;  %vm2353_vm3 = vcmp.eq.s32.totalorder %v5964_v54, %v6152_v58  ;;  %vm2258_vm4 = vcmp.ge.f32.partialorder %v6154_v9, 0.0  ;;  %vm2259_vm5 = vcmp.ge.f32.partialorder %v6156_v28, 0.0 }
 0x21b   :  { %v2385_v36 = vsel %vm2353_vm3, %v5969_v52, 0.0  ;;  %v2290_v4 = vsel %vm2258_vm4, 1, %v8664_v17  ;;  %v2291_v8 = vsel %vm2259_vm5, 1, %v8664_v17 }
 0x21c   :  { %2417 = vadd.xlane.f32.xlu0 %v2385_v36  ;;  %v6172_v37 = vadd.s32 1, %v2290_v4  ;;  %v6174_v27 = vadd.s32 1, %v2291_v8 }
 0x21d   :  { %v6168_v42 = vpop.xlane.xlu1 %2007  ;;  %v6170_v62 = vpop.xlane.xlu0 %2009 }
 0x21e   :  { %9035 = vst [vmem:[#allocation38_spill] sm:$0xff] %v6172_v37  ;;  %9036 = vst [vmem:[#allocation39_spill] sm:$0xff] %v6174_v27  ;;  %vm2354_vm6 = vcmp.eq.s32.totalorder %v5964_v54, %v6172_v37  ;;  %vm2355_vm7 = vcmp.eq.s32.totalorder %v5964_v54, %v6174_v27  ;;  %vm2260_vm8 = vcmp.ge.f32.partialorder %v6168_v42, 0.0  ;;  %vm2261_vm9 = vcmp.ge.f32.partialorder %v6170_v62, 0.0 }
 0x21f   :  { %v2386_v33 = vsel %vm2354_vm6, %v5966_v5, 0.0  ;;  %v2387_v39 = vsel %vm2355_vm7, %v5976_v24, 0.0  ;;  %v2292_v34 = vsel %vm2260_vm8, 1, %v8664_v17  ;;  %v2293_v13 = vsel %vm2261_vm9, 1, %v8664_v17 }
 0x220   :  { %2419 = vadd.xlane.f32.xlu1 %v2386_v33  ;;  %2421 = vadd.xlane.f32.xlu0 %v2387_v39  ;;  %v6195_v35 = vadd.s32 1, %v2292_v34  ;;  %v6199_v10 = vadd.s32 1, %v2293_v13 }
 0x221   :  { %v6189_v51 = vpop.xlane.xlu1 %2011  ;;  %v6191_v46 = vpop.xlane.xlu0 %2013 }
 0x222   :  { %9037 = vst [vmem:[#allocation40_spill] sm:$0xff] %v6195_v35  ;;  %vm2262_vm10 = vcmp.ge.f32.partialorder %v6189_v51, 0.0  ;;  %9038 = vst [vmem:[#allocation41_spill] sm:$0xff] %v6199_v10  ;;  %vm2356_vm11 = vcmp.eq.s32.totalorder %v5964_v54, %v6195_v35  ;;  %vm2263_vm12 = vcmp.ge.f32.partialorder %v6191_v46, 0.0  ;;  %vm2357_vm13 = vcmp.eq.s32.totalorder %v5964_v54, %v6199_v10 }
 0x223   :  { %v2294_v6 = vsel %vm2262_vm10, 1, %v8664_v17  ;;  %v2388_v18 = vsel %vm2356_vm11, %v5974_v56, 0.0  ;;  %v2389_v47 = vsel %vm2357_vm13, %v5986_v19, 0.0  ;;  %v2295_v30 = vsel %vm2263_vm12, 1, %v8664_v17 }
 0x224   :  { %2423 = vadd.xlane.f32.xlu1 %v2388_v18  ;;  %2425 = vadd.xlane.f32.xlu0 %v2389_v47  ;;  %v6219_v60 = vadd.s32 1, %v2294_v6  ;;  %v6222_v49 = vadd.s32 1, %v2295_v30 }
 0x225   :  { %v6203_v11 = vpop.xlane.xlu1 %2015  ;;  %v6205_v12 = vpop.xlane.xlu0 %2017 }
 0x226   :  { %9039 = vst [vmem:[#allocation42_spill] sm:$0xff] %v6219_v60  ;;  %9040 = vst [vmem:[#allocation43_spill] sm:$0xff] %v6222_v49  ;;  %vm2358_vm14 = vcmp.eq.s32.totalorder %v5964_v54, %v6219_v60  ;;  %vm2264_vm15 = vcmp.ge.f32.partialorder %v6203_v11, 0.0  ;;  %vm2359_vm0 = vcmp.eq.s32.totalorder %v5964_v54, %v6222_v49  ;;  %vm2265_vm2 = vcmp.ge.f32.partialorder %v6205_v12, 0.0 }
 0x227   :  { %v2390_v16 = vsel %vm2358_vm14, %v5984_v29, 0.0  ;;  %v2391_v36 = vsel %vm2359_vm0, %v5996_v31, 0.0  ;;  %v2296_v4 = vsel %vm2264_vm15, 1, %v8664_v17  ;;  %v2297_v39 = vsel %vm2265_vm2, 1, %v8664_v17 }
 0x228   :  { %2427 = vadd.xlane.f32.xlu1 %v2390_v16  ;;  %2429 = vadd.xlane.f32.xlu0 %v2391_v36  ;;  %v6244_v33 = vadd.s32 1, %v2296_v4  ;;  %v6250_v34 = vadd.s32 1, %v2297_v39 }
 0x229   :  { %v6224_v0 = vpop.xlane.xlu1 %2019  ;;  %v6228_v40 = vpop.xlane.xlu0 %2021 }
 0x22a   :  { %9041 = vst [vmem:[#allocation44_spill] sm:$0xff] %v6244_v33  ;;  %vm2360_vm4 = vcmp.eq.s32.totalorder %v5964_v54, %v6244_v33  ;;  %9042 = vst [vmem:[#allocation45_spill] sm:$0xff] %v6250_v34  ;;  %vm2361_vm5 = vcmp.eq.s32.totalorder %v5964_v54, %v6250_v34  ;;  %vm2266_vm8 = vcmp.ge.f32.partialorder %v6224_v0, 0.0  ;;  %vm2267_vm9 = vcmp.ge.f32.partialorder %v6228_v40, 0.0 }
 0x22b   :  { %v2392_v6 = vsel %vm2360_vm4, %v5994_v14, 0.0  ;;  %v2393_v47 = vsel %vm2361_vm5, %v6006_v15, 0.0  ;;  %v2298_v30 = vsel %vm2266_vm8, 1, %v8664_v17  ;;  %v2299_v16 = vsel %vm2267_vm9, 1, %v8664_v17 }
 0x22c   :  { %2431 = vadd.xlane.f32.xlu1 %v2392_v6  ;;  %2433 = vadd.xlane.f32.xlu0 %v2393_v47  ;;  %v6270_v36 = vadd.s32 1, %v2298_v30  ;;  %v6272_v4 = vadd.s32 1, %v2299_v16 }
 0x22d   :  { %v6242_v8 = vpop.xlane.xlu1 %2023  ;;  %v6252_v13 = vpop.xlane.xlu0 %2025 }
 0x22e   :  { %9043 = vst [vmem:[#allocation46_spill] sm:$0xff] %v6270_v36  ;;  %9044 = vst [vmem:[#allocation47_spill] sm:$0xff] %v6272_v4  ;;  %vm8663_vm10 = vcmp.eq.s32.totalorder %v5964_v54, %v6270_v36  ;;  %vm8619_vm12 = vcmp.eq.s32.totalorder %v5964_v54, %v6272_v4  ;;  %vm2268_vm15 = vcmp.ge.f32.partialorder %v6242_v8, 0.0  ;;  %vm2269_vm2 = vcmp.ge.f32.partialorder %v6252_v13, 0.0 }
 0x22f   :  { %v2394_v47 = vsel %vm8663_vm10, %v6004_v23, 0.0  ;;  %v2395_v30 = vsel %vm8619_vm12, %v6017_v32, 0.0  ;;  %v2300_v16 = vsel %vm2268_vm15, 1, %v8664_v17  ;;  %v2301_v15 = vsel %vm2269_vm2, 1, %v8664_v17 }
 0x230   :  { %2435 = vadd.xlane.f32.xlu1 %v2394_v47  ;;  %2437 = vadd.xlane.f32.xlu0 %v2395_v30  ;;  %v6294_v14 = vadd.s32 1, %v2300_v16  ;;  %v6296_v31 = vadd.s32 1, %v2301_v15 }
 0x231   :  { %v6258_v18 = vpop.xlane.xlu1 %2027  ;;  %v6274_v39 = vpop.xlane.xlu0 %2029 }
 0x232   :  { %9045 = vst [vmem:[#allocation48_spill] sm:$0xff] %v6294_v14  ;;  %9046 = vst [vmem:[#allocation49_spill] sm:$0xff] %v6296_v31  ;;  %vm2270_vm8 = vcmp.ge.f32.partialorder %v6258_v18, 0.0  ;;  %vm8626_vm9 = vcmp.eq.s32.totalorder %v5964_v54, %v6294_v14  ;;  %vm8647_vm12 = vcmp.eq.s32.totalorder %v5964_v54, %v6296_v31  ;;  %vm2271_vm15 = vcmp.ge.f32.partialorder %v6274_v39, 0.0 }
 0x233   :  { %v2396_v47 = vsel %vm8626_vm9, %v6014_v21, 0.0  ;;  %v2397_v15 = vsel %vm8647_vm12, %v6029_v59, 0.0  ;;  %v2302_v30 = vsel %vm2270_vm8, 1, %v8664_v17  ;;  %v2303_v32 = vsel %vm2271_vm15, 1, %v8664_v17 }
 0x234   :  { %2439 = vadd.xlane.f32.xlu1 %v2396_v47  ;;  %2441 = vadd.xlane.f32.xlu0 %v2397_v15  ;;  %v6317_v16 = vadd.s32 1, %v2302_v30  ;;  %v6320_v4 = vadd.s32 1, %v2303_v32 }
 0x235   :  { %v6276_v6 = vpop.xlane.xlu1 %2031  ;;  %v6298_v23 = vpop.xlane.xlu0 %2033 }
 0x236   :  { %9047 = vst [vmem:[#allocation50_spill] sm:$0xff] %v6317_v16  ;;  %9048 = vst [vmem:[#allocation51_spill] sm:$0xff] %v6320_v4  ;;  %vm8631_vm2 = vcmp.eq.s32.totalorder %v5964_v54, %v6317_v16  ;;  %vm2272_vm9 = vcmp.ge.f32.partialorder %v6276_v6, 0.0  ;;  %vm8639_vm8 = vcmp.eq.s32.totalorder %v5964_v54, %v6320_v4  ;;  %vm2273_vm15 = vcmp.ge.f32.partialorder %v6298_v23, 0.0 }
 0x237   :  { %v2398_v47 = vsel %vm8631_vm2, %v6026_v44, 0.0  ;;  %v2399_v32 = vsel %vm8639_vm8, %v6041_v55, 0.0  ;;  %v2304_v15 = vsel %vm2272_vm9, 1, %v8664_v17  ;;  %v2305_v31 = vsel %vm2273_vm15, 1, %v8664_v17 }
 0x238   :  { %2443 = vadd.xlane.f32.xlu1 %v2398_v47  ;;  %2445 = vadd.xlane.f32.xlu0 %v2399_v32  ;;  %v6340_v30 = vadd.s32 1, %v2304_v15  ;;  %v6346_v44 = vadd.s32 1, %v2305_v31 }
 0x239   :  { %v6301_v29 = vpop.xlane.xlu1 %2035  ;;  %v6324_v21 = vpop.xlane.xlu0 %2037 }
 0x23a   :  { %9049 = vst [vmem:[#allocation52_spill] sm:$0xff] %v6340_v30  ;;  %vm8638_vm2 = vcmp.eq.s32.totalorder %v5964_v54, %v6340_v30  ;;  %9050 = vst [vmem:[#allocation53_spill] sm:$0xff] %v6346_v44  ;;  %vm2274_vm9 = vcmp.ge.f32.partialorder %v6301_v29, 0.0  ;;  %vm8646_vm15 = vcmp.eq.s32.totalorder %v5964_v54, %v6346_v44 }
 0x23b   :  { %v2400_v47 = vsel %vm8638_vm2, %v6038_v48, 0.0  ;;  %v2306_v15 = vsel %vm2274_vm9, 1, %v8664_v17  ;;  %v2401_v31 = vsel %vm8646_vm15, %v6053_v2, 0.0  ;;  %vm2275_vm2 = vcmp.ge.f32.partialorder %v6324_v21, 0.0 }
 0x23c   :  { %2447 = vadd.xlane.f32.xlu1 %v2400_v47  ;;  %v6364_v4 = vadd.s32 1, %v2306_v15  ;;  %2449 = vadd.xlane.f32.xlu0 %v2401_v31  ;;  %v2307_v47 = vsel %vm2275_vm2, 1, %v8664_v17 }
 0x23d   :  { %v6327_v59 = vpop.xlane.xlu1 %2039  ;;  %v6352_v55 = vpop.xlane.xlu0 %2041  ;;  %v6374_v30 = vadd.s32 1, %v2307_v47 }
 0x23e   :  { %9051 = vst [vmem:[#allocation54_spill] sm:$0xff] %v6364_v4  ;;  %vm8662_vm8 = vcmp.eq.s32.totalorder %v5964_v54, %v6364_v4  ;;  %vm2276_vm9 = vcmp.ge.f32.partialorder %v6327_v59, 0.0  ;;  %vm2277_vm15 = vcmp.ge.f32.partialorder %v6352_v55, 0.0 }
 0x23f   :  { %v2402_v48 = vsel %vm8662_vm8, %v6050_v7, 0.0  ;;  %9052 = vst [vmem:[#allocation55_spill] sm:$0xff] %v6374_v30  ;;  %vm8656_vm12 = vcmp.eq.s32.totalorder %v5964_v54, %v6374_v30  ;;  %v2308_v31 = vsel %vm2276_vm9, 1, %v8664_v17 }
 0x240   :  { %2451 = vadd.xlane.f32.xlu1 %v2402_v48  ;;  %v2403_v47 = vsel %vm8656_vm12, %v6065_v61, 0.0  ;;  %v6389_v7 = vadd.s32 1, %v2308_v31  ;;  %v2309_v48 = vsel %vm2277_vm15, 1, %v8664_v17 }
 0x241   :  { %v6355_v32 = vpop.xlane.xlu1 %2043  ;;  %v6376_v44 = vpop.xlane.xlu0 %2045  ;;  %2453 = vadd.xlane.f32.xlu0 %v2403_v47  ;;  %v6394_v2 = vadd.s32 1, %v2309_v48 }
 0x242   :  { %9053 = vst [vmem:[#allocation56_spill] sm:$0xff] %v6389_v7  ;;  %vm8661_vm2 = vcmp.eq.s32.totalorder %v5964_v54, %v6389_v7  ;;  %vm2278_vm12 = vcmp.ge.f32.partialorder %v6355_v32, 0.0  ;;  %vm2279_vm15 = vcmp.ge.f32.partialorder %v6376_v44, 0.0 }
 0x243   :  { %9054 = vst [vmem:[#allocation57_spill] sm:$0xff] %v6394_v2  ;;  %v2404_v4 = vsel %vm8661_vm2, %v6062_v63, 0.0  ;;  %vm8849_vm9 = vcmp.eq.s32.totalorder %v5964_v54, %v6394_v2  ;;  %v2310_v48 = vsel %vm2278_vm12, 1, %v8664_v17 }
 0x244   :  { %2455 = vadd.xlane.f32.xlu1 %v2404_v4  ;;  %v2405_v47 = vsel %vm8849_vm9, %v6077_v45, 0.0  ;;  %v2311_v4 = vsel %vm2279_vm15, 1, %v8664_v17  ;;  %v6414_v63 = vadd.s32 1, %v2310_v48  ;;  %v9057_v45 = vmov 0  }
 0x245   :  { %v6380_v15 = vpop.xlane.xlu1 %2047  ;;  %v6402_v61 = vpop.xlane.xlu0 %2049  ;;  %2457 = vadd.xlane.f32.xlu0 %v2405_v47  ;;  %v6416_v7 = vadd.s32 1, %v2311_v4 }
 0x246   :  { %9055 = vst [vmem:[#allocation58_spill] sm:$0xff] %v6414_v63  ;;  %vm2280_vm2 = vcmp.ge.f32.partialorder %v6380_v15, 0.0  ;;  %vm8694_vm8 = vcmp.eq.s32.totalorder %v5964_v54, %v6414_v63  ;;  %vm2281_vm12 = vcmp.ge.f32.partialorder %v6402_v61, 0.0 }
 0x247   :  { %9056 = vst [vmem:[#allocation59_spill] sm:$0xff] %v6416_v7  ;;  %vm8676_vm10 = vcmp.eq.s32.totalorder %v5964_v54, %v6416_v7  ;;  %v2406_v47 = vsel %vm8694_vm8, %v6074_v43, 0.0  ;;  %v2312_v2 = vsel %vm2280_vm2, 1, %v9057_v45  ;;  %v2313_v63 = vsel %vm2281_vm12, 1, %v9057_v45 }
 0x248   :  { %v2407_v48 = vsel %vm8676_vm10, %v6089_v50, 0.0  ;;  %2459 = vadd.xlane.f32.xlu1 %v2406_v47  ;;  %v6437_v30 = vadd.s32 1, %v2312_v2  ;;  %v6440_v43 = vadd.s32 1, %v2313_v63 }
 0x249   :  { %v6406_v31 = vpop.xlane.xlu1 %2051  ;;  %v6431_v4 = vpop.xlane.xlu0 %2053  ;;  %2461 = vadd.xlane.f32.xlu0 %v2407_v48 }
 0x24a   :  { %9058 = vst [vmem:[#allocation60_spill] sm:$0xff] %v6437_v30  ;;  %9059 = vst [vmem:[#allocation61_spill] sm:$0xff] %v6440_v43  ;;  %vm2282_vm15 = vcmp.ge.f32.partialorder %v6406_v31, 0.0  ;;  %vm8683_vm10 = vcmp.eq.s32.totalorder %v5964_v54, %v6437_v30  ;;  %vm8686_vm2 = vcmp.eq.s32.totalorder %v5964_v54, %v6440_v43  ;;  %vm2283_vm12 = vcmp.ge.f32.partialorder %v6431_v4, 0.0 }
 0x24b   :  { %v2408_v47 = vsel %vm8683_vm10, %v6086_v38, 0.0  ;;  %v2409_v2 = vsel %vm8686_vm2, %v6101_v22, 0.0  ;;  %v2314_v48 = vsel %vm2282_vm15, 1, %v9057_v45  ;;  %v2315_v38 = vsel %vm2283_vm12, 1, %v9057_v45 }
 0x24c   :  { %2463 = vadd.xlane.f32.xlu1 %v2408_v47  ;;  %v6460_v7 = vadd.s32 1, %v2314_v48  ;;  %v6466_v47 = vadd.s32 1, %v2315_v38 }
 0x24d   :  { %v6433_v17 = vpop.xlane.xlu1 %2055  ;;  %v6455_v63 = vpop.xlane.xlu0 %2057  ;;  %2465 = vadd.xlane.f32.xlu0 %v2409_v2 }
 0x24e   :  { %9060 = vst [vmem:[#allocation62_spill] sm:$0xff] %v6460_v7  ;;  %vm8693_vm10 = vcmp.eq.s32.totalorder %v5964_v54, %v6460_v7  ;;  %9061 = vst [vmem:[#allocation63_spill] sm:$0xff] %v6466_v47  ;;  %vm2284_vm15 = vcmp.ge.f32.partialorder %v6433_v17, 0.0  ;;  %vm8695_vm2 = vcmp.eq.s32.totalorder %v5964_v54, %v6466_v47  ;;  %vm2285_vm12 = vcmp.ge.f32.partialorder %v6455_v63, 0.0 }
 0x24f   :  { %v2410_v22 = vsel %vm8693_vm10, %v6098_v20, 0.0  ;;  %v2411_v2 = vsel %vm8695_vm2, %v6113_v53, 0.0  ;;  %v2316_v38 = vsel %vm2284_vm15, 1, %v9057_v45 }
 0x250   :  { %2467 = vadd.xlane.f32.xlu1 %v2410_v22  ;;  %v6485_v20 = vadd.s32 1, %v2316_v38  ;;  %v2317_v22 = vsel %vm2285_vm12, 1, %v9057_v45 }
 0x251   :  { %v6458_v50 = vpop.xlane.xlu1 %2059  ;;  %v6479_v48 = vpop.xlane.xlu0 %2061  ;;  %2469 = vadd.xlane.f32.xlu0 %v2411_v2  ;;  %v6488_v7 = vadd.s32 1, %v2317_v22 }
 0x252   :  { %9063 = vst [vmem:[#allocation65_spill] sm:$0xff] %v6485_v20  ;;  %vm2286_vm10 = vcmp.ge.f32.partialorder %v6458_v50, 0.0  ;;  %vm2287_vm8 = vcmp.ge.f32.partialorder %v6479_v48, 0.0  ;;  %vm8848_vm2 = vcmp.eq.s32.totalorder %v5964_v54, %v6485_v20 }
 0x253   :  { %9064 = vst [vmem:[#allocation66_spill] sm:$0xff] %v6488_v7  ;;  %v2318_v53 = vsel %vm2286_vm10, 1, %v9057_v45  ;;  %v2412_v2 = vsel %vm8848_vm2, %v6110_v41, 0.0  ;;  %vm8706_vm12 = vcmp.eq.s32.totalorder %v5964_v54, %v6488_v7  ;;  %v2319_v47 = vsel %vm2287_vm8, 1, %v9057_v45 }
 0x254   :  { %2471 = vadd.xlane.f32.xlu1 %v2412_v2  ;;  %v2413_v38 = vsel %vm8706_vm12, %v6125_v26, 0.0  ;;  %v6506_v22 = vadd.s32 1, %v2318_v53  ;;  %v6512_v41 = vadd.s32 1, %v2319_v47  ;;  %v2097_v47 = vmul.f32 0.70710677, %v6148_v25 }
 0x255   :  { %v6483_v43 = vpop.xlane.xlu1 %2063  ;;  %2473 = vadd.xlane.f32.xlu0 %v2413_v38  ;;  %v2098_v38 = vmul.f32 0.70710677, %v6154_v9  ;;  %v2103_v7 = vmul.f32 0.70710677, %v6191_v46 }
 0x256   :  { %9062 = vst [vmem:[#allocation64_spill] sm:$0xff] %v6483_v43  ;;  %vm2288_vm15 = vcmp.ge.f32.partialorder %v6483_v43, 0.0  ;;  %9065 = vst [vmem:[#allocation67_spill] sm:$0xff] %v6506_v22  ;;  %vm8756_vm10 = vcmp.eq.s32.totalorder %v5964_v54, %v6506_v22  ;;  %vm8731_vm12 = vcmp.eq.s32.totalorder %v5964_v54, %v6512_v41  ;;  %4946 = verf.f32 %v2097_v47 }
 0x257   :  { %v2320_v43 = vsel %vm2288_vm15, 1, %v9057_v45  ;;  %9066 = vst [vmem:[#allocation68_spill] sm:$0xff] %v6512_v41  ;;  %v2414_v2 = vsel %vm8756_vm10, %v6122_v57, 0.0  ;;  %v2415_v53 = vsel %vm8731_vm12, %v6137_v3, 0.0  ;;  %4948 = verf.f32 %v2098_v38 }
 0x258   :  { %v6514_v20 = vadd.s32 1, %v2320_v43  ;;  %2475 = vadd.xlane.f32.xlu1 %v2414_v2  ;;  %v2099_v2 = vmul.f32 0.70710677, %v6156_v28  ;;  %v2100_v57 = vmul.f32 0.70710677, %v6168_v42  ;;  %v2066_v38 = vmul.f32 0.5, %v6154_v9 }
 0x259   :  { %2477 = vadd.xlane.f32.xlu0 %v2415_v53  ;;  %v2101_v3 = vmul.f32 0.70710677, %v6170_v62  ;;  %v2102_v41 = vmul.f32 0.70710677, %v6189_v51  ;;  %v2065_v53 = vmul.f32 0.5, %v6148_v25  ;;  %v6547_v22 = vmul.f32 0.5, %v6168_v42 }
 0x25a   :  { %9067 = vst [vmem:[#allocation69_spill] sm:$0xff] %v6514_v20  ;;  %vm8726_vm8 = vcmp.eq.s32.totalorder %v5964_v54, %v6514_v20  ;;  %4950 = verf.f32 %v2099_v2  ;;  %v6551_v25 = vmul.f32 0.5, %v6170_v62  ;;  %v6561_v42 = vmul.f32 0.5, %v6189_v51 }
 0x25b   :  { %v2416_v43 = vsel %vm8726_vm8, %v6134_v1, 0.0  ;;  %4952 = verf.f32 %v2100_v57  ;;  %v2067_v1 = vmul.f32 0.5, %v6156_v28  ;;  %v2706_v57 = vmul.u32 2, %v6172_v37 }
 0x25c   :  { %2479 = vadd.xlane.f32.xlu1 %v2416_v43  ;;  %v2705_v43 = vmul.u32 2, %v6152_v58  ;;  %4954 = verf.f32 %v2101_v3  ;;  %v2707_v58 = vmul.u32 2, %v6174_v27  ;;  %v6564_v3 = vmul.f32 0.5, %v6191_v46 }
 0x25d   :  { %4956 = verf.f32 %v2102_v41  ;;  %v2105_v27 = vmul.f32 0.70710677, %v6205_v12  ;;  %v2708_v46 = vmul.u32 2, %v6195_v35 }
 0x25e   :  { %4958 = verf.f32 %v2103_v7 }
 0x260   :  { %v4947_v26 = vpop.eup %4946 }
 0x261   :  { %v2161_v47 = vadd.f32 1.0, %v4947_v26  ;;  %v2104_v26 = vmul.f32 0.70710677, %v6203_v11  ;;  %v4949_v62 = vpop.eup %4948 }
 0x263   :  { %4960 = verf.f32 %v2104_v26  ;;  %v2107_v26 = vmul.f32 0.70710677, %v6228_v40 }
 0x264   :  { %4962 = verf.f32 %v2105_v27 }
 0x2a9   :  { %v6538_v20 = vpop.xlane.xlu0 %2417 }
 0x2aa   :  { %9068 = vst [vmem:[#allocation70_spill] sm:$0xff] %v6538_v20  ;;  %vm2737_vm15 = vcmp.ge.f32.partialorder %v6538_v20, 0.0  ;;  %v4951_v20 = vpop.eup %4950 }
 0x2ab   :  { %v2769_v2 = vsel %vm2737_vm15, 1, %v9057_v45 }
 0x2ac   :  { %v2801_v30 = vadd.s32 %v2769_v2, %v2705_v43  ;;  %v6567_v43 = vmul.f32 %v2161_v47, %v2065_v53  ;;  %v2162_v47 = vadd.f32 1.0, %v4949_v62  ;;  %v4953_v62 = vpop.eup %4952 }
 0x2ad   :  { %v6555_v9 = vpop.xlane.xlu1 %2419  ;;  %v6557_v28 = vpop.xlane.xlu0 %2421 }
 0x2ae   :  { %9069 = vst [vmem:[#allocation71_spill] sm:$0xff] %v6555_v9  ;;  %9070 = vst [vmem:[#allocation72_spill] sm:$0xff] %v6557_v28  ;;  %vm2738_vm15 = vcmp.ge.f32.partialorder %v6555_v9, 0.0  ;;  %vm2739_vm8 = vcmp.ge.f32.partialorder %v6557_v28, 0.0  ;;  %v6571_v2 = vadd.s32 1, %v2801_v30  ;;  %v2074_v28 = vmul.f32 0.5, %v6224_v0 }
 0x2af   :  { %v2770_v41 = vsel %vm2738_vm15, 1, %v9057_v45  ;;  %v2771_v51 = vsel %vm2739_vm8, 1, %v9057_v45  ;;  %v2106_v9 = vmul.f32 0.70710677, %v6224_v0 }
 0x2b0   :  { %9071 = vst [vmem:[#allocation73_spill] sm:$0xff] %v6571_v2  ;;  %v2802_v37 = vadd.s32 %v2770_v41, %v2706_v57  ;;  %vm8737_vm12 = vcmp.eq.s32.totalorder %v5964_v54, %v6571_v2  ;;  %v2803_v53 = vadd.s32 %v2771_v51, %v2707_v58  ;;  %v2709_v57 = vmul.u32 2, %v6199_v10 }
 0x2b1   :  { %v2897_v7 = vsel %vm8737_vm12, %v5969_v52, 0.0  ;;  %v6587_v41 = vmul.f32 0.5, %v6203_v11  ;;  %v6590_v35 = vpop.xlane.xlu1 %2423  ;;  %v2163_v51 = vadd.f32 1.0, %v4951_v20  ;;  %v6595_v52 = vpop.xlane.xlu0 %2425  ;;  %v2108_v11 = vmul.f32 0.70710677, %v6242_v8 }
 0x2b2   :  { %v6583_v30 = vadd.s32 1, %v2802_v37  ;;  %9073 = vst [vmem:[#allocation75_spill] sm:$0xff] %v6590_v35  ;;  %2929 = vadd.xlane.f32.xlu0 %v2897_v7  ;;  %v6592_v58 = vadd.s32 1, %v2803_v53  ;;  %vm2740_vm8 = vcmp.ge.f32.partialorder %v6590_v35, 0.0  ;;  %9075 = vst [vmem:[#allocation77_spill] sm:$0xff] %v6595_v52  ;;  %v6600_v37 = vmul.f32 0.5, %v6205_v12  ;;  %v4955_v53 = vpop.eup %4954 }
 0x2b3   :  { %v2772_v10 = vsel %vm2740_vm8, 1, %v9057_v45  ;;  %vm2741_vm12 = vcmp.ge.f32.partialorder %v6595_v52, 0.0  ;;  %v6605_v7 = vmul.f32 %v2162_v47, %v2066_v38  ;;  %4964 = verf.f32 %v2106_v9  ;;  %v4957_v2 = vpop.eup %4956 }
 0x2b4   :  { %9072 = vst [vmem:[#allocation74_spill] sm:$0xff] %v6583_v30  ;;  %9074 = vst [vmem:[#allocation76_spill] sm:$0xff] %v6592_v58  ;;  %vm8754_vm15 = vcmp.eq.s32.totalorder %v5964_v54, %v6583_v30  ;;  %v2773_v20 = vsel %vm2741_vm12, 1, %v9057_v45  ;;  %v2164_v12 = vadd.f32 1.0, %v4953_v62  ;;  %4966 = verf.f32 %v2107_v26 }
 0x2b5   :  { %v2898_v27 = vsel %vm8754_vm15, %v5966_v5, 0.0  ;;  %v2109_v35 = vmul.f32 0.70710677, %v6252_v13  ;;  %vm8752_vm8 = vcmp.eq.s32.totalorder %v5964_v54, %v6592_v58  ;;  %v6615_v52 = vmul.f32 %v2163_v51, %v2067_v1  ;;  %v6617_v38 = vpop.xlane.xlu1 %2427  ;;  %v6625_v62 = vpop.xlane.xlu0 %2429 }
 0x2b6   :  { %2931 = vadd.xlane.f32.xlu1 %v2898_v27  ;;  %9076 = vst [vmem:[#allocation78_spill] sm:$0xff] %v6617_v38  ;;  %v2899_v9 = vsel %vm8752_vm8, %v5976_v24, 0.0  ;;  %v2804_v47 = vadd.s32 %v2772_v10, %v2708_v46  ;;  %v2805_v5 = vadd.s32 %v2773_v20, %v2709_v57  ;;  %v2165_v30 = vadd.f32 1.0, %v4955_v53  ;;  %9077 = vst [vmem:[#allocation79_spill] sm:$0xff] %v6625_v62  ;;  %v4959_v1 = vpop.eup %4958 }
 0x2b7   :  { %v2710_v26 = vmul.u32 2, %v6219_v60  ;;  %4968 = verf.f32 %v2108_v11  ;;  %vm2742_vm12 = vcmp.ge.f32.partialorder %v6617_v38, 0.0  ;;  %2933 = vadd.xlane.f32.xlu0 %v2899_v9  ;;  %v2166_v51 = vadd.f32 1.0, %v4957_v2  ;;  %v4961_v24 = vpop.eup %4960 }
 0x2b8   :  { %v2711_v27 = vmul.u32 2, %v6222_v49  ;;  %v2110_v58 = vmul.f32 0.70710677, %v6258_v18  ;;  %v6631_v10 = vmul.f32 %v2164_v12, %v6547_v22  ;;  %v2075_v46 = vmul.f32 0.5, %v6228_v40  ;;  %v4963_v40 = vpop.eup %4962 }
 0x2b9   :  { %4970 = verf.f32 %v2109_v35  ;;  %v2111_v57 = vmul.f32 0.70710677, %v6274_v39  ;;  %v2774_v11 = vsel %vm2742_vm12, 1, %v9057_v45  ;;  %vm2743_vm8 = vcmp.ge.f32.partialorder %v6625_v62, 0.0  ;;  %v6649_v49 = vpop.xlane.xlu1 %2431 }
 0x2ba   :  { %v6637_v2 = vadd.s32 1, %v2804_v47  ;;  %v6639_v53 = vadd.s32 1, %v2805_v5  ;;  %v6642_v0 = vmul.f32 %v2165_v30, %v6551_v25  ;;  %v2167_v20 = vadd.f32 1.0, %v4959_v1  ;;  %9080 = vst [vmem:[#allocation82_spill] sm:$0xff] %v6649_v49 }
 0x2bb   :  { %v2712_v22 = vmul.u32 2, %v6244_v33  ;;  %v2076_v12 = vmul.f32 0.5, %v6242_v8  ;;  %v6647_v35 = vmul.f32 %v2166_v51, %v6561_v42  ;;  %v2168_v9 = vadd.f32 1.0, %v4961_v24  ;;  %v6659_v42 = vpop.xlane.xlu0 %2433 }
 0x2bc   :  { %9078 = vst [vmem:[#allocation80_spill] sm:$0xff] %v6637_v2  ;;  %9079 = vst [vmem:[#allocation81_spill] sm:$0xff] %v6639_v53  ;;  %4972 = verf.f32 %v2110_v58  ;;  %vm8771_vm12 = vcmp.eq.s32.totalorder %v5964_v54, %v6637_v2  ;;  %v2112_v5 = vmul.f32 0.70710677, %v6276_v6  ;;  %v2775_v25 = vsel %vm2743_vm8, 1, %v9057_v45 }
 0x2bd   :  { %vm8768_vm15 = vcmp.eq.s32.totalorder %v5964_v54, %v6639_v53  ;;  %v2806_v30 = vadd.s32 %v2774_v11, %v2710_v26  ;;  %v4965_v8 = vpop.eup %4964  ;;  %v2077_v47 = vmul.f32 0.5, %v6252_v13  ;;  %4974 = verf.f32 %v2111_v57  ;;  %9081 = vst [vmem:[#allocation83_spill] sm:$0xff] %v6659_v42 }
 0x2be   :  { %v2113_v24 = vmul.f32 0.70710677, %v6298_v23  ;;  %v2900_v58 = vsel %vm8771_vm12, %v5974_v56, 0.0  ;;  %v4967_v1 = vpop.eup %4966  ;;  %v6666_v51 = vmul.f32 %v2167_v20, %v6564_v3  ;;  %v2169_v33 = vadd.f32 1.0, %v4963_v40 }
 0x2bf   :  { %v2713_v26 = vmul.u32 2, %v6250_v34  ;;  %vm2744_vm8 = vcmp.ge.f32.partialorder %v6649_v49, 0.0  ;;  %2935 = vadd.xlane.f32.xlu1 %v2900_v58  ;;  %v6671_v13 = vmul.f32 0.5, %v6258_v18  ;;  %vm2745_vm10 = vcmp.ge.f32.partialorder %v6659_v42, 0.0 }
 0x2c0   :  { %v2901_v57 = vsel %vm8768_vm15, %v5986_v19, 0.0  ;;  %v2807_v11 = vadd.s32 %v2775_v25, %v2711_v27  ;;  %v6679_v3 = vmul.f32 %v2168_v9, %v6587_v41  ;;  %v2170_v20 = vadd.f32 1.0, %v4965_v8  ;;  %v9083_v25 = vld [vmem:[#allocation47_spill] sm:$0xff] }
 0x2c1   :  { %v4969_v56 = vpop.eup %4968  ;;  %4976 = verf.f32 %v2112_v5  ;;  %2937 = vadd.xlane.f32.xlu0 %v2901_v57  ;;  %v6681_v40 = vadd.s32 1, %v2806_v30  ;;  %v2171_v58 = vadd.f32 1.0, %v4967_v1  ;;  %v2776_v18 = vsel %vm2744_vm8, 1, %v9057_v45  ;;  %v6691_v5 = vpop.xlane.xlu1 %2435 }
 0x2c2   :  { %4978 = verf.f32 %v2113_v24  ;;  %v2777_v34 = vsel %vm2745_vm10, 1, %v9057_v45  ;;  %v6686_v53 = vmul.f32 %v2169_v33, %v6600_v37  ;;  %v2714_v27 = vmul.u32 2, %v6270_v36  ;;  %9084 = vst [vmem:[#allocation85_spill] sm:$0xff] %v6691_v5  ;;  %v9086_v36 = vld [vmem:[#allocation49_spill] sm:$0xff] }
 0x2c3   :  { %9082 = vst [vmem:[#allocation84_spill] sm:$0xff] %v6681_v40  ;;  %v4971_v60 = vpop.eup %4970  ;;  %v2079_v9 = vmul.f32 0.5, %v6274_v39  ;;  %v2172_v30 = vadd.f32 1.0, %v4969_v56  ;;  %v6694_v8 = vmul.f32 0.5, %v6276_v6  ;;  %vm8770_vm8 = vcmp.eq.s32.totalorder %v5964_v54, %v6681_v40 }
 0x2c4   :  { %v6698_v24 = vadd.s32 1, %v2807_v11  ;;  %v6700_v1 = vmul.f32 %v2170_v20, %v2074_v28  ;;  %v2114_v33 = vmul.f32 0.70710677, %v6301_v29  ;;  %v2808_v37 = vadd.s32 %v2776_v18, %v2712_v22  ;;  %v9087_v28 = vld [vmem:[#allocation10_spill] sm:$0xff]  ;;  %v9089_v11 = vld [vmem:[#allocation13_spill] sm:$0xff] }
 0x2c5   :  { %v2809_v57 = vadd.s32 %v2777_v34, %v2713_v26  ;;  %v6703_v19 = vmul.f32 %v2171_v58, %v2075_v46  ;;  %v2173_v39 = vadd.f32 1.0, %v4971_v60  ;;  %v2081_v6 = vmul.f32 0.5, %v6298_v23  ;;  %v6720_v23 = vpop.xlane.xlu0 %2437  ;;  %v6728_v58 = vpop.xlane.xlu1 %2439 }
 0x2c6   :  { %9085 = vst [vmem:[#allocation86_spill] sm:$0xff] %v6698_v24  ;;  %v4973_v41 = vpop.eup %4972  ;;  %v2115_v42 = vmul.f32 0.70710677, %v6324_v21  ;;  %vm2746_vm10 = vcmp.ge.f32.partialorder %v6691_v5, 0.0  ;;  %v2902_v22 = vsel %vm8770_vm8, %v9087_v28, 0.0  ;;  %v6714_v26 = vmul.f32 %v2172_v30, %v2076_v12  ;;  %9088 = vst [vmem:[#allocation87_spill] sm:$0xff] %v6720_v23 }
 0x2c7   :  { %v4975_v34 = vpop.eup %4974  ;;  %v6717_v60 = vmul.f32 0.5, %v6301_v29  ;;  %v2116_v46 = vmul.f32 0.70710677, %v6327_v59  ;;  %2939 = vadd.xlane.f32.xlu1 %v2902_v22  ;;  %vm8769_vm15 = vcmp.eq.s32.totalorder %v5964_v54, %v6698_v24  ;;  %4980 = verf.f32 %v2114_v33  ;;  %9090 = vst [vmem:[#allocation88_spill] sm:$0xff] %v6728_v58  ;;  %v9093_v28 = vld [vmem:[#allocation51_spill] sm:$0xff] }
 0x2c8   :  { %v2903_v20 = vsel %vm8769_vm15, %v9089_v11, 0.0  ;;  %v6730_v12 = vadd.s32 1, %v2808_v37  ;;  %v6732_v29 = vadd.s32 1, %v2809_v57  ;;  %v6734_v18 = vmul.f32 %v2173_v39, %v2077_v47 }
 0x2c9   :  { %v6737_v30 = vmul.f32 0.5, %v6324_v21  ;;  %v2117_v22 = vmul.f32 0.70710677, %v6352_v55  ;;  %v2778_v33 = vsel %vm2746_vm10, 1, %v9057_v45  ;;  %2941 = vadd.xlane.f32.xlu0 %v2903_v20  ;;  %v2174_v56 = vadd.f32 1.0, %v4973_v41  ;;  %v9096_v20 = vld [vmem:[#allocation5_spill] sm:$0xff]  ;;  %v6762_v37 = vpop.xlane.xlu1 %2443 }
 0x2ca   :  { %9091 = vst [vmem:[#allocation89_spill] sm:$0xff] %v6730_v12  ;;  %9092 = vst [vmem:[#allocation90_spill] sm:$0xff] %v6732_v29  ;;  %v2175_v11 = vadd.f32 1.0, %v4975_v34  ;;  %4982 = verf.f32 %v2115_v42  ;;  %v2118_v21 = vmul.f32 0.70710677, %v6355_v32  ;;  %vm2747_vm15 = vcmp.ge.f32.partialorder %v6720_v23, 0.0  ;;  %v6752_v42 = vpop.xlane.xlu0 %2441 }
 0x2cb   :  { %v4977_v2 = vpop.eup %4976  ;;  %4984 = verf.f32 %v2116_v46  ;;  %vm2748_vm8 = vcmp.ge.f32.partialorder %v6728_v58, 0.0  ;;  %vm8786_vm10 = vcmp.eq.s32.totalorder %v5964_v54, %v6730_v12  ;;  %vm8785_vm12 = vcmp.eq.s32.totalorder %v5964_v54, %v6732_v29  ;;  %9094 = vst [vmem:[#allocation91_spill] sm:$0xff] %v6752_v42  ;;  %v9095_v34 = vld [vmem:[#allocation12_spill] sm:$0xff]  ;;  %9097 = vst [vmem:[#allocation92_spill] sm:$0xff] %v6762_v37  ;;  %v9111_v23 = vld [vmem:[#allocation15_spill] sm:$0xff] }
 0x2cc   :  { %v4979_v57 = vpop.eup %4978  ;;  %v2810_v41 = vadd.s32 %v2778_v33, %v2714_v27  ;;  %v2176_v39 = vadd.f32 1.0, %v4977_v2  ;;  %4986 = verf.f32 %v2117_v22  ;;  %v2904_v46 = vsel %vm8786_vm10, %v9095_v34, 0.0  ;;  %v9098_v33 = vld [vmem:[#allocation52_spill] sm:$0xff] }
 0x2cd   :  { %v2905_v47 = vsel %vm8785_vm12, %v9096_v20, 0.0  ;;  %v6765_v24 = vmul.f32 %v2174_v56, %v6671_v13  ;;  %v6767_v27 = vmul.f32 %v2175_v11, %v2079_v9  ;;  %v2177_v2 = vadd.f32 1.0, %v4979_v57  ;;  %2943 = vadd.xlane.f32.xlu1 %v2904_v46  ;;  %v9100_v57 = vld [vmem:[#allocation53_spill] sm:$0xff] }
 0x2ce   :  { %v2779_v22 = vsel %vm2747_vm15, 1, %v9057_v45  ;;  %2945 = vadd.xlane.f32.xlu0 %v2905_v47  ;;  %v6772_v34 = vmul.f32 0.5, %v6327_v59  ;;  %v2119_v29 = vmul.f32 0.70710677, %v6376_v44  ;;  %v2780_v20 = vsel %vm2748_vm8, 1, %v9057_v45 }
 0x2cf   :  { %v6779_v13 = vmul.f32 0.5, %v6352_v55  ;;  %4988 = verf.f32 %v2118_v21  ;;  %v2120_v9 = vmul.f32 0.70710677, %v6380_v15  ;;  %v6782_v56 = vadd.s32 1, %v2810_v41  ;;  %v6801_v41 = vpop.xlane.xlu0 %2445 }
 0x2d0   :  { %v6785_v11 = vmul.f32 %v2176_v39, %v6694_v8  ;;  %v6789_v47 = vmul.f32 0.5, %v6355_v32  ;;  %v9101_v46 = vmul.u32 2, %v9083_v25  ;;  %v6793_v58 = vmul.f32 %v2177_v2, %v2081_v6  ;;  %9103 = vst [vmem:[#allocation94_spill] sm:$0xff] %v6801_v41  ;;  %v9104_v32 = vld [vmem:[#allocation14_spill] sm:$0xff]  ;;  %v6809_v2 = vpop.xlane.xlu1 %2447 }
 0x2d1   :  { %9099 = vst [vmem:[#allocation93_spill] sm:$0xff] %v6782_v56  ;;  %v4981_v40 = vpop.eup %4980  ;;  %v2121_v55 = vmul.f32 0.70710677, %v6402_v61  ;;  %vm8784_vm15 = vcmp.eq.s32.totalorder %v5964_v54, %v6782_v56  ;;  %v9102_v21 = vmul.u32 2, %v6294_v14  ;;  %4990 = verf.f32 %v2119_v29  ;;  %9106 = vst [vmem:[#allocation96_spill] sm:$0xff] %v6809_v2 }
 0x2d2   :  { %v2811_v12 = vadd.s32 %v2779_v22, %v9101_v46  ;;  %vm2749_vm8 = vcmp.ge.f32.partialorder %v6752_v42, 0.0  ;;  %v2906_v39 = vsel %vm8784_vm15, %v9104_v32, 0.0  ;;  %v9107_v46 = vld [vmem:[#allocation54_spill] sm:$0xff]  ;;  %v6813_v14 = vmul.f32 0.5, %v6376_v44 }
 0x2d3   :  { %v2812_v8 = vadd.s32 %v2780_v20, %v9102_v21  ;;  %4992 = verf.f32 %v2120_v9  ;;  %2947 = vadd.xlane.f32.xlu1 %v2906_v39  ;;  %v2178_v21 = vadd.f32 1.0, %v4981_v40  ;;  %v2122_v25 = vmul.f32 0.70710677, %v6406_v31  ;;  %v9109_v9 = vld [vmem:[#allocation16_spill] sm:$0xff] }
 0x2d4   :  { %v6807_v6 = vadd.s32 1, %v2811_v12  ;;  %v4983_v22 = vpop.eup %4982  ;;  %vm2750_vm15 = vcmp.ge.f32.partialorder %v6762_v37, 0.0  ;;  %4994 = verf.f32 %v2121_v55  ;;  %v2123_v12 = vmul.f32 0.70710677, %v6431_v4  ;;  %v9110_v55 = vld [vmem:[#allocation55_spill] sm:$0xff]  ;;  %v6847_v56 = vpop.xlane.xlu1 %2451 }
 0x2d5   :  { %v6815_v29 = vadd.s32 1, %v2812_v8  ;;  %v4985_v20 = vpop.eup %4984  ;;  %v2781_v44 = vsel %vm2749_vm8, 1, %v9057_v45  ;;  %v2179_v39 = vadd.f32 1.0, %v4983_v22  ;;  %v6830_v59 = vmul.f32 0.5, %v6380_v15  ;;  %v6843_v15 = vpop.xlane.xlu0 %2449  ;;  %9114 = vst [vmem:[#allocation98_spill] sm:$0xff] %v6847_v56 }
 0x2d6   :  { %9105 = vst [vmem:[#allocation95_spill] sm:$0xff] %v6807_v6  ;;  %vm8813_vm12 = vcmp.eq.s32.totalorder %v5964_v54, %v6807_v6  ;;  %v4987_v40 = vpop.eup %4986  ;;  %v2124_v32 = vmul.f32 0.70710677, %v6433_v17  ;;  %v2125_v37 = vmul.f32 0.70710677, %v6455_v63  ;;  %v2782_v42 = vsel %vm2750_vm15, 1, %v9057_v45 }
 0x2d7   :  { %9108 = vst [vmem:[#allocation97_spill] sm:$0xff] %v6815_v29  ;;  %v2907_v8 = vsel %vm8813_vm12, %v9109_v9, 0.0  ;;  %vm8808_vm10 = vcmp.eq.s32.totalorder %v5964_v54, %v6815_v29  ;;  %v2180_v9 = vadd.f32 1.0, %v4985_v20  ;;  %4996 = verf.f32 %v2122_v25  ;;  %9112 = vst [vmem:[#allocation55_spill] sm:$0xff] %v6843_v15 }
 0x2d8   :  { %2949 = vadd.xlane.f32.xlu0 %v2907_v8  ;;  %v2908_v22 = vsel %vm8808_vm10, %v9111_v23, 0.0  ;;  %vm2751_vm8 = vcmp.ge.f32.partialorder %v6801_v41, 0.0  ;;  %v9113_v8 = vmul.u32 2, %v9086_v36  ;;  %v6850_v49 = vmul.f32 %v2178_v21, %v6717_v60  ;;  %v9118_v36 = vld [vmem:[#allocation57_spill] sm:$0xff]  ;;  %v9124_v23 = vld [vmem:[#allocation59_spill] sm:$0xff] }
 0x2d9   :  { %2951 = vadd.xlane.f32.xlu1 %v2908_v22  ;;  %v4989_v5 = vpop.eup %4988  ;;  %v2181_v62 = vadd.f32 1.0, %v4987_v40  ;;  %v6853_v29 = vmul.f32 0.5, %v6402_v61  ;;  %4998 = verf.f32 %v2123_v12  ;;  %v6856_v25 = vmul.f32 %v2179_v39, %v6737_v30  ;;  %v9119_v40 = vld [vmem:[#allocation18_spill] sm:$0xff] }
 0x2da   :  { %v2813_v6 = vadd.s32 %v2781_v44, %v9113_v8  ;;  %5000 = verf.f32 %v2124_v32  ;;  %v9116_v22 = vmul.u32 2, %v6317_v16  ;;  %v9117_v8 = vld [vmem:[#allocation56_spill] sm:$0xff]  ;;  %v2783_v61 = vsel %vm2751_vm8, 1, %v9057_v45 }
 0x2db   :  { %5002 = verf.f32 %v2125_v37  ;;  %v4991_v60 = vpop.eup %4990  ;;  %v6868_v21 = vmul.f32 %v2180_v9, %v6772_v34  ;;  %v2182_v30 = vadd.f32 1.0, %v4989_v5  ;;  %v6871_v32 = vmul.f32 0.5, %v6406_v31  ;;  %v6888_v31 = vpop.xlane.xlu0 %2453 }
 0x2dc   :  { %v6858_v20 = vadd.s32 1, %v2813_v6  ;;  %v2814_v44 = vadd.s32 %v2782_v42, %v9116_v22  ;;  %v6876_v6 = vmul.f32 %v2181_v62, %v6779_v13  ;;  %v6879_v37 = vmul.f32 0.5, %v6431_v4  ;;  %9120 = vst [vmem:[#allocation56_spill] sm:$0xff] %v6888_v31  ;;  %v6894_v13 = vpop.xlane.xlu1 %2455  ;;  %v9123_v22 = vld [vmem:[#allocation58_spill] sm:$0xff] }
 0x2dd   :  { %v4993_v42 = vpop.eup %4992  ;;  %v2126_v12 = vmul.f32 0.70710677, %v6458_v50  ;;  %vm2752_vm8 = vcmp.ge.f32.partialorder %v6809_v2, 0.0  ;;  %vm2753_vm10 = vcmp.ge.f32.partialorder %v6843_v15, 0.0  ;;  %v9122_v62 = vmul.u32 2, %v9093_v28  ;;  %v9128_v28 = vld [vmem:[#allocation60_spill] sm:$0xff] }
 0x2de   :  { %9115 = vst [vmem:[#allocation99_spill] sm:$0xff] %v6858_v20  ;;  %vm8812_vm15 = vcmp.eq.s32.totalorder %v5964_v54, %v6858_v20  ;;  %v6890_v34 = vadd.s32 1, %v2814_v44  ;;  %v4995_v9 = vpop.eup %4994  ;;  %v2183_v39 = vadd.f32 1.0, %v4991_v60  ;;  %v2127_v20 = vmul.f32 0.70710677, %v6479_v48  ;;  %v9129_v2 = vld [vmem:[#allocation20_spill] sm:$0xff] }
 0x2df   :  { %v2909_v5 = vsel %vm8812_vm15, %v9119_v40, 0.0  ;;  %v2815_v4 = vadd.s32 %v2783_v61, %v9122_v62  ;;  %v6900_v16 = vmul.f32 %v2182_v30, %v6789_v47  ;;  %5004 = verf.f32 %v2126_v12  ;;  %v9126_v62 = vld [vmem:[#allocation17_spill] sm:$0xff] }
 0x2e0   :  { %2953 = vadd.xlane.f32.xlu0 %v2909_v5  ;;  %9121 = vst [vmem:[#allocation57_spill] sm:$0xff] %v6890_v34  ;;  %v2184_v5 = vadd.f32 1.0, %v4993_v42  ;;  %vm8830_vm15 = vcmp.eq.s32.totalorder %v5964_v54, %v6890_v34  ;;  %v2784_v61 = vsel %vm2752_vm8, 1, %v9057_v45  ;;  %v2785_v60 = vsel %vm2753_vm10, 1, %v9057_v45  ;;  %v6932_v34 = vpop.xlane.xlu0 %2457  ;;  %v6938_v41 = vpop.xlane.xlu1 %2459 }
 0x2e1   :  { %v6904_v44 = vadd.s32 1, %v2815_v4  ;;  %v2910_v47 = vsel %vm8830_vm15, %v9126_v62, 0.0  ;;  %v4997_v30 = vpop.eup %4996  ;;  %v2185_v42 = vadd.f32 1.0, %v4995_v9  ;;  %v2092_v40 = vmul.f32 0.5, %v6433_v17 }
 0x2e2   :  { %v2093_v4 = vmul.f32 0.5, %v6455_v63  ;;  %2955 = vadd.xlane.f32.xlu1 %v2910_v47  ;;  %v6921_v38 = vmul.f32 %v2183_v39, %v6813_v14  ;;  %5006 = verf.f32 %v2127_v20  ;;  %v6929_v17 = vmul.f32 %v2184_v5, %v6830_v59  ;;  %v9130_v63 = vld [vmem:[#allocation61_spill] sm:$0xff] }
 0x2e3   :  { %9125 = vst [vmem:[#allocation58_spill] sm:$0xff] %v6904_v44  ;;  %vm8829_vm12 = vcmp.eq.s32.totalorder %v5964_v54, %v6904_v44  ;;  %v4999_v12 = vpop.eup %4998  ;;  %v9131_v14 = vmul.u32 2, %v9098_v33  ;;  %v9132_v15 = vmul.u32 2, %v9100_v57  ;;  %v2186_v44 = vadd.f32 1.0, %v4997_v30  ;;  %v9136_v30 = vld [vmem:[#allocation64_spill] sm:$0xff] }
 0x2e4   :  { %9127 = vst [vmem:[#allocation59_spill] sm:$0xff] %v6921_v38  ;;  %v2911_v9 = vsel %vm8829_vm12, %v9129_v2, 0.0  ;;  %v5001_v62 = vpop.eup %5000  ;;  %v2094_v2 = vmul.f32 0.5, %v6458_v50  ;;  %vm2754_vm10 = vcmp.ge.f32.partialorder %v6847_v56, 0.0  ;;  %vm2755_vm8 = vcmp.ge.f32.partialorder %v6888_v31, 0.0 }
 0x2e5   :  { %2957 = vadd.xlane.f32.xlu0 %v2911_v9  ;;  %v2816_v39 = vadd.s32 %v2784_v61, %v9131_v14  ;;  %v2817_v20 = vadd.s32 %v2785_v60, %v9132_v15  ;;  %v5003_v38 = vpop.eup %5002  ;;  %v6944_v59 = vmul.f32 %v2185_v42, %v6853_v29  ;;  %v2187_v5 = vadd.f32 1.0, %v4999_v12  ;;  %v9135_v15 = vld [vmem:[#allocation62_spill] sm:$0xff]  ;;  %v9138_v12 = vld [vmem:[#allocation19_spill] sm:$0xff] }
 0x2e6   :  { %v2188_v14 = vadd.f32 1.0, %v5001_v62  ;;  %v6952_v47 = vmul.f32 0.5, %v6479_v48  ;;  %v2128_v50 = vmul.f32 0.70710677, %v9136_v30  ;;  %v2189_v57 = vadd.f32 1.0, %v5003_v38  ;;  %v6980_v62 = vpop.xlane.xlu0 %2461 }
 0x2e7   :  { %v6946_v9 = vadd.s32 1, %v2816_v39  ;;  %v6948_v61 = vadd.s32 1, %v2817_v20  ;;  %v2786_v33 = vsel %vm2754_vm10, 1, %v9057_v45  ;;  %v2787_v31 = vsel %vm2755_vm8, 1, %v9057_v45 }
 0x2e8   :  { %v6960_v29 = vmul.f32 %v2186_v44, %v6871_v32  ;;  %v6970_v38 = vmul.f32 %v2187_v5, %v6879_v37  ;;  %v6974_v60 = vmul.f32 0.5, %v9136_v30  ;;  %v9141_v32 = vld [vmem:[#allocation22_spill] sm:$0xff]  ;;  %vm2756_vm10 = vcmp.ge.f32.partialorder %v6894_v13, 0.0 }
 0x2e9   :  { %9133 = vst [vmem:[#allocation60_spill] sm:$0xff] %v6946_v9  ;;  %9134 = vst [vmem:[#allocation100_spill] sm:$0xff] %v6948_v61  ;;  %vm8839_vm12 = vcmp.eq.s32.totalorder %v5964_v54, %v6946_v9  ;;  %vm8838_vm15 = vcmp.eq.s32.totalorder %v5964_v54, %v6948_v61  ;;  %v5005_v9 = vpop.eup %5004  ;;  %vm2757_vm8 = vcmp.ge.f32.partialorder %v6932_v34, 0.0  ;;  %v9142_v37 = vmul.u32 2, %v9107_v46 }
 0x2ea   :  { %v2912_v48 = vsel %vm8839_vm12, %v9138_v12, 0.0  ;;  %9140 = vst [vmem:[#allocation64_spill] sm:$0xff] %v6974_v60  ;;  %v2913_v44 = vsel %vm8838_vm15, %v9141_v32, 0.0  ;;  %v6982_v12 = vpop.xlane.xlu1 %2463  ;;  %v9143_v30 = vmul.u32 2, %v9110_v55  ;;  %v6990_v20 = vmul.f32 %v2188_v14, %v2092_v40  ;;  %v9144_v32 = vld [vmem:[#allocation66_spill] sm:$0xff]  ;;  %v9145_v60 = vld [vmem:[#allocation67_spill] sm:$0xff] }
 0x2eb   :  { %2959 = vadd.xlane.f32.xlu1 %v2912_v48  ;;  %2961 = vadd.xlane.f32.xlu0 %v2913_v44  ;;  %v2818_v5 = vadd.s32 %v2786_v33, %v9142_v37  ;;  %v6992_v61 = vmul.f32 %v2189_v57, %v2093_v4  ;;  %5008 = verf.f32 %v2128_v50  ;;  %v6999_v44 = vsel %vm1968_vm1, %v6605_v7, 0.0  ;;  %v9148_v50 = vld [vmem:[#allocation68_spill] sm:$0xff]  ;;  %v9149_v37 = vld [vmem:[#allocation21_spill] sm:$0xff] }
 0x2ec   :  { %v2819_v48 = vadd.s32 %v2787_v31, %v9143_v30  ;;  %v5007_v39 = vpop.eup %5006  ;;  %v2190_v31 = vadd.f32 1.0, %v5005_v9  ;;  %v2788_v40 = vsel %vm2756_vm10, 1, %v9057_v45  ;;  %v2789_v57 = vsel %vm2757_vm8, 1, %v9057_v45  ;;  %v9150_v30 = vld [vmem:[#allocation24_spill] sm:$0xff] }
 0x2ed   :  { %v7001_v46 = vadd.s32 1, %v2818_v5  ;;  %v7010_v4 = vsel %vm1968_vm1, %v6567_v43, 0.0  ;;  %v7019_v7 = vsel %vm1968_vm1, %v6615_v52, 0.0  ;;  %v7024_v9 = vsel %vm1968_vm1, %v6631_v10, 0.0  ;;  %v7035_v52 = vpop.xlane.xlu0 %2465 }
 0x2ee   :  { %v7003_v33 = vadd.s32 1, %v2819_v48  ;;  %9147 = vst [vmem:[#allocation102_spill] sm:$0xff] %v7024_v9  ;;  %v2191_v14 = vadd.f32 1.0, %v5007_v39  ;;  %v7037_v42 = vpop.xlane.xlu1 %2467  ;;  %vm2758_vm10 = vcmp.ge.f32.partialorder %v6938_v41, 0.0  ;;  %vm2759_vm8 = vcmp.ge.f32.partialorder %v6980_v62, 0.0  ;;  %v9153_v9 = vld [vmem:[#allocation69_spill] sm:$0xff] }
 0x2ef   :  { %vm8847_vm15 = vcmp.eq.s32.totalorder %v5964_v54, %v7001_v46  ;;  %v9151_v10 = vmul.u32 2, %v9117_v8  ;;  %v9152_v43 = vmul.u32 2, %v9118_v36 }
 0x2f0   :  { %9146 = vst [vmem:[#allocation101_spill] sm:$0xff] %v7003_v33  ;;  %vm8842_vm12 = vcmp.eq.s32.totalorder %v5964_v54, %v7003_v33  ;;  %v2914_v5 = vsel %vm8847_vm15, %v9149_v37, 0.0  ;;  %v7045_v37 = vmul.f32 %v2190_v31, %v2094_v2  ;;  %v7051_v33 = vsel %vm1968_vm1, %v6642_v0, 0.0 }
 0x2f1   :  { %v2915_v48 = vsel %vm8842_vm12, %v9150_v30, 0.0  ;;  %2963 = vadd.xlane.f32.xlu1 %v2914_v5  ;;  %v2820_v39 = vadd.s32 %v2788_v40, %v9151_v10  ;;  %v2821_v56 = vadd.s32 %v2789_v57, %v9152_v43  ;;  %9154 = vst [vmem:[#allocation103_spill] sm:$0xff] %v7051_v33  ;;  %v7056_v5 = vsel %vm1968_vm1, %v6647_v35, 0.0  ;;  %v9161_v43 = vld [vmem:[#allocation23_spill] sm:$0xff]  ;;  %v9162_v10 = vld [vmem:[#allocation26_spill] sm:$0xff] }
 0x2f2   :  { %2965 = vadd.xlane.f32.xlu0 %v2915_v48  ;;  %9155 = vst [vmem:[#allocation104_spill] sm:$0xff] %v7056_v5  ;;  %v7065_v2 = vsel %vm1968_vm1, %v6666_v51, 0.0  ;;  %v7070_v31 = vsel %vm1968_vm1, %v6679_v3, 0.0  ;;  %v2790_v0 = vsel %vm2758_vm10, 1, %v9057_v45  ;;  %v2791_v57 = vsel %vm2759_vm8, 1, %v9057_v45 }
 0x2f3   :  { %v7058_v48 = vadd.s32 1, %v2820_v39  ;;  %v7060_v40 = vadd.s32 1, %v2821_v56  ;;  %9156 = vst [vmem:[#allocation105_spill] sm:$0xff] %v7065_v2  ;;  %9157 = vst [vmem:[#allocation106_spill] sm:$0xff] %v7070_v31  ;;  %v7077_v35 = vsel %vm1968_vm1, %v6686_v53, 0.0  ;;  %v7082_v56 = vsel %vm1968_vm1, %v6700_v1, 0.0  ;;  %v7104_v39 = vpop.xlane.xlu1 %2471 }
 0x2f4   :  { %9158 = vst [vmem:[#allocation107_spill] sm:$0xff] %v7077_v35  ;;  %9159 = vst [vmem:[#allocation108_spill] sm:$0xff] %v7082_v56  ;;  %v2223_v51 = vmul.f32 %v2191_v14, %v6952_v47  ;;  %v7092_v3 = vsel %vm1968_vm1, %v6703_v19, 0.0  ;;  %v7102_v14 = vpop.xlane.xlu0 %2469  ;;  %v7109_v19 = vsel %vm1968_vm1, %v6714_v26, 0.0  ;;  %v7114_v30 = vsel %vm1968_vm1, %v6734_v18, 0.0  ;;  %v9200_v2 = vld [vmem:[#allocation78_spill] sm:$0xff] }
 0x2f5   :  { %vm8844_vm12 = vcmp.eq.s32.totalorder %v5964_v54, %v7058_v48  ;;  %vm8843_vm10 = vcmp.eq.s32.totalorder %v5964_v54, %v7060_v40  ;;  %9160 = vst [vmem:[#allocation109_spill] sm:$0xff] %v7092_v3  ;;  %v5009_v53 = vpop.eup %5008  ;;  %9163 = vst [vmem:[#allocation110_spill] sm:$0xff] %v7109_v19  ;;  %vm2760_vm8 = vcmp.ge.f32.partialorder %v6982_v12, 0.0  ;;  %v9166_v3 = vmul.u32 2, %v9124_v23 }
 0x2f6   :  { %v2916_v1 = vsel %vm8844_vm12, %v9161_v43, 0.0  ;;  %v2917_v47 = vsel %vm8843_vm10, %v9162_v10, 0.0  ;;  %9164 = vst [vmem:[#allocation111_spill] sm:$0xff] %v7114_v30  ;;  %v9165_v10 = vmul.u32 2, %v9123_v22  ;;  %v7124_v26 = vsel %vm1968_vm1, %v6765_v24, 0.0 }
 0x2f7   :  { %2967 = vadd.xlane.f32.xlu1 %v2916_v1  ;;  %2969 = vadd.xlane.f32.xlu0 %v2917_v47  ;;  %v2823_v56 = vadd.s32 %v2791_v57, %v9166_v3  ;;  %9167 = vst [vmem:[#allocation112_spill] sm:$0xff] %v7124_v26  ;;  %vm2761_vm10 = vcmp.ge.f32.partialorder %v7035_v52, 0.0  ;;  %v7130_v18 = vsel %vm1968_vm1, %v6767_v27, 0.0  ;;  %v7135_v1 = vsel %vm1968_vm1, %v6785_v11, 0.0  ;;  %v9178_v47 = vld [vmem:[#allocation71_spill] sm:$0xff] }
 0x2f8   :  { %v2822_v43 = vadd.s32 %v2790_v0, %v9165_v10  ;;  %9168 = vst [vmem:[#allocation113_spill] sm:$0xff] %v7130_v18  ;;  %9169 = vst [vmem:[#allocation114_spill] sm:$0xff] %v7135_v1  ;;  %v7140_v0 = vsel %vm1968_vm1, %v6793_v58, 0.0  ;;  %v7144_v24 = vsel %vm1968_vm1, %v2223_v51, 0.0  ;;  %v7153_v27 = vsel %vm1968_vm1, %v6850_v49, 0.0  ;;  %v9183_v1 = vld [vmem:[#allocation59_spill] sm:$0xff] }
 0x2f9   :  { %9170 = vst [vmem:[#allocation115_spill] sm:$0xff] %v7140_v0  ;;  %9171 = vst [vmem:[#allocation116_spill] sm:$0xff] %v7144_v24  ;;  %v7148_v3 = vadd.s32 1, %v2823_v56  ;;  %v2792_v11 = vsel %vm2760_vm8, 1, %v9057_v45  ;;  %v7159_v58 = vsel %vm1968_vm1, %v6856_v25, 0.0  ;;  %v7164_v51 = vsel %vm1968_vm1, %v6868_v21, 0.0 }
 0x2fa   :  { %v7146_v57 = vadd.s32 1, %v2822_v43  ;;  %9173 = vst [vmem:[#allocation118_spill] sm:$0xff] %v7153_v27  ;;  %9174 = vst [vmem:[#allocation119_spill] sm:$0xff] %v7159_v58  ;;  %v7169_v56 = vsel %vm1968_vm1, %v6876_v6, 0.0  ;;  %v9177_v43 = vld [vmem:[#allocation70_spill] sm:$0xff]  ;;  %v2793_v10 = vsel %vm2761_vm10, 1, %v9057_v45  ;;  %v7186_v58 = vpop.xlane.xlu0 %2473  ;;  %v7188_v27 = vpop.xlane.xlu1 %2475 }
 0x2fb   :  { %9172 = vst [vmem:[#allocation117_spill] sm:$0xff] %v7148_v3  ;;  %9175 = vst [vmem:[#allocation120_spill] sm:$0xff] %v7164_v51  ;;  %v2513_v49 = vmul.f32 0.70710677, %v9177_v43  ;;  %vm8845_vm12 = vcmp.eq.s32.totalorder %v5964_v54, %v7148_v3  ;;  %v2192_v25 = vadd.f32 1.0, %v5009_v53  ;;  %v9179_v21 = vld [vmem:[#allocation25_spill] sm:$0xff] }
 0x2fc   :  { %9176 = vst [vmem:[#allocation121_spill] sm:$0xff] %v7169_v56  ;;  %vm8846_vm8 = vcmp.eq.s32.totalorder %v5964_v54, %v7146_v57  ;;  %v2514_v24 = vmul.f32 0.70710677, %v9178_v47  ;;  %v9180_v6 = vld [vmem:[#allocation28_spill] sm:$0xff]  ;;  %vm2762_vm10 = vcmp.ge.f32.partialorder %v7037_v42, 0.0  ;;  %v9181_v53 = vmul.u32 2, %v9128_v28 }
 0x2fd   :  { %v2918_v51 = vsel %vm8846_vm8, %v9179_v21, 0.0  ;;  %v2919_v56 = vsel %vm8845_vm12, %v9180_v6, 0.0  ;;  %v7196_v21 = vsel %vm1968_vm1, %v6900_v16, 0.0  ;;  %v7201_v6 = vsel %vm1968_vm1, %v9183_v1, 0.0 }
 0x2fe   :  { %2971 = vadd.xlane.f32.xlu1 %v2918_v51  ;;  %2973 = vadd.xlane.f32.xlu0 %v2919_v56  ;;  %v2824_v0 = vadd.s32 %v2792_v11, %v9181_v53  ;;  %9182 = vst [vmem:[#allocation70_spill] sm:$0xff] %v7196_v21  ;;  %9184 = vst [vmem:[#allocation71_spill] sm:$0xff] %v7201_v6  ;;  %vm2763_vm12 = vcmp.ge.f32.partialorder %v7102_v14, 0.0  ;;  %v9185_v18 = vmul.u32 2, %v9130_v63  ;;  %v7209_v51 = vsel %vm1968_vm1, %v6929_v17, 0.0  ;;  %v9188_v11 = vld [vmem:[#allocation72_spill] sm:$0xff] }
 0x2ff   :  { %9186 = vst [vmem:[#allocation59_spill] sm:$0xff] %v7209_v51  ;;  %v7214_v16 = vsel %vm1968_vm1, %v6944_v59, 0.0  ;;  %5010 = verf.f32 %v2513_v49  ;;  %v2515_v56 = vmul.f32 0.70710677, %v9188_v11  ;;  %v7222_v53 = vsel %vm1968_vm1, %v6960_v29, 0.0  ;;  %v9193_v29 = vld [vmem:[#allocation27_spill] sm:$0xff] }
 0x300   :  { %v2825_v26 = vadd.s32 %v2793_v10, %v9185_v18  ;;  %9187 = vst [vmem:[#allocation122_spill] sm:$0xff] %v7214_v16  ;;  %v7217_v1 = vadd.s32 1, %v2824_v0  ;;  %9190 = vst [vmem:[#allocation123_spill] sm:$0xff] %v7222_v53  ;;  %5012 = verf.f32 %v2514_v24  ;;  %v2794_v18 = vsel %vm2762_vm10, 1, %v9057_v45  ;;  %v9192_v0 = vld [vmem:[#allocation75_spill] sm:$0xff]  ;;  %v7242_v10 = vpop.xlane.xlu1 %2479  ;;  %v9195_v16 = vld [vmem:[#allocation77_spill] sm:$0xff] }
 0x301   :  { %vm2764_vm8 = vcmp.ge.f32.partialorder %v7104_v39, 0.0  ;;  %v2795_v59 = vsel %vm2763_vm12, 1, %v9057_v45  ;;  %vm2765_vm15 = vcmp.ge.f32.partialorder %v7186_v58, 0.0  ;;  %vm2766_vm9 = vcmp.ge.f32.partialorder %v7188_v27, 0.0  ;;  %v9196_v21 = vld [vmem:[#allocation30_spill] sm:$0xff] }
 0x302   :  { %9189 = vst [vmem:[#allocation72_spill] sm:$0xff] %v7217_v1  ;;  %v7226_v17 = vadd.s32 1, %v2825_v26  ;;  %vm2888_vm2 = vcmp.eq.s32.totalorder %v5964_v54, %v7217_v1  ;;  %v2516_v49 = vmul.f32 0.70710677, %v9192_v0  ;;  %v7240_v26 = vpop.xlane.xlu0 %2477  ;;  %v7247_v53 = vsel %vm1968_vm1, %v6970_v38, 0.0 }
 0x303   :  { %v2920_v24 = vsel %vm2888_vm2, %v9193_v29, 0.0  ;;  %9194 = vst [vmem:[#allocation75_spill] sm:$0xff] %v7247_v53  ;;  %5014 = verf.f32 %v2515_v56  ;;  %v2517_v51 = vmul.f32 0.70710677, %v9195_v16  ;;  %v2796_v6 = vsel %vm2764_vm8, 1, %v9057_v45  ;;  %v9198_v53 = vld [vmem:[#allocation63_spill] sm:$0xff] }
 0x304   :  { %9191 = vst [vmem:[#allocation124_spill] sm:$0xff] %v7226_v17  ;;  %vm2889_vm10 = vcmp.eq.s32.totalorder %v5964_v54, %v7226_v17  ;;  %2975 = vadd.xlane.f32.xlu1 %v2920_v24  ;;  %v2797_v30 = vsel %vm2765_vm15, 1, %v9057_v45  ;;  %v2798_v19 = vsel %vm2766_vm9, 1, %v9057_v45  ;;  %v9197_v35 = vmul.u32 2, %v9135_v15 }
 0x305   :  { %v2921_v29 = vsel %vm2889_vm10, %v9196_v21, 0.0  ;;  %v9199_v56 = vmul.u32 2, %v9198_v53  ;;  %v2518_v5 = vmul.f32 0.70710677, %v9200_v2  ;;  %vm2767_vm12 = vcmp.ge.f32.partialorder %v7240_v26, 0.0 }
 0x306   :  { %2977 = vadd.xlane.f32.xlu0 %v2921_v29  ;;  %v2826_v38 = vadd.s32 %v2794_v18, %v9197_v35  ;;  %vm2768_vm8 = vcmp.ge.f32.partialorder %v7242_v10, 0.0  ;;  %v7267_v24 = vsel %vm1968_vm1, %v6990_v20, 0.0  ;;  %v9202_v29 = vld [vmem:[#allocation64_spill] sm:$0xff]  ;;  %5016 = verf.f32 %v2516_v49  ;;  %v9205_v18 = vld [vmem:[#allocation79_spill] sm:$0xff]  ;;  %v9210_v49 = vld [vmem:[#allocation82_spill] sm:$0xff] }
 0x307   :  { %v2827_v31 = vadd.s32 %v2795_v59, %v9199_v56  ;;  %9201 = vst [vmem:[#allocation77_spill] sm:$0xff] %v7267_v24  ;;  %v2224_v21 = vmul.f32 %v2192_v25, %v9202_v29  ;;  %v2519_v59 = vmul.f32 0.70710677, %v9205_v18  ;;  %v9206_v56 = vld [vmem:[#allocation65_spill] sm:$0xff]  ;;  %v9208_v1 = vmul.u32 2, %v9144_v32 }
 0x308   :  { %v7270_v33 = vadd.s32 1, %v2826_v38  ;;  %v9207_v53 = vmul.u32 2, %v9206_v56  ;;  %v9209_v63 = vmul.u32 2, %v9145_v60  ;;  %5018 = verf.f32 %v2517_v51  ;;  %v9211_v29 = vld [vmem:[#allocation29_spill] sm:$0xff]  ;;  %v9213_v51 = vld [vmem:[#allocation32_spill] sm:$0xff] }
 0x309   :  { %v7272_v35 = vadd.s32 1, %v2827_v31  ;;  %v2829_v15 = vadd.s32 %v2797_v30, %v9208_v1  ;;  %v2799_v20 = vsel %vm2767_vm12, 1, %v9057_v45  ;;  %v2800_v31 = vsel %vm2768_vm8, 1, %v9057_v45  ;;  %v5011_v25 = vpop.eup %5010 }
 0x30a   :  { %9203 = vst [vmem:[#allocation78_spill] sm:$0xff] %v7270_v33  ;;  %v2828_v17 = vadd.s32 %v2796_v6, %v9207_v53  ;;  %v2830_v3 = vadd.s32 %v2798_v19, %v9209_v63  ;;  %vm2890_vm9 = vcmp.eq.s32.totalorder %v5964_v54, %v7270_v33  ;;  %5020 = verf.f32 %v2518_v5  ;;  %v5013_v63 = vpop.eup %5012  ;;  %v9212_v19 = vld [vmem:[#allocation83_spill] sm:$0xff] }
 0x30b   :  { %9204 = vst [vmem:[#allocation64_spill] sm:$0xff] %v7272_v35  ;;  %v2520_v38 = vmul.f32 0.70710677, %v9210_v49  ;;  %v2922_v30 = vsel %vm2890_vm9, %v9211_v29, 0.0  ;;  %vm8860_vm15 = vcmp.eq.s32.totalorder %v5964_v54, %v7272_v35  ;;  %v2521_v6 = vmul.f32 0.70710677, %v9212_v19 }
 0x30c   :  { %2979 = vadd.xlane.f32.xlu1 %v2922_v30  ;;  %v2923_v1 = vsel %vm8860_vm15, %v9213_v51, 0.0  ;;  %v7297_v5 = vadd.s32 1, %v2828_v17  ;;  %v7299_v53 = vadd.s32 1, %v2829_v15  ;;  %5022 = verf.f32 %v2519_v59  ;;  %v9228_v51 = vld [vmem:[#allocation87_spill] sm:$0xff] }
 0x30d   :  { %2981 = vadd.xlane.f32.xlu0 %v2923_v1  ;;  %v7301_v24 = vadd.s32 1, %v2830_v3  ;;  %v9217_v29 = vmul.u32 2, %v9148_v50  ;;  %v9218_v32 = vmul.u32 2, %v9153_v9  ;;  %v2481_v30 = vmul.f32 0.5, %v9177_v43  ;;  %v5015_v17 = vpop.eup %5014 }
 0x30e   :  { %9214 = vst [vmem:[#allocation79_spill] sm:$0xff] %v7297_v5  ;;  %9215 = vst [vmem:[#allocation82_spill] sm:$0xff] %v7299_v53  ;;  %vm2892_vm12 = vcmp.eq.s32.totalorder %v5964_v54, %v7297_v5  ;;  %v7313_v15 = vsel %vm1968_vm1, %v6992_v61, 0.0  ;;  %v7318_v3 = vsel %vm1968_vm1, %v7045_v37, 0.0  ;;  %v2577_v59 = vadd.f32 1.0, %v5011_v25  ;;  %v9222_v61 = vld [vmem:[#allocation34_spill] sm:$0xff] }
 0x30f   :  { %9216 = vst [vmem:[#allocation83_spill] sm:$0xff] %v7301_v24  ;;  %v2831_v60 = vadd.s32 %v2799_v20, %v9217_v29  ;;  %v2832_v56 = vadd.s32 %v2800_v31, %v9218_v32  ;;  %9219 = vst [vmem:[#allocation125_spill] sm:$0xff] %v7313_v15  ;;  %5024 = verf.f32 %v2520_v38  ;;  %v9221_v20 = vld [vmem:[#allocation31_spill] sm:$0xff]  ;;  %vm8862_vm8 = vcmp.eq.s32.totalorder %v5964_v54, %v7299_v53  ;;  %v9223_v31 = vld [vmem:[#allocation85_spill] sm:$0xff] }
 0x310   :  { %9220 = vst [vmem:[#allocation126_spill] sm:$0xff] %v7318_v3  ;;  %v2924_v32 = vsel %vm2892_vm12, %v9221_v20, 0.0  ;;  %v2578_v43 = vadd.f32 1.0, %v5013_v63  ;;  %5026 = verf.f32 %v2521_v6  ;;  %v2925_v37 = vsel %vm8862_vm8, %v9222_v61, 0.0  ;;  %v9224_v38 = vld [vmem:[#allocation33_spill] sm:$0xff]  ;;  %v5017_v6 = vpop.eup %5016 }
 0x311   :  { %2983 = vadd.xlane.f32.xlu1 %v2924_v32  ;;  %vm8861_vm15 = vcmp.eq.s32.totalorder %v5964_v54, %v7301_v24  ;;  %v2522_v25 = vmul.f32 0.70710677, %v9223_v31  ;;  %2985 = vadd.xlane.f32.xlu0 %v2925_v37  ;;  %v7337_v1 = vadd.s32 1, %v2831_v60  ;;  %v7339_v63 = vadd.s32 1, %v2832_v56  ;;  %v9233_v24 = vld [vmem:[#allocation35_spill] sm:$0xff] }
 0x312   :  { %v2926_v29 = vsel %vm8861_vm15, %v9224_v38, 0.0  ;;  %v7343_v32 = vsel %vm1968_vm1, %v2224_v21, 0.0  ;;  %v2482_v61 = vmul.f32 0.5, %v9178_v47  ;;  %v2483_v20 = vmul.f32 0.5, %v9188_v11  ;;  %v5019_v60 = vpop.eup %5018  ;;  %v9230_v21 = vld [vmem:[#allocation88_spill] sm:$0xff] }
 0x313   :  { %9225 = vst [vmem:[#allocation85_spill] sm:$0xff] %v7337_v1  ;;  %9226 = vst [vmem:[#allocation127_spill] sm:$0xff] %v7339_v63  ;;  %v2523_v37 = vmul.f32 0.70710677, %v9228_v51  ;;  %v2609_v3 = vmul.f32 %v2577_v59, %v2481_v30  ;;  %v2579_v15 = vadd.f32 1.0, %v5015_v17  ;;  %vm2895_vm15 = vcmp.eq.s32.totalorder %v5964_v54, %v7337_v1  ;;  %v9231_v47 = vld [vmem:[#allocation36_spill] sm:$0xff] }
 0x314   :  { %9227 = vst [vmem:[#allocation128_spill] sm:$0xff] %v7343_v32  ;;  %vm2896_vm8 = vcmp.eq.s32.totalorder %v5964_v54, %v7339_v63  ;;  %v2610_v56 = vmul.f32 %v2578_v43, %v2482_v61  ;;  %v2524_v32 = vmul.f32 0.70710677, %v9230_v21  ;;  %v2927_v11 = vsel %vm2895_vm15, %v9231_v47, 0.0  ;;  %v5021_v30 = vpop.eup %5020  ;;  %v9232_v59 = vld [vmem:[#allocation91_spill] sm:$0xff] }
 0x315   :  { %2987 = vadd.xlane.f32.xlu1 %v2926_v29  ;;  %v2484_v17 = vmul.f32 0.5, %v9192_v0  ;;  %5028 = verf.f32 %v2522_v25  ;;  %v2525_v50 = vmul.f32 0.70710677, %v9232_v59  ;;  %2989 = vadd.xlane.f32.xlu0 %v2927_v11  ;;  %v2928_v43 = vsel %vm2896_vm8, %v9233_v24, 0.0  ;;  %v9237_v11 = vld [vmem:[#allocation92_spill] sm:$0xff] }
 0x316   :  { %v2485_v61 = vmul.f32 0.5, %v9195_v16  ;;  %5030 = verf.f32 %v2523_v37  ;;  %v5023_v47 = vpop.eup %5022  ;;  %v2641_v0 = vsel %vm2353_vm3, %v2609_v3, 0.0  ;;  %v2611_v25 = vmul.f32 %v2579_v15, %v2483_v20  ;;  %v9239_v16 = vld [vmem:[#allocation94_spill] sm:$0xff]  ;;  %v9240_v20 = vld [vmem:[#allocation80_spill] sm:$0xff] }
 0x317   :  { %v2580_v35 = vadd.f32 1.0, %v5017_v6  ;;  %v2526_v33 = vmul.f32 0.70710677, %v9237_v11  ;;  %v2642_v24 = vsel %vm2354_vm6, %v2610_v56, 0.0  ;;  %v2581_v63 = vadd.f32 1.0, %v5019_v60  ;;  %v9241_v29 = vld [vmem:[#allocation96_spill] sm:$0xff] }
 0x318   :  { %5032 = verf.f32 %v2524_v32  ;;  %v2527_v9 = vmul.f32 0.70710677, %v9239_v16  ;;  %v2486_v37 = vmul.f32 0.5, %v9200_v2  ;;  %v2582_v53 = vadd.f32 1.0, %v5021_v30 }
 0x319   :  { %2991 = vadd.xlane.f32.xlu1 %v2928_v43  ;;  %v5025_v5 = vpop.eup %5024  ;;  %v2487_v1 = vmul.f32 0.5, %v9205_v18  ;;  %5034 = verf.f32 %v2525_v50  ;;  %v2583_v3 = vadd.f32 1.0, %v5023_v47  ;;  %v2528_v45 = vmul.f32 0.70710677, %v9241_v29  ;;  %v9245_v47 = vld [vmem:[#allocation55_spill] sm:$0xff] }
 0x31a   :  { %v5027_v15 = vpop.eup %5026  ;;  %v7380_v38 = vadd.f32 %v2641_v0, %v7010_v4  ;;  %v7383_v32 = vadd.f32 %v2642_v24, %v6999_v44  ;;  %v2612_v60 = vmul.f32 %v2580_v35, %v2484_v17  ;;  %v2488_v56 = vmul.f32 0.5, %v9210_v49  ;;  %v9246_v0 = vld [vmem:[#allocation81_spill] sm:$0xff]  ;;  %v9247_v35 = vld [vmem:[#allocation98_spill] sm:$0xff] }
 0x31b   :  { %5036 = verf.f32 %v2526_v33  ;;  %v2643_v50 = vsel %vm2355_vm7, %v2611_v25, 0.0  ;;  %v2613_v18 = vmul.f32 %v2581_v63, %v2485_v61  ;;  %v2529_v30 = vmul.f32 0.70710677, %v9245_v47  ;;  %v9250_v61 = vld [vmem:[#allocation56_spill] sm:$0xff] }
 0x31c   :  { %9242 = vst [vmem:[#allocation87_spill] sm:$0xff] %v7380_v38  ;;  %9243 = vst [vmem:[#allocation88_spill] sm:$0xff] %v7383_v32  ;;  %5038 = verf.f32 %v2527_v9  ;;  %v2614_v43 = vmul.f32 %v2582_v53, %v2486_v37  ;;  %v2584_v6 = vadd.f32 1.0, %v5025_v5  ;;  %v2489_v4 = vmul.f32 0.5, %v9212_v19 }
 0x31d   :  { %v2615_v44 = vmul.f32 %v2583_v3, %v2487_v1  ;;  %v2585_v24 = vadd.f32 1.0, %v5027_v15  ;;  %5040 = verf.f32 %v2528_v45  ;;  %v2530_v49 = vmul.f32 0.70710677, %v9247_v35 }
 0x31e   :  { %v7396_v25 = vsel %vm2356_vm11, %v2612_v60, 0.0  ;;  %v2531_v53 = vmul.f32 0.70710677, %v9250_v61  ;;  %v7401_v5 = vadd.f32 %v2643_v50, %v7019_v7  ;;  %v7406_v45 = vsel %vm2357_vm13, %v2613_v18, 0.0 }
 0x31f   :  { %v5029_v33 = vpop.eup %5028  ;;  %v2490_v1 = vmul.f32 0.5, %v9223_v31  ;;  %5042 = verf.f32 %v2529_v30  ;;  %v2532_v15 = vmul.f32 0.70710677, %v6894_v13  ;;  %v7413_v60 = vsel %vm2358_vm14, %v2614_v43, 0.0 }
 0x320   :  { %9251 = vst [vmem:[#allocation91_spill] sm:$0xff] %v7401_v5  ;;  %v5031_v19 = vpop.eup %5030  ;;  %v2616_v2 = vmul.f32 %v2584_v6, %v2488_v56  ;;  %v2491_v7 = vmul.f32 0.5, %v9228_v51  ;;  %v2533_v50 = vmul.f32 0.70710677, %v6932_v34  ;;  %v7420_v18 = vsel %vm2359_vm0, %v2615_v44, 0.0 }
 0x321   :  { %v2617_v31 = vmul.f32 %v2585_v24, %v2489_v4  ;;  %5044 = verf.f32 %v2530_v49  ;;  %v2586_v5 = vadd.f32 1.0, %v5029_v33  ;;  %v2587_v3 = vadd.f32 1.0, %v5031_v19 }
 0x322   :  { %v5033_v17 = vpop.eup %5032  ;;  %5046 = verf.f32 %v2531_v53  ;;  %v2534_v6 = vmul.f32 0.70710677, %v6938_v41  ;;  %v2492_v51 = vmul.f32 0.5, %v9230_v21  ;;  %v2493_v56 = vmul.f32 0.5, %v9232_v59 }
 0x323   :  { %v5035_v38 = vpop.eup %5034  ;;  %5048 = verf.f32 %v2532_v15  ;;  %v2535_v43 = vmul.f32 0.70710677, %v6980_v62  ;;  %v7430_v4 = vsel %vm2360_vm4, %v2616_v2, 0.0  ;;  %v2536_v33 = vmul.f32 0.70710677, %v6982_v12 }
 0x324   :  { %5050 = verf.f32 %v2533_v50  ;;  %v2588_v19 = vadd.f32 1.0, %v5033_v17  ;;  %v2589_v63 = vadd.f32 1.0, %v5035_v38  ;;  %v2494_v59 = vmul.f32 0.5, %v9237_v11 }
 0x325   :  { %v5037_v37 = vpop.eup %5036  ;;  %v7439_v9 = vsel %vm2361_vm5, %v2617_v31, 0.0  ;;  %v2618_v44 = vmul.f32 %v2586_v5, %v2490_v1  ;;  %v2619_v2 = vmul.f32 %v2587_v3, %v2491_v7  ;;  %5052 = verf.f32 %v2534_v6  ;;  %v9261_v7 = vld [vmem:[#allocation46_spill] sm:$0xff]  ;;  %v9263_v3 = vld [vmem:[#allocation47_spill] sm:$0xff] }
 0x326   :  { %v5039_v53 = vpop.eup %5038  ;;  %v2590_v49 = vadd.f32 1.0, %v5037_v37  ;;  %v2495_v50 = vmul.f32 0.5, %v9239_v16  ;;  %5054 = verf.f32 %v2535_v43  ;;  %v2537_v17 = vmul.f32 0.70710677, %v7035_v52 }
 0x327   :  { %v5041_v32 = vpop.eup %5040  ;;  %v2591_v38 = vadd.f32 1.0, %v5039_v53  ;;  %5056 = verf.f32 %v2536_v33  ;;  %v2538_v11 = vmul.f32 0.70710677, %v7037_v42  ;;  %v2620_v15 = vmul.f32 %v2588_v19, %v2492_v51 }
 0x328   :  { %v2621_v31 = vmul.f32 %v2589_v63, %v2493_v56  ;;  %v2496_v5 = vmul.f32 0.5, %v9241_v29  ;;  %v2539_v1 = vmul.f32 0.70710677, %v7102_v14  ;;  %vm9262_vm1 = vcmp.eq.s32.totalorder %v5964_v54, %v9261_v7  ;;  %v9274_v56 = vld [vmem:[#allocation51_spill] sm:$0xff] }
 0x329   :  { %v5043_v21 = vpop.eup %5042  ;;  %v7450_v16 = vsel %vm9262_vm1, %v2618_v44, 0.0  ;;  %vm9264_vm3 = vcmp.eq.s32.totalorder %v5964_v54, %v9263_v3  ;;  %v2592_v33 = vadd.f32 1.0, %v5041_v32  ;;  %v2622_v51 = vmul.f32 %v2590_v49, %v2494_v59  ;;  %v9269_v32 = vld [vmem:[#allocation49_spill] sm:$0xff] }
 0x32a   :  { %v7455_v6 = vsel %vm9264_vm3, %v2619_v2, 0.0  ;;  %v2497_v63 = vmul.f32 0.5, %v9245_v47  ;;  %5058 = verf.f32 %v2537_v17  ;;  %v2623_v30 = vmul.f32 %v2591_v38, %v2495_v50  ;;  %v9267_v2 = vld [vmem:[#allocation48_spill] sm:$0xff]  ;;  %v9271_v38 = vld [vmem:[#allocation50_spill] sm:$0xff] }
 0x32b   :  { %v5045_v53 = vpop.eup %5044  ;;  %v2593_v7 = vadd.f32 1.0, %v5043_v21  ;;  %v2498_v44 = vmul.f32 0.5, %v9247_v35  ;;  %5060 = verf.f32 %v2538_v11  ;;  %vm9268_vm6 = vcmp.eq.s32.totalorder %v5964_v54, %v9267_v2 }
 0x32c   :  { %v5047_v19 = vpop.eup %5046  ;;  %v7464_v3 = vsel %vm9268_vm6, %v2620_v15, 0.0  ;;  %vm9270_vm7 = vcmp.eq.s32.totalorder %v5964_v54, %v9269_v32  ;;  %5062 = verf.f32 %v2539_v1  ;;  %v2540_v47 = vmul.f32 0.70710677, %v7104_v39 }
 0x32d   :  { %v5049_v24 = vpop.eup %5048  ;;  %v7469_v49 = vsel %vm9270_vm7, %v2621_v31, 0.0  ;;  %v2624_v50 = vmul.f32 %v2592_v33, %v2496_v5  ;;  %v2594_v21 = vadd.f32 1.0, %v5045_v53  ;;  %v2499_v35 = vmul.f32 0.5, %v9250_v61 }
 0x32e   :  { %v5051_v59 = vpop.eup %5050  ;;  %v2541_v17 = vmul.f32 0.70710677, %v7186_v58  ;;  %vm9272_vm11 = vcmp.eq.s32.totalorder %v5964_v54, %v9271_v38  ;;  %v2595_v32 = vadd.f32 1.0, %v5047_v19  ;;  %v2500_v31 = vmul.f32 0.5, %v6894_v13  ;;  %v9277_v38 = vld [vmem:[#allocation57_spill] sm:$0xff]  ;;  %v9278_v13 = vld [vmem:[#allocation52_spill] sm:$0xff] }
 0x32f   :  { %v7477_v11 = vsel %vm9272_vm11, %v2622_v51, 0.0  ;;  %v5053_v1 = vpop.eup %5052  ;;  %vm9275_vm13 = vcmp.eq.s32.totalorder %v5964_v54, %v9274_v56  ;;  %v2625_v33 = vmul.f32 %v2593_v7, %v2497_v63  ;;  %v2501_v61 = vmul.f32 0.5, %v6932_v34 }
 0x330   :  { %v7484_v5 = vsel %vm9275_vm13, %v2623_v30, 0.0  ;;  %v2542_v53 = vmul.f32 0.70710677, %v7188_v27  ;;  %v5055_v37 = vpop.eup %5054  ;;  %v2596_v29 = vadd.f32 1.0, %v5049_v24  ;;  %v2597_v43 = vadd.f32 1.0, %v5051_v59  ;;  %v9281_v24 = vld [vmem:[#allocation53_spill] sm:$0xff] }
 0x331   :  { %9276 = vst [vmem:[#allocation37_spill] sm:$0xff] %v7484_v5  ;;  %5064 = verf.f32 %v2540_v47  ;;  %v5057_v19 = vpop.eup %5056  ;;  %vm9279_vm14 = vcmp.eq.s32.totalorder %v5964_v54, %v9278_v13  ;;  %v2626_v56 = vmul.f32 %v2594_v21, %v2498_v44  ;;  %v2627_v63 = vmul.f32 %v2595_v32, %v2499_v35  ;;  %v3729_v44 = vld [vmem:[%s8554_s2] sm:$0xff] }
 0x332   :  { %v7492_v2 = vsel %vm9279_vm14, %v2624_v50, 0.0  ;;  %5066 = verf.f32 %v2541_v17  ;;  %v2502_v34 = vmul.f32 0.5, %v6938_v41  ;;  %v2598_v7 = vadd.f32 1.0, %v5053_v1  ;;  %v3730_v41 = vld [vmem:[%s8554_s2 + $0x8] sm:$0xff] }
 0x333   :  { %v2503_v5 = vmul.f32 0.5, %v6980_v62  ;;  %vm9282_vm0 = vcmp.eq.s32.totalorder %v5964_v54, %v9281_v24  ;;  %v2599_v13 = vadd.f32 1.0, %v5055_v37  ;;  %5068 = verf.f32 %v2542_v53  ;;  %v3731_v62 = vld [vmem:[%s8554_s2 + $0x10] sm:$0xff]  ;;  %v3732_v37 = vld [vmem:[%s8554_s2 + $0x18] sm:$0xff] }
 0x334   :  { %v7500_v47 = vsel %vm9282_vm0, %v2625_v33, 0.0  ;;  %v5059_v50 = vpop.eup %5058  ;;  %v2628_v21 = vmul.f32 %v2596_v29, %v2500_v31  ;;  %v2629_v35 = vmul.f32 %v2597_v43, %v2501_v61  ;;  %v2600_v17 = vadd.f32 1.0, %v5057_v19  ;;  %v9284_v33 = vld [vmem:[#allocation54_spill] sm:$0xff]  ;;  %v9286_v24 = vld [vmem:[#allocation100_spill] sm:$0xff] }
 0x335   :  { %v4746_v32 = vpack.c.bf16 %v3730_v41, %v3729_v44  ;;  %v5061_v1 = vpop.eup %5060  ;;  %vm9285_vm4 = vcmp.eq.s32.totalorder %v5964_v54, %v9284_v33  ;;  %v2504_v15 = vmul.f32 0.5, %v6982_v12  ;;  %v4750_v59 = vpack.c.bf16 %v3732_v37, %v3731_v62  ;;  %v9288_v44 = vld [vmem:[#allocation101_spill] sm:$0xff]  ;;  %v9312_v37 = vld [vmem:[#allocation76_spill] sm:$0xff] }
 0x336   :  { %v7518_v53 = vsel %vm9285_vm4, %v2626_v56, 0.0  ;;  %v5063_v30 = vpop.eup %5062  ;;  %vm9287_vm5 = vcmp.eq.s32.totalorder %v5964_v54, %v9110_v55  ;;  %v2630_v29 = vmul.f32 %v2598_v7, %v2502_v34  ;;  %v2505_v31 = vmul.f32 0.5, %v7035_v52 }
 0x337   :  { %v7525_v43 = vsel %vm9287_vm5, %v2627_v63, 0.0  ;;  %v2543_v61 = vmul.f32 0.70710677, %v7240_v26  ;;  %4747 = vmatprep.subr.bf16.mxu1 %v4746_v32  ;;  %v2631_v19 = vmul.f32 %v2599_v13, %v2503_v5  ;;  %v2601_v33 = vadd.f32 1.0, %v5059_v50 }
 0x338   :  { %4749 = vmatpush3.bf16.msra.mxu1 %v4746_v32  ;;  %vm9289_vm1 = vcmp.eq.s32.totalorder %v5964_v54, %v9117_v8  ;;  %vm9290_vm3 = vcmp.eq.s32.totalorder %v5964_v54, %v9118_v36  ;;  %v2632_v52 = vmul.f32 %v2600_v17, %v2504_v15  ;;  %v2602_v63 = vadd.f32 1.0, %v5061_v1 }
 0x339   :  { %v7534_v12 = vsel %vm9289_vm1, %v2628_v21, 0.0  ;;  %v7539_v55 = vsel %vm9290_vm3, %v2629_v35, 0.0  ;;  %4751 = vmatprep.subr.bf16.mxu1 %v4750_v59  ;;  %v2506_v34 = vmul.f32 0.5, %v7037_v42  ;;  %v2507_v7 = vmul.f32 0.5, %v7102_v14 }
 0x33a   :  { %v2603_v13 = vadd.f32 1.0, %v5063_v30  ;;  %vm9291_vm6 = vcmp.eq.s32.totalorder %v5964_v54, %v9123_v22  ;;  %5070 = verf.f32 %v2543_v61  ;;  %v2544_v15 = vmul.f32 0.70710677, %v7242_v10 }
 0x33b   :  { %v5065_v62 = vpop.eup %5064  ;;  %v7547_v8 = vsel %vm9291_vm6, %v2630_v29, 0.0  ;;  %vm9292_vm7 = vcmp.eq.s32.totalorder %v5964_v54, %v9124_v23  ;;  %v2633_v42 = vmul.f32 %v2601_v33, %v2505_v31  ;;  %v2508_v14 = vmul.f32 0.5, %v7104_v39 }
 0x33c   :  { %v5067_v50 = vpop.eup %5066  ;;  %v7554_v21 = vsel %vm9292_vm7, %v2631_v19, 0.0  ;;  %v2509_v30 = vmul.f32 0.5, %v7186_v58  ;;  %4753 = vmatpush3.bf16.msra.mxu1 %v4750_v59  ;;  %vm9293_vm11 = vcmp.eq.s32.totalorder %v5964_v54, %v9128_v28  ;;  %v2634_v35 = vmul.f32 %v2602_v63, %v2506_v34  ;;  %v9296_v28 = vld [vmem:[#allocation61_spill] sm:$0xff] }
 0x33d   :  { %v7561_v22 = vsel %vm9293_vm11, %v2632_v52, 0.0  ;;  %v5069_v23 = vpop.eup %5068  ;;  %v2635_v29 = vmul.f32 %v2603_v13, %v2507_v7  ;;  %v2510_v31 = vmul.f32 0.5, %v7188_v27  ;;  %v2604_v39 = vadd.f32 1.0, %v5065_v62  ;;  %v9298_v63 = vld [vmem:[#allocation73_spill] sm:$0xff]  ;;  %v9300_v27 = vld [vmem:[#allocation62_spill] sm:$0xff] }
 0x33e   :  { %v2605_v58 = vadd.f32 1.0, %v5067_v50  ;;  %5072 = verf.f32 %v2544_v15  ;;  %v9295_v59 = vmov 0   ;;  %vm9297_vm14 = vcmp.eq.s32.totalorder %v5964_v54, %v9296_v28 }
 0x33f   :  { %v2930_v1 = vpop.xlane.xlu0 %2929  ;;  %v7570_v33 = vsel %vm9297_vm14, %v2633_v42, 0.0  ;;  %v2511_v52 = vmul.f32 0.5, %v7240_v26  ;;  %v9299_v34 = vmul.u32 2, %v9298_v63  ;;  %vm9301_vm0 = vcmp.eq.s32.totalorder %v5964_v54, %v9300_v27 }
 0x340   :  { %v3025_v61 = vmul.f32 0.70710677, %v2930_v1  ;;  %vm3249_vm13 = vcmp.ge.f32.partialorder %v2930_v1, 0.0  ;;  %v7578_v13 = vsel %vm9301_vm0, %v2634_v35, 0.0  ;;  %v2606_v17 = vadd.f32 1.0, %v5069_v23  ;;  %v9316_v23 = vld [vmem:[#allocation66_spill] sm:$0xff] }
 0x341   :  { %v3281_v19 = vsel %vm3249_vm13, 1, %v9295_v59  ;;  %v7583_v42 = vmul.f32 0.5, %v7242_v10  ;;  %v2636_v35 = vmul.f32 %v2604_v39, %v2508_v14  ;;  %v9308_v14 = vld [vmem:[#allocation74_spill] sm:$0xff]  ;;  %v9313_v56 = vmul.u32 2, %v9312_v37 }
 0x342   :  { %5074 = verf.f32 %v3025_v61  ;;  %v3313_v7 = vadd.s32 %v3281_v19, %v9299_v34  ;;  %v9305_v61 = vld [vmem:[#allocation63_spill] sm:$0xff]  ;;  %v2637_v34 = vmul.f32 %v2605_v58, %v2509_v30  ;;  %v2638_v5 = vmul.f32 %v2606_v17, %v2510_v31  ;;  %v9314_v17 = vld [vmem:[#allocation65_spill] sm:$0xff]  ;;  %v9328_v39 = vld [vmem:[#allocation6_spill] sm:$0xff] }
 0x343   :  { %v2932_v36 = vpop.xlane.xlu1 %2931  ;;  %vm9306_vm5 = vcmp.eq.s32.totalorder %v5964_v54, %v9305_v61  ;;  %v9309_v30 = vmul.u32 2, %v9308_v14  ;;  %v9311_v61 = vld [vmem:[#allocation7_spill] sm:$0xff]  ;;  %vm9315_vm6 = vcmp.eq.s32.totalorder %v5964_v54, %v9314_v17  ;;  %vm9317_vm7 = vcmp.eq.s32.totalorder %v5964_v54, %v9316_v23 }
 0x344   :  { %v3026_v28 = vmul.f32 0.70710677, %v2932_v36  ;;  %vm3250_vm4 = vcmp.ge.f32.partialorder %v2932_v36, 0.0  ;;  %v7585_v26 = vadd.s32 1, %v3313_v7  ;;  %v7590_v19 = vsel %vm9306_vm5, %v2635_v29, 0.0  ;;  %v7593_v15 = vpop.xlane.xlu0 %2933  ;;  %v5071_v7 = vpop.eup %5070 }
 0x345   :  { %v3282_v27 = vsel %vm3250_vm4, 1, %v9295_v59  ;;  %v3027_v10 = vmul.f32 0.70710677, %v7593_v15  ;;  %vm3251_vm1 = vcmp.ge.f32.partialorder %v7593_v15, 0.0  ;;  %v7613_v31 = vsel %vm9315_vm6, %v2636_v35, 0.0  ;;  %v9323_v35 = vld [vmem:[#allocation67_spill] sm:$0xff] }
 0x346   :  { %9304 = vst [vmem:[#allocation92_spill] sm:$0xff] %v7585_v26  ;;  %5076 = verf.f32 %v3026_v28  ;;  %v3283_v41 = vsel %vm3251_vm1, 1, %v9295_v59  ;;  %vm3377_vm3 = vcmp.eq.s32.totalorder %v5964_v54, %v7585_v26  ;;  %v3314_v29 = vadd.s32 %v3282_v27, %v9309_v30 }
 0x347   :  { %5078 = verf.f32 %v3027_v10  ;;  %v3409_v28 = vsel %vm3377_vm3, %v9311_v61, 0.0  ;;  %v3315_v51 = vadd.s32 %v3283_v41, %v9313_v56  ;;  %v7618_v27 = vsel %vm9317_vm7, %v2637_v34, 0.0  ;;  %v9325_v34 = vld [vmem:[#allocation102_spill] sm:$0xff]  ;;  %v9331_v56 = vld [vmem:[#allocation9_spill] sm:$0xff] }
 0x348   :  { %3441 = vadd.xlane.f32.xlu0 %v3409_v28  ;;  %v7621_v58 = vadd.s32 1, %v3314_v29  ;;  %v2607_v26 = vadd.f32 1.0, %v5071_v7  ;;  %v5073_v17 = vpop.eup %5072  ;;  %vm9324_vm11 = vcmp.eq.s32.totalorder %v5964_v54, %v9323_v35  ;;  %v7636_v23 = vadd.f32 %v7396_v25, %v9325_v34  ;;  %v9326_v7 = vld [vmem:[#allocation103_spill] sm:$0xff]  ;;  %v9329_v35 = vld [vmem:[#allocation104_spill] sm:$0xff]  ;;  %v9333_v34 = vld [vmem:[#allocation106_spill] sm:$0xff] }
 0x349   :  { %v7625_v41 = vadd.s32 1, %v3315_v51  ;;  %v7630_v62 = vsel %vm9324_vm11, %v2638_v5, 0.0  ;;  %v7640_v29 = vadd.f32 %v7406_v45, %v9326_v7  ;;  %v7651_v10 = vadd.f32 %v7413_v60, %v9329_v35  ;;  %v9339_v25 = vld [vmem:[#allocation107_spill] sm:$0xff] }
 0x34a   :  { %9319 = vst [vmem:[#allocation38_spill] sm:$0xff] %v7621_v58  ;;  %vm3378_vm13 = vcmp.eq.s32.totalorder %v5964_v54, %v7621_v58  ;;  %v2993_v50 = vmul.f32 0.5, %v2930_v1  ;;  %v2608_v51 = vadd.f32 1.0, %v5073_v17  ;;  %v9334_v17 = vmul.u32 2, %v9240_v20 }
 0x34b   :  { %9322 = vst [vmem:[#allocation94_spill] sm:$0xff] %v7625_v41  ;;  %v3410_v5 = vsel %vm3378_vm13, %v9328_v39, 0.0  ;;  %vm3379_vm14 = vcmp.eq.s32.totalorder %v5964_v54, %v7625_v41  ;;  %v2639_v39 = vmul.f32 %v2607_v26, %v2511_v52  ;;  %v7671_v41 = vadd.f32 %v7430_v4, %v9333_v34 }
 0x34c   :  { %v5075_v28 = vpop.eup %5074  ;;  %v7654_v7 = vpop.xlane.xlu1 %2935  ;;  %3443 = vadd.xlane.f32.xlu1 %v3410_v5  ;;  %v3411_v58 = vsel %vm3379_vm14, %v9331_v56, 0.0  ;;  %v2994_v26 = vmul.f32 0.5, %v2932_v36  ;;  %vm9335_vm5 = vcmp.eq.s32.totalorder %v5964_v54, %v9298_v63  ;;  %v9336_v4 = vmul.u32 2, %v9246_v0  ;;  %v9341_v63 = vld [vmem:[#allocation68_spill] sm:$0xff] }
 0x34d   :  { %v3089_v45 = vadd.f32 1.0, %v5075_v28  ;;  %v3028_v61 = vmul.f32 0.70710677, %v7654_v7  ;;  %vm3252_vm0 = vcmp.ge.f32.partialorder %v7654_v7, 0.0  ;;  %3445 = vadd.xlane.f32.xlu0 %v3411_v58  ;;  %v9332_v28 = vld [vmem:[#allocation105_spill] sm:$0xff]  ;;  %v2995_v32 = vmul.f32 0.5, %v7593_v15 }
 0x34e   :  { %v3284_v35 = vsel %vm3252_vm0, 1, %v9295_v59  ;;  %v7663_v1 = vpop.xlane.xlu0 %2937  ;;  %v7667_v5 = vadd.f32 %v7420_v18, %v9332_v28  ;;  %vm9342_vm1 = vcmp.eq.s32.totalorder %v5964_v54, %v9341_v63  ;;  %vm9345_vm6 = vcmp.eq.s32.totalorder %v5964_v54, %v9308_v14  ;;  %v9354_v63 = vld [vmem:[#allocation112_spill] sm:$0xff] }
 0x34f   :  { %v3121_v60 = vmul.f32 %v3089_v45, %v2993_v50  ;;  %5080 = verf.f32 %v3028_v61  ;;  %v3029_v56 = vmul.f32 0.70710677, %v7663_v1  ;;  %vm3253_vm4 = vcmp.ge.f32.partialorder %v7663_v1, 0.0  ;;  %v9337_v61 = vld [vmem:[#allocation87_spill] sm:$0xff] }
 0x350   :  { %v5077_v52 = vpop.eup %5076  ;;  %v3285_v58 = vsel %vm3253_vm4, 1, %v9295_v59  ;;  %v3316_v45 = vadd.s32 %v3284_v35, %v9334_v17  ;;  %vm9353_vm4 = vcmp.eq.s32.totalorder %v5964_v54, %v9312_v37 }
 0x351   :  { %v3090_v50 = vadd.f32 1.0, %v5077_v52  ;;  %v3153_v18 = vsel %vm9335_vm5, %v3121_v60, 0.0  ;;  %v5079_v28 = vpop.eup %5078  ;;  %5082 = verf.f32 %v3029_v56  ;;  %v3317_v36 = vadd.s32 %v3285_v58, %v9336_v4 }
 0x352   :  { %v7684_v34 = vadd.f32 %v3153_v18, %v9337_v61  ;;  %v7688_v52 = vadd.f32 %v7439_v9, %v9339_v25  ;;  %v3091_v35 = vadd.f32 1.0, %v5079_v28  ;;  %v7691_v17 = vadd.s32 1, %v3316_v45  ;;  %v9344_v18 = vld [vmem:[#allocation108_spill] sm:$0xff]  ;;  %v9346_v25 = vld [vmem:[#allocation109_spill] sm:$0xff]  ;;  %v9352_v28 = vld [vmem:[#allocation111_spill] sm:$0xff] }
 0x353   :  { %v3122_v30 = vmul.f32 %v3090_v50, %v2994_v26  ;;  %v7696_v60 = vsel %vm9342_vm1, %v2639_v39, 0.0  ;;  %v2640_v56 = vmul.f32 %v2608_v51, %v7583_v42  ;;  %v7699_v58 = vadd.s32 1, %v3317_v36  ;;  %v9347_v26 = vld [vmem:[#allocation88_spill] sm:$0xff] }
 0x354   :  { %9338 = vst [vmem:[#allocation80_spill] sm:$0xff] %v7684_v34  ;;  %9340 = vst [vmem:[#allocation96_spill] sm:$0xff] %v7691_v17  ;;  %v7703_v4 = vadd.f32 %v7450_v16, %v9344_v18  ;;  %v3123_v15 = vmul.f32 %v3091_v35, %v2995_v32  ;;  %vm3380_vm7 = vcmp.eq.s32.totalorder %v5964_v54, %v7691_v17  ;;  %v7717_v51 = vpop.xlane.xlu1 %2939  ;;  %v9349_v50 = vld [vmem:[#allocation8_spill] sm:$0xff]  ;;  %v9350_v32 = vld [vmem:[#allocation110_spill] sm:$0xff] }
 0x355   :  { %9343 = vst [vmem:[#allocation39_spill] sm:$0xff] %v7699_v58  ;;  %v3154_v9 = vsel %vm9345_vm6, %v3122_v30, 0.0  ;;  %v7712_v39 = vadd.f32 %v7455_v6, %v9346_v25  ;;  %v3412_v16 = vsel %vm3380_vm7, %v9349_v50, 0.0  ;;  %vm3381_vm11 = vcmp.eq.s32.totalorder %v5964_v54, %v7699_v58  ;;  %v9351_v30 = vld [vmem:[#allocation11_spill] sm:$0xff]  ;;  %v9356_v25 = vld [vmem:[#allocation37_spill] sm:$0xff]  ;;  %v9369_v34 = vld [vmem:[#allocation118_spill] sm:$0xff] }
 0x356   :  { %v7715_v42 = vadd.f32 %v3154_v9, %v9347_v26  ;;  %v7727_v14 = vadd.f32 %v7464_v3, %v9350_v32  ;;  %v3030_v6 = vmul.f32 0.70710677, %v7717_v51  ;;  %vm3254_vm0 = vcmp.ge.f32.partialorder %v7717_v51, 0.0  ;;  %3447 = vadd.xlane.f32.xlu1 %v3412_v16  ;;  %v2942_v35 = vpop.xlane.xlu0 %2941  ;;  %v9355_v9 = vld [vmem:[#allocation113_spill] sm:$0xff] }
 0x357   :  { %v3413_v45 = vsel %vm3381_vm11, %v9351_v30, 0.0  ;;  %v7737_v36 = vadd.f32 %v7469_v49, %v9352_v28  ;;  %v3286_v61 = vsel %vm3254_vm0, 1, %v9295_v59  ;;  %v3155_v3 = vsel %vm9353_vm4, %v3123_v15, 0.0  ;;  %v9357_v49 = vld [vmem:[#allocation114_spill] sm:$0xff]  ;;  %v9358_v30 = vld [vmem:[#allocation69_spill] sm:$0xff]  ;;  %v9361_v15 = vld [vmem:[#allocation84_spill] sm:$0xff] }
 0x358   :  { %9348 = vst [vmem:[#allocation55_spill] sm:$0xff] %v7715_v42  ;;  %3449 = vadd.xlane.f32.xlu0 %v3413_v45  ;;  %v7745_v18 = vadd.f32 %v7477_v11, %v9354_v63  ;;  %v7749_v26 = vadd.f32 %v9356_v25, %v9355_v9  ;;  %5084 = verf.f32 %v3030_v6  ;;  %v3031_v50 = vmul.f32 0.70710677, %v2942_v35  ;;  %v9363_v63 = vld [vmem:[#allocation91_spill] sm:$0xff]  ;;  %v9365_v25 = vld [vmem:[#allocation86_spill] sm:$0xff] }
 0x359   :  { %vm3255_vm5 = vcmp.ge.f32.partialorder %v2942_v35, 0.0  ;;  %v7753_v16 = vadd.f32 %v7492_v2, %v9357_v49  ;;  %v5081_v32 = vpop.eup %5080  ;;  %vm9359_vm1 = vcmp.eq.s32.totalorder %v5964_v54, %v9358_v30  ;;  %v9362_v45 = vmul.u32 2, %v9361_v15  ;;  %v9367_v49 = vld [vmem:[#allocation115_spill] sm:$0xff] }
 0x35a   :  { %v7758_v37 = vsel %vm9359_vm1, %v2640_v56, 0.0  ;;  %v3287_v11 = vsel %vm3255_vm5, 1, %v9295_v59  ;;  %v7764_v9 = vadd.f32 %v3155_v3, %v9363_v63  ;;  %v3092_v6 = vadd.f32 1.0, %v5081_v32  ;;  %v9370_v3 = vld [vmem:[#allocation119_spill] sm:$0xff]  ;;  %v9372_v63 = vld [vmem:[#allocation120_spill] sm:$0xff] }
 0x35b   :  { %9360 = vst [vmem:[#allocation81_spill] sm:$0xff] %v7758_v37  ;;  %v3318_v28 = vadd.s32 %v3286_v61, %v9362_v45  ;;  %5086 = verf.f32 %v3031_v50  ;;  %v9366_v58 = vmul.u32 2, %v9365_v25  ;;  %v7770_v17 = vadd.f32 %v7500_v47, %v9367_v49  ;;  %v5083_v30 = vpop.eup %5082  ;;  %v2946_v45 = vpop.xlane.xlu0 %2945  ;;  %v9395_v37 = vld [vmem:[#allocation95_spill] sm:$0xff] }
 0x35c   :  { %9364 = vst [vmem:[#allocation98_spill] sm:$0xff] %v7764_v9  ;;  %v2996_v56 = vmul.f32 0.5, %v7654_v7  ;;  %v7777_v61 = vadd.f32 %v7518_v53, %v9369_v34  ;;  %v7781_v32 = vadd.f32 %v7525_v43, %v9370_v3  ;;  %v2997_v50 = vmul.f32 0.5, %v7663_v1  ;;  %v9373_v53 = vld [vmem:[#allocation121_spill] sm:$0xff] }
 0x35d   :  { %v3319_v2 = vadd.s32 %v3287_v11, %v9366_v58  ;;  %v7773_v42 = vadd.s32 1, %v3318_v28  ;;  %v3093_v58 = vadd.f32 1.0, %v5083_v30  ;;  %v2944_v11 = vpop.xlane.xlu1 %2943  ;;  %v7788_v7 = vadd.f32 %v7534_v12, %v9372_v63  ;;  %v9375_v12 = vld [vmem:[#allocation10_spill] sm:$0xff] }
 0x35e   :  { %v3124_v28 = vmul.f32 %v3092_v6, %v2996_v56  ;;  %v3032_v49 = vmul.f32 0.70710677, %v2944_v11  ;;  %vm3256_vm6 = vcmp.ge.f32.partialorder %v2944_v11, 0.0  ;;  %v7792_v34 = vadd.f32 %v7539_v55, %v9373_v53  ;;  %v9376_v6 = vld [vmem:[#allocation13_spill] sm:$0xff]  ;;  %v9379_v63 = vld [vmem:[#allocation90_spill] sm:$0xff] }
 0x35f   :  { %9368 = vst [vmem:[#allocation40_spill] sm:$0xff] %v7773_v42  ;;  %v7784_v47 = vadd.s32 1, %v3319_v2  ;;  %v3125_v43 = vmul.f32 %v3093_v58, %v2997_v50  ;;  %v3288_v3 = vsel %vm3256_vm6, 1, %v9295_v59  ;;  %v3033_v1 = vmul.f32 0.70710677, %v2946_v45  ;;  %v9377_v56 = vld [vmem:[#allocation89_spill] sm:$0xff] }
 0x360   :  { %9374 = vst [vmem:[#allocation41_spill] sm:$0xff] %v7792_v34  ;;  %vm3257_vm0 = vcmp.ge.f32.partialorder %v2946_v45, 0.0  ;;  %5088 = verf.f32 %v3032_v49  ;;  %vm8893_vm4 = vcmp.eq.s32.totalorder %v5964_v54, %v7773_v42  ;;  %v9378_v50 = vmul.u32 2, %v9377_v56  ;;  %v9383_v42 = vld [vmem:[#allocation70_spill] sm:$0xff] }
 0x361   :  { %9371 = vst [vmem:[#allocation56_spill] sm:$0xff] %v7784_v47  ;;  %v3289_v2 = vsel %vm3257_vm0, 1, %v9295_v59  ;;  %vm8892_vm5 = vcmp.eq.s32.totalorder %v5964_v54, %v7784_v47  ;;  %5090 = verf.f32 %v3033_v1  ;;  %v3414_v55 = vsel %vm8893_vm4, %v9375_v12, 0.0  ;;  %v7822_v9 = vpop.xlane.xlu1 %2947 }
 0x362   :  { %v3415_v30 = vsel %vm8892_vm5, %v9376_v6, 0.0  ;;  %v3320_v58 = vadd.s32 %v3288_v3, %v9378_v50  ;;  %3451 = vadd.xlane.f32.xlu1 %v3414_v55  ;;  %v9380_v49 = vmul.u32 2, %v9379_v63  ;;  %vm9381_vm1 = vcmp.eq.s32.totalorder %v5964_v54, %v9240_v20  ;;  %v5085_v6 = vpop.eup %5084  ;;  %v9388_v20 = vld [vmem:[#allocation71_spill] sm:$0xff] }
 0x363   :  { %3453 = vadd.xlane.f32.xlu0 %v3415_v30  ;;  %v3156_v1 = vsel %vm9381_vm1, %v3124_v28, 0.0  ;;  %vm9382_vm6 = vcmp.eq.s32.totalorder %v5964_v54, %v9246_v0  ;;  %v7820_v47 = vadd.f32 %v7547_v8, %v9383_v42  ;;  %v7834_v28 = vadd.f32 %v7554_v21, %v9388_v20 }
 0x364   :  { %v3321_v53 = vadd.s32 %v3289_v2, %v9380_v49  ;;  %v3157_v12 = vsel %vm9382_vm6, %v3125_v43, 0.0  ;;  %v7824_v3 = vadd.s32 1, %v3320_v58  ;;  %v7827_v55 = vadd.f32 %v3156_v1, %v7636_v23 }
 0x365   :  { %9384 = vst [vmem:[#allocation42_spill] sm:$0xff] %v7820_v47  ;;  %v7830_v2 = vadd.f32 %v3157_v12, %v7640_v29  ;;  %9389 = vst [vmem:[#allocation46_spill] sm:$0xff] %v7834_v28  ;;  %v2998_v0 = vmul.f32 0.5, %v7717_v51  ;;  %v3094_v43 = vadd.f32 1.0, %v5085_v6  ;;  %v3034_v8 = vmul.f32 0.70710677, %v7822_v9  ;;  %v5087_v42 = vpop.eup %5086  ;;  %v7844_v21 = vpop.xlane.xlu0 %2949 }
 0x366   :  { %9385 = vst [vmem:[#allocation43_spill] sm:$0xff] %v7824_v3  ;;  %9386 = vst [vmem:[#allocation44_spill] sm:$0xff] %v7827_v55  ;;  %vm3258_vm0 = vcmp.ge.f32.partialorder %v7822_v9, 0.0  ;;  %v2999_v30 = vmul.f32 0.5, %v2942_v35  ;;  %vm8888_vm1 = vcmp.eq.s32.totalorder %v5964_v54, %v7824_v3  ;;  %v7842_v23 = vadd.s32 1, %v3321_v53  ;;  %v9391_v51 = vld [vmem:[#allocation12_spill] sm:$0xff]  ;;  %v7861_v20 = vpop.xlane.xlu1 %2951 }
 0x367   :  { %9387 = vst [vmem:[#allocation45_spill] sm:$0xff] %v7830_v2  ;;  %v3290_v50 = vsel %vm3258_vm0, 1, %v9295_v59  ;;  %v3095_v29 = vadd.f32 1.0, %v5087_v42  ;;  %v3000_v58 = vmul.f32 0.5, %v2944_v11  ;;  %5092 = verf.f32 %v3034_v8  ;;  %v3733_v11 = vld [vmem:[%s8554_s2 + $0x20] sm:$0xff]  ;;  %v3734_v53 = vld [vmem:[%s8554_s2 + $0x28] sm:$0xff] }
 0x368   :  { %9390 = vst [vmem:[#allocation47_spill] sm:$0xff] %v7842_v23  ;;  %v3416_v49 = vsel %vm8888_vm1, %v9391_v51, 0.0  ;;  %v3126_v1 = vmul.f32 %v3094_v43, %v2998_v0  ;;  %v3035_v35 = vmul.f32 0.70710677, %v7844_v21  ;;  %vm3259_vm6 = vcmp.ge.f32.partialorder %v7844_v21, 0.0  ;;  %v9392_v0 = vld [vmem:[#allocation5_spill] sm:$0xff] }
 0x369   :  { %3455 = vadd.xlane.f32.xlu1 %v3416_v49  ;;  %vm8891_vm0 = vcmp.eq.s32.totalorder %v5964_v54, %v7842_v23  ;;  %v3001_v12 = vmul.f32 0.5, %v2946_v45  ;;  %v3291_v6 = vsel %vm3259_vm6, 1, %v9295_v59  ;;  %v9393_v8 = vld [vmem:[#allocation93_spill] sm:$0xff]  ;;  %v3127_v49 = vmul.f32 %v3095_v29, %v2999_v30 }
 0x36a   :  { %v3417_v43 = vsel %vm8891_vm0, %v9392_v0, 0.0  ;;  %v9394_v42 = vmul.u32 2, %v9393_v8  ;;  %5094 = verf.f32 %v3035_v35  ;;  %v3036_v3 = vmul.f32 0.70710677, %v7861_v20  ;;  %v5089_v45 = vpop.eup %5088 }
 0x36b   :  { %vm3260_vm1 = vcmp.ge.f32.partialorder %v7861_v20, 0.0  ;;  %3457 = vadd.xlane.f32.xlu0 %v3417_v43  ;;  %v9396_v28 = vmul.u32 2, %v9395_v37  ;;  %v4754_v23 = vpack.c.bf16 %v3734_v53, %v3733_v11  ;;  %v5091_v0 = vpop.eup %5090  ;;  %v3096_v34 = vadd.f32 1.0, %v5089_v45  ;;  %v9400_v53 = vld [vmem:[#allocation14_spill] sm:$0xff] }
 0x36c   :  { %v3322_v51 = vadd.s32 %v3290_v50, %v9394_v42  ;;  %v3292_v2 = vsel %vm3260_vm1, 1, %v9295_v59  ;;  %5096 = verf.f32 %v3036_v3  ;;  %v9397_v50 = vld [vmem:[#allocation97_spill] sm:$0xff]  ;;  %vm9399_vm6 = vcmp.eq.s32.totalorder %v5964_v54, %v9361_v15  ;;  %v3735_v15 = vld [vmem:[%s8554_s2 + $0x30] sm:$0xff] }
 0x36d   :  { %v3323_v47 = vadd.s32 %v3291_v6, %v9396_v28  ;;  %v9398_v30 = vmul.u32 2, %v9397_v50  ;;  %v3158_v35 = vsel %vm9399_vm6, %v3126_v1, 0.0  ;;  %v3097_v43 = vadd.f32 1.0, %v5091_v0  ;;  %4755 = vmatprep.subr.bf16.mxu1 %v4754_v23 }
 0x36e   :  { %v7872_v55 = vadd.s32 1, %v3322_v51  ;;  %v7886_v28 = vadd.f32 %v3158_v35, %v7651_v10  ;;  %v3128_v11 = vmul.f32 %v3096_v34, %v3000_v58  ;;  %4757 = vmatpush3.bf16.msra.mxu1 %v4754_v23  ;;  %vm9402_vm6 = vcmp.eq.s32.totalorder %v5964_v54, %v9365_v25  ;;  %v7903_v58 = vpop.xlane.xlu0 %2953  ;;  %v9403_v51 = vld [vmem:[#allocation16_spill] sm:$0xff] }
 0x36f   :  { %v3324_v29 = vadd.s32 %v3292_v2, %v9398_v30  ;;  %v7883_v42 = vadd.s32 1, %v3323_v47  ;;  %v3736_v47 = vld [vmem:[%s8554_s2 + $0x38] sm:$0xff]  ;;  %v3159_v10 = vsel %vm9402_vm6, %v3127_v49, 0.0  ;;  %v3129_v34 = vmul.f32 %v3097_v43, %v3001_v12  ;;  %v9404_v12 = vld [vmem:[#allocation59_spill] sm:$0xff] }
 0x370   :  { %vm8890_vm1 = vcmp.eq.s32.totalorder %v5964_v54, %v7872_v55  ;;  %v4758_v23 = vpack.c.bf16 %v3736_v47, %v3735_v15  ;;  %v7908_v1 = vadd.f32 %v3159_v10, %v7667_v5  ;;  %v3037_v6 = vmul.f32 0.70710677, %v7903_v58  ;;  %v9408_v43 = vld [vmem:[#allocation99_spill] sm:$0xff]  ;;  %v7936_v47 = vpop.xlane.xlu1 %2955 }
 0x371   :  { %v3418_v3 = vsel %vm8890_vm1, %v9400_v53, 0.0  ;;  %v7892_v2 = vadd.s32 1, %v3324_v29  ;;  %vm8896_vm1 = vcmp.eq.s32.totalorder %v5964_v54, %v7883_v42  ;;  %vm3261_vm0 = vcmp.ge.f32.partialorder %v7903_v58, 0.0  ;;  %v5093_v45 = vpop.eup %5092 }
 0x372   :  { %3459 = vadd.xlane.f32.xlu1 %v3418_v3  ;;  %v3419_v25 = vsel %vm8896_vm1, %v9403_v51, 0.0  ;;  %v7918_v49 = vadd.f32 %v7561_v22, %v9404_v12  ;;  %v3293_v0 = vsel %vm3261_vm0, 1, %v9295_v59  ;;  %4759 = vmatprep.subr.bf16.mxu1 %v4758_v23  ;;  %vm9405_vm5 = vcmp.eq.s32.totalorder %v5964_v54, %v9377_v56  ;;  %v9407_v22 = vld [vmem:[#allocation15_spill] sm:$0xff]  ;;  %v2958_v12 = vpop.xlane.xlu0 %2957 }
 0x373   :  { %9401 = vst [vmem:[#allocation48_spill] sm:$0xff] %v7892_v2  ;;  %3461 = vadd.xlane.f32.xlu0 %v3419_v25  ;;  %vm8895_vm6 = vcmp.eq.s32.totalorder %v5964_v54, %v7892_v2  ;;  %v3160_v5 = vsel %vm9405_vm5, %v3128_v11, 0.0  ;;  %vm9406_vm4 = vcmp.eq.s32.totalorder %v5964_v54, %v9379_v63  ;;  %v3098_v29 = vadd.f32 1.0, %v5093_v45  ;;  %4761 = vmatpush3.bf16.msra.mxu1 %v4758_v23  ;;  %v9410_v11 = vld [vmem:[#allocation122_spill] sm:$0xff] }
 0x374   :  { %v3161_v30 = vsel %vm9406_vm4, %v3129_v34, 0.0  ;;  %5098 = verf.f32 %v3037_v6  ;;  %v3420_v35 = vsel %vm8895_vm6, %v9407_v22, 0.0  ;;  %v9409_v53 = vmul.u32 2, %v9408_v43  ;;  %v5095_v34 = vpop.eup %5094 }
 0x375   :  { %v3002_v15 = vmul.f32 0.5, %v7822_v9  ;;  %v7939_v56 = vadd.f32 %v3160_v5, %v7671_v41  ;;  %v7942_v63 = vadd.f32 %v3161_v30, %v7688_v52  ;;  %v7946_v10 = vadd.f32 %v7570_v33, %v9410_v11  ;;  %v9411_v9 = vld [vmem:[#allocation123_spill] sm:$0xff]  ;;  %v3737_v5 = vld [vmem:[%s8554_s2 + $0x40] sm:$0xff] }
 0x376   :  { %v3325_v3 = vadd.s32 %v3293_v0, %v9409_v53  ;;  %3463 = vadd.xlane.f32.xlu1 %v3420_v35  ;;  %v3003_v6 = vmul.f32 0.5, %v7844_v21  ;;  %v3038_v23 = vmul.f32 0.70710677, %v7936_v47  ;;  %vm3262_vm4 = vcmp.ge.f32.partialorder %v7936_v47, 0.0  ;;  %v5097_v33 = vpop.eup %5096 }
 0x377   :  { %v7953_v51 = vadd.f32 %v7578_v13, %v9411_v9  ;;  %v3130_v41 = vmul.f32 %v3098_v29, %v3002_v15  ;;  %v3099_v25 = vadd.f32 1.0, %v5095_v34  ;;  %v3294_v52 = vsel %vm3262_vm4, 1, %v9295_v59  ;;  %v3738_v13 = vld [vmem:[%s8554_s2 + $0x48] sm:$0xff] }
 0x378   :  { %v7956_v45 = vadd.s32 1, %v3325_v3  ;;  %v3004_v0 = vmul.f32 0.5, %v7861_v20  ;;  %5100 = verf.f32 %v3038_v23  ;;  %v3039_v21 = vmul.f32 0.70710677, %v2958_v12  ;;  %v9413_v20 = vld [vmem:[#allocation18_spill] sm:$0xff] }
 0x379   :  { %vm3263_vm5 = vcmp.ge.f32.partialorder %v2958_v12, 0.0  ;;  %v3131_v30 = vmul.f32 %v3099_v25, %v3003_v6  ;;  %v3100_v29 = vadd.f32 1.0, %v5097_v33  ;;  %v9414_v53 = vmul.u32 2, %v9277_v38  ;;  %v9415_v15 = vld [vmem:[#allocation58_spill] sm:$0xff] }
 0x37a   :  { %9412 = vst [vmem:[#allocation49_spill] sm:$0xff] %v7956_v45  ;;  %v3295_v22 = vsel %vm3263_vm5, 1, %v9295_v59  ;;  %vm8894_vm0 = vcmp.eq.s32.totalorder %v5964_v54, %v7956_v45  ;;  %5102 = verf.f32 %v3039_v21  ;;  %v9416_v11 = vmul.u32 2, %v9415_v15 }
 0x37b   :  { %v3421_v35 = vsel %vm8894_vm0, %v9413_v20, 0.0  ;;  %v3326_v3 = vadd.s32 %v3294_v52, %v9414_v53  ;;  %v3132_v23 = vmul.f32 %v3100_v29, %v3004_v0  ;;  %v4762_v6 = vpack.c.bf16 %v3738_v13, %v3737_v5  ;;  %v2960_v0 = vpop.xlane.xlu1 %2959  ;;  %v9421_v5 = vld [vmem:[#allocation75_spill] sm:$0xff]  ;;  %v9423_v13 = vld [vmem:[#allocation125_spill] sm:$0xff]  ;;  %v9424_v29 = vld [vmem:[#allocation126_spill] sm:$0xff]  ;;  %v2962_v53 = vpop.xlane.xlu0 %2961 }
 0x37c   :  { %v3327_v34 = vadd.s32 %v3295_v22, %v9416_v11  ;;  %3465 = vadd.xlane.f32.xlu0 %v3421_v35  ;;  %vm9417_vm4 = vcmp.eq.s32.totalorder %v5964_v54, %v9393_v8  ;;  %vm9418_vm5 = vcmp.eq.s32.totalorder %v5964_v54, %v9395_v37  ;;  %v7994_v8 = vadd.f32 %v7590_v19, %v9421_v5 }
 0x37d   :  { %v3162_v9 = vsel %vm9417_vm4, %v3130_v41, 0.0  ;;  %v3163_v25 = vsel %vm9418_vm5, %v3131_v30, 0.0  ;;  %v7982_v33 = vadd.s32 1, %v3326_v3  ;;  %4763 = vmatprep.subr.bf16.mxu1 %v4762_v6  ;;  %v9422_v41 = vld [vmem:[#allocation77_spill] sm:$0xff]  ;;  %v8002_v30 = vadd.f32 %v7618_v27, %v9423_v13 }
 0x37e   :  { %v7984_v21 = vadd.s32 1, %v3327_v34  ;;  %v7987_v52 = vadd.f32 %v3162_v9, %v7703_v4  ;;  %v7990_v22 = vadd.f32 %v3163_v25, %v7712_v39  ;;  %v7998_v37 = vadd.f32 %v7613_v31, %v9422_v41  ;;  %v5099_v39 = vpop.eup %5098  ;;  %4765 = vmatpush3.bf16.msra.mxu1 %v4762_v6  ;;  %v9427_v6 = vld [vmem:[#allocation20_spill] sm:$0xff] }
 0x37f   :  { %9419 = vst [vmem:[#allocation50_spill] sm:$0xff] %v7982_v33  ;;  %v8006_v4 = vadd.f32 %v7630_v62, %v9424_v29  ;;  %v3005_v20 = vmul.f32 0.5, %v7903_v58  ;;  %v3040_v35 = vmul.f32 0.70710677, %v2960_v0  ;;  %vm3264_vm4 = vcmp.ge.f32.partialorder %v2960_v0, 0.0  ;;  %v9426_v62 = vld [vmem:[#allocation17_spill] sm:$0xff] }
 0x380   :  { %9420 = vst [vmem:[#allocation51_spill] sm:$0xff] %v7984_v21  ;;  %vm8908_vm5 = vcmp.eq.s32.totalorder %v5964_v54, %v7982_v33  ;;  %v3101_v19 = vadd.f32 1.0, %v5099_v39  ;;  %v3296_v31 = vsel %vm3264_vm4, 1, %v9295_v59  ;;  %v3041_v3 = vmul.f32 0.70710677, %v2962_v53  ;;  %v9428_v9 = vld [vmem:[#allocation60_spill] sm:$0xff] }
 0x381   :  { %vm9425_vm0 = vcmp.eq.s32.totalorder %v5964_v54, %v9397_v50  ;;  %5104 = verf.f32 %v3040_v35  ;;  %vm3265_vm6 = vcmp.ge.f32.partialorder %v2962_v53, 0.0  ;;  %v3422_v58 = vsel %vm8908_vm5, %v9426_v62, 0.0  ;;  %v9432_v39 = vld [vmem:[#allocation116_spill] sm:$0xff]  ;;  %v3739_v62 = vld [vmem:[%s8554_s2 + $0x50] sm:$0xff] }
 0x382   :  { %v3164_v27 = vsel %vm9425_vm0, %v3132_v23, 0.0  ;;  %vm8898_vm1 = vcmp.eq.s32.totalorder %v5964_v54, %v7984_v21  ;;  %v3133_v11 = vmul.f32 %v3101_v19, %v3005_v20  ;;  %5106 = verf.f32 %v3041_v3  ;;  %3467 = vadd.xlane.f32.xlu1 %v3422_v58  ;;  %v5101_v23 = vpop.eup %5100  ;;  %v2964_v58 = vpop.xlane.xlu1 %2963 }
 0x383   :  { %v3297_v34 = vsel %vm3265_vm6, 1, %v9295_v59  ;;  %v3423_v50 = vsel %vm8898_vm1, %v9427_v6, 0.0  ;;  %v9429_v25 = vmul.u32 2, %v9428_v9  ;;  %v9430_v41 = vmul.u32 2, %v9286_v24 }
 0x384   :  { %3469 = vadd.xlane.f32.xlu0 %v3423_v50  ;;  %v8031_v29 = vadd.f32 %v3164_v27, %v7727_v14  ;;  %v8035_v20 = vadd.f32 %v7696_v60, %v9432_v39  ;;  %v3006_v35 = vmul.f32 0.5, %v7936_v47  ;;  %v3102_v19 = vadd.f32 1.0, %v5101_v23  ;;  %v5103_v27 = vpop.eup %5102  ;;  %v2966_v60 = vpop.xlane.xlu0 %2965 }
 0x385   :  { %v3328_v5 = vadd.s32 %v3296_v31, %v9429_v25  ;;  %v3329_v13 = vadd.s32 %v3297_v34, %v9430_v41  ;;  %v3007_v3 = vmul.f32 0.5, %v2958_v12  ;;  %v3740_v31 = vld [vmem:[%s8554_s2 + $0x58] sm:$0xff]  ;;  %vm9433_vm6 = vcmp.eq.s32.totalorder %v5964_v54, %v9408_v43 }
 0x386   :  { %9431 = vst [vmem:[#allocation57_spill] sm:$0xff] %v8031_v29  ;;  %v3165_v14 = vsel %vm9433_vm6, %v3133_v11, 0.0  ;;  %v4766_v12 = vpack.c.bf16 %v3740_v31, %v3739_v62  ;;  %v3134_v50 = vmul.f32 %v3102_v19, %v3006_v35  ;;  %v3103_v23 = vadd.f32 1.0, %v5103_v27  ;;  %v9439_v19 = vld [vmem:[#allocation22_spill] sm:$0xff] }
 0x387   :  { %v8047_v34 = vadd.s32 1, %v3328_v5  ;;  %v8049_v47 = vadd.s32 1, %v3329_v13  ;;  %v8052_v6 = vadd.f32 %v3165_v14, %v7737_v36  ;;  %v3008_v25 = vmul.f32 0.5, %v2960_v0  ;;  %v9438_v13 = vld [vmem:[#allocation19_spill] sm:$0xff]  ;;  %v3742_v62 = vld [vmem:[%s8554_s2 + $0x68] sm:$0xff] }
 0x388   :  { %v3042_v41 = vmul.f32 0.70710677, %v2964_v58  ;;  %v3009_v39 = vmul.f32 0.5, %v2962_v53  ;;  %vm3266_vm0 = vcmp.ge.f32.partialorder %v2964_v58, 0.0  ;;  %v3043_v21 = vmul.f32 0.70710677, %v2966_v60  ;;  %4767 = vmatprep.subr.bf16.mxu1 %v4766_v12 }
 0x389   :  { %9434 = vst [vmem:[#allocation52_spill] sm:$0xff] %v8047_v34  ;;  %9435 = vst [vmem:[#allocation53_spill] sm:$0xff] %v8049_v47  ;;  %vm3267_vm4 = vcmp.ge.f32.partialorder %v2966_v60, 0.0  ;;  %v3135_v43 = vmul.f32 %v3103_v23, %v3007_v3  ;;  %v3298_v11 = vsel %vm3266_vm0, 1, %v9295_v59  ;;  %4769 = vmatpush3.bf16.msra.mxu1 %v4766_v12  ;;  %vm8902_vm6 = vcmp.eq.s32.totalorder %v5964_v54, %v8047_v34  ;;  %v3741_v3 = vld [vmem:[%s8554_s2 + $0x60] sm:$0xff]  ;;  %v2970_v12 = vpop.xlane.xlu0 %2969 }
 0x38a   :  { %9436 = vst [vmem:[#allocation54_spill] sm:$0xff] %v8052_v6  ;;  %5108 = verf.f32 %v3042_v41  ;;  %v3299_v5 = vsel %vm3267_vm4, 1, %v9295_v59  ;;  %vm8901_vm1 = vcmp.eq.s32.totalorder %v5964_v54, %v8049_v47  ;;  %v9437_v36 = vmul.u32 2, %v7001_v46 }
 0x38b   :  { %5110 = verf.f32 %v3043_v21  ;;  %v3010_v53 = vmul.f32 0.5, %v2964_v58  ;;  %v3424_v35 = vsel %vm8902_vm6, %v9438_v13, 0.0  ;;  %v3425_v21 = vsel %vm8901_vm1, %v9439_v19, 0.0  ;;  %v5105_v14 = vpop.eup %5104  ;;  %v2968_v58 = vpop.xlane.xlu1 %2967 }
 0x38c   :  { %v3330_v0 = vadd.s32 %v3298_v11, %v9437_v36  ;;  %vm9440_vm0 = vcmp.eq.s32.totalorder %v5964_v54, %v9277_v38  ;;  %v3011_v27 = vmul.f32 0.5, %v2966_v60  ;;  %3471 = vadd.xlane.f32.xlu1 %v3424_v35  ;;  %3473 = vadd.xlane.f32.xlu0 %v3425_v21  ;;  %v4770_v41 = vpack.c.bf16 %v3742_v62, %v3741_v3  ;;  %v5107_v36 = vpop.eup %5106 }
 0x38d   :  { %v3166_v31 = vsel %vm9440_vm0, %v3134_v50, 0.0  ;;  %v3104_v13 = vadd.f32 1.0, %v5105_v14  ;;  %v3044_v19 = vmul.f32 0.70710677, %v2968_v58  ;;  %vm3268_vm4 = vcmp.ge.f32.partialorder %v2968_v58, 0.0 }
 0x38e   :  { %v8079_v23 = vadd.s32 1, %v3330_v0  ;;  %v8082_v11 = vadd.f32 %v3166_v31, %v7745_v18  ;;  %v9443_v47 = vmul.u32 2, %v9288_v44  ;;  %v3105_v50 = vadd.f32 1.0, %v5107_v36  ;;  %4771 = vmatprep.subr.bf16.mxu1 %v4770_v41  ;;  %v2974_v31 = vpop.xlane.xlu0 %2973 }
 0x38f   :  { %v3300_v60 = vsel %vm3268_vm4, 1, %v9295_v59  ;;  %v3045_v34 = vmul.f32 0.70710677, %v2970_v12  ;;  %vm9444_vm0 = vcmp.eq.s32.totalorder %v5964_v54, %v9415_v15  ;;  %v3136_v35 = vmul.f32 %v3104_v13, %v3008_v25  ;;  %4773 = vmatpush3.bf16.msra.mxu1 %v4770_v41 }
 0x390   :  { %9441 = vst [vmem:[#allocation100_spill] sm:$0xff] %v8079_v23  ;;  %9442 = vst [vmem:[#allocation101_spill] sm:$0xff] %v8082_v11  ;;  %v3331_v38 = vadd.s32 %v3299_v5, %v9443_v47  ;;  %v3167_v0 = vsel %vm9444_vm0, %v3135_v43, 0.0  ;;  %5112 = verf.f32 %v3044_v19  ;;  %vm3269_vm1 = vcmp.ge.f32.partialorder %v2970_v12, 0.0  ;;  %v9445_v5 = vld [vmem:[#allocation21_spill] sm:$0xff]  ;;  %v2972_v43 = vpop.xlane.xlu1 %2971 }
 0x391   :  { %vm8903_vm6 = vcmp.eq.s32.totalorder %v5964_v54, %v8079_v23  ;;  %v3137_v18 = vmul.f32 %v3105_v50, %v3009_v39  ;;  %5114 = verf.f32 %v3045_v34  ;;  %v3301_v47 = vsel %vm3269_vm1, 1, %v9295_v59 }
 0x392   :  { %v3426_v21 = vsel %vm8903_vm6, %v9445_v5, 0.0  ;;  %v3012_v3 = vmul.f32 0.5, %v2968_v58  ;;  %v3013_v62 = vmul.f32 0.5, %v2970_v12  ;;  %v8097_v15 = vadd.s32 1, %v3331_v38  ;;  %v9452_v5 = vld [vmem:[#allocation24_spill] sm:$0xff] }
 0x393   :  { %3475 = vadd.xlane.f32.xlu1 %v3426_v21  ;;  %v8100_v25 = vadd.f32 %v3167_v0, %v7749_v26  ;;  %v9448_v39 = vmul.u32 2, %v7058_v48  ;;  %v9449_v14 = vmul.u32 2, %v7060_v40  ;;  %vm9450_vm1 = vcmp.eq.s32.totalorder %v5964_v54, %v9428_v9 }
 0x394   :  { %9446 = vst [vmem:[#allocation61_spill] sm:$0xff] %v8097_v15  ;;  %v3168_v36 = vsel %vm9450_vm1, %v3136_v35, 0.0  ;;  %vm9451_vm4 = vcmp.eq.s32.totalorder %v5964_v54, %v9286_v24  ;;  %v5109_v12 = vpop.eup %5108  ;;  %v8112_v13 = vmul.f32 0.5, %v2972_v43  ;;  %v3046_v26 = vmul.f32 0.70710677, %v2972_v43  ;;  %v3743_v24 = vld [vmem:[%s8554_s2 + $0x70] sm:$0xff] }
 0x395   :  { %9447 = vst [vmem:[#allocation73_spill] sm:$0xff] %v8100_v25  ;;  %v3332_v34 = vadd.s32 %v3300_v60, %v9448_v39  ;;  %v3333_v41 = vadd.s32 %v3301_v47, %v9449_v14  ;;  %v3169_v58 = vsel %vm9451_vm4, %v3137_v18, 0.0  ;;  %vm3270_vm0 = vcmp.ge.f32.partialorder %v2972_v43, 0.0  ;;  %v5111_v38 = vpop.eup %5110  ;;  %v3744_v35 = vld [vmem:[%s8554_s2 + $0x78] sm:$0xff]  ;;  %v2976_v25 = vpop.xlane.xlu1 %2975  ;;  %s5227_s2 = smov [#allocation2]  }
 0x396   :  { %v8114_v19 = vmul.f32 0.5, %v2974_v31  ;;  %v3106_v50 = vadd.f32 1.0, %v5109_v12  ;;  %v3302_v60 = vsel %vm3270_vm0, 1, %v9295_v59  ;;  %v3047_v0 = vmul.f32 0.70710677, %v2974_v31  ;;  %s4007_s29 = sshll.u32 %s5227_s2, 4  ;;  %s4008_s29 = int_to_ptr.vmem [resolvable:$true] %s4007_s29 }
 0x397   :  { %vm3271_vm6 = vcmp.ge.f32.partialorder %v2974_v31, 0.0  ;;  %v3107_v47 = vadd.f32 1.0, %v5111_v38  ;;  %5116 = verf.f32 %v3046_v26  ;;  %vm8905_vm1 = vcmp.eq.s32.totalorder %v5964_v54, %v8097_v15  ;;  %v9456_v26 = vld [vmem:[#allocation117_spill] sm:$0xff]  ;;  %s5202_s30 = scalar_lea.vmem %s4008_s29, 4096  ;;  %p5207_p1 = scmp.lt.s32.totalorder %s4008_s29, %s4008_s29 }
 0x398   :  { %v3303_v9 = vsel %vm3271_vm6, 1, %v9295_v59  ;;  %v3138_v18 = vmul.f32 %v3106_v50, %v3010_v53  ;;  %5118 = verf.f32 %v3047_v0  ;;  %v3427_v21 = vsel %vm8905_vm1, %v9452_v5, 0.0  ;;  %p5203_p0 = scmp.ne.s32.totalorder %s4008_s29, %s5202_s30  ;;  %p5208_p2 = scmp.lt.s32.totalorder %s5202_s30, %s5202_s30 }
 0x399   :  { %v8130_v43 = vadd.s32 1, %v3332_v34  ;;  %v3139_v31 = vmul.f32 %v3107_v47, %v3011_v27  ;;  %3477 = vadd.xlane.f32.xlu0 %v3427_v21  ;;  %v8132_v39 = vadd.s32 1, %v3333_v41  ;;  %v9455_v14 = vmul.u32 2, %v7146_v57  ;;  %v9460_v47 = vld [vmem:[#allocation23_spill] sm:$0xff] }
 0x39a   :  { %v9457_v38 = vmul.u32 2, %v9456_v26  ;;  %v4774_v53 = vpack.c.bf16 %v3744_v35, %v3743_v24  ;;  %v8141_v50 = vadd.f32 %v3168_v36, %v7753_v16  ;;  %v8144_v34 = vadd.f32 %v3169_v58, %v7770_v17  ;;  %v5113_v27 = vpop.eup %5112  ;;  %v9461_v35 = vld [vmem:[#allocation26_spill] sm:$0xff]  ;;  %p5209_p3 = por %p5208_p2, %p5207_p1 }
 0x39b   :  { %9453 = vst [vmem:[#allocation62_spill] sm:$0xff] %v8130_v43  ;;  %9454 = vst [vmem:[#allocation63_spill] sm:$0xff] %v8132_v39  ;;  %v3334_v12 = vadd.s32 %v3302_v60, %v9455_v14  ;;  %vm8907_vm6 = vcmp.eq.s32.totalorder %v5964_v54, %v8130_v43  ;;  %v8146_v41 = vmul.f32 0.5, %v2976_v25  ;;  %v3048_v0 = vmul.f32 0.70710677, %v2976_v25  ;;  %v2978_v60 = vpop.xlane.xlu0 %2977  ;;  %v5115_v5 = vpop.eup %5114  ;;  %v9477_v43 = vld [vmem:[#allocation78_spill] sm:$0xff] }
 0x39c   :  { %v3335_v23 = vadd.s32 %v3303_v9, %v9457_v38  ;;  %9458 = vst [vmem:[#allocation74_spill] sm:$0xff] %v8141_v50  ;;  %9459 = vst [vmem:[#allocation7_spill] sm:$0xff] %v8144_v34  ;;  %vm3272_vm4 = vcmp.ge.f32.partialorder %v2976_v25, 0.0  ;;  %v3428_v9 = vsel %vm8907_vm6, %v9460_v47, 0.0  ;;  %v3108_v21 = vadd.f32 1.0, %v5113_v27  ;;  %4775 = vmatprep.subr.bf16.mxu1 %v4774_v53  ;;  %p5210_p4 = pnand %p5209_p3, %p5203_p0 }
 0x39d   :  { %v3304_v24 = vsel %vm3272_vm4, 1, %v9295_v59  ;;  %v8153_v16 = vmul.f32 0.5, %v2978_v60  ;;  %v3049_v36 = vmul.f32 0.70710677, %v2978_v60  ;;  %3479 = vadd.xlane.f32.xlu1 %v3428_v9  ;;  %v3109_v17 = vadd.f32 1.0, %v5115_v5  ;;  %4777 = vmatpush3.bf16.msra.mxu1 %v4774_v53  ;;  %v9466_v53 = vld [vmem:[#allocation124_spill] sm:$0xff] }
 0x39e   :  { %5120 = verf.f32 %v3048_v0  ;;  %vm3273_vm0 = vcmp.ge.f32.partialorder %v2978_v60, 0.0  ;;  %vm8906_vm1 = vcmp.eq.s32.totalorder %v5964_v54, %v8132_v39  ;;  %v3140_v25 = vmul.f32 %v3108_v21, %v3012_v3  ;;  %v9464_v60 = vld [vmem:[#allocation72_spill] sm:$0xff] }
 0x39f   :  { %5122 = verf.f32 %v3049_v36  ;;  %v3305_v58 = vsel %vm3273_vm0, 1, %v9295_v59  ;;  %v3429_v14 = vsel %vm8906_vm1, %v9461_v35, 0.0  ;;  %v8162_v38 = vmul.f32 %v3109_v17, %v3013_v62  ;;  %v2980_v36 = vpop.xlane.xlu1 %2979  ;;  %v2982_v17 = vpop.xlane.xlu0 %2981 }
 0x3a0   :  { %3481 = vadd.xlane.f32.xlu0 %v3429_v14  ;;  %v8164_v27 = vadd.s32 1, %v3334_v12  ;;  %v8166_v0 = vadd.s32 1, %v3335_v23  ;;  %v9465_v47 = vmul.u32 2, %v9464_v60  ;;  %v9467_v3 = vmul.u32 2, %v9466_v53 }
 0x3a1   :  { %vm9468_vm4 = vcmp.eq.s32.totalorder %v5964_v54, %v7001_v46  ;;  %vm9469_vm0 = vcmp.eq.s32.totalorder %v5964_v54, %v9288_v44  ;;  %vm9470_vm1 = vcmp.eq.s32.totalorder %v5964_v54, %v7058_v48  ;;  %v5117_v12 = vpop.eup %5116  ;;  %v3050_v48 = vmul.f32 0.70710677, %v2980_v36 }
 0x3a2   :  { %9462 = vst [vmem:[#allocation76_spill] sm:$0xff] %v8164_v27  ;;  %9463 = vst [vmem:[#allocation65_spill] sm:$0xff] %v8166_v0  ;;  %v3336_v9 = vadd.s32 %v3304_v24, %v9465_v47  ;;  %v3337_v5 = vadd.s32 %v3305_v58, %v9467_v3  ;;  %v3170_v21 = vsel %vm9468_vm4, %v3138_v18, 0.0  ;;  %v8178_v62 = vsel %vm9469_vm0, %v3139_v31, 0.0  ;;  %v5119_v44 = vpop.eup %5118 }
 0x3a3   :  { %v8183_v23 = vsel %vm9470_vm1, %v3140_v25, 0.0  ;;  %vm3398_vm6 = vcmp.eq.s32.totalorder %v5964_v54, %v8164_v27  ;;  %vm3399_vm5 = vcmp.eq.s32.totalorder %v5964_v54, %v8166_v0  ;;  %v8192_v18 = vadd.f32 %v3170_v21, %v7777_v61  ;;  %v9473_v61 = vld [vmem:[#allocation25_spill] sm:$0xff] }
 0x3a4   :  { %v8189_v46 = vadd.s32 1, %v3336_v9  ;;  %v3110_v31 = vadd.f32 1.0, %v5117_v12  ;;  %v8194_v24 = vmul.f32 0.5, %v2980_v36  ;;  %vm3274_vm1 = vcmp.ge.f32.partialorder %v2980_v36, 0.0  ;;  %v9474_v12 = vld [vmem:[#allocation28_spill] sm:$0xff]  ;;  %v2984_v36 = vpop.xlane.xlu1 %2983 }
 0x3a5   :  { %9472 = vst [vmem:[#allocation67_spill] sm:$0xff] %v8192_v18  ;;  %v3111_v25 = vadd.f32 1.0, %v5119_v44  ;;  %v3306_v58 = vsel %vm3274_vm1, 1, %v9295_v59  ;;  %v8197_v35 = vmul.f32 0.5, %v2982_v17  ;;  %v3051_v14 = vmul.f32 0.70710677, %v2982_v17 }
 0x3a6   :  { %9471 = vst [vmem:[#allocation66_spill] sm:$0xff] %v8189_v46  ;;  %v8200_v47 = vmul.f32 %v3110_v31, %v8112_v13  ;;  %5124 = verf.f32 %v3050_v48  ;;  %vm3275_vm4 = vcmp.ge.f32.partialorder %v2982_v17, 0.0  ;;  %v3430_v9 = vsel %vm3398_vm6, %v9473_v61, 0.0  ;;  %v2986_v48 = vpop.xlane.xlu0 %2985 }
 0x3a7   :  { %v8207_v3 = vmul.f32 %v3111_v25, %v8114_v19  ;;  %5126 = verf.f32 %v3051_v14  ;;  %v3307_v21 = vsel %vm3275_vm4, 1, %v9295_v59  ;;  %3483 = vadd.xlane.f32.xlu1 %v3430_v9  ;;  %v3431_v13 = vsel %vm3399_vm5, %v9474_v12, 0.0 }
 0x3a8   :  { %3485 = vadd.xlane.f32.xlu0 %v3431_v13  ;;  %v8214_v44 = vmul.f32 0.5, %v2984_v36  ;;  %v3052_v31 = vmul.f32 0.70710677, %v2984_v36  ;;  %vm3276_vm0 = vcmp.ge.f32.partialorder %v2984_v36, 0.0  ;;  %vm8915_vm1 = vcmp.eq.s32.totalorder %v5964_v54, %v8189_v46  ;;  %v5121_v19 = vpop.eup %5120  ;;  %v9475_v13 = vld [vmem:[#allocation27_spill] sm:$0xff]  ;;  %v2988_v39 = vpop.xlane.xlu1 %2987 }
 0x3a9   :  { %v3308_v17 = vsel %vm3276_vm0, 1, %v9295_v59  ;;  %v8219_v25 = vmul.f32 0.5, %v2986_v48  ;;  %v3053_v14 = vmul.f32 0.70710677, %v2986_v48  ;;  %vm3277_vm4 = vcmp.ge.f32.partialorder %v2986_v48, 0.0  ;;  %v5123_v61 = vpop.eup %5122 }
 0x3aa   :  { %v3112_v9 = vadd.f32 1.0, %v5121_v19  ;;  %5128 = verf.f32 %v3052_v31  ;;  %v3309_v12 = vsel %vm3277_vm4, 1, %v9295_v59  ;;  %v3432_v36 = vsel %vm8915_vm1, %v9475_v13, 0.0  ;;  %v2990_v34 = vpop.xlane.xlu0 %2989 }
 0x3ab   :  { %v3113_v0 = vadd.f32 1.0, %v5123_v61  ;;  %5130 = verf.f32 %v3053_v14  ;;  %3487 = vadd.xlane.f32.xlu1 %v3432_v36  ;;  %v8226_v27 = vadd.s32 1, %v3337_v5  ;;  %v9478_v15 = vmul.u32 2, %v9477_v43  ;;  %v9479_v61 = vld [vmem:[#allocation30_spill] sm:$0xff]  ;;  %v9483_v36 = vld [vmem:[#allocation79_spill] sm:$0xff] }
 0x3ac   :  { %v8231_v48 = vmul.f32 %v3112_v9, %v8146_v41  ;;  %v8233_v31 = vmul.f32 0.5, %v2988_v39  ;;  %v3054_v19 = vmul.f32 0.70710677, %v2988_v39  ;;  %vm3278_vm0 = vcmp.ge.f32.partialorder %v2988_v39, 0.0  ;;  %v2992_v13 = vpop.xlane.xlu1 %2991 }
 0x3ad   :  { %9476 = vst [vmem:[#allocation102_spill] sm:$0xff] %v8226_v27  ;;  %v3338_v18 = vadd.s32 %v3306_v58, %v9478_v15  ;;  %v8236_v46 = vmul.f32 %v3113_v0, %v8153_v16  ;;  %vm8917_vm4 = vcmp.eq.s32.totalorder %v5964_v54, %v8226_v27  ;;  %v3310_v5 = vsel %vm3278_vm0, 1, %v9295_v59  ;;  %v9481_v0 = vld [vmem:[#allocation64_spill] sm:$0xff]  ;;  %v9489_v27 = vld [vmem:[#allocation83_spill] sm:$0xff] }
 0x3ae   :  { %v8241_v14 = vmul.f32 0.5, %v2990_v34  ;;  %v3433_v15 = vsel %vm8917_vm4, %v9479_v61, 0.0  ;;  %5132 = verf.f32 %v3054_v19  ;;  %v3055_v41 = vmul.f32 0.70710677, %v2990_v34 }
 0x3af   :  { %vm3279_vm1 = vcmp.ge.f32.partialorder %v2990_v34, 0.0  ;;  %3489 = vadd.xlane.f32.xlu0 %v3433_v15  ;;  %v8248_v16 = vadd.s32 1, %v3338_v18  ;;  %v9482_v58 = vmul.u32 2, %v9481_v0  ;;  %v9484_v50 = vmul.u32 2, %v9483_v36  ;;  %v9510_v36 = vld [vmem:[#allocation128_spill] sm:$0xff] }
 0x3b0   :  { %v3311_v39 = vsel %vm3279_vm1, 1, %v9295_v59  ;;  %v5125_v33 = vpop.eup %5124  ;;  %5134 = verf.f32 %v3055_v41  ;;  %v8254_v6 = vmul.f32 0.5, %v2992_v13  ;;  %v3056_v61 = vmul.f32 0.70710677, %v2992_v13 }
 0x3b1   :  { %9480 = vst [vmem:[#allocation103_spill] sm:$0xff] %v8248_v16  ;;  %v3339_v9 = vadd.s32 %v3307_v21, %v9482_v58  ;;  %v3340_v11 = vadd.s32 %v3308_v17, %v9484_v50  ;;  %vm3280_vm0 = vcmp.ge.f32.partialorder %v2992_v13, 0.0  ;;  %v5127_v19 = vpop.eup %5126  ;;  %v3114_v34 = vadd.f32 1.0, %v5125_v33  ;;  %v9486_v58 = vld [vmem:[#allocation29_spill] sm:$0xff]  ;;  %v9487_v33 = vld [vmem:[#allocation82_spill] sm:$0xff] }
 0x3b2   :  { %vm8925_vm1 = vcmp.eq.s32.totalorder %v5964_v54, %v8248_v16  ;;  %v3312_v15 = vsel %vm3280_vm0, 1, %v9295_v59  ;;  %v3115_v21 = vadd.f32 1.0, %v5127_v19  ;;  %5136 = verf.f32 %v3056_v61  ;;  %v9491_v16 = vld [vmem:[#allocation32_spill] sm:$0xff] }
 0x3b3   :  { %v8258_v18 = vadd.s32 1, %v3339_v9  ;;  %v3434_v50 = vsel %vm8925_vm1, %v9486_v58, 0.0  ;;  %v8265_v17 = vadd.s32 1, %v3340_v11  ;;  %v3146_v41 = vmul.f32 %v3114_v34, %v8194_v24  ;;  %v9492_v24 = vld [vmem:[#allocation85_spill] sm:$0xff] }
 0x3b4   :  { %3491 = vadd.xlane.f32.xlu1 %v3434_v50  ;;  %v9488_v9 = vmul.u32 2, %v9487_v33  ;;  %v9490_v59 = vmul.u32 2, %v9489_v27  ;;  %v5129_v45 = vpop.eup %5128  ;;  %v3147_v29 = vmul.f32 %v3115_v21, %v8197_v35 }
 0x3b5   :  { %9485 = vst [vmem:[#allocation6_spill] sm:$0xff] %v8258_v18  ;;  %vm8924_vm4 = vcmp.eq.s32.totalorder %v5964_v54, %v8258_v18  ;;  %vm8923_vm0 = vcmp.eq.s32.totalorder %v5964_v54, %v8265_v17  ;;  %v9493_v61 = vmul.u32 2, %v9492_v24  ;;  %v5131_v58 = vpop.eup %5130  ;;  %v3116_v50 = vadd.f32 1.0, %v5129_v45 }
 0x3b6   :  { %v3341_v13 = vadd.s32 %v3309_v12, %v9488_v9  ;;  %v3342_v19 = vadd.s32 %v3310_v5, %v9490_v59  ;;  %v3435_v11 = vsel %vm8924_vm4, %v9491_v16, 0.0  ;;  %v9494_v12 = vld [vmem:[#allocation31_spill] sm:$0xff]  ;;  %v3117_v9 = vadd.f32 1.0, %v5131_v58  ;;  %v9501_v58 = vld [vmem:[#allocation41_spill] sm:$0xff] }
 0x3b7   :  { %v3343_v34 = vadd.s32 %v3311_v39, %v9493_v61  ;;  %3493 = vadd.xlane.f32.xlu0 %v3435_v11  ;;  %v3436_v5 = vsel %vm8923_vm0, %v9494_v12, 0.0  ;;  %v9495_v59 = vld [vmem:[#allocation127_spill] sm:$0xff]  ;;  %v8297_v39 = vadd.f32 %v8178_v62, %v7781_v32  ;;  %v3148_v45 = vmul.f32 %v3116_v50, %v8214_v44  ;;  %v9498_v62 = vld [vmem:[#allocation33_spill] sm:$0xff] }
 0x3b8   :  { %v8287_v35 = vadd.s32 1, %v3341_v13  ;;  %v8289_v21 = vadd.s32 1, %v3342_v19  ;;  %v9496_v18 = vmul.u32 2, %v9495_v59  ;;  %3495 = vadd.xlane.f32.xlu1 %v3436_v5  ;;  %v8306_v13 = vadd.f32 %v8183_v23, %v7788_v7  ;;  %v5133_v19 = vpop.eup %5132  ;;  %v9499_v7 = vld [vmem:[#allocation36_spill] sm:$0xff] }
 0x3b9   :  { %v8291_v16 = vadd.s32 1, %v3343_v34  ;;  %v3118_v11 = vadd.f32 1.0, %v5133_v19  ;;  %v9505_v19 = vld [vmem:[#allocation35_spill] sm:$0xff]  ;;  %v3180_v53 = vsel %vm2892_vm12, %v3148_v45, 0.0 }
 0x3ba   :  { %v3344_v2 = vadd.s32 %v3312_v15, %v9496_v18  ;;  %vm8926_vm0 = vcmp.eq.s32.totalorder %v5964_v54, %v8287_v35  ;;  %vm8927_vm4 = vcmp.eq.s32.totalorder %v5964_v54, %v8289_v21  ;;  %v3149_v18 = vmul.f32 %v3117_v9, %v8219_v25  ;;  %v9497_v15 = vld [vmem:[#allocation34_spill] sm:$0xff]  ;;  %v5135_v34 = vpop.eup %5134 }
 0x3bb   :  { %v3437_v32 = vsel %vm8926_vm0, %v9497_v15, 0.0  ;;  %v3438_v44 = vsel %vm8927_vm4, %v9498_v62, 0.0  ;;  %vm8928_vm1 = vcmp.eq.s32.totalorder %v5964_v54, %v8291_v16  ;;  %vm9500_vm0 = vcmp.eq.s32.totalorder %v5964_v54, %v7060_v40  ;;  %v9504_v9 = vld [vmem:[#allocation42_spill] sm:$0xff] }
 0x3bc   :  { %3497 = vadd.xlane.f32.xlu0 %v3437_v32  ;;  %v3439_v23 = vsel %vm8928_vm1, %v9499_v7, 0.0  ;;  %v8323_v25 = vadd.s32 1, %v3344_v2  ;;  %v3173_v61 = vsel %vm9500_vm0, %v8162_v38, 0.0  ;;  %vm9502_vm4 = vcmp.eq.s32.totalorder %v5964_v54, %v7146_v57  ;;  %3499 = vadd.xlane.f32.xlu1 %v3438_v44 }
 0x3bd   :  { %v8330_v50 = vadd.f32 %v3173_v61, %v9501_v58  ;;  %v3174_v12 = vsel %vm9502_vm4, %v8200_v47, 0.0  ;;  %vm9503_vm1 = vcmp.eq.s32.totalorder %v5964_v54, %v9456_v26  ;;  %v3176_v40 = vsel %vm2888_vm2, %v8231_v48, 0.0  ;;  %v5137_v47 = vpop.eup %5136 }
 0x3be   :  { %v3175_v2 = vsel %vm9503_vm1, %v8207_v3, 0.0  ;;  %v3150_v38 = vmul.f32 %v3118_v11, %v8233_v31  ;;  %v3119_v5 = vadd.f32 1.0, %v5135_v34  ;;  %vm3408_vm0 = vcmp.eq.s32.totalorder %v5964_v54, %v8323_v25  ;;  %v9506_v3 = vld [vmem:[#allocation46_spill] sm:$0xff] }
 0x3bf   :  { %v8348_v57 = vadd.f32 %v3174_v12, %v9504_v9  ;;  %v3440_v26 = vsel %vm3408_vm0, %v9505_v19, 0.0  ;;  %v8355_v15 = vadd.f32 %v3175_v2, %v9506_v3  ;;  %v8358_v60 = vadd.f32 %v3176_v40, %v7918_v49 }
 0x3c0   :  { %v3177_v48 = vsel %vm2889_vm10, %v8236_v46, 0.0  ;;  %v3151_v31 = vmul.f32 %v3119_v5, %v8241_v14  ;;  %v3120_v32 = vadd.f32 1.0, %v5137_v47  ;;  %3501 = vadd.xlane.f32.xlu0 %v3439_v23  ;;  %v3178_v44 = vsel %vm2890_vm9, %v3146_v41, 0.0  ;;  %3503 = vadd.xlane.f32.xlu1 %v3440_v26  ;;  %v9519_v47 = vld [vmem:[#allocation44_spill] sm:$0xff] }
 0x3c1   :  { %v8366_v62 = vadd.f32 %v3177_v48, %v7946_v10  ;;  %v8372_v11 = vadd.f32 %v3178_v44, %v7953_v51  ;;  %vm9507_vm2 = vcmp.eq.s32.totalorder %v5964_v54, %v9481_v0  ;;  %vm9508_vm10 = vcmp.eq.s32.totalorder %v5964_v54, %v9487_v33  ;;  %v9513_v48 = vld [vmem:[#allocation80_spill] sm:$0xff] }
 0x3c2   :  { %v3179_v49 = vsel %vm9507_vm2, %v3147_v29, 0.0  ;;  %v3181_v10 = vsel %vm9508_vm10, %v3149_v18, 0.0  ;;  %v3152_v46 = vmul.f32 %v3120_v32, %v8254_v6  ;;  %v8388_v51 = vadd.f32 %v3180_v53, %v7998_v37  ;;  %v9511_v6 = vld [vmem:[#allocation81_spill] sm:$0xff] }
 0x3c3   :  { %v8385_v43 = vadd.f32 %v3179_v49, %v7994_v8  ;;  %v8391_v14 = vadd.f32 %v3181_v10, %v8002_v30  ;;  %vm9509_vm9 = vcmp.eq.s32.totalorder %v5964_v54, %v9489_v27  ;;  %v3183_v0 = vsel %vm2895_vm15, %v3151_v31, 0.0  ;;  %v9515_v10 = vld [vmem:[#allocation55_spill] sm:$0xff] }
 0x3c4   :  { %v3182_v29 = vsel %vm9509_vm9, %v3150_v38, 0.0  ;;  %v2704_v41 = vadd.f32 %v9511_v6, %v9510_v36  ;;  %v8405_v37 = vadd.f32 %v3183_v0, %v8035_v20  ;;  %v3184_v30 = vsel %vm2896_vm8, %v3152_v46, 0.0  ;;  %v9517_v36 = vld [vmem:[#allocation98_spill] sm:$0xff] }
 0x3c5   :  { %v8402_v8 = vadd.f32 %v3182_v29, %v8006_v4 }
 0x3c6   :  { %v8410_v33 = vadd.f32 %v3184_v30, %v2704_v41 }
 0x3d5   :  { %v3442_v27 = vpop.xlane.xlu0 %3441 }
 0x3d6   :  { %v3537_v45 = vmul.f32 0.70710677, %v3442_v27  ;;  %v3505_v61 = vmul.f32 0.5, %v3442_v27 }
 0x3d8   :  { %5138 = verf.f32 %v3537_v45 }
 0x3d9   :  { %v3444_v24 = vpop.xlane.xlu1 %3443 }
 0x3da   :  { %v3538_v18 = vmul.f32 0.70710677, %v3444_v24  ;;  %v3446_v7 = vpop.xlane.xlu0 %3445  ;;  %v3506_v5 = vmul.f32 0.5, %v3444_v24 }
 0x3db   :  { %v3539_v23 = vmul.f32 0.70710677, %v3446_v7  ;;  %v3507_v26 = vmul.f32 0.5, %v3446_v7 }
 0x3dc   :  { %5140 = verf.f32 %v3538_v18 }
 0x3dd   :  { %5142 = verf.f32 %v3539_v23 }
 0x3e2   :  { %v5139_v4 = vpop.eup %5138 }
 0x3e3   :  { %v3601_v34 = vadd.f32 1.0, %v5139_v4  ;;  %v3448_v20 = vpop.xlane.xlu1 %3447 }
 0x3e4   :  { %v3540_v58 = vmul.f32 0.70710677, %v3448_v20  ;;  %v3508_v7 = vmul.f32 0.5, %v3448_v20 }
 0x3e5   :  { %v3450_v12 = vpop.xlane.xlu0 %3449  ;;  %v3633_v2 = vmul.f32 %v3601_v34, %v3505_v61 }
 0x3e6   :  { %v3541_v59 = vmul.f32 0.70710677, %v3450_v12  ;;  %v5141_v40 = vpop.eup %5140  ;;  %5144 = verf.f32 %v3540_v58  ;;  %v3509_v4 = vmul.f32 0.5, %v3450_v12  ;;  %v9521_v12 = vld [vmem:[#allocation45_spill] sm:$0xff] }
 0x3e7   :  { %v5143_v38 = vpop.eup %5142  ;;  %v3602_v9 = vadd.f32 1.0, %v5141_v40  ;;  %v3665_v19 = vsel %vm3377_vm3, %v3633_v2, 0.0 }
 0x3e8   :  { %5146 = verf.f32 %v3541_v59  ;;  %v3603_v3 = vadd.f32 1.0, %v5143_v38  ;;  %v3697_v31 = vadd.f32 %v3665_v19, %v9513_v48 }
 0x3e9   :  { %v3634_v32 = vmul.f32 %v3602_v9, %v3506_v5 }
 0x3ea   :  { %v3635_v44 = vmul.f32 %v3603_v3, %v3507_v26  ;;  %4650 = vmatprep.mubr.f32.mxu1 %v3697_v31 }
 0x3eb   :  { %v3666_v53 = vsel %vm3378_vm13, %v3634_v32, 0.0  ;;  %vm9530_vm13 = vcmp.eq.s32.totalorder %v5964_v54, %v7872_v55 }
 0x3ec   :  { %v3698_v46 = vadd.f32 %v3666_v53, %v9515_v10  ;;  %v3667_v0 = vsel %vm3379_vm14, %v3635_v44, 0.0  ;;  %vm9531_vm14 = vcmp.eq.s32.totalorder %v5964_v54, %v7883_v42 }
 0x3ed   :  { %v3699_v6 = vadd.f32 %v3667_v0, %v9517_v36 }
 0x3ee   :  { %4651 = vmatmul.mubr.f32.vlgmr.msra.gmra.mrb[32].mxu1 %v3698_v46 }
 0x3ef   :  { %v3452_v41 = vpop.xlane.xlu1 %3451  ;;  %4653 = vmatprep.mubr.f32.mxu1 %v3699_v6 }
 0x3f0   :  { %v3454_v30 = vpop.xlane.xlu0 %3453  ;;  %v3542_v27 = vmul.f32 0.70710677, %v3452_v41  ;;  %v5145_v24 = vpop.eup %5144  ;;  %v3510_v49 = vmul.f32 0.5, %v3452_v41 }
 0x3f1   :  { %v3543_v45 = vmul.f32 0.70710677, %v3454_v30  ;;  %v3604_v23 = vadd.f32 1.0, %v5145_v24  ;;  %v3511_v46 = vmul.f32 0.5, %v3454_v30  ;;  %v9524_v30 = vld [vmem:[#allocation56_spill] sm:$0xff] }
 0x3f2   :  { %v5147_v18 = vpop.eup %5146  ;;  %5148 = verf.f32 %v3542_v27  ;;  %vm9525_vm12 = vcmp.eq.s32.totalorder %v5964_v54, %v9524_v30 }
 0x3f3   :  { %v3605_v61 = vadd.f32 1.0, %v5147_v18  ;;  %5150 = verf.f32 %v3543_v45  ;;  %v3636_v34 = vmul.f32 %v3604_v23, %v3508_v7  ;;  %v9522_v7 = vld [vmem:[#allocation40_spill] sm:$0xff] }
 0x3f4   :  { %vm9523_vm15 = vcmp.eq.s32.totalorder %v5964_v54, %v9522_v7 }
 0x3f5   :  { %v3637_v2 = vmul.f32 %v3605_v61, %v3509_v4  ;;  %v3668_v5 = vsel %vm3380_vm7, %v3636_v34, 0.0 }
 0x3f6   :  { %v3456_v58 = vpop.xlane.xlu1 %3455  ;;  %v3700_v19 = vadd.f32 %v3668_v5, %v9519_v47 }
 0x3f7   :  { %v3544_v59 = vmul.f32 0.70710677, %v3456_v58  ;;  %v3669_v26 = vsel %vm3381_vm11, %v3637_v2, 0.0  ;;  %v3512_v18 = vmul.f32 0.5, %v3456_v58 }
 0x3f8   :  { %v3458_v40 = vpop.xlane.xlu0 %3457  ;;  %4654 = vmatmul.mubr.f32.gmra.mrb[34].mxu1 %v3700_v19  ;;  %v3701_v3 = vadd.f32 %v3669_v26, %v9521_v12  ;;  %v9526_v19 = vld [vmem:[#allocation43_spill] sm:$0xff] }
 0x3f9   :  { %5152 = verf.f32 %v3544_v59  ;;  %v3545_v9 = vmul.f32 0.70710677, %v3458_v40  ;;  %v3513_v38 = vmul.f32 0.5, %v3458_v40  ;;  %vm9527_vm8 = vcmp.eq.s32.totalorder %v5964_v54, %v9526_v19  ;;  %v9528_v12 = vld [vmem:[#allocation47_spill] sm:$0xff] }
 0x3fa   :  { %4656 = vmatprep.mubr.f32.mxu1 %v3701_v3  ;;  %vm9529_vm3 = vcmp.eq.s32.totalorder %v5964_v54, %v9528_v12 }
 0x3fb   :  { %5154 = verf.f32 %v3545_v9 }
 0x3fc   :  { %v5149_v31 = vpop.eup %5148 }
 0x3fd   :  { %v5151_v44 = vpop.eup %5150  ;;  %v3606_v53 = vadd.f32 1.0, %v5149_v31 }
 0x3fe   :  { %v3607_v29 = vadd.f32 1.0, %v5151_v44 }
 0x3ff   :  { %v3460_v48 = vpop.xlane.xlu1 %3459  ;;  %v3638_v36 = vmul.f32 %v3606_v53, %v3510_v49 }
 0x400   :  { %v3546_v32 = vmul.f32 0.70710677, %v3460_v48  ;;  %v3462_v10 = vpop.xlane.xlu0 %3461  ;;  %v3639_v27 = vmul.f32 %v3607_v29, %v3511_v46  ;;  %v3514_v3 = vmul.f32 0.5, %v3460_v48 }
 0x401   :  { %v3547_v0 = vmul.f32 0.70710677, %v3462_v10  ;;  %v3670_v23 = vsel %vm9523_vm15, %v3638_v36, 0.0  ;;  %v3515_v49 = vmul.f32 0.5, %v3462_v10 }
 0x402   :  { %5156 = verf.f32 %v3546_v32  ;;  %v3702_v41 = vadd.f32 %v3670_v23, %v7886_v28  ;;  %v3671_v61 = vsel %vm9525_vm12, %v3639_v27, 0.0 }
 0x403   :  { %v3464_v6 = vpop.xlane.xlu1 %3463  ;;  %5158 = verf.f32 %v3547_v0  ;;  %v5153_v24 = vpop.eup %5152  ;;  %v3703_v2 = vadd.f32 %v3671_v61, %v7908_v1 }
 0x404   :  { %v3548_v45 = vmul.f32 0.70710677, %v3464_v6  ;;  %v3608_v4 = vadd.f32 1.0, %v5153_v24  ;;  %4657 = vmatmul.mubr.f32.gmra.mrb[36].mxu1 %v3702_v41  ;;  %v3516_v27 = vmul.f32 0.5, %v3464_v6  ;;  %v9532_v6 = vld [vmem:[#allocation48_spill] sm:$0xff]  ;;  %v9534_v41 = vld [vmem:[#allocation57_spill] sm:$0xff] }
 0x405   :  { %v5155_v34 = vpop.eup %5154  ;;  %4659 = vmatprep.mubr.f32.mxu1 %v3703_v2  ;;  %vm9533_vm7 = vcmp.eq.s32.totalorder %v5964_v54, %v9532_v6 }
 0x406   :  { %5160 = verf.f32 %v3548_v45  ;;  %v3640_v59 = vmul.f32 %v3608_v4, %v3512_v18  ;;  %v3609_v5 = vadd.f32 1.0, %v5155_v34 }
 0x408   :  { %v3641_v9 = vmul.f32 %v3609_v5, %v3513_v38  ;;  %v3672_v20 = vsel %vm9527_vm8, %v3640_v59, 0.0 }
 0x409   :  { %v3466_v58 = vpop.xlane.xlu0 %3465  ;;  %v3704_v28 = vadd.f32 %v3672_v20, %v7939_v56 }
 0x40a   :  { %v3549_v47 = vmul.f32 0.70710677, %v3466_v58  ;;  %v3673_v1 = vsel %vm9529_vm3, %v3641_v9, 0.0  ;;  %v3517_v30 = vmul.f32 0.5, %v3466_v58  ;;  %v9537_v9 = vld [vmem:[#allocation54_spill] sm:$0xff] }
 0x40b   :  { %4660 = vmatmul.mubr.f32.gmra.mrb[38].mxu1 %v3704_v28  ;;  %v3705_v31 = vadd.f32 %v3673_v1, %v7942_v63 }
 0x40c   :  { %v5157_v26 = vpop.eup %5156  ;;  %5162 = verf.f32 %v3549_v47 }
 0x40d   :  { %v3610_v40 = vadd.f32 1.0, %v5157_v26  ;;  %v5159_v32 = vpop.eup %5158  ;;  %4662 = vmatprep.mubr.f32.mxu1 %v3705_v31  ;;  %v9538_v31 = vld [vmem:[#allocation50_spill] sm:$0xff] }
 0x40e   :  { %v3611_v53 = vadd.f32 1.0, %v5159_v32  ;;  %vm9539_vm4 = vcmp.eq.s32.totalorder %v5964_v54, %v9538_v31 }
 0x40f   :  { %v3642_v44 = vmul.f32 %v3610_v40, %v3514_v3  ;;  %v3468_v46 = vpop.xlane.xlu1 %3467 }
 0x410   :  { %v5161_v29 = vpop.eup %5160  ;;  %v3550_v0 = vmul.f32 0.70710677, %v3468_v46  ;;  %v3643_v36 = vmul.f32 %v3611_v53, %v3515_v49  ;;  %v3518_v20 = vmul.f32 0.5, %v3468_v46  ;;  %v9541_v53 = vld [vmem:[#allocation51_spill] sm:$0xff] }
 0x411   :  { %v3470_v56 = vpop.xlane.xlu0 %3469  ;;  %v3612_v45 = vadd.f32 1.0, %v5161_v29  ;;  %v3674_v48 = vsel %vm9530_vm13, %v3642_v44, 0.0  ;;  %v9540_v44 = vld [vmem:[#allocation101_spill] sm:$0xff]  ;;  %vm9542_vm1 = vcmp.eq.s32.totalorder %v5964_v54, %v9541_v53 }
 0x412   :  { %v3551_v24 = vmul.f32 0.70710677, %v3470_v56  ;;  %5164 = verf.f32 %v3550_v0  ;;  %v3706_v63 = vadd.f32 %v3674_v48, %v7987_v52  ;;  %v3675_v10 = vsel %vm9531_vm14, %v3643_v36, 0.0  ;;  %v9543_v0 = vld [vmem:[#allocation73_spill] sm:$0xff] }
 0x413   :  { %v3644_v18 = vmul.f32 %v3612_v45, %v3516_v27  ;;  %v3707_v7 = vadd.f32 %v3675_v10, %v7990_v22  ;;  %v9535_v22 = vld [vmem:[#allocation49_spill] sm:$0xff]  ;;  %v3519_v26 = vmul.f32 0.5, %v3470_v56  ;;  %vm9569_vm14 = vcmp.eq.s32.totalorder %v5964_v54, %v8265_v17 }
 0x414   :  { %5166 = verf.f32 %v3551_v24  ;;  %4663 = vmatmul.mubr.f32.gmra.mrb[40].mxu1 %v3706_v63  ;;  %vm9536_vm11 = vcmp.eq.s32.totalorder %v5964_v54, %v9535_v22  ;;  %v9547_v22 = vld [vmem:[#allocation53_spill] sm:$0xff] }
 0x415   :  { %v3676_v23 = vsel %vm9533_vm7, %v3644_v18, 0.0  ;;  %4665 = vmatprep.mubr.f32.mxu1 %v3707_v7  ;;  %vm9548_vm10 = vcmp.eq.s32.totalorder %v5964_v54, %v9547_v22  ;;  %vm9570_vm7 = vcmp.eq.s32.totalorder %v5964_v54, %v8287_v35 }
 0x416   :  { %v5163_v4 = vpop.eup %5162  ;;  %v3708_v55 = vadd.f32 %v3676_v23, %v9534_v41 }
 0x417   :  { %v3613_v61 = vadd.f32 1.0, %v5163_v4 }
 0x418   :  { %4666 = vmatmul.mubr.f32.gmra.mrb[42].mxu1 %v3708_v55 }
 0x419   :  { %v3472_v34 = vpop.xlane.xlu1 %3471  ;;  %v3474_v2 = vpop.xlane.xlu0 %3473  ;;  %v3645_v52 = vmul.f32 %v3613_v61, %v3517_v30  ;;  %v9544_v30 = vld [vmem:[#allocation52_spill] sm:$0xff] }
 0x41a   :  { %v3552_v59 = vmul.f32 0.70710677, %v3472_v34  ;;  %v3553_v42 = vmul.f32 0.70710677, %v3474_v2  ;;  %v3520_v24 = vmul.f32 0.5, %v3472_v34  ;;  %v3521_v63 = vmul.f32 0.5, %v3474_v2 }
 0x41b   :  { %v3677_v38 = vsel %vm9536_vm11, %v3645_v52, 0.0  ;;  %vm9545_vm2 = vcmp.eq.s32.totalorder %v5964_v54, %v9544_v30  ;;  %vm9571_vm11 = vcmp.eq.s32.totalorder %v5964_v54, %v8289_v21 }
 0x41c   :  { %5168 = verf.f32 %v3552_v59  ;;  %v5165_v5 = vpop.eup %5164  ;;  %v3709_v47 = vadd.f32 %v3677_v38, %v9537_v9  ;;  %v9549_v38 = vld [vmem:[#allocation7_spill] sm:$0xff] }
 0x41d   :  { %5170 = verf.f32 %v3553_v42  ;;  %v3614_v28 = vadd.f32 1.0, %v5165_v5  ;;  %v9546_v42 = vld [vmem:[#allocation74_spill] sm:$0xff] }
 0x41e   :  { %v5167_v19 = vpop.eup %5166  ;;  %4668 = vmatprep.mubr.f32.mxu1 %v3709_v47 }
 0x41f   :  { %v3615_v12 = vadd.f32 1.0, %v5167_v19  ;;  %v3646_v3 = vmul.f32 %v3614_v28, %v3518_v20  ;;  %v9550_v19 = vld [vmem:[#allocation100_spill] sm:$0xff] }
 0x420   :  { %v3476_v58 = vpop.xlane.xlu1 %3475  ;;  %vm9551_vm9 = vcmp.eq.s32.totalorder %v5964_v54, %v9550_v19 }
 0x421   :  { %v3554_v1 = vmul.f32 0.70710677, %v3476_v58  ;;  %v3647_v40 = vmul.f32 %v3615_v12, %v3519_v26  ;;  %v3678_v32 = vsel %vm9539_vm4, %v3646_v3, 0.0  ;;  %v3522_v52 = vmul.f32 0.5, %v3476_v58  ;;  %v9552_v12 = vld [vmem:[#allocation67_spill] sm:$0xff] }
 0x422   :  { %v3710_v49 = vadd.f32 %v3678_v32, %v9540_v44  ;;  %vm9572_vm4 = vcmp.eq.s32.totalorder %v5964_v54, %v8291_v16 }
 0x423   :  { %5172 = verf.f32 %v3554_v1  ;;  %v3679_v29 = vsel %vm9542_vm1, %v3647_v40, 0.0 }
 0x424   :  { %v3711_v36 = vadd.f32 %v3679_v29, %v9543_v0  ;;  %4669 = vmatmul.mubr.f32.gmra.mrb[44].mxu1 %v3710_v49 }
 0x426   :  { %v3478_v46 = vpop.xlane.xlu0 %3477  ;;  %v5169_v27 = vpop.eup %5168  ;;  %4671 = vmatprep.mubr.f32.mxu1 %v3711_v36  ;;  %v9553_v36 = vld [vmem:[#allocation61_spill] sm:$0xff] }
 0x427   :  { %v3555_v56 = vmul.f32 0.70710677, %v3478_v46  ;;  %v5171_v45 = vpop.eup %5170  ;;  %v3616_v48 = vadd.f32 1.0, %v5169_v27  ;;  %v3523_v3 = vmul.f32 0.5, %v3478_v46  ;;  %vm9554_vm15 = vcmp.eq.s32.totalorder %v5964_v54, %v9553_v36 }
 0x428   :  { %v3617_v10 = vadd.f32 1.0, %v5171_v45 }
 0x429   :  { %5174 = verf.f32 %v3555_v56  ;;  %v3648_v6 = vmul.f32 %v3616_v48, %v3520_v24 }
 0x42a   :  { %v3480_v18 = vpop.xlane.xlu1 %3479  ;;  %v3649_v23 = vmul.f32 %v3617_v10, %v3521_v63 }
 0x42b   :  { %v3556_v7 = vmul.f32 0.70710677, %v3480_v18  ;;  %v3680_v61 = vsel %vm9545_vm2, %v3648_v6, 0.0  ;;  %v3524_v53 = vmul.f32 0.5, %v3480_v18 }
 0x42c   :  { %v3712_v34 = vadd.f32 %v3680_v61, %v9546_v42  ;;  %v3681_v2 = vsel %vm9548_vm10, %v3649_v23, 0.0 }
 0x42d   :  { %5176 = verf.f32 %v3556_v7  ;;  %v3482_v4 = vpop.xlane.xlu0 %3481  ;;  %v5173_v41 = vpop.eup %5172  ;;  %v3713_v5 = vadd.f32 %v3681_v2, %v9549_v38  ;;  %v9555_v7 = vld [vmem:[#allocation62_spill] sm:$0xff] }
 0x42e   :  { %v3557_v55 = vmul.f32 0.70710677, %v3482_v4  ;;  %v3618_v59 = vadd.f32 1.0, %v5173_v41  ;;  %4672 = vmatmul.mubr.f32.gmra.mrb[46].mxu1 %v3712_v34  ;;  %v3525_v24 = vmul.f32 0.5, %v3482_v4  ;;  %vm9556_vm12 = vcmp.eq.s32.totalorder %v5964_v54, %v9555_v7 }
 0x42f   :  { %4674 = vmatprep.mubr.f32.mxu1 %v3713_v5 }
 0x430   :  { %5178 = verf.f32 %v3557_v55  ;;  %v3650_v9 = vmul.f32 %v3618_v59, %v3522_v52  ;;  %v9557_v55 = vld [vmem:[#allocation63_spill] sm:$0xff] }
 0x431   :  { %vm9558_vm8 = vcmp.eq.s32.totalorder %v5964_v54, %v9557_v55 }
 0x432   :  { %v3682_v20 = vsel %vm9551_vm9, %v3650_v9, 0.0 }
 0x433   :  { %v5175_v28 = vpop.eup %5174  ;;  %v3714_v1 = vadd.f32 %v3682_v20, %v9552_v12 }
 0x434   :  { %v3484_v47 = vpop.xlane.xlu1 %3483  ;;  %v3619_v40 = vadd.f32 1.0, %v5175_v28 }
 0x435   :  { %v3558_v58 = vmul.f32 0.70710677, %v3484_v47  ;;  %v3486_v26 = vpop.xlane.xlu0 %3485  ;;  %4675 = vmatmul.mubr.f32.gmra.mrb[48].mxu1 %v3714_v1  ;;  %v3526_v59 = vmul.f32 0.5, %v3484_v47 }
 0x436   :  { %v3559_v31 = vmul.f32 0.70710677, %v3486_v26  ;;  %v3651_v44 = vmul.f32 %v3619_v40, %v3523_v3  ;;  %v3527_v22 = vmul.f32 0.5, %v3486_v26 }
 0x437   :  { %5180 = verf.f32 %v3558_v58  ;;  %v5177_v32 = vpop.eup %5176 }
 0x438   :  { %5182 = verf.f32 %v3559_v31  ;;  %v3488_v49 = vpop.xlane.xlu1 %3487  ;;  %v3620_v29 = vadd.f32 1.0, %v5177_v32  ;;  %v3683_v56 = vsel %vm9554_vm15, %v3651_v44, 0.0 }
 0x439   :  { %v3560_v0 = vmul.f32 0.70710677, %v3488_v49  ;;  %v3715_v46 = vadd.f32 %v3683_v56, %v8297_v39  ;;  %v3528_v28 = vmul.f32 0.5, %v3488_v49  ;;  %v9561_v56 = vld [vmem:[#allocation66_spill] sm:$0xff] }
 0x43a   :  { %v5179_v27 = vpop.eup %5178  ;;  %v3652_v45 = vmul.f32 %v3620_v29, %v3524_v53 }
 0x43b   :  { %5184 = verf.f32 %v3560_v0  ;;  %v3621_v48 = vadd.f32 1.0, %v5179_v27  ;;  %4677 = vmatprep.mubr.f32.mxu1 %v3715_v46 }
 0x43c   :  { %v3490_v63 = vpop.xlane.xlu0 %3489  ;;  %v3684_v18 = vsel %vm9556_vm12, %v3652_v45, 0.0 }
 0x43d   :  { %v3561_v10 = vmul.f32 0.70710677, %v3490_v63  ;;  %v3653_v6 = vmul.f32 %v3621_v48, %v3525_v24  ;;  %v3716_v23 = vadd.f32 %v3684_v18, %v8306_v13  ;;  %v3529_v29 = vmul.f32 0.5, %v3490_v63  ;;  %v9563_v63 = vld [vmem:[#allocation102_spill] sm:$0xff] }
 0x43f   :  { %5186 = verf.f32 %v3561_v10  ;;  %4678 = vmatmul.mubr.f32.gmra.mrb[50].mxu1 %v3716_v23  ;;  %v3685_v30 = vsel %vm9558_vm8, %v3653_v6, 0.0 }
 0x440   :  { %v3717_v61 = vadd.f32 %v3685_v30, %v8330_v50 }
 0x441   :  { %v3492_v41 = vpop.xlane.xlu1 %3491  ;;  %v5181_v39 = vpop.eup %5180 }
 0x442   :  { %v3562_v4 = vmul.f32 0.70710677, %v3492_v41  ;;  %v5183_v52 = vpop.eup %5182  ;;  %v3622_v42 = vadd.f32 1.0, %v5181_v39  ;;  %4680 = vmatprep.mubr.f32.mxu1 %v3717_v61  ;;  %v3530_v7 = vmul.f32 0.5, %v3492_v41 }
 0x443   :  { %v3623_v2 = vadd.f32 1.0, %v5183_v52 }
 0x444   :  { %v3494_v34 = vpop.xlane.xlu0 %3493  ;;  %5188 = verf.f32 %v3562_v4  ;;  %v3654_v13 = vmul.f32 %v3622_v42, %v3526_v59  ;;  %v9565_v59 = vld [vmem:[#allocation103_spill] sm:$0xff] }
 0x445   :  { %v3563_v38 = vmul.f32 0.70710677, %v3494_v34  ;;  %v3496_v5 = vpop.xlane.xlu1 %3495  ;;  %v5185_v9 = vpop.eup %5184  ;;  %v3655_v19 = vmul.f32 %v3623_v2, %v3527_v22  ;;  %v3531_v30 = vmul.f32 0.5, %v3494_v34  ;;  %vm9566_vm3 = vcmp.eq.s32.totalorder %v5964_v54, %v9565_v59 }
 0x446   :  { %v3564_v20 = vmul.f32 0.70710677, %v3496_v5  ;;  %v3624_v58 = vadd.f32 1.0, %v5185_v9  ;;  %v3686_v47 = vsel %vm3398_vm6, %v3654_v13, 0.0  ;;  %vm9562_vm6 = vcmp.eq.s32.totalorder %v5964_v54, %v9561_v56 }
 0x447   :  { %5190 = verf.f32 %v3563_v38  ;;  %v3718_v26 = vadd.f32 %v3686_v47, %v8348_v57  ;;  %v3687_v32 = vsel %vm3399_vm5, %v3655_v19, 0.0  ;;  %vm9564_vm5 = vcmp.eq.s32.totalorder %v5964_v54, %v9563_v63 }
 0x448   :  { %5192 = verf.f32 %v3564_v20  ;;  %v3656_v3 = vmul.f32 %v3624_v58, %v3528_v28  ;;  %v3719_v49 = vadd.f32 %v3687_v32, %v8355_v15  ;;  %v3532_v61 = vmul.f32 0.5, %v3496_v5 }
 0x449   :  { %v3498_v12 = vpop.xlane.xlu0 %3497  ;;  %v3500_v40 = vpop.xlane.xlu1 %3499  ;;  %4681 = vmatmul.mubr.f32.gmra.mrb[52].mxu1 %v3718_v26 }
 0x44a   :  { %v3565_v1 = vmul.f32 0.70710677, %v3498_v12  ;;  %v5187_v44 = vpop.eup %5186  ;;  %v3566_v53 = vmul.f32 0.70710677, %v3500_v40  ;;  %v3688_v27 = vsel %vm9562_vm6, %v3656_v3, 0.0  ;;  %4683 = vmatprep.mubr.f32.mxu1 %v3719_v49  ;;  %v3533_v38 = vmul.f32 0.5, %v3498_v12 }
 0x44b   :  { %v3625_v0 = vadd.f32 1.0, %v5187_v44  ;;  %v3720_v45 = vadd.f32 %v3688_v27, %v8358_v60  ;;  %v3534_v20 = vmul.f32 0.5, %v3500_v40 }
 0x44c   :  { %5194 = verf.f32 %v3565_v1 }
 0x44d   :  { %v3502_v36 = vpop.xlane.xlu0 %3501  ;;  %5196 = verf.f32 %v3566_v53  ;;  %v3657_v46 = vmul.f32 %v3625_v0, %v3529_v29  ;;  %v3504_v24 = vpop.xlane.xlu1 %3503  ;;  %4684 = vmatmul.mubr.f32.gmra.mrb[54].mxu1 %v3720_v45 }
 0x44e   :  { %v3567_v57 = vmul.f32 0.70710677, %v3502_v36  ;;  %v5189_v48 = vpop.eup %5188  ;;  %v3568_v10 = vmul.f32 0.70710677, %v3504_v24  ;;  %v3535_v47 = vmul.f32 0.5, %v3502_v36  ;;  %v3536_v31 = vmul.f32 0.5, %v3504_v24 }
 0x44f   :  { %v3626_v15 = vadd.f32 1.0, %v5189_v48  ;;  %v3689_v18 = vsel %vm9564_vm5, %v3657_v46, 0.0 }
 0x450   :  { %5198 = verf.f32 %v3567_v57  ;;  %v3721_v23 = vadd.f32 %v3689_v18, %v8366_v62  ;;  %v9567_v62 = vld [vmem:[#allocation6_spill] sm:$0xff] }
 0x451   :  { %v5191_v6 = vpop.eup %5190  ;;  %5200 = verf.f32 %v3568_v10  ;;  %v3658_v55 = vmul.f32 %v3626_v15, %v3530_v7  ;;  %vm9568_vm13 = vcmp.eq.s32.totalorder %v5964_v54, %v9567_v62 }
 0x452   :  { %v3627_v39 = vadd.f32 1.0, %v5191_v6  ;;  %v5193_v60 = vpop.eup %5192  ;;  %4686 = vmatprep.mubr.f32.mxu1 %v3721_v23 }
 0x453   :  { %v3628_v52 = vadd.f32 1.0, %v5193_v60  ;;  %v3690_v41 = vsel %vm9566_vm3, %v3658_v55, 0.0 }
 0x454   :  { %v3659_v4 = vmul.f32 %v3627_v39, %v3531_v30  ;;  %v3722_v22 = vadd.f32 %v3690_v41, %v8372_v11 }
 0x455   :  { %v3660_v2 = vmul.f32 %v3628_v52, %v3532_v61 }
 0x456   :  { %v5195_v42 = vpop.eup %5194  ;;  %v3691_v34 = vsel %vm9568_vm13, %v3659_v4, 0.0  ;;  %4687 = vmatmul.mubr.f32.gmra.mrb[56].mxu1 %v3722_v22 }
 0x457   :  { %v3629_v13 = vadd.f32 1.0, %v5195_v42  ;;  %v5197_v9 = vpop.eup %5196  ;;  %v3723_v19 = vadd.f32 %v3691_v34, %v8385_v43  ;;  %v3692_v58 = vsel %vm9569_vm14, %v3660_v2, 0.0 }
 0x458   :  { %v3630_v28 = vadd.f32 1.0, %v5197_v9  ;;  %v3724_v11 = vadd.f32 %v3692_v58, %v8388_v51 }
 0x459   :  { %v3661_v5 = vmul.f32 %v3629_v13, %v3533_v38  ;;  %4689 = vmatprep.mubr.f32.mxu1 %v3723_v19 }
 0x45a   :  { %v5199_v50 = vpop.eup %5198  ;;  %v3662_v12 = vmul.f32 %v3630_v28, %v3534_v20  ;;  %4690 = vmatmul.mubr.f32.gmra.mrb[58].mxu1 %v3724_v11 }
 0x45b   :  { %v3631_v1 = vadd.f32 1.0, %v5199_v50  ;;  %v3693_v26 = vsel %vm9570_vm7, %v3661_v5, 0.0  ;;  %v5201_v3 = vpop.eup %5200 }
 0x45c   :  { %v3725_v43 = vadd.f32 %v3693_v26, %v8391_v14  ;;  %v3632_v32 = vadd.f32 1.0, %v5201_v3  ;;  %v3694_v17 = vsel %vm9571_vm11, %v3662_v12, 0.0 }
 0x45d   :  { %v3663_v40 = vmul.f32 %v3631_v1, %v3535_v47  ;;  %v3726_v51 = vadd.f32 %v3694_v17, %v8402_v8 }
 0x45e   :  { %4692 = vmatprep.mubr.f32.mxu1 %v3725_v43  ;;  %v3664_v35 = vmul.f32 %v3632_v32, %v3536_v31 }
 0x45f   :  { %v3695_v44 = vsel %vm9572_vm4, %v3663_v40, 0.0  ;;  %4693 = vmatmul.mubr.f32.gmra.mrb[60].mxu1 %v3726_v51 }
 0x460   :  { %v3727_v53 = vadd.f32 %v3695_v44, %v8405_v37  ;;  %v3696_v14 = vsel %vm3408_vm0, %v3664_v35, 0.0 }
 0x461   :  { %v3728_v49 = vadd.f32 %v3696_v14, %v8410_v33 }
 0x462   :  { %4695 = vmatprep.mubr.f32.mxu1 %v3727_v53 }
 0x463   :  { %4696 = vmatmul.mubr.f32.gmra.mrb[62].mxu1 %v3728_v49 }
 0x4c1   :  { %v4652_v21 = vpop.f32.mrb[32].mxu1 }
 0x4c2   :  { %3971 = vst [vmem:[#allocation2 + $0x8] sm:$0xff] %v4652_v21  ;;  %v3811_v29 = vpop.f32.mrb[33].mxu1 }
 0x4c3   :  { %3970 = vst [vmem:[#allocation2] sm:$0xff] %v3811_v29 }
 0x4cb   :  { %v4655_v8 = vpop.f32.mrb[34].mxu1 }
 0x4cc   :  { %3973 = vst [vmem:[#allocation2 + $0x18] sm:$0xff] %v4655_v8  ;;  %v3821_v16 = vpop.f32.mrb[35].mxu1 }
 0x4cd   :  { %3972 = vst [vmem:[#allocation2 + $0x10] sm:$0xff] %v3821_v16 }
 0x4d7   :  { %v4658_v0 = vpop.f32.mrb[36].mxu1 }
 0x4d8   :  { %3975 = vst [vmem:[#allocation2 + $0x28] sm:$0xff] %v4658_v0  ;;  %v3831_v36 = vpop.f32.mrb[37].mxu1 }
 0x4d9   :  { %3974 = vst [vmem:[#allocation2 + $0x20] sm:$0xff] %v3831_v36 }
 0x4de   :  { %v4661_v37 = vpop.f32.mrb[38].mxu1 }
 0x4df   :  { %3977 = vst [vmem:[#allocation2 + $0x38] sm:$0xff] %v4661_v37  ;;  %v3841_v54 = vpop.f32.mrb[39].mxu1 }
 0x4e0   :  { %3976 = vst [vmem:[#allocation2 + $0x30] sm:$0xff] %v3841_v54 }
 0x4e7   :  { %v4664_v25 = vpop.f32.mrb[40].mxu1 }
 0x4e8   :  { %3979 = vst [vmem:[#allocation2 + $0x48] sm:$0xff] %v4664_v25  ;;  %v3851_v33 = vpop.f32.mrb[41].mxu1 }
 0x4e9   :  { %3978 = vst [vmem:[#allocation2 + $0x40] sm:$0xff] %v3851_v33 }
 0x4eb   :  { %v4667_v56 = vpop.f32.mrb[42].mxu1 }
 0x4ec   :  { %3981 = vst [vmem:[#allocation2 + $0x58] sm:$0xff] %v4667_v56  ;;  %v3861_v27 = vpop.f32.mrb[43].mxu1 }
 0x4ed   :  { %3980 = vst [vmem:[#allocation2 + $0x50] sm:$0xff] %v3861_v27 }
 0x4f7   :  { %v4670_v57 = vpop.f32.mrb[44].mxu1 }
 0x4f8   :  { %3983 = vst [vmem:[#allocation2 + $0x68] sm:$0xff] %v4670_v57  ;;  %v3871_v45 = vpop.f32.mrb[45].mxu1 }
 0x4f9   :  { %3982 = vst [vmem:[#allocation2 + $0x60] sm:$0xff] %v3871_v45 }
 0x501   :  { %v4673_v46 = vpop.f32.mrb[46].mxu1 }
 0x502   :  { %3985 = vst [vmem:[#allocation2 + $0x78] sm:$0xff] %v4673_v46  ;;  %v3881_v24 = vpop.f32.mrb[47].mxu1 }
 0x503   :  { %3984 = vst [vmem:[#allocation2 + $0x70] sm:$0xff] %v3881_v24 }
 0x508   :  { %v4676_v48 = vpop.f32.mrb[48].mxu1 }
 0x509   :  { %3987 = vst [vmem:[#allocation2 + $0x88] sm:$0xff] %v4676_v48  ;;  %v3891_v10 = vpop.f32.mrb[49].mxu1 }
 0x50a   :  { %3986 = vst [vmem:[#allocation2 + $0x80] sm:$0xff] %v3891_v10 }
 0x512   :  { %v4679_v7 = vpop.f32.mrb[50].mxu1 }
 0x513   :  { %3989 = vst [vmem:[#allocation2 + $0x98] sm:$0xff] %v4679_v7  ;;  %v3901_v15 = vpop.f32.mrb[51].mxu1 }
 0x514   :  { %3988 = vst [vmem:[#allocation2 + $0x90] sm:$0xff] %v3901_v15 }
 0x51c   :  { %v4682_v63 = vpop.f32.mrb[52].mxu1 }
 0x51d   :  { %3991 = vst [vmem:[#allocation2 + $0xa8] sm:$0xff] %v4682_v63  ;;  %v3911_v18 = vpop.f32.mrb[53].mxu1 }
 0x51e   :  { %3990 = vst [vmem:[#allocation2 + $0xa0] sm:$0xff] %v3911_v18 }
 0x520   :  { %v4685_v6 = vpop.f32.mrb[54].mxu1 }
 0x521   :  { %3993 = vst [vmem:[#allocation2 + $0xb8] sm:$0xff] %v4685_v6  ;;  %v3921_v23 = vpop.f32.mrb[55].mxu1 }
 0x522   :  { %3992 = vst [vmem:[#allocation2 + $0xb0] sm:$0xff] %v3921_v23 }
 0x529   :  { %v4688_v55 = vpop.f32.mrb[56].mxu1 }
 0x52a   :  { %3995 = vst [vmem:[#allocation2 + $0xc8] sm:$0xff] %v4688_v55  ;;  %v3931_v30 = vpop.f32.mrb[57].mxu1 }
 0x52b   :  { %3994 = vst [vmem:[#allocation2 + $0xc0] sm:$0xff] %v3931_v30 }
 0x52d   :  { %v4691_v39 = vpop.f32.mrb[58].mxu1 }
 0x52e   :  { %3997 = vst [vmem:[#allocation2 + $0xd8] sm:$0xff] %v4691_v39  ;;  %v3941_v60 = vpop.f32.mrb[59].mxu1 }
 0x52f   :  { %3996 = vst [vmem:[#allocation2 + $0xd0] sm:$0xff] %v3941_v60 }
 0x532   :  { %v4694_v4 = vpop.f32.mrb[60].mxu1 }
 0x533   :  { %3999 = vst [vmem:[#allocation2 + $0xe8] sm:$0xff] %v4694_v4  ;;  %v3951_v61 = vpop.f32.mrb[61].mxu1 }
 0x534   :  { %3998 = vst [vmem:[#allocation2 + $0xe0] sm:$0xff] %v3951_v61 }
 0x536   :  { %v4697_v52 = vpop.f32.mrb[62].mxu1 }
 0x537   :  { %4001 = vst [vmem:[#allocation2 + $0xf8] sm:$0xff] %v4697_v52  ;;  %v3961_v59 = vpop.f32.mrb[63].mxu1 }
 0x538   :  { %4000 = vst [vmem:[#allocation2 + $0xf0] sm:$0xff] %v3961_v59 }
 0x539   :  { %5213 = shalt.err (!%p5210_p4)
}
 0x53a   :  { %s5214_s6 = scalar_lea.hbm %s8555_s3, 4096 }
 0x53b   :  { %p5215_p5 = scmp.ne.s32.totalorder %s8555_s3, %s5214_s6  ;;  %p5218_p6 = scmp.lt.u32.totalorder %s5214_s6, %s8555_s3 }
 0x53d   :  { %p5220_p7 = pnand %p5218_p6, %p5215_p5 }
 0x53f   :  { %5223 = shalt.err (!%p5220_p7)
}
 0x540   :  { %s5228_s11 = smov 128   ;;  %s5229_s12 = smov 8  }
 0x541   :  { %4013 = dma.vmem_to_hbm [thread:$0]  %s4008_s29, 4096, %s8555_s3, [#allocation3], %s5228_s11, %s5228_s11, %s5229_s12  }
 0x542   :  { %5224 = dma.done.wait [#allocation3], 4096  }
 0x543   :  { %5225 = vsyncadd [#allocation3], 4294963200 }
 0x544   :  { %4017 = vsyncpa [#allocation3], 1 }

</bundles_post_ra>
